<compile_context>
chip_gen: v5e
topology: v5e:2x2
jax: 0.10.0
libtpu: 0.0.40
codegen_flags: <defaults>
</compile_context>

<pallas_src>
import jax
import jax.numpy as jnp
from jax.experimental import pallas as pl
from jax.experimental.pallas import tpu as pltpu

# ---------------- hyper-params (consistent with the module) ----------------
USER_VOCAB = 50
ITEM_VOCAB = 60
TAG_VOCAB = 40
EMB_DIM = 32                       # embedding_dim
DENSE_SIZE = 8                     # dense_feature_size
CROSS_LAYERS = 2                   # Cross(layer_num=2)
F_IN = 3 * EMB_DIM + DENSE_SIZE    # cross / deep input width (104)
F_PAD = 128                        # sublane-padded feature width
HIDDEN = 2 * EMB_DIM               # MLP hidden size (64)
DEEP_OUT = EMB_DIM                 # MLP output size (32)
STACK = F_PAD + HIDDEN             # fused layer-0 output rows (192)
GK = 256                           # padded gather-slot count (>= 50 + 60 + 40)
OFF_ITEM = USER_VOCAB              # item ids offset in the gather table (50)
OFF_TAG = USER_VOCAB + ITEM_VOCAB  # tag ids offset (110)
TB = 512                           # batch tile (lane dim; review: >= 512)


# ---------------------------------- Pallas kernel ----------------------------------
def dcn_kernel(u_ref, it_ref, tg_ref, dn_ref,
               gt_ref, w_ref, w12_ref, wfin_ref, bias_ref, out_ref):
    tb = dn_ref.shape[1]                       # batch tile width (lanes)

    # ---- in-kernel embedding gather: multi-hot id counts -> one f32 MXU matmul ----
    slot = jax.lax.broadcasted_iota(jnp.int32, (GK, tb), 0)          # vocab slot on sublanes
    mh = jnp.zeros((GK, tb), jnp.float32)
    for ids_ref, off in ((u_ref, 0), (it_ref, OFF_ITEM), (tg_ref, OFF_TAG)):
        for j in range(ids_ref.shape[0]):
            mh = mh + (slot == (ids_ref[j:j + 1, :] + off)).astype(jnp.float32)
    # gather table column k holds the embedding of slot k in its concat position.
    emb = jnp.dot(gt_ref[...], mh, preferred_element_type=jnp.float32)   # (F_PAD, tb) f32

    # dense features occupy feature rows 96:104; rows 104:128 stay exactly zero.
    dense_slab = jnp.concatenate(
        [jnp.zeros((3 * EMB_DIM, tb), jnp.float32),
         dn_ref[...],
         jnp.zeros((F_PAD - F_IN, tb), jnp.float32)], axis=0)
    x0 = emb + dense_slab                                   # exact f32 features (column form)
    x0_bf = x0.astype(jnp.bfloat16)

    # ---- fused cross-layer-0 + MLP-layer-0 matmul (shared RHS = x0) ----
    t0 = jnp.dot(w_ref[0:STACK, :], x0_bf,
                 preferred_element_type=jnp.float32)        # (STACK, tb) f32
    xl_w0 = t0[:F_PAD, :]                                   # cross layer-0  K0 @ x0
    h = t0[F_PAD:, :]                                       # MLP layer-0 pre-activation

    # ---- Cross network (torch column form xl_w = K @ x_l), f32 elementwise ----
    xl = x0 * (xl_w0 + bias_ref[:, 0:1]) + x0               # layer 0
    xl_w1 = jnp.dot(w_ref[STACK:STACK + F_PAD, :], xl.astype(jnp.bfloat16),
                    preferred_element_type=jnp.float32)
    xl = x0 * (xl_w1 + bias_ref[:, 1:2]) + xl               # layer 1

    # ---- Deep MLP: 3 hidden ReLU layers (bf16 MXU operands, f32 accumulate) ----
    h = jnp.maximum(h + bias_ref[:HIDDEN, 2:3], 0.0)
    h = jnp.maximum(jnp.dot(w12_ref[0], h.astype(jnp.bfloat16),
                            preferred_element_type=jnp.float32) + bias_ref[:HIDDEN, 3:4], 0.0)
    h = jnp.maximum(jnp.dot(w12_ref[1], h.astype(jnp.bfloat16),
                            preferred_element_type=jnp.float32) + bias_ref[:HIDDEN, 4:5], 0.0)

    # ---- together: deep output layer folded into wfin; lane-dense (1, TB) output ----
    stack = jnp.concatenate([xl, h], axis=0)                # (STACK, tb) f32
    logit = jnp.dot(wfin_ref[...], stack,
                    preferred_element_type=jnp.float32)     # (8, tb); only row 0 is real
    out_ref[...] = jax.nn.sigmoid(logit[0:1, :] + bias_ref[0:1, 5:6])


def dcn_pallas(u_t, it_t, tg_t, dn_t, gtab_t, w_slab, w12, wfin, bias_slab):
    n_b = u_t.shape[1]
    assert n_b % TB == 0
    grid = (n_b // TB,)

    def batch_spec(rows):
        return pl.BlockSpec((rows, TB), lambda i: (0, i))

    def const_spec(arr):
        return pl.BlockSpec(arr.shape, lambda i, _nd=arr.ndim: (0,) * _nd)

    def call(batch_sem):
        return pl.pallas_call(
            dcn_kernel,
            out_shape=jax.ShapeDtypeStruct((1, n_b), jnp.float32),
            grid=grid,
            in_specs=[
                batch_spec(u_t.shape[0]),          # user ids  (int32, batch on lanes)
                batch_spec(it_t.shape[0]),         # item ids
                batch_spec(tg_t.shape[0]),         # tag ids
                batch_spec(dn_t.shape[0]),         # dense features (f32)
                const_spec(gtab_t),                # gather table (f32, VMEM-resident)
                const_spec(w_slab),                # bf16 slab: [K0 ; W0^T ; K1]
                const_spec(w12),                   # bf16 slab: [W1^T, W2^T]
                const_spec(wfin),                  # f32 final weights (row 0 real)
                const_spec(bias_slab),             # f32 bias slab
            ],
            out_specs=pl.BlockSpec((1, TB), lambda i: (0, i)),
            compiler_params=pltpu.CompilerParams(dimension_semantics=(batch_sem,)),
        )(u_t, it_t, tg_t, dn_t, gtab_t, w_slab, w12, wfin, bias_slab)

    # v7x has 2 TensorCores per chip: engage both via CORE_PARALLEL; fall back to
    # PARALLEL on single-core chips (v5e/v6e) or if the runtime rejects it.
    sems = []
    kind = jax.devices()[0].device_kind.lower()
    if ("v7" in kind or "7x" in kind) and hasattr(pltpu, "CORE_PARALLEL"):
        sems.append(pltpu.CORE_PARALLEL)
    sems.append(pltpu.PARALLEL)
    err = None
    for sem in sems:
        try:
            return call(sem)
        except Exception as e:                    # pragma: no cover - fallback path
            err = e
    raise err


# ------------------------- one-time parameter preparation -------------------------
def prepare_params(params):
    """Pack module parameters into kernel-ready constants (hoisted out of forward)."""
    f32, bf16 = jnp.float32, jnp.bfloat16

    # Combined gather table: column k holds the embedding of vocab slot k, placed in
    # the feature rows that concat([user, item, tag, dense]) dictates.
    gtab = jnp.zeros((GK, F_PAD), f32)
    gtab = gtab.at[:USER_VOCAB, 0:EMB_DIM].set(params["user_emb"])
    gtab = gtab.at[OFF_ITEM:OFF_ITEM + ITEM_VOCAB, EMB_DIM:2 * EMB_DIM].set(params["item_emb"])
    gtab = gtab.at[OFF_TAG:OFF_TAG + TAG_VOCAB, 2 * EMB_DIM:3 * EMB_DIM].set(params["tag_emb"])
    gtab_t = gtab.T                                                      # (F_PAD, GK) f32

    # Cross kernels keep the torch orientation (xl_w = K @ x_l); zero-pad 104 -> 128.
    ck = jnp.zeros((CROSS_LAYERS, F_PAD, F_PAD), f32).at[:, :F_IN, :F_IN].set(params["cross_k"])
    # MLP weights in column form (h = W^T x); layer-0 columns zero-padded to 128.
    w0t = jnp.zeros((HIDDEN, F_PAD), f32).at[:, :F_IN].set(params["w0"].T)
    # bf16 weight slab: rows [0:192] = fused layer-0 LHS [K0 ; W0^T], rows [192:320] = K1.
    w_slab = jnp.concatenate([ck[0], w0t, ck[1]], axis=0).astype(bf16)   # (320, 128)
    w12 = jnp.stack([params["w1"].T, params["w2"].T]).astype(bf16)       # (2, 64, 64)

    # Together layer: deep half folded into the last MLP layer (w3f = w3 @ wt_deep).
    wt = params["w_together"][0]                                         # (F_IN + DEEP_OUT,)
    wt_cross = jnp.zeros((F_PAD,), f32).at[:F_IN].set(wt[:F_IN])
    wt_deep = wt[F_IN:]
    w3f = params["w3"] @ wt_deep                                         # (HIDDEN,)
    b3f = params["b3"][0] @ wt_deep                                      # scalar
    wfin = jnp.zeros((8, STACK), f32).at[0].set(jnp.concatenate([wt_cross, w3f]))

    # f32 bias slab (F_PAD, 8): cols 0/1 cross biases, 2/3/4 MLP biases, [0,5] = b3f.
    bias = jnp.zeros((F_PAD, 8), f32)
    bias = bias.at[:F_IN, 0].set(params["cross_b"][0, :, 0])
    bias = bias.at[:F_IN, 1].set(params["cross_b"][1, :, 0])
    bias = bias.at[:HIDDEN, 2].set(params["b0"][0])
    bias = bias.at[:HIDDEN, 3].set(params["b1"][0])
    bias = bias.at[:HIDDEN, 4].set(params["b2"][0])
    bias = bias.at[0, 5].set(b3f)
    return {"gtab_t": gtab_t, "w_slab": w_slab, "w12": w12, "wfin": wfin, "bias": bias}


# ---------------------------------- forward (glue) ----------------------------------
def dcnv2xl_forward(kparams, user_ids, item_ids, dense_features, sparse_features):
    user_ids = user_ids if user_ids.ndim > 1 else user_ids[:, None]
    item_ids = item_ids if item_ids.ndim > 1 else item_ids[:, None]
    B = user_ids.shape[0]
    b_pad = pl.cdiv(B, TB) * TB

    def prep(a, dtype):
        a = jnp.pad(a.astype(dtype), ((0, b_pad - B), (0, 0)))
        return a.T                                   # batch on lanes

    u_t = prep(user_ids, jnp.int32)                  # (3, b_pad)
    it_t = prep(item_ids, jnp.int32)                 # (2, b_pad)
    tg_t = prep(sparse_features, jnp.int32)          # (4, b_pad)
    dn_t = prep(dense_features, jnp.float32)         # (8, b_pad)

    out_row = dcn_pallas(u_t, it_t, tg_t, dn_t,
                         kparams["gtab_t"], kparams["w_slab"], kparams["w12"],
                         kparams["wfin"], kparams["bias"])   # (1, b_pad)
    return out_row[0, :B][:, None]


# ---------------- pure-JAX f32 reference mirroring the PyTorch forward ----------------
def reference_forward(params, user_ids, item_ids, dense_features, sparse_features):
    user_e = params["user_emb"][user_ids]
    item_e = params["item_emb"][item_ids]
    if user_ids.ndim > 1:
        user_e = jnp.sum(user_e, axis=-2)
        item_e = jnp.sum(item_e, axis=-2)
    tag_e = jnp.sum(params["tag_emb"][sparse_features], axis=1)
    x = jnp.concatenate([user_e, item_e, tag_e, dense_features], axis=-1).astype(jnp.float32)

    x0 = x[..., None]                                 # (B, F, 1)  — torch column form
    xl = x0
    for i in range(CROSS_LAYERS):
        xl_w = jnp.einsum("fg,bgo->bfo", params["cross_k"][i], xl)
        xl = x0 * (xl_w + params["cross_b"][i]) + xl
    cross_out = xl[..., 0]

    h = jax.nn.relu(x @ params["w0"] + params["b0"])
    h = jax.nn.relu(h @ params["w1"] + params["b1"])
    h = jax.nn.relu(h @ params["w2"] + params["b2"])
    deep_out = h @ params["w3"] + params["b3"]

    stack = jnp.concatenate([cross_out, deep_out], axis=-1)
    return jax.nn.sigmoid(stack @ params["w_together"].T)


def init_params(key):
    ks = jax.random.split(key, 12)
    xavier_std = (2.0 / (F_IN + F_IN)) ** 0.5
    # TODO(synk): the MLP class was not provided; a standard ReLU MLP with
    # `hidden_layers` hidden layers + linear output layer is assumed.  Inits are
    # deterministic-synthetic, not a replica of PyTorch's default init.
    return {
        "user_emb": jax.random.normal(ks[0], (USER_VOCAB, EMB_DIM), jnp.float32),
        "item_emb": jax.random.normal(ks[1], (ITEM_VOCAB, EMB_DIM), jnp.float32),
        "tag_emb":  jax.random.normal(ks[2], (TAG_VOCAB, EMB_DIM), jnp.float32),
        "cross_k":  jax.random.normal(ks[3], (CROSS_LAYERS, F_IN, F_IN), jnp.float32) * xavier_std,
        "cross_b":  jnp.zeros((CROSS_LAYERS, F_IN, 1), jnp.float32),
        "w0": jax.random.normal(ks[4], (F_IN, HIDDEN), jnp.float32) * 0.05,
        "b0": jnp.zeros((1, HIDDEN), jnp.float32),
        "w1": jax.random.normal(ks[5], (HIDDEN, HIDDEN), jnp.float32) * 0.05,
        "b1": jnp.zeros((1, HIDDEN), jnp.float32),
        "w2": jax.random.normal(ks[6], (HIDDEN, HIDDEN), jnp.float32) * 0.05,
        "b2": jnp.zeros((1, HIDDEN), jnp.float32),
        "w3": jax.random.normal(ks[7], (HIDDEN, DEEP_OUT), jnp.float32) * 0.05,
        "b3": jnp.zeros((1, DEEP_OUT), jnp.float32),
        "w_together": jax.random.normal(ks[8], (1, F_IN + DEEP_OUT), jnp.float32) * 0.05,
    }


if __name__ == "__main__":
    params = init_params(jax.random.PRNGKey(0))
    kparams = prepare_params(params)          # one-time weight prep (hoisted out of forward)

    BATCH = 1000                              # pads to 1024 -> 2 grid steps at TB = 512
    kd = jax.random.split(jax.random.PRNGKey(0), 4)
    user_ids = jax.random.randint(kd[0], (BATCH, 3), 0, USER_VOCAB)      # multi-valued -> summed
    item_ids = jax.random.randint(kd[1], (BATCH, 2), 0, ITEM_VOCAB)
    dense_features = jax.random.normal(kd[2], (BATCH, DENSE_SIZE), jnp.float32)
    sparse_features = jax.random.randint(kd[3], (BATCH, 4), 0, TAG_VOCAB)

    out = dcnv2xl_forward(kparams, user_ids, item_ids, dense_features, sparse_features)
    out = jax.block_until_ready(out)

    ref = reference_forward(params, user_ids, item_ids, dense_features, sparse_features)
    assert out.shape == (BATCH, 1)
    # Tolerance vs. the f32 reference: cross / MLP matmul operands are bf16
    # (f32 accumulation); outputs are sigmoid-bounded in [0, 1].
    assert jnp.allclose(out, ref, rtol=5e-2, atol=3e-2), (out, ref)
    print("KERNEL_OK")
</pallas_src>

<mosaic_0001>
module attributes {stable_mosaic.version = 11 : i64} {
  func.func @dcn_kernel(%arg0: i32, %arg1: memref<3x512xi32, #tpu.memory_space<vmem>>, %arg2: memref<2x512xi32, #tpu.memory_space<vmem>>, %arg3: memref<4x512xi32, #tpu.memory_space<vmem>>, %arg4: memref<8x512xf32, #tpu.memory_space<vmem>>, %arg5: memref<128x256xf32, #tpu.memory_space<vmem>>, %arg6: memref<320x128xbf16, #tpu.memory_space<vmem>>, %arg7: memref<2x64x64xbf16, #tpu.memory_space<vmem>>, %arg8: memref<8x192xf32, #tpu.memory_space<vmem>>, %arg9: memref<128x8xf32, #tpu.memory_space<vmem>>, %arg10: memref<1x512xf32, #tpu.memory_space<vmem>>) attributes {dimension_semantics = [#tpu.dimension_semantics<parallel>], iteration_bounds = array<i64: 2>, scalar_prefetch = 0 : i64, scratch_operands = 0 : i64, tpu.core_type = #tpu.core_type<tc>, window_params = [{transform_indices = @transform_0, window_bounds = array<i64: 3, 512>}, {transform_indices = @transform_1, window_bounds = array<i64: 2, 512>}, {transform_indices = @transform_2, window_bounds = array<i64: 4, 512>}, {transform_indices = @transform_3, window_bounds = array<i64: 8, 512>}, {pipeline_mode = #tpu.pipeline_mode<synchronous>, transform_indices = @transform_4, window_bounds = array<i64: 128, 256>}, {pipeline_mode = #tpu.pipeline_mode<synchronous>, transform_indices = @transform_5, window_bounds = array<i64: 320, 128>}, {pipeline_mode = #tpu.pipeline_mode<synchronous>, transform_indices = @transform_6, window_bounds = array<i64: 2, 64, 64>}, {pipeline_mode = #tpu.pipeline_mode<synchronous>, transform_indices = @transform_7, window_bounds = array<i64: 8, 192>}, {pipeline_mode = #tpu.pipeline_mode<synchronous>, transform_indices = @transform_8, window_bounds = array<i64: 128, 8>}, {transform_indices = @transform_9, window_bounds = array<i64: 1, 512>}]} {
    %0 = tpu.iota {dimensions = array<i32: 0>} : vector<256x512xi32>
    %cst = arith.constant 0.000000e+00 : f32
    %1 = vector.broadcast %cst : f32 to vector<256x512xf32>
    %c0 = arith.constant 0 : index
    %c0_0 = arith.constant 0 : index
    %2 = vector.load %arg1[%c0, %c0_0] : memref<3x512xi32, #tpu.memory_space<vmem>>, vector<1x512xi32>
    %c0_i32 = arith.constant 0 : i32
    %3 = vector.broadcast %c0_i32 : i32 to vector<1x512xi32>
    %4 = arith.addi %2, %3 : vector<1x512xi32>
    %5 = vector.broadcast %4 : vector<1x512xi32> to vector<256x512xi32>
    %6 = arith.cmpi eq, %0, %5 : vector<256x512xi32>
    %7 = arith.extui %6 : vector<256x512xi1> to vector<256x512xi32>
    %8 = arith.sitofp %7 : vector<256x512xi32> to vector<256x512xf32>
    %9 = arith.addf %1, %8 : vector<256x512xf32>
    %c1 = arith.constant 1 : index
    %c0_1 = arith.constant 0 : index
    %10 = vector.load %arg1[%c1, %c0_1] : memref<3x512xi32, #tpu.memory_space<vmem>>, vector<1x512xi32>
    %c0_i32_2 = arith.constant 0 : i32
    %11 = vector.broadcast %c0_i32_2 : i32 to vector<1x512xi32>
    %12 = arith.addi %10, %11 : vector<1x512xi32>
    %13 = vector.broadcast %12 : vector<1x512xi32> to vector<256x512xi32>
    %14 = arith.cmpi eq, %0, %13 : vector<256x512xi32>
    %15 = arith.extui %14 : vector<256x512xi1> to vector<256x512xi32>
    %16 = arith.sitofp %15 : vector<256x512xi32> to vector<256x512xf32>
    %17 = arith.addf %9, %16 : vector<256x512xf32>
    %c2 = arith.constant 2 : index
    %c0_3 = arith.constant 0 : index
    %18 = vector.load %arg1[%c2, %c0_3] : memref<3x512xi32, #tpu.memory_space<vmem>>, vector<1x512xi32>
    %c0_i32_4 = arith.constant 0 : i32
    %19 = vector.broadcast %c0_i32_4 : i32 to vector<1x512xi32>
    %20 = arith.addi %18, %19 : vector<1x512xi32>
    %21 = vector.broadcast %20 : vector<1x512xi32> to vector<256x512xi32>
    %22 = arith.cmpi eq, %0, %21 : vector<256x512xi32>
    %23 = arith.extui %22 : vector<256x512xi1> to vector<256x512xi32>
    %24 = arith.sitofp %23 : vector<256x512xi32> to vector<256x512xf32>
    %25 = arith.addf %17, %24 : vector<256x512xf32>
    %c0_5 = arith.constant 0 : index
    %c0_6 = arith.constant 0 : index
    %26 = vector.load %arg2[%c0_5, %c0_6] : memref<2x512xi32, #tpu.memory_space<vmem>>, vector<1x512xi32>
    %c50_i32 = arith.constant 50 : i32
    %27 = vector.broadcast %c50_i32 : i32 to vector<1x512xi32>
    %28 = arith.addi %26, %27 : vector<1x512xi32>
    %29 = vector.broadcast %28 : vector<1x512xi32> to vector<256x512xi32>
    %30 = arith.cmpi eq, %0, %29 : vector<256x512xi32>
    %31 = arith.extui %30 : vector<256x512xi1> to vector<256x512xi32>
    %32 = arith.sitofp %31 : vector<256x512xi32> to vector<256x512xf32>
    %33 = arith.addf %25, %32 : vector<256x512xf32>
    %c1_7 = arith.constant 1 : index
    %c0_8 = arith.constant 0 : index
    %34 = vector.load %arg2[%c1_7, %c0_8] : memref<2x512xi32, #tpu.memory_space<vmem>>, vector<1x512xi32>
    %c50_i32_9 = arith.constant 50 : i32
    %35 = vector.broadcast %c50_i32_9 : i32 to vector<1x512xi32>
    %36 = arith.addi %34, %35 : vector<1x512xi32>
    %37 = vector.broadcast %36 : vector<1x512xi32> to vector<256x512xi32>
    %38 = arith.cmpi eq, %0, %37 : vector<256x512xi32>
    %39 = arith.extui %38 : vector<256x512xi1> to vector<256x512xi32>
    %40 = arith.sitofp %39 : vector<256x512xi32> to vector<256x512xf32>
    %41 = arith.addf %33, %40 : vector<256x512xf32>
    %c0_10 = arith.constant 0 : index
    %c0_11 = arith.constant 0 : index
    %42 = vector.load %arg3[%c0_10, %c0_11] : memref<4x512xi32, #tpu.memory_space<vmem>>, vector<1x512xi32>
    %c110_i32 = arith.constant 110 : i32
    %43 = vector.broadcast %c110_i32 : i32 to vector<1x512xi32>
    %44 = arith.addi %42, %43 : vector<1x512xi32>
    %45 = vector.broadcast %44 : vector<1x512xi32> to vector<256x512xi32>
    %46 = arith.cmpi eq, %0, %45 : vector<256x512xi32>
    %47 = arith.extui %46 : vector<256x512xi1> to vector<256x512xi32>
    %48 = arith.sitofp %47 : vector<256x512xi32> to vector<256x512xf32>
    %49 = arith.addf %41, %48 : vector<256x512xf32>
    %c1_12 = arith.constant 1 : index
    %c0_13 = arith.constant 0 : index
    %50 = vector.load %arg3[%c1_12, %c0_13] : memref<4x512xi32, #tpu.memory_space<vmem>>, vector<1x512xi32>
    %c110_i32_14 = arith.constant 110 : i32
    %51 = vector.broadcast %c110_i32_14 : i32 to vector<1x512xi32>
    %52 = arith.addi %50, %51 : vector<1x512xi32>
    %53 = vector.broadcast %52 : vector<1x512xi32> to vector<256x512xi32>
    %54 = arith.cmpi eq, %0, %53 : vector<256x512xi32>
    %55 = arith.extui %54 : vector<256x512xi1> to vector<256x512xi32>
    %56 = arith.sitofp %55 : vector<256x512xi32> to vector<256x512xf32>
    %57 = arith.addf %49, %56 : vector<256x512xf32>
    %c2_15 = arith.constant 2 : index
    %c0_16 = arith.constant 0 : index
    %58 = vector.load %arg3[%c2_15, %c0_16] : memref<4x512xi32, #tpu.memory_space<vmem>>, vector<1x512xi32>
    %c110_i32_17 = arith.constant 110 : i32
    %59 = vector.broadcast %c110_i32_17 : i32 to vector<1x512xi32>
    %60 = arith.addi %58, %59 : vector<1x512xi32>
    %61 = vector.broadcast %60 : vector<1x512xi32> to vector<256x512xi32>
    %62 = arith.cmpi eq, %0, %61 : vector<256x512xi32>
    %63 = arith.extui %62 : vector<256x512xi1> to vector<256x512xi32>
    %64 = arith.sitofp %63 : vector<256x512xi32> to vector<256x512xf32>
    %65 = arith.addf %57, %64 : vector<256x512xf32>
    %c3 = arith.constant 3 : index
    %c0_18 = arith.constant 0 : index
    %66 = vector.load %arg3[%c3, %c0_18] : memref<4x512xi32, #tpu.memory_space<vmem>>, vector<1x512xi32>
    %c110_i32_19 = arith.constant 110 : i32
    %67 = vector.broadcast %c110_i32_19 : i32 to vector<1x512xi32>
    %68 = arith.addi %66, %67 : vector<1x512xi32>
    %69 = vector.broadcast %68 : vector<1x512xi32> to vector<256x512xi32>
    %70 = arith.cmpi eq, %0, %69 : vector<256x512xi32>
    %71 = arith.extui %70 : vector<256x512xi1> to vector<256x512xi32>
    %72 = arith.sitofp %71 : vector<256x512xi32> to vector<256x512xf32>
    %73 = arith.addf %65, %72 : vector<256x512xf32>
    %c0_20 = arith.constant 0 : index
    %c0_21 = arith.constant 0 : index
    %74 = vector.load %arg5[%c0_20, %c0_21] : memref<128x256xf32, #tpu.memory_space<vmem>>, vector<128x256xf32>
    %cst_22 = arith.constant dense<0.000000e+00> : vector<128x512xf32>
    %75 = tpu.matmul %74, %73, %cst_22 {dimension_numbers = #tpu.dot_dimension_numbers<[1], [0], [0], [1], [0, 0, 1, 1], [], []>} : vector<128x256xf32>, vector<256x512xf32>, vector<128x512xf32> -> vector<128x512xf32>
    %cst_23 = arith.constant 0.000000e+00 : f32
    %76 = vector.broadcast %cst_23 : f32 to vector<96x512xf32>
    %c0_24 = arith.constant 0 : index
    %c0_25 = arith.constant 0 : index
    %77 = vector.load %arg4[%c0_24, %c0_25] : memref<8x512xf32, #tpu.memory_space<vmem>>, vector<8x512xf32>
    %cst_26 = arith.constant 0.000000e+00 : f32
    %78 = vector.broadcast %cst_26 : f32 to vector<24x512xf32>
    %79 = tpu.concatenate %76, %77, %78 in 0 : vector<96x512xf32>, vector<8x512xf32>, vector<24x512xf32> -> vector<128x512xf32>
    %80 = arith.addf %75, %79 : vector<128x512xf32>
    %81 = arith.truncf %80 : vector<128x512xf32> to vector<128x512xbf16>
    %c0_27 = arith.constant 0 : index
    %c0_28 = arith.constant 0 : index
    %82 = vector.load %arg6[%c0_27, %c0_28] : memref<320x128xbf16, #tpu.memory_space<vmem>>, vector<192x128xbf16>
    %cst_29 = arith.constant dense<0.000000e+00> : vector<192x512xf32>
    %83 = tpu.matmul %82, %81, %cst_29 {dimension_numbers = #tpu.dot_dimension_numbers<[1], [0], [0], [1], [0, 0, 1, 1], [], []>} : vector<192x128xbf16>, vector<128x512xbf16>, vector<192x512xf32> -> vector<192x512xf32>
    %84 = vector.extract_strided_slice %83 {offsets = [0, 0], sizes = [128, 512], strides = [1, 1]} : vector<192x512xf32> to vector<128x512xf32>
    %85 = vector.extract_strided_slice %83 {offsets = [128, 0], sizes = [64, 512], strides = [1, 1]} : vector<192x512xf32> to vector<64x512xf32>
    %c0_30 = arith.constant 0 : index
    %c0_31 = arith.constant 0 : index
    %86 = vector.load %arg9[%c0_30, %c0_31] : memref<128x8xf32, #tpu.memory_space<vmem>>, vector<128x1xf32>
    %87 = vector.broadcast %86 : vector<128x1xf32> to vector<128x512xf32>
    %88 = arith.addf %84, %87 : vector<128x512xf32>
    %89 = arith.mulf %80, %88 : vector<128x512xf32>
    %90 = arith.addf %89, %80 : vector<128x512xf32>
    %c192 = arith.constant 192 : index
    %c0_32 = arith.constant 0 : index
    %91 = vector.load %arg6[%c192, %c0_32] : memref<320x128xbf16, #tpu.memory_space<vmem>>, vector<128x128xbf16>
    %92 = arith.truncf %90 : vector<128x512xf32> to vector<128x512xbf16>
    %cst_33 = arith.constant dense<0.000000e+00> : vector<128x512xf32>
    %93 = tpu.matmul %91, %92, %cst_33 {dimension_numbers = #tpu.dot_dimension_numbers<[1], [0], [0], [1], [0, 0, 1, 1], [], []>} : vector<128x128xbf16>, vector<128x512xbf16>, vector<128x512xf32> -> vector<128x512xf32>
    %c0_34 = arith.constant 0 : index
    %c1_35 = arith.constant 1 : index
    %94 = vector.load %arg9[%c0_34, %c1_35] : memref<128x8xf32, #tpu.memory_space<vmem>>, vector<128x1xf32>
    %95 = vector.broadcast %94 : vector<128x1xf32> to vector<128x512xf32>
    %96 = arith.addf %93, %95 : vector<128x512xf32>
    %97 = arith.mulf %80, %96 : vector<128x512xf32>
    %98 = arith.addf %97, %90 : vector<128x512xf32>
    %c0_36 = arith.constant 0 : index
    %c2_37 = arith.constant 2 : index
    %99 = vector.load %arg9[%c0_36, %c2_37] : memref<128x8xf32, #tpu.memory_space<vmem>>, vector<64x1xf32>
    %100 = vector.broadcast %99 : vector<64x1xf32> to vector<64x512xf32>
    %101 = arith.addf %85, %100 : vector<64x512xf32>
    %cst_38 = arith.constant 0.000000e+00 : f32
    %102 = vector.broadcast %cst_38 : f32 to vector<64x512xf32>
    %103 = arith.maximumf %101, %102 : vector<64x512xf32>
    %c0_39 = arith.constant 0 : index
    %c0_40 = arith.constant 0 : index
    %c0_41 = arith.constant 0 : index
    %104 = vector.load %arg7[%c0_39, %c0_40, %c0_41] : memref<2x64x64xbf16, #tpu.memory_space<vmem>>, vector<1x64x64xbf16>
    %105 = vector.shape_cast %104 : vector<1x64x64xbf16> to vector<64x64xbf16>
    %106 = arith.truncf %103 : vector<64x512xf32> to vector<64x512xbf16>
    %cst_42 = arith.constant dense<0.000000e+00> : vector<64x512xf32>
    %107 = tpu.matmul %105, %106, %cst_42 {dimension_numbers = #tpu.dot_dimension_numbers<[1], [0], [0], [1], [0, 0, 1, 1], [], []>} : vector<64x64xbf16>, vector<64x512xbf16>, vector<64x512xf32> -> vector<64x512xf32>
    %c0_43 = arith.constant 0 : index
    %c3_44 = arith.constant 3 : index
    %108 = vector.load %arg9[%c0_43, %c3_44] : memref<128x8xf32, #tpu.memory_space<vmem>>, vector<64x1xf32>
    %109 = vector.broadcast %108 : vector<64x1xf32> to vector<64x512xf32>
    %110 = arith.addf %107, %109 : vector<64x512xf32>
    %cst_45 = arith.constant 0.000000e+00 : f32
    %111 = vector.broadcast %cst_45 : f32 to vector<64x512xf32>
    %112 = arith.maximumf %110, %111 : vector<64x512xf32>
    %c1_46 = arith.constant 1 : index
    %c0_47 = arith.constant 0 : index
    %c0_48 = arith.constant 0 : index
    %113 = vector.load %arg7[%c1_46, %c0_47, %c0_48] : memref<2x64x64xbf16, #tpu.memory_space<vmem>>, vector<1x64x64xbf16>
    %114 = vector.shape_cast %113 : vector<1x64x64xbf16> to vector<64x64xbf16>
    %115 = arith.truncf %112 : vector<64x512xf32> to vector<64x512xbf16>
    %cst_49 = arith.constant dense<0.000000e+00> : vector<64x512xf32>
    %116 = tpu.matmul %114, %115, %cst_49 {dimension_numbers = #tpu.dot_dimension_numbers<[1], [0], [0], [1], [0, 0, 1, 1], [], []>} : vector<64x64xbf16>, vector<64x512xbf16>, vector<64x512xf32> -> vector<64x512xf32>
    %c0_50 = arith.constant 0 : index
    %c4 = arith.constant 4 : index
    %117 = vector.load %arg9[%c0_50, %c4] : memref<128x8xf32, #tpu.memory_space<vmem>>, vector<64x1xf32>
    %118 = vector.broadcast %117 : vector<64x1xf32> to vector<64x512xf32>
    %119 = arith.addf %116, %118 : vector<64x512xf32>
    %cst_51 = arith.constant 0.000000e+00 : f32
    %120 = vector.broadcast %cst_51 : f32 to vector<64x512xf32>
    %121 = arith.maximumf %119, %120 : vector<64x512xf32>
    %122 = tpu.concatenate %98, %121 in 0 : vector<128x512xf32>, vector<64x512xf32> -> vector<192x512xf32>
    %c0_52 = arith.constant 0 : index
    %c0_53 = arith.constant 0 : index
    %123 = vector.load %arg8[%c0_52, %c0_53] : memref<8x192xf32, #tpu.memory_space<vmem>>, vector<8x192xf32>
    %cst_54 = arith.constant dense<0.000000e+00> : vector<8x512xf32>
    %124 = tpu.matmul %123, %122, %cst_54 {dimension_numbers = #tpu.dot_dimension_numbers<[1], [0], [0], [1], [0, 0, 1, 1], [], []>} : vector<8x192xf32>, vector<192x512xf32>, vector<8x512xf32> -> vector<8x512xf32>
    %125 = vector.extract_strided_slice %124 {offsets = [0, 0], sizes = [1, 512], strides = [1, 1]} : vector<8x512xf32> to vector<1x512xf32>
    %c0_55 = arith.constant 0 : index
    %c5 = arith.constant 5 : index
    %126 = vector.load %arg9[%c0_55, %c5] : memref<128x8xf32, #tpu.memory_space<vmem>>, vector<1x1xf32>
    %127 = vector.broadcast %126 : vector<1x1xf32> to vector<1x512xf32>
    %128 = arith.addf %125, %127 : vector<1x512xf32>
    %129 = arith.negf %128 : vector<1x512xf32>
    %130 = math.exp %129 : vector<1x512xf32>
    %cst_56 = arith.constant 1.000000e+00 : f32
    %131 = vector.broadcast %cst_56 : f32 to vector<1x512xf32>
    %132 = arith.addf %131, %130 : vector<1x512xf32>
    %133 = arith.divf %131, %132 : vector<1x512xf32>
    %c0_57 = arith.constant 0 : index
    %c0_58 = arith.constant 0 : index
    %134 = vector.load %arg10[%c0_57, %c0_58] : memref<1x512xf32, #tpu.memory_space<vmem>>, vector<1x512xf32>
    tpu.vector_store %arg10[%c0_57, %c0_58], %133 {strides = array<i32>} : memref<1x512xf32, #tpu.memory_space<vmem>>, vector<1x512xf32>,
    return
  }
  func.func @transform_0(%arg0: i32) -> (i32, i32) {
    %c0_i32 = arith.constant 0 : i32
    %c0_i32_0 = arith.constant 0 : i32
    return %c0_i32, %arg0 : i32, i32
  }
  func.func @transform_1(%arg0: i32) -> (i32, i32) {
    %c0_i32 = arith.constant 0 : i32
    %c0_i32_0 = arith.constant 0 : i32
    return %c0_i32, %arg0 : i32, i32
  }
  func.func @transform_2(%arg0: i32) -> (i32, i32) {
    %c0_i32 = arith.constant 0 : i32
    %c0_i32_0 = arith.constant 0 : i32
    return %c0_i32, %arg0 : i32, i32
  }
  func.func @transform_3(%arg0: i32) -> (i32, i32) {
    %c0_i32 = arith.constant 0 : i32
    %c0_i32_0 = arith.constant 0 : i32
    return %c0_i32, %arg0 : i32, i32
  }
  func.func @transform_4(%arg0: i32) -> (i32, i32) {
    %c0_i32 = arith.constant 0 : i32
    %c0_i32_0 = arith.constant 0 : i32
    %c0_i32_1 = arith.constant 0 : i32
    return %c0_i32, %c0_i32_0 : i32, i32
  }
  func.func @transform_5(%arg0: i32) -> (i32, i32) {
    %c0_i32 = arith.constant 0 : i32
    %c0_i32_0 = arith.constant 0 : i32
    %c0_i32_1 = arith.constant 0 : i32
    return %c0_i32, %c0_i32_0 : i32, i32
  }
  func.func @transform_6(%arg0: i32) -> (i32, i32, i32) {
    %c0_i32 = arith.constant 0 : i32
    %c0_i32_0 = arith.constant 0 : i32
    %c0_i32_1 = arith.constant 0 : i32
    %c0_i32_2 = arith.constant 0 : i32
    return %c0_i32, %c0_i32_0, %c0_i32_1 : i32, i32, i32
  }
  func.func @transform_7(%arg0: i32) -> (i32, i32) {
    %c0_i32 = arith.constant 0 : i32
    %c0_i32_0 = arith.constant 0 : i32
    %c0_i32_1 = arith.constant 0 : i32
    return %c0_i32, %c0_i32_0 : i32, i32
  }
  func.func @transform_8(%arg0: i32) -> (i32, i32) {
    %c0_i32 = arith.constant 0 : i32
    %c0_i32_0 = arith.constant 0 : i32
    %c0_i32_1 = arith.constant 0 : i32
    return %c0_i32, %c0_i32_0 : i32, i32
  }
  func.func @transform_9(%arg0: i32) -> (i32, i32) {
    %c0_i32 = arith.constant 0 : i32
    %c0_i32_0 = arith.constant 0 : i32
    return %c0_i32, %arg0 : i32, i32
  }
}

</mosaic_0001>

<bundles_post_ra>
// kernel: tpu_custom_call.1
= control target key start
LH: loop header
LB: loop body
LE: loop exit
PB: predicated region body
PF: predicated region fallthrough
CT: control target
= control target key end

     0   :  { %s16264_s0 = inlined_call_operand.hbm [shape: s32[3,1024], index: 0, kind: input, shape index: {}]   ;;  %s16265_s1 = inlined_call_operand.hbm [shape: s32[2,1024], index: 1, kind: input, shape index: {}]   ;;  %s16266_s2 = inlined_call_operand.hbm [shape: s32[4,1024], index: 2, kind: input, shape index: {}]   ;;  %s16267_s3 = inlined_call_operand.vmem [shape: f32[8,1024], index: 3, kind: input, shape index: {}]   ;;  %s16268_s4 = inlined_call_operand.hbm [shape: f32[128,256], index: 4, kind: input, shape index: {}]   ;;  %s16269_s5 = inlined_call_operand.hbm [shape: bf16[320,128], index: 5, kind: input, shape index: {}]   ;;  %s16270_s6 = inlined_call_operand.vmem [shape: bf16[2,64,64], index: 6, kind: input, shape index: {}]   ;;  %s16271_s7 = inlined_call_operand.hbm [shape: f32[8,192], index: 7, kind: input, shape index: {}]   ;;  %s16272_s8 = inlined_call_operand.vmem [shape: f32[128,8], index: 8, kind: input, shape index: {}]   ;;  %s16273_s9 = inlined_call_operand.hbm [shape: f32[1,1024], index: 9, kind: output, shape index: {}]  }
   0x1   :  { %16624 = sst [smem:[#allocation171_spill]] %s16265_s1 }
   0x2   :  { %16625 = sst [smem:[#allocation172_spill]] %s16268_s4 }
   0x3   :  { %16626 = sst [smem:[#allocation173_spill]] %s16269_s5 }
   0x4   :  { %16627 = sst [smem:[#allocation174_spill]] %s16273_s9 }
   0x5   :  { %14 = vsyncpa [#allocation3], 0 }
   0x6   :  { %16 = vsyncpa [#allocation3 + $0x1], 0 }
   0x7   :  { %17 = vsyncpa [#allocation6], 0 }
   0x8   :  { %19 = vsyncpa [#allocation6 + $0x1], 0 }
   0x9   :  { %20 = vsyncpa [#allocation9], 0 }
   0xa   :  { %21 = vsyncpa [#allocation12], 0 }
   0xb   :  { %22 = vsyncpa [#allocation4], 0 }
   0xc   :  { %24 = vsyncpa [#allocation4 + $0x1], 0  ;;  %s9832_s30 = smov 0   ;;  %s9834_s10 = smov 0  }
   0xd   :  { %s9836_s11 = smov 0   ;;  %s9838_s12 = smov 0  }
   0xe LB: > { %16628 = sst [smem:[#allocation19_spill]] %s9754_s30  ;;  %s9856_s16 = sadd.s32 4294967295, %s9766_s12   ;;  %s9766_s12 = sphi %s9838_s12, %s17183_s12   ;;  %s9762_s11 = sphi %s9836_s11, %s17185_s11   ;;  %s9758_s10 = sphi %s9834_s10, %s17187_s10   ;;  %s9754_s30 = sphi %s9832_s30, %s17186_s30  }
   0xf   : > { %16629 = sst [smem:[#allocation20_spill]] %s9762_s11  ;;  %p7960_p0 = scmp.ge.s32.totalorder %s9766_s12, 1 }
  0x10   : > { %s16630_s4 = sld [smem:[#allocation172_spill]]  ;;  %p16282_p1 = scmp.eq.s32.totalorder %s9856_s16, 0 }
  0x11   : > { %p270_p2 = scmp.lt.s32.totalorder %s9766_s12, 3  ;;  %s9768_s18 = smov [#allocation8]  }
  0x12   : > { %s283_s19 = sshll.u32 %s9768_s18, 4  ;;  %s9769_s21 = smov 256   ;;  %s284_s19 = int_to_ptr.vmem [resolvable:$true] %s283_s19 }
  0x13   : > { %p9861_p3 = pnand %p7960_p0, %p270_p2  ;;  %s9770_s22 = smov 16  }
  0x14   : > { %s7959_s23 = sadd.s32 4294967294, %s9766_s12   ;;  %s9878_s24 = sadd.s32 1, %s9766_s12  }
  0x15   : > { %p9357_p4 = pneg %p9861_p3  ;;  %16633 = sst [smem:[#allocation21_spill]] %s9878_s24 }
  0x16   : > { %s281_s15 = sshll.u32 %s16630_s4, 4  ;;  %s37_s25 = sadd.s32 1, %s9762_s11  ;;  %s282_s15 = int_to_ptr.hbm [resolvable:$true] %s281_s15 }
  0x17   : > { %p9870_p6 = pnand %p9357_p4, %p16282_p1  ;;  %s34_s26 = ssub.s32 %s9766_s12, %s9878_s24 }
  0x18   : > { %p44_p7 = scmp.ne.s32.totalorder %s9762_s11, %s9758_s10  ;;  %p35_p8 = scmp.eq.s32.totalorder %s34_s26, 0 }
  0x19   : > { %9360 = dma.hbm_to_vmem [thread:$0]  (!%p9870_p6), %s282_s15, 4096, %s284_s19, [#allocation9], %s9769_s21, %s9769_s21, %s9770_s22  }
  0x1a   : > { %p45_p9 = scmp.eq.s32.totalorder %s9766_s12, 0  ;;  %p50_p10 = scmp.ne.s32.totalorder %s9758_s10, %s9754_s30 }
  0x1b   : > { %p257_p11 = scmp.eq.s32.totalorder %s9856_s16, 1  ;;  %p263_p2 = scmp.eq.s32.totalorder %s7959_s23, 1 }
  0x1c   : > { %s9890_s27 = scalar_select %p35_p8, %s9762_s11, %s37_s25  }
  0x1d   : > { %p46_p12 = por %p45_p9, %p44_p7  ;;  %p9894_p13 = por %p16282_p1, %p50_p10 }
  0x1e   : > { %16634 = sst [smem:[#allocation22_spill]] %s9890_s27  ;;  %p9898_p0 = por %p257_p11, %p44_p7 }
  0x1f   : > { %p9384_p4 = scmp.lt.s32.totalorder %s9766_s12, 2  ;;  %s9904_s13 = sand.u32 1, %s9762_s11  }
  0x20   : > { %s16636_s29 = scalar_select %p9898_p0, 1, 0 }
  0x21   : > { %p9906_p5 = por %p263_p2, %p50_p10  ;;  %s349_s15 = sand.u32 1, %s9766_s12  }
  0x22   : > { %16637 = sst [smem:[#allocation23_spill]] %s16636_s29  ;;  %p9911_p8 = pnand %p9384_p4, %p46_p12 }
  0x23   : > { %s16638_s14 = scalar_select %p9906_p5, 1, 0 }
  0x24   : > { %s7968_s19 = sshll.u32 %s9904_s13, 3  ;;  %s9307_s21 = sshll.u32 %s9766_s12, 3 }
  0x25   : > { %16639 = sst [smem:[#allocation24_spill]] %s16638_s14  ;;  %s353_s26 = scalar_lea.vmem [#allocation5], %s7968_s19 }
  0x26   : > { %s16641_s1 = sld [smem:[#allocation171_spill]]  ;;  %s362_s4 = sshll.u32 %s353_s26, 4  ;;  %s363_s4 = int_to_ptr.vmem [resolvable:$true] %s362_s4 }
  0x27   : > { %s16642_s5 = sld [smem:[#allocation173_spill]]  ;;  %s9923_s30 = scalar_lea.sflag [#allocation6], %s349_s15 }
  0x28   : > { %p9542_p9 = pneg %p9911_p8 }
  0x2c   : > { %s358_s23 = scalar_lea.hbm %s16641_s1, %s9307_s21  ;;  %s9545_s22 = scalar_lea.hbm %s16641_s1, 16 }
  0x2d   : > { %s360_s27 = sshll.u32 %s358_s23, 4  ;;  %s295_s14 = sshll.u32 %s16642_s5, 4  ;;  %s361_s27 = int_to_ptr.hbm [resolvable:$true] %s360_s27  ;;  %s296_s14 = int_to_ptr.hbm [resolvable:$true] %s295_s14 }
  0x2e   : > { %s9538_s29 = sshra.s32 %s361_s27, 4  ;;  %s9539_s29 = int_to_ptr.hbm [resolvable:$true] %s9538_s29 }
  0x2f   : > { %s9540_s9 = scalar_lea.hbm %s9539_s29, 8  ;;  %p9546_p12 = scmp.lt.s32.totalorder %s9539_s29, %s16641_s1 }
  0x30   : > { %p9541_p7 = scmp.ne.s32.totalorder %s9539_s29, %s9540_s9  ;;  %p9547_p2 = scmp.lt.s32.totalorder %s9545_s22, %s9540_s9 }
  0x32   : > { %p9543_p10 = pnand %p9542_p9, %p9541_p7  ;;  %p9548_p4 = por %p9547_p2, %p9546_p12 }
  0x34   : > { %p9544_p11 = pneg %p9543_p10 }
  0x36   : > { %p9549_p1 = pnand %p9548_p4, %p9544_p11 }
  0x38   : > { %9552 = shalt.err (!%p9549_p1)
}
  0x39   : > { %9373 = dma.hbm_to_vmem [thread:$0]  (!%p9911_p8), %s361_s27, 128, %s363_s4, %s9923_s30  }
  0x3a   : > { %s9771_s11 = smov [#allocation10]   ;;  %s9772_s15 = smov 64  }
  0x3b   : > { %s297_s24 = sshll.u32 %s9771_s11, 4  ;;  %s9773_s26 = smov 4   ;;  %s298_s24 = int_to_ptr.vmem [resolvable:$true] %s297_s24 }
  0x3c   : > { %9363 = dma.hbm_to_vmem [thread:$0]  (!%p9870_p6), %s296_s14, 2560, %s298_s24, [#allocation9], %s9772_s15, %s9772_s15, %s9773_s26  }
  0x3d   : > { %s313_s19 = sshll.u32 %s16271_s7, 4  ;;  %s9774_s21 = smov [#allocation11]   ;;  %s314_s19 = int_to_ptr.hbm [resolvable:$true] %s313_s19 }
  0x3e   : > { %s315_s22 = sshll.u32 %s9774_s21, 4  ;;  %s7965_s4 = sshll.u32 %s9904_s13, 4  ;;  %s316_s22 = int_to_ptr.vmem [resolvable:$true] %s315_s22 }
  0x3f   : > { %9366 = dma.hbm_to_vmem [thread:$0]  (!%p9870_p6), %s314_s19, 256, %s316_s22, [#allocation12]  }
  0x40   : > { %s9306_s27 = sshll.u32 %s9766_s12, 4  ;;  %s333_s5 = scalar_lea.vmem [#allocation2], %s7965_s4 }
  0x41   : > { %s338_s11 = scalar_lea.hbm %s16264_s0, %s9306_s27  ;;  %s342_s14 = sshll.u32 %s333_s5, 4  ;;  %s343_s14 = int_to_ptr.vmem [resolvable:$true] %s342_s14 }
  0x42   : > { %s340_s1 = sshll.u32 %s338_s11, 4  ;;  %s330_s24 = scalar_lea.sflag [#allocation3], %s9904_s13  ;;  %s341_s1 = int_to_ptr.hbm [resolvable:$true] %s340_s1 }
  0x43   : > { %s9628_s15 = sshra.s32 %s341_s1, 4  ;;  %s9635_s29 = scalar_lea.hbm %s16264_s0, 32  ;;  %s9629_s15 = int_to_ptr.hbm [resolvable:$true] %s9628_s15 }
  0x44   : > { %s9630_s26 = scalar_lea.hbm %s9629_s15, 16  ;;  %p9636_p10 = scmp.lt.s32.totalorder %s9629_s15, %s16264_s0 }
  0x45   : > { %p9631_p1 = scmp.ne.s32.totalorder %s9629_s15, %s9630_s26  ;;  %p9637_p11 = scmp.lt.s32.totalorder %s9635_s29, %s9630_s26 }
  0x47   : > { %p9633_p7 = pnand %p9631_p1, %p9542_p9  ;;  %p9638_p12 = por %p9637_p11, %p9636_p10 }
  0x49   : > { %p9634_p6 = pneg %p9633_p7 }
  0x4b   : > { %p9639_p2 = pnand %p9638_p12, %p9634_p6 }
  0x4d   : > { %9642 = shalt.err (!%p9639_p2)
}
  0x4e   : > { %9370 = dma.hbm_to_vmem [thread:$0]  (!%p9911_p8), %s341_s1, 256, %s343_s14, %s330_s24  }
  0x4f   : > { %s378_s22 = scalar_lea.hbm %s16266_s2, %s9306_s27  ;;  %s373_s23 = scalar_lea.vmem [#allocation7], %s7965_s4 }
  0x50   : > { %s380_s25 = sshll.u32 %s378_s22, 4  ;;  %s382_s11 = sshll.u32 %s373_s23, 4  ;;  %s381_s25 = int_to_ptr.hbm [resolvable:$true] %s380_s25  ;;  %s383_s11 = int_to_ptr.vmem [resolvable:$true] %s382_s11 }
  0x51   : > { %s9658_s20 = sshra.s32 %s381_s25, 4  ;;  %s9665_s1 = scalar_lea.hbm %s16266_s2, 32  ;;  %s9659_s20 = int_to_ptr.hbm [resolvable:$true] %s9658_s20 }
  0x52   : > { %s9660_s15 = scalar_lea.hbm %s9659_s20, 16  ;;  %p9666_p6 = scmp.lt.s32.totalorder %s9659_s20, %s16266_s2 }
  0x53   : > { %p9661_p4 = scmp.ne.s32.totalorder %s9659_s20, %s9660_s15  ;;  %p9667_p10 = scmp.lt.s32.totalorder %s9665_s1, %s9660_s15 }
  0x55   : > { %p9663_p1 = pnand %p9661_p4, %p9542_p9  ;;  %p9668_p11 = por %p9667_p10, %p9666_p6 }
  0x57   : > { %p9664_p7 = pneg %p9663_p1 }
  0x59   : > { %p9669_p12 = pnand %p9668_p11, %p9664_p7 }
  0x5b   : > { %9672 = shalt.err (!%p9669_p12)
}
  0x5c   : > { %9376 = dma.hbm_to_vmem [thread:$0]  (!%p9911_p8), %s381_s25, 256, %s383_s11, %s9923_s30  }
  0x5d   : > { %400 = sbr.rel (%p9861_p3) target bundleno = 2315 (0x90b), region = 56 }
  0x62   : > { %s9981_s4 = sand.u32 1, %s9758_s10  }
  0x63   : > { %s7975_s27 = sshll.u32 %s9981_s4, 4  ;;  %s403_s29 = scalar_lea.sflag [#allocation3], %s9981_s4 }
  0x64   : > { %s9985_s19 = scalar_lea.vmem [#allocation2], %s7975_s27 }
  0x65   : > { %9733 = dma.done.wait (%p9894_p13), %s403_s29, 256  }
  0x66   : > { %9735 = vsyncadd (%p9894_p13), %s403_s29, 4294967040  ;;  %s412_s30 = sand.u32 1, %s9856_s16   ;;  %s7976_s17 = sshll.u32 %s9981_s4, 3 }
  0x67   : > { %s413_s18 = scalar_lea.sflag [#allocation6], %s412_s30  ;;  %s416_s21 = scalar_lea.vmem [#allocation5], %s7976_s17 }
  0x68   : > { %9737 = dma.done.wait (%p9894_p13), %s413_s18, 384  }
  0x69   : > { %9739 = vsyncadd (%p9894_p13), %s413_s18, 4294966912  ;;  %s9997_s5 = scalar_lea.vmem [#allocation7], %s7975_s27  ;;  %p16643_p3 = scmp.eq.s32.totalorder %s9856_s16, 0 }
  0x6b   : > { %9741 = dma.done.wait (%p16643_p3), [#allocation9], 6656   ;;  %p16644_p8 = pmov %p16643_p3 }
  0x6c   : > { %p16645_p9 = pmov %p16643_p3 }
  0x6d   : > { %9743 = vsyncadd (%p16644_p8), [#allocation9], 4294960640 }
  0x6e   : > { %9745 = dma.done.wait (%p16645_p9), [#allocation12], 256   ;;  %p16646_p2 = pmov %p16643_p3 }
  0x6f   : > { %v16283_v0 = vlaneseq  ;;  %v536_v4 = vld [vmem:[%s9985_s19] ss:$4 sm:$0xf]  ;;  %v8112_v5 = vld [vmem:[%s9985_s19 + $0x1] ss:$4 sm:$0xf] }
  0x70   : > { %9747 = vsyncadd (%p16646_p2), [#allocation12], 4294967040  ;;  %v10018_v6 = vperm.slane %v536_v4, 0  ;;  %v10020_v7 = vperm.slane %v8112_v5, 0  ;;  %v10028_v12 = vperm.slane %v536_v4, 1  ;;  %v10030_v13 = vperm.slane %v8112_v5, 1 }
  0x71   : > { %v10008_v1 = vshrl.u32 %v16283_v0, 7  ;;  %v8241_v8 = vld [vmem:[%s9985_s19 + $0x2] ss:$4 sm:$0xf]  ;;  %v9775_v16 = vmov 0.0   ;;  %s14353_s28 = sshll.u32 %s9856_s16, 2 }
  0x72   : > { %v10026_v10 = vperm.slane %v8241_v8, 0  ;;  %v2089_v11 = vld [vmem:[%s416_s21] ss:$2 sm:$0xf]  ;;  %v10097_v45 = vperm.slane %v8241_v8, 1  ;;  %p496_p13 = scmp.lt.s32.totalorder %s14353_s28, 7 }
  0x73   : > { %v10011_v2 = vadd.s32 120, %v10008_v1  ;;  %v10014_v3 = vadd.s32 248, %v10008_v1  ;;  %v10024_v9 = vadd.s32 112, %v10008_v1  ;;  %v10036_v14 = vadd.s32 50, %v2089_v11  ;;  %s7981_s29 = sshll.u32 %s9981_s4, 2 }
  0x74   : > { %v8498_v15 = vld [vmem:[%s416_s21 + $0x1] ss:$2 sm:$0xf]  ;;  %v3126_v20 = vld [vmem:[%s9997_s5] ss:$4 sm:$0xf] }
  0x75   : > { %vm601_vm0 = vcmp.eq.s32.totalorder %v10011_v2, %v10018_v6  ;;  %vm1119_vm1 = vcmp.eq.s32.totalorder %v10011_v2, %v10020_v7  ;;  %vm665_vm2 = vcmp.eq.s32.totalorder %v10014_v3, %v10018_v6  ;;  %vm1637_vm3 = vcmp.eq.s32.totalorder %v10011_v2, %v10026_v10  ;;  %v8755_v25 = vld [vmem:[%s9997_s5 + $0x1] ss:$4 sm:$0xf]  ;;  %v8884_v28 = vld [vmem:[%s9997_s5 + $0x2] ss:$4 sm:$0xf] }
  0x76   : > { %v8044_v17 = vsel %vm601_vm0, 1.0, %v9775_v16  ;;  %v8173_v18 = vsel %vm1119_vm1, 1.0, %v9775_v16  ;;  %v10044_v19 = vadd.s32 50, %v8498_v15  ;;  %v8302_v22 = vsel %vm1637_vm3, 1.0, %v9775_v16  ;;  %s497_s13 = scalar_select %p496_p13, %s14353_s28, 7 }
  0x77   : > { %v1503_v21 = vadd.f32 %v8173_v18, %v8044_v17  ;;  %v10049_v23 = vperm.slane %v10036_v14, 0  ;;  %v10051_v24 = vadd.s32 110, %v3126_v20  ;;  %v10057_v27 = vadd.s32 110, %v8755_v25  ;;  %v9013_v33 = vld [vmem:[%s9997_s5 + $0x3] ss:$4 sm:$0xf] }
  0x78   : > { %v10055_v26 = vperm.slane %v10044_v19, 0  ;;  %v8108_v29 = vsel %vm665_vm2, 1.0, %v9775_v16  ;;  %vm1183_vm4 = vcmp.eq.s32.totalorder %v10014_v3, %v10020_v7  ;;  %v10068_v32 = vadd.s32 110, %v8884_v28  ;;  %s7983_s22 = sshll.u32 %s497_s13, 3  ;;  %s491_s18 = scalar_lea.vmem [#allocation13], %s7981_s29 }
  0x79   : > { %v2021_v30 = vadd.f32 %v8302_v22, %v1503_v21  ;;  %vm2155_vm5 = vcmp.eq.s32.totalorder %v10011_v2, %v10049_v23  ;;  %v10066_v31 = vperm.slane %v10051_v24, 0  ;;  %v10075_v35 = vperm.slane %v10057_v27, 0  ;;  %s14360_s23 = scalar_lea.vmem %s16267_s3, %s7983_s22  ;;  %s7802_s21 = sshll.u32 %s491_s18, 4  ;;  %s7803_s21 = int_to_ptr.vmem [resolvable:$true] %s7802_s21 }
  0x7a   : > { %v8430_v34 = vsel %vm2155_vm5, 1.0, %v9775_v16  ;;  %vm2674_vm6 = vcmp.eq.s32.totalorder %v10011_v2, %v10055_v26  ;;  %v10077_v36 = vadd.s32 110, %v9013_v33  ;;  %v10083_v39 = vperm.slane %v10068_v32, 0 }
  0x7b   : > { %v2539_v37 = vadd.f32 %v8430_v34, %v2021_v30  ;;  %v8559_v38 = vsel %vm2674_vm6, 1.0, %v9775_v16  ;;  %vm3192_vm7 = vcmp.eq.s32.totalorder %v10011_v2, %v10066_v31  ;;  %vm3711_vm8 = vcmp.eq.s32.totalorder %v10011_v2, %v10075_v35 }
  0x7c   : > { %v8687_v40 = vsel %vm3192_vm7, 1.0, %v9775_v16  ;;  %v10089_v41 = vperm.slane %v10077_v36, 0  ;;  %v8237_v42 = vsel %vm1183_vm4, 1.0, %v9775_v16  ;;  %vm4230_vm9 = vcmp.eq.s32.totalorder %v10011_v2, %v10083_v39 }
  0x7d   : > { %v3058_v43 = vadd.f32 %v8559_v38, %v2539_v37  ;;  %v1567_v44 = vadd.f32 %v8237_v42, %v8108_v29  ;;  %v8816_v46 = vsel %vm3711_vm8, 1.0, %v9775_v16  ;;  %vm1701_vm11 = vcmp.eq.s32.totalorder %v10014_v3, %v10026_v10 }
  0x7e   : > { %vm4749_vm10 = vcmp.eq.s32.totalorder %v10011_v2, %v10089_v41  ;;  %vm2219_vm12 = vcmp.eq.s32.totalorder %v10014_v3, %v10049_v23  ;;  %v8945_v48 = vsel %vm4230_vm9, 1.0, %v9775_v16  ;;  %v8366_v49 = vsel %vm1701_vm11, 1.0, %v9775_v16 }
  0x7f   : > { %v3576_v47 = vadd.f32 %v8687_v40, %v3058_v43  ;;  %v8494_v50 = vsel %vm2219_vm12, 1.0, %v9775_v16  ;;  %v2085_v51 = vadd.f32 %v8366_v49, %v1567_v44  ;;  %vm2738_vm13 = vcmp.eq.s32.totalorder %v10014_v3, %v10055_v26 }
  0x80   : > { %vm3256_vm14 = vcmp.eq.s32.totalorder %v10014_v3, %v10066_v31  ;;  %vm3775_vm15 = vcmp.eq.s32.totalorder %v10014_v3, %v10075_v35  ;;  %v9074_v53 = vsel %vm4749_vm10, 1.0, %v9775_v16  ;;  %v8623_v54 = vsel %vm2738_vm13, 1.0, %v9775_v16 }
  0x81   : > { %v4095_v52 = vadd.f32 %v8816_v46, %v3576_v47  ;;  %v8751_v55 = vsel %vm3256_vm14, 1.0, %v9775_v16  ;;  %v2603_v56 = vadd.f32 %v8494_v50, %v2085_v51  ;;  %v8880_v57 = vsel %vm3775_vm15, 1.0, %v9775_v16 }
  0x82   : > { %vm4294_vm0 = vcmp.eq.s32.totalorder %v10014_v3, %v10083_v39  ;;  %vm602_vm1 = vcmp.eq.s32.totalorder %v10011_v2, %v10028_v12  ;;  %vm4813_vm2 = vcmp.eq.s32.totalorder %v10014_v3, %v10089_v41  ;;  %vm1120_vm3 = vcmp.eq.s32.totalorder %v10011_v2, %v10030_v13 }
  0x83   : > { %v4614_v58 = vadd.f32 %v8945_v48, %v4095_v52  ;;  %v9009_v59 = vsel %vm4294_vm0, 1.0, %v9775_v16  ;;  %v8045_v60 = vsel %vm602_vm1, 1.0, %v9775_v16  ;;  %v3122_v61 = vadd.f32 %v8623_v54, %v2603_v56 }
  0x84   : > { %vm1638_vm4 = vcmp.eq.s32.totalorder %v10011_v2, %v10097_v45  ;;  %v10132_v62 = vperm.slane %v10036_v14, 1  ;;  %v8174_v4 = vsel %vm1120_vm3, 1.0, %v9775_v16  ;;  %v10137_v8 = vperm.slane %v10044_v19, 1 }
  0x85   : > { %v5133_v63 = vadd.f32 %v9074_v53, %v4614_v58  ;;  %v8303_v5 = vsel %vm1638_vm4, 1.0, %v9775_v16  ;;  %v3640_v11 = vadd.f32 %v8751_v55, %v3122_v61  ;;  %v1504_v15 = vadd.f32 %v8174_v4, %v8045_v60 }
  0x86   : > { %vm2156_vm5 = vcmp.eq.s32.totalorder %v10011_v2, %v10132_v62  ;;  %v10142_v17 = vperm.slane %v10051_v24, 1  ;;  %vm2675_vm6 = vcmp.eq.s32.totalorder %v10011_v2, %v10137_v8  ;;  %v10148_v20 = vperm.slane %v10057_v27, 1 }
  0x87   : > { %5237 = vmatpush.msra.mxu0 %v5133_v63  ;;  %v8431_v18 = vsel %vm2156_vm5, 1.0, %v9775_v16  ;;  %v10151_v21 = vperm.slane %v10068_v32, 1  ;;  %v4159_v22 = vadd.f32 %v8880_v57, %v3640_v11  ;;  %v2022_v25 = vadd.f32 %v8303_v5, %v1504_v15 }
  0x88   : > { %vm3193_vm7 = vcmp.eq.s32.totalorder %v10011_v2, %v10142_v17  ;;  %v10156_v28 = vadd.s32 240, %v10008_v1  ;;  %v9138_v29 = vsel %vm4813_vm2, 1.0, %v9775_v16  ;;  %v8560_v30 = vsel %vm2675_vm6, 1.0, %v9775_v16 }
  0x89   : > { %vm3712_vm8 = vcmp.eq.s32.totalorder %v10011_v2, %v10148_v20  ;;  %v10166_v33 = vperm.slane %v10077_v36, 1  ;;  %v4678_v34 = vadd.f32 %v9009_v59, %v4159_v22  ;;  %v2540_v37 = vadd.f32 %v8431_v18, %v2022_v25 }
  0x8a   : > { %v8688_v38 = vsel %vm3193_vm7, 1.0, %v9775_v16  ;;  %vm4231_vm9 = vcmp.eq.s32.totalorder %v10011_v2, %v10151_v21  ;;  %vm666_vm11 = vcmp.eq.s32.totalorder %v10014_v3, %v10028_v12  ;;  %vm1184_vm12 = vcmp.eq.s32.totalorder %v10014_v3, %v10030_v13 }
  0x8b   : > { %vm4750_vm10 = vcmp.eq.s32.totalorder %v10011_v2, %v10166_v33  ;;  %vm1702_vm13 = vcmp.eq.s32.totalorder %v10014_v3, %v10097_v45  ;;  %v5197_v40 = vadd.f32 %v9138_v29, %v4678_v34  ;;  %v3059_v42 = vadd.f32 %v8560_v30, %v2540_v37 }
  0x8c   : > { %v8817_v43 = vsel %vm3712_vm8, 1.0, %v9775_v16  ;;  %v8109_v44 = vsel %vm666_vm11, 1.0, %v9775_v16  ;;  %v8238_v46 = vsel %vm1184_vm12, 1.0, %v9775_v16  ;;  %v8367_v47 = vsel %vm1702_vm13, 1.0, %v9775_v16 }
  0x8d   : > { %vm2220_vm14 = vcmp.eq.s32.totalorder %v10014_v3, %v10132_v62  ;;  %vm2739_vm15 = vcmp.eq.s32.totalorder %v10014_v3, %v10137_v8  ;;  %5302 = vmatpush.msra.mxu1 %v5197_v40  ;;  %v3577_v48 = vadd.f32 %v8688_v38, %v3059_v42  ;;  %v8946_v49 = vsel %vm4231_vm9, 1.0, %v9775_v16 }
  0x8e   : > { %v9075_v50 = vsel %vm4750_vm10, 1.0, %v9775_v16  ;;  %v1568_v51 = vadd.f32 %v8238_v46, %v8109_v44  ;;  %v8495_v52 = vsel %vm2220_vm14, 1.0, %v9775_v16  ;;  %v8624_v53 = vsel %vm2739_vm15, 1.0, %v9775_v16 }
  0x8f   : > { %vm3257_vm0 = vcmp.eq.s32.totalorder %v10014_v3, %v10142_v17  ;;  %vm3776_vm1 = vcmp.eq.s32.totalorder %v10014_v3, %v10148_v20  ;;  %v4096_v54 = vadd.f32 %v8817_v43, %v3577_v48  ;;  %vm4295_vm2 = vcmp.eq.s32.totalorder %v10014_v3, %v10151_v21 }
  0x90   : > { %v2086_v55 = vadd.f32 %v8367_v47, %v1568_v51  ;;  %vm4814_vm3 = vcmp.eq.s32.totalorder %v10014_v3, %v10166_v33  ;;  %v8752_v56 = vsel %vm3257_vm0, 1.0, %v9775_v16  ;;  %v8881_v57 = vsel %vm3776_vm1, 1.0, %v9775_v16 }
  0x91   : > { %vm597_vm4 = vcmp.eq.s32.totalorder %v10024_v9, %v10018_v6  ;;  %vm1115_vm5 = vcmp.eq.s32.totalorder %v10024_v9, %v10020_v7  ;;  %v4615_v58 = vadd.f32 %v8946_v49, %v4096_v54  ;;  %vm1633_vm6 = vcmp.eq.s32.totalorder %v10024_v9, %v10026_v10 }
  0x92   : > { %v2604_v59 = vadd.f32 %v8495_v52, %v2086_v55  ;;  %v8040_v60 = vsel %vm597_vm4, 1.0, %v9775_v16  ;;  %v8169_v61 = vsel %vm1115_vm5, 1.0, %v9775_v16  ;;  %vm2151_vm7 = vcmp.eq.s32.totalorder %v10024_v9, %v10049_v23 }
  0x93   : > { %v1499_v63 = vadd.f32 %v8169_v61, %v8040_v60  ;;  %vm2670_vm8 = vcmp.eq.s32.totalorder %v10024_v9, %v10055_v26  ;;  %v5134_v4 = vadd.f32 %v9075_v50, %v4615_v58  ;;  %v8298_v11 = vsel %vm1633_vm6, 1.0, %v9775_v16 }
  0x94   : > { %v3123_v5 = vadd.f32 %v8624_v53, %v2604_v59  ;;  %v8426_v15 = vsel %vm2151_vm7, 1.0, %v9775_v16  ;;  %v9010_v18 = vsel %vm4295_vm2, 1.0, %v9775_v16  ;;  %vm3188_vm9 = vcmp.eq.s32.totalorder %v10024_v9, %v10066_v31 }
  0x95   : > { %v2017_v22 = vadd.f32 %v8298_v11, %v1499_v63  ;;  %vm3707_vm10 = vcmp.eq.s32.totalorder %v10024_v9, %v10075_v35  ;;  %5367 = vmatpush.msra.mxu2 %v5134_v4  ;;  %v9139_v29 = vsel %vm4814_vm3, 1.0, %v9775_v16  ;;  %v8555_v30 = vsel %vm2670_vm8, 1.0, %v9775_v16 }
  0x96   : > { %v3641_v25 = vadd.f32 %v8752_v56, %v3123_v5  ;;  %v8683_v34 = vsel %vm3188_vm9, 1.0, %v9775_v16  ;;  %v8812_v38 = vsel %vm3707_vm10, 1.0, %v9775_v16  ;;  %vm4226_vm11 = vcmp.eq.s32.totalorder %v10024_v9, %v10083_v39 }
  0x97   : > { %v2535_v37 = vadd.f32 %v8426_v15, %v2017_v22  ;;  %vm661_vm12 = vcmp.eq.s32.totalorder %v10156_v28, %v10018_v6  ;;  %vm4745_vm13 = vcmp.eq.s32.totalorder %v10024_v9, %v10089_v41  ;;  %vm1179_vm14 = vcmp.eq.s32.totalorder %v10156_v28, %v10020_v7 }
  0x98   : > { %v4160_v40 = vadd.f32 %v8881_v57, %v3641_v25  ;;  %v8104_v42 = vsel %vm661_vm12, 1.0, %v9775_v16  ;;  %v8233_v44 = vsel %vm1179_vm14, 1.0, %v9775_v16  ;;  %vm1697_vm15 = vcmp.eq.s32.totalorder %v10156_v28, %v10026_v10 }
  0x99   : > { %v3054_v43 = vadd.f32 %v8555_v30, %v2535_v37  ;;  %vm2215_vm0 = vcmp.eq.s32.totalorder %v10156_v28, %v10049_v23  ;;  %v1563_v47 = vadd.f32 %v8233_v44, %v8104_v42  ;;  %v8362_v48 = vsel %vm1697_vm15, 1.0, %v9775_v16 }
  0x9a   : > { %v4679_v46 = vadd.f32 %v9010_v18, %v4160_v40  ;;  %v8490_v49 = vsel %vm2215_vm0, 1.0, %v9775_v16  ;;  %vm2734_vm1 = vcmp.eq.s32.totalorder %v10156_v28, %v10055_v26  ;;  %vm3252_vm2 = vcmp.eq.s32.totalorder %v10156_v28, %v10066_v31 }
  0x9b   : > { %v3572_v50 = vadd.f32 %v8683_v34, %v3054_v43  ;;  %vm3771_vm3 = vcmp.eq.s32.totalorder %v10156_v28, %v10075_v35  ;;  %v8941_v52 = vsel %vm4226_vm11, 1.0, %v9775_v16  ;;  %v9070_v53 = vsel %vm4745_vm13, 1.0, %v9775_v16 }
  0x9c   : > { %v5198_v51 = vadd.f32 %v9139_v29, %v4679_v46  ;;  %v2081_v54 = vadd.f32 %v8362_v48, %v1563_v47  ;;  %v8619_v56 = vsel %vm2734_vm1, 1.0, %v9775_v16  ;;  %v8747_v57 = vsel %vm3252_vm2, 1.0, %v9775_v16 }
  0x9d   : > { %v4091_v55 = vadd.f32 %v8812_v38, %v3572_v50  ;;  %v8876_v58 = vsel %vm3771_vm3, 1.0, %v9775_v16  ;;  %vm4290_vm4 = vcmp.eq.s32.totalorder %v10156_v28, %v10083_v39  ;;  %vm4809_vm5 = vcmp.eq.s32.totalorder %v10156_v28, %v10089_v41 }
  0x9e   : > { %5432 = vmatpush.msra.mxu3 %v5198_v51  ;;  %v2599_v59 = vadd.f32 %v8490_v49, %v2081_v54  ;;  %vm598_vm6 = vcmp.eq.s32.totalorder %v10024_v9, %v10028_v12  ;;  %vm1116_vm7 = vcmp.eq.s32.totalorder %v10024_v9, %v10030_v13  ;;  %vm1634_vm8 = vcmp.eq.s32.totalorder %v10024_v9, %v10097_v45 }
  0x9f   : > { %v4610_v60 = vadd.f32 %v8941_v52, %v4091_v55  ;;  %v8041_v61 = vsel %vm598_vm6, 1.0, %v9775_v16  ;;  %v8170_v4 = vsel %vm1116_vm7, 1.0, %v9775_v16  ;;  %v8299_v5 = vsel %vm1634_vm8, 1.0, %v9775_v16 }
  0xa0   : > { %v3118_v63 = vadd.f32 %v8619_v56, %v2599_v59  ;;  %vm2152_vm9 = vcmp.eq.s32.totalorder %v10024_v9, %v10132_v62  ;;  %v9005_v15 = vsel %vm4290_vm4, 1.0, %v9775_v16  ;;  %v1500_v18 = vadd.f32 %v8170_v4, %v8041_v61 }
  0xa1   : > { %v5129_v11 = vadd.f32 %v9070_v53, %v4610_v60  ;;  %vm2671_vm10 = vcmp.eq.s32.totalorder %v10024_v9, %v10137_v8  ;;  %v8427_v25 = vsel %vm2152_vm9, 1.0, %v9775_v16  ;;  %vm3189_vm11 = vcmp.eq.s32.totalorder %v10024_v9, %v10142_v17 }
  0xa2   : > { %v3636_v22 = vadd.f32 %v8747_v57, %v3118_v63  ;;  %vm3708_vm12 = vcmp.eq.s32.totalorder %v10024_v9, %v10148_v20  ;;  %v9134_v29 = vsel %vm4809_vm5, 1.0, %v9775_v16  ;;  %v2018_v30 = vadd.f32 %v8299_v5, %v1500_v18 }
  0xa3   : > { %5238 = vmatpush.msra.mxu0 %v5129_v11  ;;  %v8556_v34 = vsel %vm2671_vm10, 1.0, %v9775_v16  ;;  %v8684_v37 = vsel %vm3189_vm11, 1.0, %v9775_v16  ;;  %v8813_v40 = vsel %vm3708_vm12, 1.0, %v9775_v16  ;;  %vm4227_vm13 = vcmp.eq.s32.totalorder %v10024_v9, %v10151_v21 }
  0xa4   : > { %v4155_v38 = vadd.f32 %v8876_v58, %v3636_v22  ;;  %vm662_vm14 = vcmp.eq.s32.totalorder %v10156_v28, %v10028_v12  ;;  %v2536_v42 = vadd.f32 %v8427_v25, %v2018_v30  ;;  %vm4746_vm15 = vcmp.eq.s32.totalorder %v10024_v9, %v10166_v33 }
  0xa5   : > { %v8105_v43 = vsel %vm662_vm14, 1.0, %v9775_v16  ;;  %vm1180_vm0 = vcmp.eq.s32.totalorder %v10156_v28, %v10030_v13  ;;  %vm1698_vm1 = vcmp.eq.s32.totalorder %v10156_v28, %v10097_v45  ;;  %vm2216_vm2 = vcmp.eq.s32.totalorder %v10156_v28, %v10132_v62 }
  0xa6   : > { %v4674_v44 = vadd.f32 %v9005_v15, %v4155_v38  ;;  %v8234_v46 = vsel %vm1180_vm0, 1.0, %v9775_v16  ;;  %v3055_v47 = vadd.f32 %v8556_v34, %v2536_v42  ;;  %v8363_v49 = vsel %vm1698_vm1, 1.0, %v9775_v16 }
  0xa7   : > { %v1564_v48 = vadd.f32 %v8234_v46, %v8105_v43  ;;  %v8491_v50 = vsel %vm2216_vm2, 1.0, %v9775_v16  ;;  %vm2735_vm3 = vcmp.eq.s32.totalorder %v10156_v28, %v10137_v8  ;;  %vm3253_vm4 = vcmp.eq.s32.totalorder %v10156_v28, %v10142_v17 }
  0xa8   : > { %v5193_v51 = vadd.f32 %v9134_v29, %v4674_v44  ;;  %vm3772_vm5 = vcmp.eq.s32.totalorder %v10156_v28, %v10148_v20  ;;  %v3573_v52 = vadd.f32 %v8684_v37, %v3055_v47  ;;  %v8942_v53 = vsel %vm4227_vm13, 1.0, %v9775_v16 }
  0xa9   : > { %v9071_v54 = vsel %vm4746_vm15, 1.0, %v9775_v16  ;;  %v2082_v55 = vadd.f32 %v8363_v49, %v1564_v48  ;;  %v8620_v56 = vsel %vm2735_vm3, 1.0, %v9775_v16  ;;  %v8748_v57 = vsel %vm3253_vm4, 1.0, %v9775_v16 }
  0xaa   : > { %5303 = vmatpush.msra.mxu1 %v5193_v51  ;;  %v8877_v58 = vsel %vm3772_vm5, 1.0, %v9775_v16  ;;  %v10327_v59 = vadd.s32 104, %v10008_v1  ;;  %v4092_v60 = vadd.f32 %v8813_v40, %v3573_v52  ;;  %vm4291_vm6 = vcmp.eq.s32.totalorder %v10156_v28, %v10151_v21 }
  0xab   : > { %v2600_v61 = vadd.f32 %v8491_v50, %v2082_v55  ;;  %vm4810_vm7 = vcmp.eq.s32.totalorder %v10156_v28, %v10166_v33  ;;  %v9006_v15 = vsel %vm4291_vm6, 1.0, %v9775_v16  ;;  %v10365_v47 = vadd.s32 232, %v10008_v1 }
  0xac   : > { %vm593_vm8 = vcmp.eq.s32.totalorder %v10327_v59, %v10018_v6  ;;  %vm1111_vm9 = vcmp.eq.s32.totalorder %v10327_v59, %v10020_v7  ;;  %vm1629_vm10 = vcmp.eq.s32.totalorder %v10327_v59, %v10026_v10  ;;  %vm2147_vm11 = vcmp.eq.s32.totalorder %v10327_v59, %v10049_v23 }
  0xad   : > { %v4611_v63 = vadd.f32 %v8942_v53, %v4092_v60  ;;  %v3119_v4 = vadd.f32 %v8620_v56, %v2600_v61  ;;  %v8036_v5 = vsel %vm593_vm8, 1.0, %v9775_v16  ;;  %v8165_v11 = vsel %vm1111_vm9, 1.0, %v9775_v16 }
  0xae   : > { %v1495_v18 = vadd.f32 %v8165_v11, %v8036_v5  ;;  %v8294_v22 = vsel %vm1629_vm10, 1.0, %v9775_v16  ;;  %vm2666_vm12 = vcmp.eq.s32.totalorder %v10327_v59, %v10055_v26  ;;  %v8422_v30 = vsel %vm2147_vm11, 1.0, %v9775_v16 }
  0xaf   : > { %v5130_v25 = vadd.f32 %v9071_v54, %v4611_v63  ;;  %v3637_v29 = vadd.f32 %v8748_v57, %v3119_v4  ;;  %vm3184_vm13 = vcmp.eq.s32.totalorder %v10327_v59, %v10066_v31  ;;  %v9135_v34 = vsel %vm4810_vm7, 1.0, %v9775_v16 }
  0xb0   : > { %v2013_v37 = vadd.f32 %v8294_v22, %v1495_v18  ;;  %vm3703_vm14 = vcmp.eq.s32.totalorder %v10327_v59, %v10075_v35  ;;  %vm4222_vm15 = vcmp.eq.s32.totalorder %v10327_v59, %v10083_v39  ;;  %v8551_v40 = vsel %vm2666_vm12, 1.0, %v9775_v16 }
  0xb1   : > { %5368 = vmatpush.msra.mxu2 %v5130_v25  ;;  %v4156_v38 = vadd.f32 %v8877_v58, %v3637_v29  ;;  %v8679_v42 = vsel %vm3184_vm13, 1.0, %v9775_v16  ;;  %vm4741_vm0 = vcmp.eq.s32.totalorder %v10327_v59, %v10089_v41  ;;  %v8808_v44 = vsel %vm3703_vm14, 1.0, %v9775_v16 }
  0xb2   : > { %v2531_v43 = vadd.f32 %v8422_v30, %v2013_v37  ;;  %v8937_v46 = vsel %vm4222_vm15, 1.0, %v9775_v16  ;;  %v9066_v49 = vsel %vm4741_vm0, 1.0, %v9775_v16  ;;  %vm594_vm1 = vcmp.eq.s32.totalorder %v10327_v59, %v10028_v12 }
  0xb3   : > { %v4675_v48 = vadd.f32 %v9006_v15, %v4156_v38  ;;  %vm1112_vm2 = vcmp.eq.s32.totalorder %v10327_v59, %v10030_v13  ;;  %vm657_vm3 = vcmp.eq.s32.totalorder %v10365_v47, %v10018_v6  ;;  %vm1175_vm4 = vcmp.eq.s32.totalorder %v10365_v47, %v10020_v7 }
  0xb4   : > { %v3050_v50 = vadd.f32 %v8551_v40, %v2531_v43  ;;  %vm1693_vm5 = vcmp.eq.s32.totalorder %v10365_v47, %v10026_v10  ;;  %v8100_v52 = vsel %vm657_vm3, 1.0, %v9775_v16  ;;  %v8229_v53 = vsel %vm1175_vm4, 1.0, %v9775_v16 }
  0xb5   : > { %v5194_v51 = vadd.f32 %v9135_v34, %v4675_v48  ;;  %v8358_v54 = vsel %vm1693_vm5, 1.0, %v9775_v16  ;;  %v1559_v56 = vadd.f32 %v8229_v53, %v8100_v52  ;;  %vm2211_vm6 = vcmp.eq.s32.totalorder %v10365_v47, %v10049_v23 }
  0xb6   : > { %v3568_v55 = vadd.f32 %v8679_v42, %v3050_v50  ;;  %vm2730_vm7 = vcmp.eq.s32.totalorder %v10365_v47, %v10055_v26  ;;  %v8486_v57 = vsel %vm2211_vm6, 1.0, %v9775_v16  ;;  %vm3248_vm8 = vcmp.eq.s32.totalorder %v10365_v47, %v10066_v31 }
  0xb7   : > { %5433 = vmatpush.msra.mxu3 %v5194_v51  ;;  %vm3767_vm9 = vcmp.eq.s32.totalorder %v10365_v47, %v10075_v35  ;;  %vm1630_vm10 = vcmp.eq.s32.totalorder %v10327_v59, %v10097_v45  ;;  %v2077_v60 = vadd.f32 %v8358_v54, %v1559_v56  ;;  %v8615_v61 = vsel %vm2730_vm7, 1.0, %v9775_v16 }
  0xb8   : > { %v4087_v58 = vadd.f32 %v8808_v44, %v3568_v55  ;;  %v8037_v63 = vsel %vm594_vm1, 1.0, %v9775_v16  ;;  %v8743_v4 = vsel %vm3248_vm8, 1.0, %v9775_v16  ;;  %v8872_v5 = vsel %vm3767_vm9, 1.0, %v9775_v16 }
  0xb9   : > { %vm4286_vm11 = vcmp.eq.s32.totalorder %v10365_v47, %v10083_v39  ;;  %v8166_v11 = vsel %vm1112_vm2, 1.0, %v9775_v16  ;;  %v2595_v18 = vadd.f32 %v8486_v57, %v2077_v60  ;;  %vm4805_vm12 = vcmp.eq.s32.totalorder %v10365_v47, %v10089_v41 }
  0xba   : > { %v4606_v15 = vadd.f32 %v8937_v46, %v4087_v58  ;;  %v8295_v22 = vsel %vm1630_vm10, 1.0, %v9775_v16  ;;  %v1496_v25 = vadd.f32 %v8166_v11, %v8037_v63  ;;  %vm2148_vm13 = vcmp.eq.s32.totalorder %v10327_v59, %v10132_v62 }
  0xbb   : > { %vm2667_vm14 = vcmp.eq.s32.totalorder %v10327_v59, %v10137_v8  ;;  %vm3185_vm15 = vcmp.eq.s32.totalorder %v10327_v59, %v10142_v17  ;;  %v3114_v30 = vadd.f32 %v8615_v61, %v2595_v18  ;;  %v9001_v34 = vsel %vm4286_vm11, 1.0, %v9775_v16 }
  0xbc   : > { %v5125_v29 = vadd.f32 %v9066_v49, %v4606_v15  ;;  %v8423_v37 = vsel %vm2148_vm13, 1.0, %v9775_v16  ;;  %v9130_v38 = vsel %vm4805_vm12, 1.0, %v9775_v16  ;;  %v2014_v40 = vadd.f32 %v8295_v22, %v1496_v25 }
  0xbd   : > { %vm3704_vm0 = vcmp.eq.s32.totalorder %v10327_v59, %v10148_v20  ;;  %vm4223_vm1 = vcmp.eq.s32.totalorder %v10327_v59, %v10151_v21  ;;  %v3632_v42 = vadd.f32 %v8743_v4, %v3114_v30  ;;  %v8552_v43 = vsel %vm2667_vm14, 1.0, %v9775_v16 }
  0xbe   : > { %5239 = vmatpush.msra.mxu0 %v5125_v29  ;;  %v8680_v44 = vsel %vm3185_vm15, 1.0, %v9775_v16  ;;  %v8809_v46 = vsel %vm3704_vm0, 1.0, %v9775_v16  ;;  %v2532_v48 = vadd.f32 %v8423_v37, %v2014_v40  ;;  %v8938_v49 = vsel %vm4223_vm1, 1.0, %v9775_v16 }
  0xbf   : > { %vm658_vm2 = vcmp.eq.s32.totalorder %v10365_v47, %v10028_v12  ;;  %vm1176_vm3 = vcmp.eq.s32.totalorder %v10365_v47, %v10030_v13  ;;  %v4151_v50 = vadd.f32 %v8872_v5, %v3632_v42  ;;  %vm1694_vm4 = vcmp.eq.s32.totalorder %v10365_v47, %v10097_v45 }
  0xc0   : > { %v8101_v51 = vsel %vm658_vm2, 1.0, %v9775_v16  ;;  %v8230_v52 = vsel %vm1176_vm3, 1.0, %v9775_v16  ;;  %v3051_v53 = vadd.f32 %v8552_v43, %v2532_v48  ;;  %v8359_v55 = vsel %vm1694_vm4, 1.0, %v9775_v16 }
  0xc1   : > { %v1560_v54 = vadd.f32 %v8230_v52, %v8101_v51  ;;  %vm2212_vm5 = vcmp.eq.s32.totalorder %v10365_v47, %v10132_v62  ;;  %v4670_v56 = vadd.f32 %v9001_v34, %v4151_v50  ;;  %vm4742_vm6 = vcmp.eq.s32.totalorder %v10327_v59, %v10166_v33 }
  0xc2   : > { %v8487_v57 = vsel %vm2212_vm5, 1.0, %v9775_v16  ;;  %vm2731_vm7 = vcmp.eq.s32.totalorder %v10365_v47, %v10137_v8  ;;  %v3569_v58 = vadd.f32 %v8680_v44, %v3051_v53  ;;  %vm3249_vm8 = vcmp.eq.s32.totalorder %v10365_v47, %v10142_v17 }
  0xc3   : > { %v2078_v60 = vadd.f32 %v8359_v55, %v1560_v54  ;;  %v8616_v61 = vsel %vm2731_vm7, 1.0, %v9775_v16  ;;  %v5189_v63 = vadd.f32 %v9130_v38, %v4670_v56  ;;  %vm3768_vm9 = vcmp.eq.s32.totalorder %v10365_v47, %v10148_v20 }
  0xc4   : > { %vm4287_vm10 = vcmp.eq.s32.totalorder %v10365_v47, %v10151_v21  ;;  %vm4806_vm11 = vcmp.eq.s32.totalorder %v10365_v47, %v10166_v33  ;;  %v4088_v4 = vadd.f32 %v8809_v46, %v3569_v58  ;;  %v9067_v5 = vsel %vm4742_vm6, 1.0, %v9775_v16 }
  0xc5   : > { %v2596_v11 = vadd.f32 %v8487_v57, %v2078_v60  ;;  %5304 = vmatpush.msra.mxu1 %v5189_v63  ;;  %v8744_v15 = vsel %vm3249_vm8, 1.0, %v9775_v16  ;;  %v8873_v18 = vsel %vm3768_vm9, 1.0, %v9775_v16  ;;  %v9002_v22 = vsel %vm4287_vm10, 1.0, %v9775_v16 }
  0xc6   : > { %v10455_v25 = vadd.s32 96, %v10008_v1  ;;  %v4607_v29 = vadd.f32 %v8938_v49, %v4088_v4  ;;  %v9131_v34 = vsel %vm4806_vm11, 1.0, %v9775_v16  ;;  %v10459_v37 = vadd.s32 224, %v10008_v1 }
  0xc7   : > { %v3115_v30 = vadd.f32 %v8616_v61, %v2596_v11  ;;  %v10475_v48 = vadd.s32 88, %v10008_v1  ;;  %v10485_v54 = vadd.s32 216, %v10008_v1 }
  0xc8   : > { %vm589_vm12 = vcmp.eq.s32.totalorder %v10455_v25, %v10018_v6  ;;  %vm1107_vm13 = vcmp.eq.s32.totalorder %v10455_v25, %v10020_v7  ;;  %vm1625_vm14 = vcmp.eq.s32.totalorder %v10455_v25, %v10026_v10  ;;  %vm2143_vm15 = vcmp.eq.s32.totalorder %v10455_v25, %v10049_v23 }
  0xc9   : > { %v5126_v38 = vadd.f32 %v9067_v5, %v4607_v29  ;;  %v3633_v40 = vadd.f32 %v8744_v15, %v3115_v30  ;;  %v8032_v42 = vsel %vm589_vm12, 1.0, %v9775_v16  ;;  %v8161_v43 = vsel %vm1107_vm13, 1.0, %v9775_v16 }
  0xca   : > { %v1491_v44 = vadd.f32 %v8161_v43, %v8032_v42  ;;  %v8290_v46 = vsel %vm1625_vm14, 1.0, %v9775_v16  ;;  %vm2662_vm0 = vcmp.eq.s32.totalorder %v10455_v25, %v10055_v26  ;;  %v8418_v50 = vsel %vm2143_vm15, 1.0, %v9775_v16 }
  0xcb   : > { %5369 = vmatpush.msra.mxu2 %v5126_v38  ;;  %v4152_v49 = vadd.f32 %v8873_v18, %v3633_v40  ;;  %vm3180_vm1 = vcmp.eq.s32.totalorder %v10455_v25, %v10066_v31  ;;  %vm3699_vm2 = vcmp.eq.s32.totalorder %v10455_v25, %v10075_v35  ;;  %v8547_v52 = vsel %vm2662_vm0, 1.0, %v9775_v16 }
  0xcc   : > { %v2009_v51 = vadd.f32 %v8290_v46, %v1491_v44  ;;  %v8675_v53 = vsel %vm3180_vm1, 1.0, %v9775_v16  ;;  %v8804_v56 = vsel %vm3699_vm2, 1.0, %v9775_v16  ;;  %vm4218_vm3 = vcmp.eq.s32.totalorder %v10455_v25, %v10083_v39 }
  0xcd   : > { %v4671_v55 = vadd.f32 %v9002_v22, %v4152_v49  ;;  %vm653_vm4 = vcmp.eq.s32.totalorder %v10459_v37, %v10018_v6  ;;  %vm4737_vm5 = vcmp.eq.s32.totalorder %v10455_v25, %v10089_v41  ;;  %vm1171_vm6 = vcmp.eq.s32.totalorder %v10459_v37, %v10020_v7 }
  0xce   : > { %v2527_v57 = vadd.f32 %v8418_v50, %v2009_v51  ;;  %v8096_v58 = vsel %vm653_vm4, 1.0, %v9775_v16  ;;  %v8225_v61 = vsel %vm1171_vm6, 1.0, %v9775_v16  ;;  %vm1689_vm7 = vcmp.eq.s32.totalorder %v10459_v37, %v10026_v10 }
  0xcf   : > { %v5190_v60 = vadd.f32 %v9131_v34, %v4671_v55  ;;  %vm2207_vm8 = vcmp.eq.s32.totalorder %v10459_v37, %v10049_v23  ;;  %v8933_v4 = vsel %vm4218_vm3, 1.0, %v9775_v16  ;;  %v1555_v5 = vadd.f32 %v8225_v61, %v8096_v58 }
  0xd0   : > { %v3046_v63 = vadd.f32 %v8547_v52, %v2527_v57  ;;  %v8354_v11 = vsel %vm1689_vm7, 1.0, %v9775_v16  ;;  %v8482_v15 = vsel %vm2207_vm8, 1.0, %v9775_v16  ;;  %vm2726_vm9 = vcmp.eq.s32.totalorder %v10459_v37, %v10055_v26 }
  0xd1   : > { %5434 = vmatpush.msra.mxu3 %v5190_v60  ;;  %vm3244_vm10 = vcmp.eq.s32.totalorder %v10459_v37, %v10066_v31  ;;  %vm3763_vm11 = vcmp.eq.s32.totalorder %v10459_v37, %v10075_v35  ;;  %v9062_v22 = vsel %vm4737_vm5, 1.0, %v9775_v16  ;;  %v2073_v29 = vadd.f32 %v8354_v11, %v1555_v5 }
  0xd2   : > { %v3564_v18 = vadd.f32 %v8675_v53, %v3046_v63  ;;  %vm4282_vm12 = vcmp.eq.s32.totalorder %v10459_v37, %v10083_v39  ;;  %v8611_v30 = vsel %vm2726_vm9, 1.0, %v9775_v16  ;;  %v8739_v34 = vsel %vm3244_vm10, 1.0, %v9775_v16 }
  0xd3   : > { %v8868_v38 = vsel %vm3763_vm11, 1.0, %v9775_v16  ;;  %vm590_vm13 = vcmp.eq.s32.totalorder %v10455_v25, %v10028_v12  ;;  %v2591_v42 = vadd.f32 %v8482_v15, %v2073_v29  ;;  %vm4801_vm14 = vcmp.eq.s32.totalorder %v10459_v37, %v10089_v41 }
  0xd4   : > { %v4083_v40 = vadd.f32 %v8804_v56, %v3564_v18  ;;  %v8033_v43 = vsel %vm590_vm13, 1.0, %v9775_v16  ;;  %vm1108_vm15 = vcmp.eq.s32.totalorder %v10455_v25, %v10030_v13  ;;  %vm1626_vm0 = vcmp.eq.s32.totalorder %v10455_v25, %v10097_v45 }
  0xd5   : > { %vm2144_vm1 = vcmp.eq.s32.totalorder %v10455_v25, %v10132_v62  ;;  %vm2663_vm2 = vcmp.eq.s32.totalorder %v10455_v25, %v10137_v8  ;;  %v3110_v46 = vadd.f32 %v8611_v30, %v2591_v42  ;;  %v8162_v49 = vsel %vm1108_vm15, 1.0, %v9775_v16 }
  0xd6   : > { %v4602_v44 = vadd.f32 %v8933_v4, %v4083_v40  ;;  %v8291_v50 = vsel %vm1626_vm0, 1.0, %v9775_v16  ;;  %v8997_v51 = vsel %vm4282_vm12, 1.0, %v9775_v16  ;;  %v9126_v52 = vsel %vm4801_vm14, 1.0, %v9775_v16 }
  0xd7   : > { %v1492_v53 = vadd.f32 %v8162_v49, %v8033_v43  ;;  %vm3181_vm3 = vcmp.eq.s32.totalorder %v10455_v25, %v10142_v17  ;;  %v3628_v56 = vadd.f32 %v8739_v34, %v3110_v46  ;;  %v8419_v57 = vsel %vm2144_vm1, 1.0, %v9775_v16 }
  0xd8   : > { %v5121_v55 = vadd.f32 %v9062_v22, %v4602_v44  ;;  %vm3700_vm4 = vcmp.eq.s32.totalorder %v10455_v25, %v10148_v20  ;;  %v8548_v60 = vsel %vm2663_vm2, 1.0, %v9775_v16  ;;  %v8676_v61 = vsel %vm3181_vm3, 1.0, %v9775_v16 }
  0xd9   : > { %v2010_v58 = vadd.f32 %v8291_v50, %v1492_v53  ;;  %v8805_v63 = vsel %vm3700_vm4, 1.0, %v9775_v16  ;;  %v4147_v4 = vadd.f32 %v8868_v38, %v3628_v56  ;;  %vm4219_vm5 = vcmp.eq.s32.totalorder %v10455_v25, %v10151_v21 }
  0xda   : > { %5240 = vmatpush.msra.mxu0 %v5121_v55  ;;  %vm4738_vm6 = vcmp.eq.s32.totalorder %v10455_v25, %v10166_v33  ;;  %vm654_vm7 = vcmp.eq.s32.totalorder %v10459_v37, %v10028_v12  ;;  %vm1172_vm8 = vcmp.eq.s32.totalorder %v10459_v37, %v10030_v13  ;;  %vm1690_vm9 = vcmp.eq.s32.totalorder %v10459_v37, %v10097_v45 }
  0xdb   : > { %v2528_v5 = vadd.f32 %v8419_v57, %v2010_v58  ;;  %v8097_v11 = vsel %vm654_vm7, 1.0, %v9775_v16  ;;  %v4666_v15 = vadd.f32 %v8997_v51, %v4147_v4  ;;  %v8226_v18 = vsel %vm1172_vm8, 1.0, %v9775_v16 }
  0xdc   : > { %v8355_v22 = vsel %vm1690_vm9, 1.0, %v9775_v16  ;;  %vm2208_vm10 = vcmp.eq.s32.totalorder %v10459_v37, %v10132_v62  ;;  %v8934_v30 = vsel %vm4219_vm5, 1.0, %v9775_v16  ;;  %v1556_v34 = vadd.f32 %v8226_v18, %v8097_v11 }
  0xdd   : > { %v3047_v29 = vadd.f32 %v8548_v60, %v2528_v5  ;;  %vm2727_vm11 = vcmp.eq.s32.totalorder %v10459_v37, %v10137_v8  ;;  %v5185_v38 = vadd.f32 %v9126_v52, %v4666_v15  ;;  %v8483_v40 = vsel %vm2208_vm10, 1.0, %v9775_v16 }
  0xde   : > { %vm3245_vm12 = vcmp.eq.s32.totalorder %v10459_v37, %v10142_v17  ;;  %vm3764_vm13 = vcmp.eq.s32.totalorder %v10459_v37, %v10148_v20  ;;  %v9063_v43 = vsel %vm4738_vm6, 1.0, %v9775_v16  ;;  %v2074_v44 = vadd.f32 %v8355_v22, %v1556_v34 }
  0xdf   : > { %v3565_v42 = vadd.f32 %v8676_v61, %v3047_v29  ;;  %v8612_v46 = vsel %vm2727_vm11, 1.0, %v9775_v16  ;;  %5305 = vmatpush.msra.mxu1 %v5185_v38  ;;  %v8740_v49 = vsel %vm3245_vm12, 1.0, %v9775_v16  ;;  %v8869_v50 = vsel %vm3764_vm13, 1.0, %v9775_v16 }
  0xe0   : > { %vm585_vm14 = vcmp.eq.s32.totalorder %v10475_v48, %v10018_v6  ;;  %vm1103_vm15 = vcmp.eq.s32.totalorder %v10475_v48, %v10020_v7  ;;  %v2592_v52 = vadd.f32 %v8483_v40, %v2074_v44  ;;  %vm4283_vm0 = vcmp.eq.s32.totalorder %v10459_v37, %v10151_v21 }
  0xe1   : > { %v4084_v51 = vadd.f32 %v8805_v63, %v3565_v42  ;;  %vm4802_vm1 = vcmp.eq.s32.totalorder %v10459_v37, %v10166_v33  ;;  %v8028_v53 = vsel %vm585_vm14, 1.0, %v9775_v16  ;;  %v8157_v55 = vsel %vm1103_vm15, 1.0, %v9775_v16 }
  0xe2   : > { %vm1621_vm2 = vcmp.eq.s32.totalorder %v10475_v48, %v10026_v10  ;;  %vm2139_vm3 = vcmp.eq.s32.totalorder %v10475_v48, %v10049_v23  ;;  %v3111_v57 = vadd.f32 %v8612_v46, %v2592_v52  ;;  %v1487_v58 = vadd.f32 %v8157_v55, %v8028_v53 }
  0xe3   : > { %v4603_v56 = vadd.f32 %v8934_v30, %v4084_v51  ;;  %v8286_v60 = vsel %vm1621_vm2, 1.0, %v9775_v16  ;;  %v8414_v61 = vsel %vm2139_vm3, 1.0, %v9775_v16  ;;  %vm2658_vm4 = vcmp.eq.s32.totalorder %v10475_v48, %v10055_v26 }
  0xe4   : > { %vm3176_vm5 = vcmp.eq.s32.totalorder %v10475_v48, %v10066_v31  ;;  %vm3695_vm6 = vcmp.eq.s32.totalorder %v10475_v48, %v10075_v35  ;;  %v3629_v4 = vadd.f32 %v8740_v49, %v3111_v57  ;;  %v8998_v5 = vsel %vm4283_vm0, 1.0, %v9775_v16 }
  0xe5   : > { %v5122_v63 = vadd.f32 %v9063_v43, %v4603_v56  ;;  %v2005_v11 = vadd.f32 %v8286_v60, %v1487_v58  ;;  %v9127_v15 = vsel %vm4802_vm1, 1.0, %v9775_v16  ;;  %v8543_v18 = vsel %vm2658_vm4, 1.0, %v9775_v16 }
  0xe6   : > { %v8671_v22 = vsel %vm3176_vm5, 1.0, %v9775_v16  ;;  %v8800_v29 = vsel %vm3695_vm6, 1.0, %v9775_v16  ;;  %v4148_v30 = vadd.f32 %v8869_v50, %v3629_v4  ;;  %vm4214_vm7 = vcmp.eq.s32.totalorder %v10475_v48, %v10083_v39 }
  0xe7   : > { %5370 = vmatpush.msra.mxu2 %v5122_v63  ;;  %v2523_v34 = vadd.f32 %v8414_v61, %v2005_v11  ;;  %vm4733_vm8 = vcmp.eq.s32.totalorder %v10475_v48, %v10089_v41  ;;  %vm649_vm9 = vcmp.eq.s32.totalorder %v10485_v54, %v10018_v6  ;;  %vm1167_vm10 = vcmp.eq.s32.totalorder %v10485_v54, %v10020_v7 }
  0xe8   : > { %vm1685_vm11 = vcmp.eq.s32.totalorder %v10485_v54, %v10026_v10  ;;  %vm2203_vm12 = vcmp.eq.s32.totalorder %v10485_v54, %v10049_v23  ;;  %v4667_v38 = vadd.f32 %v8998_v5, %v4148_v30  ;;  %v8092_v42 = vsel %vm649_vm9, 1.0, %v9775_v16 }
  0xe9   : > { %v3042_v40 = vadd.f32 %v8543_v18, %v2523_v34  ;;  %v8221_v43 = vsel %vm1167_vm10, 1.0, %v9775_v16  ;;  %v8929_v44 = vsel %vm4214_vm7, 1.0, %v9775_v16  ;;  %v8350_v49 = vsel %vm1685_vm11, 1.0, %v9775_v16 }
  0xea   : > { %v1551_v46 = vadd.f32 %v8221_v43, %v8092_v42  ;;  %vm2722_vm13 = vcmp.eq.s32.totalorder %v10485_v54, %v10055_v26  ;;  %v5186_v50 = vadd.f32 %v9127_v15, %v4667_v38  ;;  %v8478_v52 = vsel %vm2203_vm12, 1.0, %v9775_v16 }
  0xeb   : > { %v3560_v51 = vadd.f32 %v8671_v22, %v3042_v40  ;;  %vm3240_vm14 = vcmp.eq.s32.totalorder %v10485_v54, %v10066_v31  ;;  %v9058_v53 = vsel %vm4733_vm8, 1.0, %v9775_v16  ;;  %v8607_v56 = vsel %vm2722_vm13, 1.0, %v9775_v16 }
  0xec   : > { %v2069_v55 = vadd.f32 %v8350_v49, %v1551_v46  ;;  %vm3759_vm15 = vcmp.eq.s32.totalorder %v10485_v54, %v10075_v35  ;;  %5435 = vmatpush.msra.mxu3 %v5186_v50  ;;  %v8735_v58 = vsel %vm3240_vm14, 1.0, %v9775_v16  ;;  %vm4278_vm0 = vcmp.eq.s32.totalorder %v10485_v54, %v10083_v39 }
  0xed   : > { %v4079_v57 = vadd.f32 %v8800_v29, %v3560_v51  ;;  %v8864_v60 = vsel %vm3759_vm15, 1.0, %v9775_v16  ;;  %vm4797_vm1 = vcmp.eq.s32.totalorder %v10485_v54, %v10089_v41  ;;  %vm586_vm2 = vcmp.eq.s32.totalorder %v10475_v48, %v10028_v12 }
  0xee   : > { %v2587_v61 = vadd.f32 %v8478_v52, %v2069_v55  ;;  %vm1104_vm3 = vcmp.eq.s32.totalorder %v10475_v48, %v10030_v13  ;;  %v8029_v4 = vsel %vm586_vm2, 1.0, %v9775_v16  ;;  %vm1622_vm4 = vcmp.eq.s32.totalorder %v10475_v48, %v10097_v45 }
  0xef   : > { %v4598_v63 = vadd.f32 %v8929_v44, %v4079_v57  ;;  %v8158_v5 = vsel %vm1104_vm3, 1.0, %v9775_v16  ;;  %v8287_v18 = vsel %vm1622_vm4, 1.0, %v9775_v16  ;;  %vm2140_vm5 = vcmp.eq.s32.totalorder %v10475_v48, %v10132_v62 }
  0xf0   : > { %v3106_v11 = vadd.f32 %v8607_v56, %v2587_v61  ;;  %v1488_v15 = vadd.f32 %v8158_v5, %v8029_v4  ;;  %v8415_v29 = vsel %vm2140_vm5, 1.0, %v9775_v16  ;;  %vm2659_vm6 = vcmp.eq.s32.totalorder %v10475_v48, %v10137_v8 }
  0xf1   : > { %v5117_v22 = vadd.f32 %v9058_v53, %v4598_v63  ;;  %vm3177_vm7 = vcmp.eq.s32.totalorder %v10475_v48, %v10142_v17  ;;  %v8993_v34 = vsel %vm4278_vm0, 1.0, %v9775_v16  ;;  %v9122_v40 = vsel %vm4797_vm1, 1.0, %v9775_v16 }
  0xf2   : > { %v3624_v30 = vadd.f32 %v8735_v58, %v3106_v11  ;;  %v2006_v38 = vadd.f32 %v8287_v18, %v1488_v15  ;;  %v8544_v42 = vsel %vm2659_vm6, 1.0, %v9775_v16  ;;  %v8672_v43 = vsel %vm3177_vm7, 1.0, %v9775_v16 }
  0xf3   : > { %5241 = vmatpush.msra.mxu0 %v5117_v22  ;;  %vm650_vm8 = vcmp.eq.s32.totalorder %v10485_v54, %v10028_v12  ;;  %vm3696_vm9 = vcmp.eq.s32.totalorder %v10475_v48, %v10148_v20  ;;  %vm4215_vm10 = vcmp.eq.s32.totalorder %v10475_v48, %v10151_v21  ;;  %vm4734_vm11 = vcmp.eq.s32.totalorder %v10475_v48, %v10166_v33 }
  0xf4   : > { %v4143_v44 = vadd.f32 %v8864_v60, %v3624_v30  ;;  %v2524_v46 = vadd.f32 %v8415_v29, %v2006_v38  ;;  %v8093_v49 = vsel %vm650_vm8, 1.0, %v9775_v16  ;;  %vm1168_vm12 = vcmp.eq.s32.totalorder %v10485_v54, %v10030_v13 }
  0xf5   : > { %vm1686_vm13 = vcmp.eq.s32.totalorder %v10485_v54, %v10097_v45  ;;  %v8222_v52 = vsel %vm1168_vm12, 1.0, %v9775_v16  ;;  %v8801_v55 = vsel %vm3696_vm9, 1.0, %v9775_v16  ;;  %vm2204_vm14 = vcmp.eq.s32.totalorder %v10485_v54, %v10132_v62 }
  0xf6   : > { %v4662_v50 = vadd.f32 %v8993_v34, %v4143_v44  ;;  %v3043_v51 = vadd.f32 %v8544_v42, %v2524_v46  ;;  %v8351_v53 = vsel %vm1686_vm13, 1.0, %v9775_v16  ;;  %v1552_v56 = vadd.f32 %v8222_v52, %v8093_v49 }
  0xf7   : > { %vm2723_vm15 = vcmp.eq.s32.totalorder %v10485_v54, %v10137_v8  ;;  %v8479_v60 = vsel %vm2204_vm14, 1.0, %v9775_v16  ;;  %vm3241_vm0 = vcmp.eq.s32.totalorder %v10485_v54, %v10142_v17  ;;  %v8930_v61 = vsel %vm4215_vm10, 1.0, %v9775_v16 }
  0xf8   : > { %v5181_v57 = vadd.f32 %v9122_v40, %v4662_v50  ;;  %v3561_v58 = vadd.f32 %v8672_v43, %v3043_v51  ;;  %v2070_v63 = vadd.f32 %v8351_v53, %v1552_v56  ;;  %vm3760_vm1 = vcmp.eq.s32.totalorder %v10485_v54, %v10148_v20 }
  0xf9   : > { %vm4279_vm2 = vcmp.eq.s32.totalorder %v10485_v54, %v10151_v21  ;;  %v9059_v5 = vsel %vm4734_vm11, 1.0, %v9775_v16  ;;  %v8608_v11 = vsel %vm2723_vm15, 1.0, %v9775_v16  ;;  %vm4798_vm3 = vcmp.eq.s32.totalorder %v10485_v54, %v10166_v33 }
  0xfa   : > { %5306 = vmatpush.msra.mxu1 %v5181_v57  ;;  %v4080_v4 = vadd.f32 %v8801_v55, %v3561_v58  ;;  %v2588_v15 = vadd.f32 %v8479_v60, %v2070_v63  ;;  %v8736_v18 = vsel %vm3241_vm0, 1.0, %v9775_v16  ;;  %v8865_v22 = vsel %vm3760_vm1, 1.0, %v9775_v16 }
  0xfb   : > { %v10712_v29 = vadd.s32 80, %v10008_v1  ;;  %v8994_v34 = vsel %vm4279_vm2, 1.0, %v9775_v16  ;;  %v9123_v38 = vsel %vm4798_vm3, 1.0, %v9775_v16  ;;  %v10717_v40 = vadd.s32 208, %v10008_v1 }
  0xfc   : > { %v4599_v30 = vadd.f32 %v8930_v61, %v4080_v4  ;;  %v3107_v42 = vadd.f32 %v8608_v11, %v2588_v15  ;;  %v10738_v53 = vadd.s32 72, %v10008_v1  ;;  %v10742_v58 = vadd.s32 200, %v10008_v1 }
  0xfd   : > { %vm581_vm4 = vcmp.eq.s32.totalorder %v10712_v29, %v10018_v6  ;;  %vm1099_vm5 = vcmp.eq.s32.totalorder %v10712_v29, %v10020_v7  ;;  %vm1617_vm6 = vcmp.eq.s32.totalorder %v10712_v29, %v10026_v10  ;;  %vm2135_vm7 = vcmp.eq.s32.totalorder %v10712_v29, %v10049_v23 }
  0xfe   : > { %v5118_v43 = vadd.f32 %v9059_v5, %v4599_v30  ;;  %v8024_v44 = vsel %vm581_vm4, 1.0, %v9775_v16  ;;  %v8153_v46 = vsel %vm1099_vm5, 1.0, %v9775_v16  ;;  %v8282_v49 = vsel %vm1617_vm6, 1.0, %v9775_v16 }
  0xff   : > { %v3625_v50 = vadd.f32 %v8736_v18, %v3107_v42  ;;  %v1483_v51 = vadd.f32 %v8153_v46, %v8024_v44  ;;  %vm2654_vm8 = vcmp.eq.s32.totalorder %v10712_v29, %v10055_v26  ;;  %v8410_v52 = vsel %vm2135_vm7, 1.0, %v9775_v16 }
 0x100   : > { %5371 = vmatpush.msra.mxu2 %v5118_v43  ;;  %vm3172_vm9 = vcmp.eq.s32.totalorder %v10712_v29, %v10066_v31  ;;  %vm3691_vm10 = vcmp.eq.s32.totalorder %v10712_v29, %v10075_v35  ;;  %v8539_v57 = vsel %vm2654_vm8, 1.0, %v9775_v16  ;;  %vm645_vm11 = vcmp.eq.s32.totalorder %v10717_v40, %v10018_v6 }
 0x101   : > { %v4144_v55 = vadd.f32 %v8865_v22, %v3625_v50  ;;  %v2001_v56 = vadd.f32 %v8282_v49, %v1483_v51  ;;  %v8667_v60 = vsel %vm3172_vm9, 1.0, %v9775_v16  ;;  %v8796_v61 = vsel %vm3691_vm10, 1.0, %v9775_v16 }
 0x102   : > { %vm1163_vm12 = vcmp.eq.s32.totalorder %v10717_v40, %v10020_v7  ;;  %vm4210_vm13 = vcmp.eq.s32.totalorder %v10712_v29, %v10083_v39  ;;  %vm4729_vm14 = vcmp.eq.s32.totalorder %v10712_v29, %v10089_v41  ;;  %v8088_v5 = vsel %vm645_vm11, 1.0, %v9775_v16 }
 0x103   : > { %v4663_v63 = vadd.f32 %v8994_v34, %v4144_v55  ;;  %v2519_v4 = vadd.f32 %v8410_v52, %v2001_v56  ;;  %v8217_v11 = vsel %vm1163_vm12, 1.0, %v9775_v16  ;;  %vm1681_vm15 = vcmp.eq.s32.totalorder %v10717_v40, %v10026_v10 }
 0x104   : > { %vm2199_vm0 = vcmp.eq.s32.totalorder %v10717_v40, %v10049_v23  ;;  %v1547_v22 = vadd.f32 %v8217_v11, %v8088_v5  ;;  %v8346_v30 = vsel %vm1681_vm15, 1.0, %v9775_v16  ;;  %vm2718_vm1 = vcmp.eq.s32.totalorder %v10717_v40, %v10055_v26 }
 0x105   : > { %v5182_v15 = vadd.f32 %v9123_v38, %v4663_v63  ;;  %v3038_v18 = vadd.f32 %v8539_v57, %v2519_v4  ;;  %v8474_v34 = vsel %vm2199_vm0, 1.0, %v9775_v16  ;;  %vm3236_vm2 = vcmp.eq.s32.totalorder %v10717_v40, %v10066_v31 }
 0x106   : > { %vm3755_vm3 = vcmp.eq.s32.totalorder %v10717_v40, %v10075_v35  ;;  %v8925_v38 = vsel %vm4210_vm13, 1.0, %v9775_v16  ;;  %v9054_v43 = vsel %vm4729_vm14, 1.0, %v9775_v16  ;;  %v2065_v44 = vadd.f32 %v8346_v30, %v1547_v22 }
 0x107   : > { %5436 = vmatpush.msra.mxu3 %v5182_v15  ;;  %v3556_v42 = vadd.f32 %v8667_v60, %v3038_v18  ;;  %v8603_v46 = vsel %vm2718_vm1, 1.0, %v9775_v16  ;;  %v8731_v49 = vsel %vm3236_vm2, 1.0, %v9775_v16  ;;  %v8860_v50 = vsel %vm3755_vm3, 1.0, %v9775_v16 }
 0x108   : > { %vm582_vm4 = vcmp.eq.s32.totalorder %v10712_v29, %v10028_v12  ;;  %v2583_v52 = vadd.f32 %v8474_v34, %v2065_v44  ;;  %vm4274_vm5 = vcmp.eq.s32.totalorder %v10717_v40, %v10083_v39  ;;  %vm4793_vm6 = vcmp.eq.s32.totalorder %v10717_v40, %v10089_v41 }
 0x109   : > { %v4075_v51 = vadd.f32 %v8796_v61, %v3556_v42  ;;  %v8025_v55 = vsel %vm582_vm4, 1.0, %v9775_v16  ;;  %vm1100_vm7 = vcmp.eq.s32.totalorder %v10712_v29, %v10030_v13  ;;  %vm1618_vm8 = vcmp.eq.s32.totalorder %v10712_v29, %v10097_v45 }
 0x10a   : > { %vm2136_vm9 = vcmp.eq.s32.totalorder %v10712_v29, %v10132_v62  ;;  %v3102_v57 = vadd.f32 %v8603_v46, %v2583_v52  ;;  %v8154_v60 = vsel %vm1100_vm7, 1.0, %v9775_v16  ;;  %v8283_v61 = vsel %vm1618_vm8, 1.0, %v9775_v16 }
 0x10b   : > { %v4594_v56 = vadd.f32 %v8925_v38, %v4075_v51  ;;  %v8989_v63 = vsel %vm4274_vm5, 1.0, %v9775_v16  ;;  %v1484_v4 = vadd.f32 %v8154_v60, %v8025_v55  ;;  %vm2655_vm10 = vcmp.eq.s32.totalorder %v10712_v29, %v10137_v8 }
 0x10c   : > { %vm3173_vm11 = vcmp.eq.s32.totalorder %v10712_v29, %v10142_v17  ;;  %v3620_v11 = vadd.f32 %v8731_v49, %v3102_v57  ;;  %v9118_v15 = vsel %vm4793_vm6, 1.0, %v9775_v16  ;;  %v8411_v18 = vsel %vm2136_vm9, 1.0, %v9775_v16 }
 0x10d   : > { %v5113_v5 = vadd.f32 %v9054_v43, %v4594_v56  ;;  %v2002_v22 = vadd.f32 %v8283_v61, %v1484_v4  ;;  %v8540_v30 = vsel %vm2655_vm10, 1.0, %v9775_v16  ;;  %v8668_v34 = vsel %vm3173_vm11, 1.0, %v9775_v16 }
 0x10e   : > { %vm3692_vm12 = vcmp.eq.s32.totalorder %v10712_v29, %v10148_v20  ;;  %v4139_v42 = vadd.f32 %v8860_v50, %v3620_v11  ;;  %vm4211_vm13 = vcmp.eq.s32.totalorder %v10712_v29, %v10151_v21  ;;  %vm4730_vm14 = vcmp.eq.s32.totalorder %v10712_v29, %v10166_v33 }
 0x10f   : > { %5242 = vmatpush.msra.mxu0 %v5113_v5  ;;  %v8797_v38 = vsel %vm3692_vm12, 1.0, %v9775_v16  ;;  %v2520_v43 = vadd.f32 %v8411_v18, %v2002_v22  ;;  %vm646_vm15 = vcmp.eq.s32.totalorder %v10717_v40, %v10028_v12  ;;  %vm1164_vm0 = vcmp.eq.s32.totalorder %v10717_v40, %v10030_v13 }
 0x110   : > { %vm1682_vm1 = vcmp.eq.s32.totalorder %v10717_v40, %v10097_v45  ;;  %v4658_v44 = vadd.f32 %v8989_v63, %v4139_v42  ;;  %v8089_v46 = vsel %vm646_vm15, 1.0, %v9775_v16  ;;  %v8218_v49 = vsel %vm1164_vm0, 1.0, %v9775_v16 }
 0x111   : > { %v8347_v50 = vsel %vm1682_vm1, 1.0, %v9775_v16  ;;  %v3039_v51 = vadd.f32 %v8540_v30, %v2520_v43  ;;  %v1548_v52 = vadd.f32 %v8218_v49, %v8089_v46  ;;  %vm2200_vm2 = vcmp.eq.s32.totalorder %v10717_v40, %v10132_v62 }
 0x112   : > { %vm2719_vm3 = vcmp.eq.s32.totalorder %v10717_v40, %v10137_v8  ;;  %v5177_v55 = vadd.f32 %v9118_v15, %v4658_v44  ;;  %v8926_v56 = vsel %vm4211_vm13, 1.0, %v9775_v16  ;;  %v8475_v57 = vsel %vm2200_vm2, 1.0, %v9775_v16 }
 0x113   : > { %vm3237_vm4 = vcmp.eq.s32.totalorder %v10717_v40, %v10142_v17  ;;  %v3557_v60 = vadd.f32 %v8668_v34, %v3039_v51  ;;  %v9055_v61 = vsel %vm4730_vm14, 1.0, %v9775_v16  ;;  %v2066_v63 = vadd.f32 %v8347_v50, %v1548_v52 }
 0x114   : > { %vm3756_vm5 = vcmp.eq.s32.totalorder %v10717_v40, %v10148_v20  ;;  %5307 = vmatpush.msra.mxu1 %v5177_v55  ;;  %v8604_v4 = vsel %vm2719_vm3, 1.0, %v9775_v16  ;;  %v8732_v5 = vsel %vm3237_vm4, 1.0, %v9775_v16  ;;  %vm577_vm6 = vcmp.eq.s32.totalorder %v10738_v53, %v10018_v6 }
 0x115   : > { %v8861_v11 = vsel %vm3756_vm5, 1.0, %v9775_v16  ;;  %v4076_v15 = vadd.f32 %v8797_v38, %v3557_v60  ;;  %v2584_v18 = vadd.f32 %v8475_v57, %v2066_v63  ;;  %vm4275_vm7 = vcmp.eq.s32.totalorder %v10717_v40, %v10151_v21 }
 0x116   : > { %vm4794_vm8 = vcmp.eq.s32.totalorder %v10717_v40, %v10166_v33  ;;  %v8020_v22 = vsel %vm577_vm6, 1.0, %v9775_v16  ;;  %vm1095_vm9 = vcmp.eq.s32.totalorder %v10738_v53, %v10020_v7  ;;  %vm1613_vm10 = vcmp.eq.s32.totalorder %v10738_v53, %v10026_v10 }
 0x117   : > { %vm2131_vm11 = vcmp.eq.s32.totalorder %v10738_v53, %v10049_v23  ;;  %v4595_v30 = vadd.f32 %v8926_v56, %v4076_v15  ;;  %v3103_v34 = vadd.f32 %v8604_v4, %v2584_v18  ;;  %v8149_v42 = vsel %vm1095_vm9, 1.0, %v9775_v16 }
 0x118   : > { %v8278_v38 = vsel %vm1613_vm10, 1.0, %v9775_v16  ;;  %v8990_v43 = vsel %vm4275_vm7, 1.0, %v9775_v16  ;;  %v1479_v44 = vadd.f32 %v8149_v42, %v8020_v22  ;;  %vm2650_vm12 = vcmp.eq.s32.totalorder %v10738_v53, %v10055_v26 }
 0x119   : > { %vm3168_vm13 = vcmp.eq.s32.totalorder %v10738_v53, %v10066_v31  ;;  %v5114_v46 = vadd.f32 %v9055_v61, %v4595_v30  ;;  %v3621_v49 = vadd.f32 %v8732_v5, %v3103_v34  ;;  %v9119_v50 = vsel %vm4794_vm8, 1.0, %v9775_v16 }
 0x11a   : > { %v8406_v51 = vsel %vm2131_vm11, 1.0, %v9775_v16  ;;  %v1997_v52 = vadd.f32 %v8278_v38, %v1479_v44  ;;  %v8535_v55 = vsel %vm2650_vm12, 1.0, %v9775_v16  ;;  %v8663_v56 = vsel %vm3168_vm13, 1.0, %v9775_v16 }
 0x11b   : > { %vm3687_vm14 = vcmp.eq.s32.totalorder %v10738_v53, %v10075_v35  ;;  %5372 = vmatpush.msra.mxu2 %v5114_v46  ;;  %v4140_v57 = vadd.f32 %v8861_v11, %v3621_v49  ;;  %vm4206_vm15 = vcmp.eq.s32.totalorder %v10738_v53, %v10083_v39  ;;  %vm4725_vm0 = vcmp.eq.s32.totalorder %v10738_v53, %v10089_v41 }
 0x11c   : > { %v8792_v60 = vsel %vm3687_vm14, 1.0, %v9775_v16  ;;  %v2515_v61 = vadd.f32 %v8406_v51, %v1997_v52  ;;  %vm641_vm1 = vcmp.eq.s32.totalorder %v10742_v58, %v10018_v6  ;;  %vm1159_vm2 = vcmp.eq.s32.totalorder %v10742_v58, %v10020_v7 }
 0x11d   : > { %vm1677_vm3 = vcmp.eq.s32.totalorder %v10742_v58, %v10026_v10  ;;  %v4659_v63 = vadd.f32 %v8990_v43, %v4140_v57  ;;  %v8084_v4 = vsel %vm641_vm1, 1.0, %v9775_v16  ;;  %v8213_v5 = vsel %vm1159_vm2, 1.0, %v9775_v16 }
 0x11e   : > { %v8342_v11 = vsel %vm1677_vm3, 1.0, %v9775_v16  ;;  %v3034_v15 = vadd.f32 %v8535_v55, %v2515_v61  ;;  %v1543_v18 = vadd.f32 %v8213_v5, %v8084_v4  ;;  %vm2195_vm4 = vcmp.eq.s32.totalorder %v10742_v58, %v10049_v23 }
 0x11f   : > { %vm2714_vm5 = vcmp.eq.s32.totalorder %v10742_v58, %v10055_v26  ;;  %v5178_v22 = vadd.f32 %v9119_v50, %v4659_v63  ;;  %v8921_v30 = vsel %vm4206_vm15, 1.0, %v9775_v16  ;;  %v8470_v34 = vsel %vm2195_vm4, 1.0, %v9775_v16 }
 0x120   : > { %vm3232_vm6 = vcmp.eq.s32.totalorder %v10742_v58, %v10066_v31  ;;  %v3552_v42 = vadd.f32 %v8663_v56, %v3034_v15  ;;  %v9050_v38 = vsel %vm4725_vm0, 1.0, %v9775_v16  ;;  %v2061_v43 = vadd.f32 %v8342_v11, %v1543_v18 }
 0x121   : > { %vm3751_vm7 = vcmp.eq.s32.totalorder %v10742_v58, %v10075_v35  ;;  %5437 = vmatpush.msra.mxu3 %v5178_v22  ;;  %v8599_v44 = vsel %vm2714_vm5, 1.0, %v9775_v16  ;;  %v8727_v46 = vsel %vm3232_vm6, 1.0, %v9775_v16  ;;  %vm578_vm8 = vcmp.eq.s32.totalorder %v10738_v53, %v10028_v12 }
 0x122   : > { %v8856_v49 = vsel %vm3751_vm7, 1.0, %v9775_v16  ;;  %v4071_v50 = vadd.f32 %v8792_v60, %v3552_v42  ;;  %v2579_v51 = vadd.f32 %v8470_v34, %v2061_v43  ;;  %vm4270_vm9 = vcmp.eq.s32.totalorder %v10742_v58, %v10083_v39 }
 0x123   : > { %vm4789_vm10 = vcmp.eq.s32.totalorder %v10742_v58, %v10089_v41  ;;  %v8021_v52 = vsel %vm578_vm8, 1.0, %v9775_v16  ;;  %vm1096_vm11 = vcmp.eq.s32.totalorder %v10738_v53, %v10030_v13  ;;  %vm1614_vm12 = vcmp.eq.s32.totalorder %v10738_v53, %v10097_v45 }
 0x124   : > { %vm2132_vm13 = vcmp.eq.s32.totalorder %v10738_v53, %v10132_v62  ;;  %v4590_v55 = vadd.f32 %v8921_v30, %v4071_v50  ;;  %v3098_v56 = vadd.f32 %v8599_v44, %v2579_v51  ;;  %v8150_v57 = vsel %vm1096_vm11, 1.0, %v9775_v16 }
 0x125   : > { %v8279_v60 = vsel %vm1614_vm12, 1.0, %v9775_v16  ;;  %v8985_v61 = vsel %vm4270_vm9, 1.0, %v9775_v16  ;;  %v1480_v63 = vadd.f32 %v8150_v57, %v8021_v52  ;;  %vm2651_vm14 = vcmp.eq.s32.totalorder %v10738_v53, %v10137_v8 }
 0x126   : > { %vm3169_vm15 = vcmp.eq.s32.totalorder %v10738_v53, %v10142_v17  ;;  %v5109_v4 = vadd.f32 %v9050_v38, %v4590_v55  ;;  %v3616_v5 = vadd.f32 %v8727_v46, %v3098_v56  ;;  %v9114_v11 = vsel %vm4789_vm10, 1.0, %v9775_v16 }
 0x127   : > { %v8407_v15 = vsel %vm2132_vm13, 1.0, %v9775_v16  ;;  %v1998_v18 = vadd.f32 %v8279_v60, %v1480_v63  ;;  %v8536_v22 = vsel %vm2651_vm14, 1.0, %v9775_v16  ;;  %v8664_v30 = vsel %vm3169_vm15, 1.0, %v9775_v16 }
 0x128   : > { %vm3688_vm0 = vcmp.eq.s32.totalorder %v10738_v53, %v10148_v20  ;;  %5243 = vmatpush.msra.mxu0 %v5109_v4  ;;  %v4135_v34 = vadd.f32 %v8856_v49, %v3616_v5  ;;  %vm4207_vm1 = vcmp.eq.s32.totalorder %v10738_v53, %v10151_v21  ;;  %vm4726_vm2 = vcmp.eq.s32.totalorder %v10738_v53, %v10166_v33 }
 0x129   : > { %v8793_v42 = vsel %vm3688_vm0, 1.0, %v9775_v16  ;;  %v2516_v38 = vadd.f32 %v8407_v15, %v1998_v18  ;;  %vm642_vm3 = vcmp.eq.s32.totalorder %v10742_v58, %v10028_v12  ;;  %vm1160_vm4 = vcmp.eq.s32.totalorder %v10742_v58, %v10030_v13 }
 0x12a   : > { %vm1678_vm5 = vcmp.eq.s32.totalorder %v10742_v58, %v10097_v45  ;;  %v4654_v43 = vadd.f32 %v8985_v61, %v4135_v34  ;;  %v8085_v44 = vsel %vm642_vm3, 1.0, %v9775_v16  ;;  %v8214_v46 = vsel %vm1160_vm4, 1.0, %v9775_v16 }
 0x12b   : > { %v8343_v49 = vsel %vm1678_vm5, 1.0, %v9775_v16  ;;  %v3035_v50 = vadd.f32 %v8536_v22, %v2516_v38  ;;  %v1544_v51 = vadd.f32 %v8214_v46, %v8085_v44  ;;  %vm2196_vm6 = vcmp.eq.s32.totalorder %v10742_v58, %v10132_v62 }
 0x12c   : > { %vm2715_vm7 = vcmp.eq.s32.totalorder %v10742_v58, %v10137_v8  ;;  %v5173_v52 = vadd.f32 %v9114_v11, %v4654_v43  ;;  %v8922_v55 = vsel %vm4207_vm1, 1.0, %v9775_v16  ;;  %v8471_v56 = vsel %vm2196_vm6, 1.0, %v9775_v16 }
 0x12d   : > { %vm3233_vm8 = vcmp.eq.s32.totalorder %v10742_v58, %v10142_v17  ;;  %v3553_v57 = vadd.f32 %v8664_v30, %v3035_v50  ;;  %v9051_v60 = vsel %vm4726_vm2, 1.0, %v9775_v16  ;;  %v2062_v61 = vadd.f32 %v8343_v49, %v1544_v51 }
 0x12e   : > { %vm3752_vm9 = vcmp.eq.s32.totalorder %v10742_v58, %v10148_v20  ;;  %5308 = vmatpush.msra.mxu1 %v5173_v52  ;;  %v8600_v63 = vsel %vm2715_vm7, 1.0, %v9775_v16  ;;  %v8728_v4 = vsel %vm3233_vm8, 1.0, %v9775_v16  ;;  %v10951_v11 = vadd.s32 64, %v10008_v1 }
 0x12f   : > { %v8857_v5 = vsel %vm3752_vm9, 1.0, %v9775_v16  ;;  %v4072_v15 = vadd.f32 %v8793_v42, %v3553_v57  ;;  %v2580_v18 = vadd.f32 %v8471_v56, %v2062_v61  ;;  %vm4271_vm10 = vcmp.eq.s32.totalorder %v10742_v58, %v10151_v21 }
 0x130   : > { %vm4790_vm11 = vcmp.eq.s32.totalorder %v10742_v58, %v10166_v33  ;;  %vm573_vm12 = vcmp.eq.s32.totalorder %v10951_v11, %v10018_v6  ;;  %vm1091_vm13 = vcmp.eq.s32.totalorder %v10951_v11, %v10020_v7  ;;  %vm1609_vm14 = vcmp.eq.s32.totalorder %v10951_v11, %v10026_v10 }
 0x131   : > { %vm2127_vm15 = vcmp.eq.s32.totalorder %v10951_v11, %v10049_v23  ;;  %v4591_v22 = vadd.f32 %v8922_v55, %v4072_v15  ;;  %v3099_v30 = vadd.f32 %v8600_v63, %v2580_v18  ;;  %v8016_v34 = vsel %vm573_vm12, 1.0, %v9775_v16 }
 0x132   : > { %v8145_v42 = vsel %vm1091_vm13, 1.0, %v9775_v16  ;;  %v8986_v38 = vsel %vm4271_vm10, 1.0, %v9775_v16  ;;  %v8274_v44 = vsel %vm1609_vm14, 1.0, %v9775_v16  ;;  %vm2646_vm0 = vcmp.eq.s32.totalorder %v10951_v11, %v10055_v26 }
 0x133   : > { %v1475_v43 = vadd.f32 %v8145_v42, %v8016_v34  ;;  %v5110_v46 = vadd.f32 %v9051_v60, %v4591_v22  ;;  %v3617_v49 = vadd.f32 %v8728_v4, %v3099_v30  ;;  %v8402_v50 = vsel %vm2127_vm15, 1.0, %v9775_v16 }
 0x134   : > { %vm3164_vm1 = vcmp.eq.s32.totalorder %v10951_v11, %v10066_v31  ;;  %v9115_v51 = vsel %vm4790_vm11, 1.0, %v9775_v16  ;;  %vm3683_vm2 = vcmp.eq.s32.totalorder %v10951_v11, %v10075_v35  ;;  %vm4202_vm3 = vcmp.eq.s32.totalorder %v10951_v11, %v10083_v39 }
 0x135   : > { %v1993_v52 = vadd.f32 %v8274_v44, %v1475_v43  ;;  %5373 = vmatpush.msra.mxu2 %v5110_v46  ;;  %v4136_v55 = vadd.f32 %v8857_v5, %v3617_v49  ;;  %v8531_v56 = vsel %vm2646_vm0, 1.0, %v9775_v16  ;;  %v8659_v57 = vsel %vm3164_vm1, 1.0, %v9775_v16 }
 0x136   : > { %vm4721_vm4 = vcmp.eq.s32.totalorder %v10951_v11, %v10089_v41  ;;  %v8788_v61 = vsel %vm3683_vm2, 1.0, %v9775_v16  ;;  %v8917_v63 = vsel %vm4202_vm3, 1.0, %v9775_v16  ;;  %v10989_v4 = vadd.s32 192, %v10008_v1 }
 0x137   : > { %v2511_v60 = vadd.f32 %v8402_v50, %v1993_v52  ;;  %v4655_v15 = vadd.f32 %v8986_v38, %v4136_v55  ;;  %v9046_v18 = vsel %vm4721_vm4, 1.0, %v9775_v16  ;;  %vm574_vm5 = vcmp.eq.s32.totalorder %v10951_v11, %v10028_v12 }
 0x138   : > { %16647 = vst [vmem:[#allocation25_spill] sm:$0xff] %v10989_v4  ;;  %vm1092_vm6 = vcmp.eq.s32.totalorder %v10951_v11, %v10030_v13  ;;  %vm637_vm7 = vcmp.eq.s32.totalorder %v10989_v4, %v10018_v6  ;;  %vm1155_vm8 = vcmp.eq.s32.totalorder %v10989_v4, %v10020_v7  ;;  %vm1673_vm9 = vcmp.eq.s32.totalorder %v10989_v4, %v10026_v10 }
 0x139   : > { %v3030_v5 = vadd.f32 %v8531_v56, %v2511_v60  ;;  %v5174_v22 = vadd.f32 %v9115_v51, %v4655_v15  ;;  %v8080_v30 = vsel %vm637_vm7, 1.0, %v9775_v16  ;;  %v8209_v34 = vsel %vm1155_vm8, 1.0, %v9775_v16 }
 0x13a   : > { %v8338_v42 = vsel %vm1673_vm9, 1.0, %v9775_v16  ;;  %v1539_v43 = vadd.f32 %v8209_v34, %v8080_v30  ;;  %vm2191_vm10 = vcmp.eq.s32.totalorder %v10989_v4, %v10049_v23  ;;  %vm2710_vm11 = vcmp.eq.s32.totalorder %v10989_v4, %v10055_v26 }
 0x13b   : > { %v3548_v38 = vadd.f32 %v8659_v57, %v3030_v5  ;;  %5438 = vmatpush.msra.mxu3 %v5174_v22  ;;  %v8466_v44 = vsel %vm2191_vm10, 1.0, %v9775_v16  ;;  %vm3228_vm12 = vcmp.eq.s32.totalorder %v10989_v4, %v10066_v31  ;;  %vm3747_vm13 = vcmp.eq.s32.totalorder %v10989_v4, %v10075_v35 }
 0x13c   : > { %vm1610_vm14 = vcmp.eq.s32.totalorder %v10951_v11, %v10097_v45  ;;  %v2057_v49 = vadd.f32 %v8338_v42, %v1539_v43  ;;  %v8595_v50 = vsel %vm2710_vm11, 1.0, %v9775_v16  ;;  %v8017_v51 = vsel %vm574_vm5, 1.0, %v9775_v16 }
 0x13d   : > { %v4067_v46 = vadd.f32 %v8788_v61, %v3548_v38  ;;  %v8723_v52 = vsel %vm3228_vm12, 1.0, %v9775_v16  ;;  %v8852_v55 = vsel %vm3747_vm13, 1.0, %v9775_v16  ;;  %vm4266_vm15 = vcmp.eq.s32.totalorder %v10989_v4, %v10083_v39 }
 0x13e   : > { %v8146_v56 = vsel %vm1092_vm6, 1.0, %v9775_v16  ;;  %v2575_v60 = vadd.f32 %v8466_v44, %v2057_v49  ;;  %vm4785_vm0 = vcmp.eq.s32.totalorder %v10989_v4, %v10089_v41  ;;  %v8275_v61 = vsel %vm1610_vm14, 1.0, %v9775_v16 }
 0x13f   : > { %v4586_v57 = vadd.f32 %v8917_v63, %v4067_v46  ;;  %v1476_v15 = vadd.f32 %v8146_v56, %v8017_v51  ;;  %vm2128_vm1 = vcmp.eq.s32.totalorder %v10951_v11, %v10132_v62  ;;  %vm2647_vm2 = vcmp.eq.s32.totalorder %v10951_v11, %v10137_v8 }
 0x140   : > { %vm3165_vm3 = vcmp.eq.s32.totalorder %v10951_v11, %v10142_v17  ;;  %v3094_v22 = vadd.f32 %v8595_v50, %v2575_v60  ;;  %v8981_v63 = vsel %vm4266_vm15, 1.0, %v9775_v16  ;;  %v8403_v30 = vsel %vm2128_vm1, 1.0, %v9775_v16 }
 0x141   : > { %v5105_v5 = vadd.f32 %v9046_v18, %v4586_v57  ;;  %v9110_v34 = vsel %vm4785_vm0, 1.0, %v9775_v16  ;;  %v1994_v42 = vadd.f32 %v8275_v61, %v1476_v15  ;;  %vm3684_vm4 = vcmp.eq.s32.totalorder %v10951_v11, %v10148_v20 }
 0x142   : > { %vm4203_vm5 = vcmp.eq.s32.totalorder %v10951_v11, %v10151_v21  ;;  %v3612_v38 = vadd.f32 %v8723_v52, %v3094_v22  ;;  %v8532_v43 = vsel %vm2647_vm2, 1.0, %v9775_v16  ;;  %v8660_v18 = vsel %vm3165_vm3, 1.0, %v9775_v16 }
 0x143   : > { %5244 = vmatpush.msra.mxu0 %v5105_v5  ;;  %v8789_v44 = vsel %vm3684_vm4, 1.0, %v9775_v16  ;;  %v2512_v46 = vadd.f32 %v8403_v30, %v1994_v42  ;;  %v8918_v49 = vsel %vm4203_vm5, 1.0, %v9775_v16  ;;  %vm638_vm6 = vcmp.eq.s32.totalorder %v10989_v4, %v10028_v12 }
 0x144   : > { %vm1156_vm7 = vcmp.eq.s32.totalorder %v10989_v4, %v10030_v13  ;;  %v4131_v50 = vadd.f32 %v8852_v55, %v3612_v38  ;;  %v8081_v51 = vsel %vm638_vm6, 1.0, %v9775_v16  ;;  %vm1674_vm8 = vcmp.eq.s32.totalorder %v10989_v4, %v10097_v45 }
 0x145   : > { %v8210_v52 = vsel %vm1156_vm7, 1.0, %v9775_v16  ;;  %v3031_v56 = vadd.f32 %v8532_v43, %v2512_v46  ;;  %v8339_v60 = vsel %vm1674_vm8, 1.0, %v9775_v16  ;;  %vm2192_vm9 = vcmp.eq.s32.totalorder %v10989_v4, %v10132_v62 }
 0x146   : > { %v1540_v57 = vadd.f32 %v8210_v52, %v8081_v51  ;;  %v4650_v61 = vadd.f32 %v8981_v63, %v4131_v50  ;;  %vm4722_vm10 = vcmp.eq.s32.totalorder %v10951_v11, %v10166_v33  ;;  %v8467_v55 = vsel %vm2192_vm9, 1.0, %v9775_v16 }
 0x147   : > { %vm2711_vm11 = vcmp.eq.s32.totalorder %v10989_v4, %v10137_v8  ;;  %v3549_v15 = vadd.f32 %v8660_v18, %v3031_v56  ;;  %vm3229_vm12 = vcmp.eq.s32.totalorder %v10989_v4, %v10142_v17  ;;  %vm3748_vm13 = vcmp.eq.s32.totalorder %v10989_v4, %v10148_v20 }
 0x148   : > { %v2058_v5 = vadd.f32 %v8339_v60, %v1540_v57  ;;  %v8596_v22 = vsel %vm2711_vm11, 1.0, %v9775_v16  ;;  %v5169_v30 = vadd.f32 %v9110_v34, %v4650_v61  ;;  %vm4267_vm14 = vcmp.eq.s32.totalorder %v10989_v4, %v10151_v21 }
 0x149   : > { %vm4786_vm15 = vcmp.eq.s32.totalorder %v10989_v4, %v10166_v33  ;;  %v4068_v63 = vadd.f32 %v8789_v44, %v3549_v15  ;;  %v9047_v42 = vsel %vm4722_vm10, 1.0, %v9775_v16  ;;  %v8724_v43 = vsel %vm3229_vm12, 1.0, %v9775_v16 }
 0x14a   : > { %v2576_v38 = vadd.f32 %v8467_v55, %v2058_v5  ;;  %5309 = vmatpush.msra.mxu1 %v5169_v30  ;;  %v8853_v18 = vsel %vm3748_vm13, 1.0, %v9775_v16  ;;  %v8982_v34 = vsel %vm4267_vm14, 1.0, %v9775_v16  ;;  %v11079_v46 = vadd.s32 56, %v10008_v1 }
 0x14b   : > { %v4587_v50 = vadd.f32 %v8918_v49, %v4068_v63  ;;  %v9111_v52 = vsel %vm4786_vm15, 1.0, %v9775_v16  ;;  %v11083_v56 = vadd.s32 184, %v10008_v1  ;;  %v11099_v15 = vadd.s32 48, %v10008_v1 }
 0x14c   : > { %16648 = vst [vmem:[#allocation26_spill] sm:$0xff] %v11079_v46  ;;  %v3095_v51 = vadd.f32 %v8596_v22, %v2576_v38  ;;  %vm569_vm0 = vcmp.eq.s32.totalorder %v11079_v46, %v10018_v6  ;;  %vm1087_vm1 = vcmp.eq.s32.totalorder %v11079_v46, %v10020_v7  ;;  %vm1605_vm2 = vcmp.eq.s32.totalorder %v11079_v46, %v10026_v10 }
 0x14d   : > { %16649 = vst [vmem:[#allocation27_spill] sm:$0xff] %v11083_v56  ;;  %vm2123_vm3 = vcmp.eq.s32.totalorder %v11079_v46, %v10049_v23  ;;  %v5106_v44 = vadd.f32 %v9047_v42, %v4587_v50  ;;  %v8012_v57 = vsel %vm569_vm0, 1.0, %v9775_v16  ;;  %v8141_v60 = vsel %vm1087_vm1, 1.0, %v9775_v16 }
 0x14e   : > { %v3613_v49 = vadd.f32 %v8724_v43, %v3095_v51  ;;  %v1471_v61 = vadd.f32 %v8141_v60, %v8012_v57  ;;  %v8270_v55 = vsel %vm1605_vm2, 1.0, %v9775_v16  ;;  %vm2642_vm4 = vcmp.eq.s32.totalorder %v11079_v46, %v10055_v26  ;;  %16650 = vst [vmem:[#allocation28_spill] sm:$0xff] %v11099_v15 }
 0x14f   : > { %5374 = vmatpush.msra.mxu2 %v5106_v44  ;;  %v8398_v22 = vsel %vm2123_vm3, 1.0, %v9775_v16  ;;  %vm3160_vm5 = vcmp.eq.s32.totalorder %v11079_v46, %v10066_v31  ;;  %vm3679_vm6 = vcmp.eq.s32.totalorder %v11079_v46, %v10075_v35  ;;  %v8527_v63 = vsel %vm2642_vm4, 1.0, %v9775_v16 }
 0x150   : > { %v4132_v5 = vadd.f32 %v8853_v18, %v3613_v49  ;;  %v1989_v30 = vadd.f32 %v8270_v55, %v1471_v61  ;;  %v8655_v42 = vsel %vm3160_vm5, 1.0, %v9775_v16  ;;  %v11109_v38 = vadd.s32 176, %v10008_v1 }
 0x151   : > { %v8784_v50 = vsel %vm3679_vm6, 1.0, %v9775_v16  ;;  %vm4198_vm7 = vcmp.eq.s32.totalorder %v11079_v46, %v10083_v39  ;;  %vm633_vm8 = vcmp.eq.s32.totalorder %v11083_v56, %v10018_v6  ;;  %vm4717_vm9 = vcmp.eq.s32.totalorder %v11079_v46, %v10089_v41 }
 0x152   : > { %16651 = vst [vmem:[#allocation29_spill] sm:$0xff] %v11109_v38  ;;  %v4651_v43 = vadd.f32 %v8982_v34, %v4132_v5  ;;  %v2507_v18 = vadd.f32 %v8398_v22, %v1989_v30  ;;  %v8076_v51 = vsel %vm633_vm8, 1.0, %v9775_v16  ;;  %vm1151_vm10 = vcmp.eq.s32.totalorder %v11083_v56, %v10020_v7 }
 0x153   : > { %v8205_v34 = vsel %vm1151_vm10, 1.0, %v9775_v16  ;;  %vm1669_vm11 = vcmp.eq.s32.totalorder %v11083_v56, %v10026_v10  ;;  %vm2187_vm12 = vcmp.eq.s32.totalorder %v11083_v56, %v10049_v23  ;;  %v8913_v57 = vsel %vm4198_vm7, 1.0, %v9775_v16 }
 0x154   : > { %v5170_v44 = vadd.f32 %v9111_v52, %v4651_v43  ;;  %v3026_v49 = vadd.f32 %v8527_v63, %v2507_v18  ;;  %v1535_v60 = vadd.f32 %v8205_v34, %v8076_v51  ;;  %v8334_v61 = vsel %vm1669_vm11, 1.0, %v9775_v16 }
 0x155   : > { %v8462_v55 = vsel %vm2187_vm12, 1.0, %v9775_v16  ;;  %vm2706_vm13 = vcmp.eq.s32.totalorder %v11083_v56, %v10055_v26  ;;  %vm3224_vm14 = vcmp.eq.s32.totalorder %v11083_v56, %v10066_v31  ;;  %vm3743_vm15 = vcmp.eq.s32.totalorder %v11083_v56, %v10075_v35 }
 0x156   : > { %5439 = vmatpush.msra.mxu3 %v5170_v44  ;;  %v3544_v52 = vadd.f32 %v8655_v42, %v3026_v49  ;;  %v9042_v5 = vsel %vm4717_vm9, 1.0, %v9775_v16  ;;  %v2053_v22 = vadd.f32 %v8334_v61, %v1535_v60  ;;  %vm4262_vm0 = vcmp.eq.s32.totalorder %v11083_v56, %v10083_v39 }
 0x157   : > { %v8591_v30 = vsel %vm2706_vm13, 1.0, %v9775_v16  ;;  %v8719_v63 = vsel %vm3224_vm14, 1.0, %v9775_v16  ;;  %v8848_v43 = vsel %vm3743_vm15, 1.0, %v9775_v16  ;;  %vm570_vm1 = vcmp.eq.s32.totalorder %v11079_v46, %v10028_v12 }
 0x158   : > { %v4063_v18 = vadd.f32 %v8784_v50, %v3544_v52  ;;  %v2571_v42 = vadd.f32 %v8462_v55, %v2053_v22  ;;  %vm4781_vm2 = vcmp.eq.s32.totalorder %v11083_v56, %v10089_v41  ;;  %v8013_v51 = vsel %vm570_vm1, 1.0, %v9775_v16 }
 0x159   : > { %vm1088_vm3 = vcmp.eq.s32.totalorder %v11079_v46, %v10030_v13  ;;  %vm1606_vm4 = vcmp.eq.s32.totalorder %v11079_v46, %v10097_v45  ;;  %vm2124_vm5 = vcmp.eq.s32.totalorder %v11079_v46, %v10132_v62  ;;  %vm2643_vm6 = vcmp.eq.s32.totalorder %v11079_v46, %v10137_v8 }
 0x15a   : > { %v4582_v44 = vadd.f32 %v8913_v57, %v4063_v18  ;;  %v3090_v50 = vadd.f32 %v8591_v30, %v2571_v42  ;;  %v8142_v34 = vsel %vm1088_vm3, 1.0, %v9775_v16  ;;  %v8271_v49 = vsel %vm1606_vm4, 1.0, %v9775_v16 }
 0x15b   : > { %v8977_v60 = vsel %vm4262_vm0, 1.0, %v9775_v16  ;;  %v9106_v61 = vsel %vm4781_vm2, 1.0, %v9775_v16  ;;  %v1472_v55 = vadd.f32 %v8142_v34, %v8013_v51  ;;  %vm3161_vm7 = vcmp.eq.s32.totalorder %v11079_v46, %v10142_v17 }
 0x15c   : > { %v5101_v52 = vadd.f32 %v9042_v5, %v4582_v44  ;;  %v3608_v22 = vadd.f32 %v8719_v63, %v3090_v50  ;;  %v8399_v57 = vsel %vm2124_vm5, 1.0, %v9775_v16  ;;  %vm3680_vm8 = vcmp.eq.s32.totalorder %v11079_v46, %v10148_v20 }
 0x15d   : > { %v1990_v30 = vadd.f32 %v8271_v49, %v1472_v55  ;;  %v8528_v18 = vsel %vm2643_vm6, 1.0, %v9775_v16  ;;  %v8656_v42 = vsel %vm3161_vm7, 1.0, %v9775_v16  ;;  %v8785_v0 = vsel %vm3680_vm8, 1.0, %v9775_v16 }
 0x15e   : > { %5245 = vmatpush.msra.mxu0 %v5101_v52  ;;  %v4127_v4 = vadd.f32 %v8848_v43, %v3608_v22  ;;  %vm4199_vm9 = vcmp.eq.s32.totalorder %v11079_v46, %v10151_v21  ;;  %vm4718_vm10 = vcmp.eq.s32.totalorder %v11079_v46, %v10166_v33  ;;  %vm634_vm11 = vcmp.eq.s32.totalorder %v11083_v56, %v10028_v12 }
 0x15f   : > { %v2508_v5 = vadd.f32 %v8399_v57, %v1990_v30  ;;  %v8077_v63 = vsel %vm634_vm11, 1.0, %v9775_v16  ;;  %vm1152_vm12 = vcmp.eq.s32.totalorder %v11083_v56, %v10030_v13  ;;  %vm1670_vm13 = vcmp.eq.s32.totalorder %v11083_v56, %v10097_v45 }
 0x160   : > { %v4646_v51 = vadd.f32 %v8977_v60, %v4127_v4  ;;  %v8206_v43 = vsel %vm1152_vm12, 1.0, %v9775_v16  ;;  %v8335_v44 = vsel %vm1670_vm13, 1.0, %v9775_v16  ;;  %vm2188_vm14 = vcmp.eq.s32.totalorder %v11083_v56, %v10132_v62 }
 0x161   : > { %v3027_v50 = vadd.f32 %v8528_v18, %v2508_v5  ;;  %v8914_v34 = vsel %vm4199_vm9, 1.0, %v9775_v16  ;;  %v1536_v49 = vadd.f32 %v8206_v43, %v8077_v63  ;;  %vm2707_vm15 = vcmp.eq.s32.totalorder %v11083_v56, %v10137_v8 }
 0x162   : > { %v5165_v55 = vadd.f32 %v9106_v61, %v4646_v51  ;;  %v8463_v52 = vsel %vm2188_vm14, 1.0, %v9775_v16  ;;  %vm3225_vm0 = vcmp.eq.s32.totalorder %v11083_v56, %v10142_v17  ;;  %vm3744_vm1 = vcmp.eq.s32.totalorder %v11083_v56, %v10148_v20 }
 0x163   : > { %v3545_v4 = vadd.f32 %v8656_v42, %v3027_v50  ;;  %v9043_v60 = vsel %vm4718_vm10, 1.0, %v9775_v16  ;;  %v2054_v22 = vadd.f32 %v8335_v44, %v1536_v49  ;;  %v8592_v57 = vsel %vm2707_vm15, 1.0, %v9775_v16 }
 0x164   : > { %5310 = vmatpush.msra.mxu1 %v5165_v55  ;;  %v8720_v61 = vsel %vm3225_vm0, 1.0, %v9775_v16  ;;  %v8849_v30 = vsel %vm3744_vm1, 1.0, %v9775_v16  ;;  %vm565_vm2 = vcmp.eq.s32.totalorder %v11099_v15, %v10018_v6  ;;  %vm1083_vm3 = vcmp.eq.s32.totalorder %v11099_v15, %v10020_v7 }
 0x165   : > { %v4064_v18 = vadd.f32 %v8785_v0, %v3545_v4  ;;  %v2572_v42 = vadd.f32 %v8463_v52, %v2054_v22  ;;  %vm4263_vm4 = vcmp.eq.s32.totalorder %v11083_v56, %v10151_v21  ;;  %vm4782_vm5 = vcmp.eq.s32.totalorder %v11083_v56, %v10166_v33 }
 0x166   : > { %v8008_v5 = vsel %vm565_vm2, 1.0, %v9775_v16  ;;  %v8137_v63 = vsel %vm1083_vm3, 1.0, %v9775_v16  ;;  %vm1601_vm6 = vcmp.eq.s32.totalorder %v11099_v15, %v10026_v10  ;;  %vm2119_vm7 = vcmp.eq.s32.totalorder %v11099_v15, %v10049_v23 }
 0x167   : > { %v4583_v51 = vadd.f32 %v8914_v34, %v4064_v18  ;;  %v3091_v43 = vadd.f32 %v8592_v57, %v2572_v42  ;;  %v1467_v0 = vadd.f32 %v8137_v63, %v8008_v5  ;;  %v8266_v44 = vsel %vm1601_vm6, 1.0, %v9775_v16 }
 0x168   : > { %v8394_v50 = vsel %vm2119_vm7, 1.0, %v9775_v16  ;;  %vm2638_vm8 = vcmp.eq.s32.totalorder %v11099_v15, %v10055_v26  ;;  %vm3156_vm9 = vcmp.eq.s32.totalorder %v11099_v15, %v10066_v31  ;;  %vm3675_vm10 = vcmp.eq.s32.totalorder %v11099_v15, %v10075_v35 }
 0x169   : > { %v5102_v49 = vadd.f32 %v9043_v60, %v4583_v51  ;;  %v3609_v55 = vadd.f32 %v8720_v61, %v3091_v43  ;;  %v8978_v34 = vsel %vm4263_vm4, 1.0, %v9775_v16  ;;  %v1985_v52 = vadd.f32 %v8266_v44, %v1467_v0 }
 0x16a   : > { %v9107_v4 = vsel %vm4782_vm5, 1.0, %v9775_v16  ;;  %v8523_v22 = vsel %vm2638_vm8, 1.0, %v9775_v16  ;;  %v8651_v57 = vsel %vm3156_vm9, 1.0, %v9775_v16  ;;  %v8780_v18 = vsel %vm3675_vm10, 1.0, %v9775_v16 }
 0x16b   : > { %5375 = vmatpush.msra.mxu2 %v5102_v49  ;;  %v4128_v60 = vadd.f32 %v8849_v30, %v3609_v55  ;;  %v2503_v61 = vadd.f32 %v8394_v50, %v1985_v52  ;;  %vm4194_vm11 = vcmp.eq.s32.totalorder %v11099_v15, %v10083_v39  ;;  %vm4713_vm12 = vcmp.eq.s32.totalorder %v11099_v15, %v10089_v41 }
 0x16c   : > { %vm629_vm13 = vcmp.eq.s32.totalorder %v11109_v38, %v10018_v6  ;;  %vm1147_vm14 = vcmp.eq.s32.totalorder %v11109_v38, %v10020_v7  ;;  %vm1665_vm15 = vcmp.eq.s32.totalorder %v11109_v38, %v10026_v10  ;;  %vm2183_vm0 = vcmp.eq.s32.totalorder %v11109_v38, %v10049_v23 }
 0x16d   : > { %v4647_v30 = vadd.f32 %v8978_v34, %v4128_v60  ;;  %v3022_v42 = vadd.f32 %v8523_v22, %v2503_v61  ;;  %v8072_v5 = vsel %vm629_vm13, 1.0, %v9775_v16  ;;  %v8201_v63 = vsel %vm1147_vm14, 1.0, %v9775_v16 }
 0x16e   : > { %v8909_v51 = vsel %vm4194_vm11, 1.0, %v9775_v16  ;;  %v1531_v43 = vadd.f32 %v8201_v63, %v8072_v5  ;;  %v8330_v0 = vsel %vm1665_vm15, 1.0, %v9775_v16  ;;  %vm2702_vm1 = vcmp.eq.s32.totalorder %v11109_v38, %v10055_v26 }
 0x16f   : > { %v5166_v44 = vadd.f32 %v9107_v4, %v4647_v30  ;;  %v3540_v50 = vadd.f32 %v8651_v57, %v3022_v42  ;;  %v8458_v49 = vsel %vm2183_vm0, 1.0, %v9775_v16  ;;  %vm3220_vm2 = vcmp.eq.s32.totalorder %v11109_v38, %v10066_v31 }
 0x170   : > { %v9038_v55 = vsel %vm4713_vm12, 1.0, %v9775_v16  ;;  %v2049_v34 = vadd.f32 %v8330_v0, %v1531_v43  ;;  %v8587_v52 = vsel %vm2702_vm1, 1.0, %v9775_v16  ;;  %vm3739_vm3 = vcmp.eq.s32.totalorder %v11109_v38, %v10075_v35 }
 0x171   : > { %5440 = vmatpush.msra.mxu3 %v5166_v44  ;;  %v4059_v22 = vadd.f32 %v8780_v18, %v3540_v50  ;;  %v8715_v4 = vsel %vm3220_vm2, 1.0, %v9775_v16  ;;  %v8844_v57 = vsel %vm3739_vm3, 1.0, %v9775_v16  ;;  %vm4258_vm4 = vcmp.eq.s32.totalorder %v11109_v38, %v10083_v39 }
 0x172   : > { %v2567_v60 = vadd.f32 %v8458_v49, %v2049_v34  ;;  %vm4777_vm5 = vcmp.eq.s32.totalorder %v11109_v38, %v10089_v41  ;;  %vm566_vm6 = vcmp.eq.s32.totalorder %v11099_v15, %v10028_v12  ;;  %vm1084_vm7 = vcmp.eq.s32.totalorder %v11099_v15, %v10030_v13 }
 0x173   : > { %v4578_v61 = vadd.f32 %v8909_v51, %v4059_v22  ;;  %v8009_v18 = vsel %vm566_vm6, 1.0, %v9775_v16  ;;  %v8138_v30 = vsel %vm1084_vm7, 1.0, %v9775_v16  ;;  %vm1602_vm8 = vcmp.eq.s32.totalorder %v11099_v15, %v10097_v45 }
 0x174   : > { %v3086_v42 = vadd.f32 %v8587_v52, %v2567_v60  ;;  %v1468_v5 = vadd.f32 %v8138_v30, %v8009_v18  ;;  %v8267_v63 = vsel %vm1602_vm8, 1.0, %v9775_v16  ;;  %vm2120_vm9 = vcmp.eq.s32.totalorder %v11099_v15, %v10132_v62 }
 0x175   : > { %v5097_v43 = vadd.f32 %v9038_v55, %v4578_v61  ;;  %v8395_v0 = vsel %vm2120_vm9, 1.0, %v9775_v16  ;;  %vm2639_vm10 = vcmp.eq.s32.totalorder %v11099_v15, %v10137_v8  ;;  %vm3157_vm11 = vcmp.eq.s32.totalorder %v11099_v15, %v10142_v17 }
 0x176   : > { %v3604_v51 = vadd.f32 %v8715_v4, %v3086_v42  ;;  %v8973_v44 = vsel %vm4258_vm4, 1.0, %v9775_v16  ;;  %v1986_v50 = vadd.f32 %v8267_v63, %v1468_v5  ;;  %v9102_v49 = vsel %vm4777_vm5, 1.0, %v9775_v16 }
 0x177   : > { %5246 = vmatpush.msra.mxu0 %v5097_v43  ;;  %v8524_v55 = vsel %vm2639_vm10, 1.0, %v9775_v16  ;;  %v8652_v34 = vsel %vm3157_vm11, 1.0, %v9775_v16  ;;  %vm630_vm12 = vcmp.eq.s32.totalorder %v11109_v38, %v10028_v12  ;;  %vm3676_vm13 = vcmp.eq.s32.totalorder %v11099_v15, %v10148_v20 }
 0x178   : > { %v4123_v52 = vadd.f32 %v8844_v57, %v3604_v51  ;;  %v2504_v22 = vadd.f32 %v8395_v0, %v1986_v50  ;;  %vm4195_vm14 = vcmp.eq.s32.totalorder %v11099_v15, %v10151_v21  ;;  %vm4714_vm15 = vcmp.eq.s32.totalorder %v11099_v15, %v10166_v33 }
 0x179   : > { %v8073_v4 = vsel %vm630_vm12, 1.0, %v9775_v16  ;;  %vm1148_vm0 = vcmp.eq.s32.totalorder %v11109_v38, %v10030_v13  ;;  %vm1666_vm1 = vcmp.eq.s32.totalorder %v11109_v38, %v10097_v45  ;;  %v8781_v30 = vsel %vm3676_vm13, 1.0, %v9775_v16 }
 0x17a   : > { %v4642_v60 = vadd.f32 %v8973_v44, %v4123_v52  ;;  %v3023_v57 = vadd.f32 %v8524_v55, %v2504_v22  ;;  %v8202_v61 = vsel %vm1148_vm0, 1.0, %v9775_v16  ;;  %v8331_v18 = vsel %vm1666_vm1, 1.0, %v9775_v16 }
 0x17b   : > { %v1532_v42 = vadd.f32 %v8202_v61, %v8073_v4  ;;  %vm2184_vm2 = vcmp.eq.s32.totalorder %v11109_v38, %v10132_v62  ;;  %vm2703_vm3 = vcmp.eq.s32.totalorder %v11109_v38, %v10137_v8  ;;  %vm3221_vm4 = vcmp.eq.s32.totalorder %v11109_v38, %v10142_v17 }
 0x17c   : > { %v5161_v5 = vadd.f32 %v9102_v49, %v4642_v60  ;;  %v3541_v63 = vadd.f32 %v8652_v34, %v3023_v57  ;;  %v8459_v43 = vsel %vm2184_vm2, 1.0, %v9775_v16  ;;  %v8910_v0 = vsel %vm4195_vm14, 1.0, %v9775_v16 }
 0x17d   : > { %v2050_v51 = vadd.f32 %v8331_v18, %v1532_v42  ;;  %vm3740_vm5 = vcmp.eq.s32.totalorder %v11109_v38, %v10148_v20  ;;  %vm4259_vm6 = vcmp.eq.s32.totalorder %v11109_v38, %v10151_v21  ;;  %v9039_v50 = vsel %vm4714_vm15, 1.0, %v9775_v16 }
 0x17e   : > { %5311 = vmatpush.msra.mxu1 %v5161_v5  ;;  %v4060_v44 = vadd.f32 %v8781_v30, %v3541_v63  ;;  %v8588_v49 = vsel %vm2703_vm3, 1.0, %v9775_v16  ;;  %vm4778_vm7 = vcmp.eq.s32.totalorder %v11109_v38, %v10166_v33  ;;  %v8716_v34 = vsel %vm3221_vm4, 1.0, %v9775_v16 }
 0x17f   : > { %v2568_v55 = vadd.f32 %v8459_v43, %v2050_v51  ;;  %v8845_v52 = vsel %vm3740_vm5, 1.0, %v9775_v16  ;;  %v11336_v22 = vadd.s32 40, %v10008_v1  ;;  %v8974_v60 = vsel %vm4259_vm6, 1.0, %v9775_v16 }
 0x180   : > { %v4579_v4 = vadd.f32 %v8910_v0, %v4060_v44  ;;  %v9103_v57 = vsel %vm4778_vm7, 1.0, %v9775_v16  ;;  %v11341_v61 = vadd.s32 168, %v10008_v1  ;;  %v11362_v44 = vadd.s32 32, %v10008_v1 }
 0x181   : > { %16652 = vst [vmem:[#allocation30_spill] sm:$0xff] %v11336_v22  ;;  %v3087_v18 = vadd.f32 %v8588_v49, %v2568_v55  ;;  %vm561_vm8 = vcmp.eq.s32.totalorder %v11336_v22, %v10018_v6  ;;  %vm1079_vm9 = vcmp.eq.s32.totalorder %v11336_v22, %v10020_v7  ;;  %vm1597_vm10 = vcmp.eq.s32.totalorder %v11336_v22, %v10026_v10 }
 0x182   : > { %16653 = vst [vmem:[#allocation31_spill] sm:$0xff] %v11341_v61  ;;  %v5098_v30 = vadd.f32 %v9039_v50, %v4579_v4  ;;  %v8004_v42 = vsel %vm561_vm8, 1.0, %v9775_v16  ;;  %v8133_v5 = vsel %vm1079_vm9, 1.0, %v9775_v16  ;;  %v8262_v63 = vsel %vm1597_vm10, 1.0, %v9775_v16 }
 0x183   : > { %v3605_v43 = vadd.f32 %v8716_v34, %v3087_v18  ;;  %v1463_v0 = vadd.f32 %v8133_v5, %v8004_v42  ;;  %vm2115_vm11 = vcmp.eq.s32.totalorder %v11336_v22, %v10049_v23  ;;  %vm2634_vm12 = vcmp.eq.s32.totalorder %v11336_v22, %v10055_v26  ;;  %16654 = vst [vmem:[#allocation32_spill] sm:$0xff] %v11362_v44 }
 0x184   : > { %5376 = vmatpush.msra.mxu2 %v5098_v30  ;;  %v8390_v51 = vsel %vm2115_vm11, 1.0, %v9775_v16  ;;  %vm3152_vm13 = vcmp.eq.s32.totalorder %v11336_v22, %v10066_v31  ;;  %vm3671_vm14 = vcmp.eq.s32.totalorder %v11336_v22, %v10075_v35  ;;  %v8519_v55 = vsel %vm2634_vm12, 1.0, %v9775_v16 }
 0x185   : > { %v4124_v50 = vadd.f32 %v8845_v52, %v3605_v43  ;;  %v1981_v49 = vadd.f32 %v8262_v63, %v1463_v0  ;;  %v11366_v34 = vadd.s32 160, %v10008_v1  ;;  %v8647_v4 = vsel %vm3152_vm13, 1.0, %v9775_v16 }
 0x186   : > { %v8776_v18 = vsel %vm3671_vm14, 1.0, %v9775_v16  ;;  %vm625_vm15 = vcmp.eq.s32.totalorder %v11341_v61, %v10018_v6  ;;  %vm1143_vm0 = vcmp.eq.s32.totalorder %v11341_v61, %v10020_v7  ;;  %vm4190_vm1 = vcmp.eq.s32.totalorder %v11336_v22, %v10083_v39 }
 0x187   : > { %16655 = vst [vmem:[#allocation33_spill] sm:$0xff] %v11366_v34  ;;  %v4643_v30 = vadd.f32 %v8974_v60, %v4124_v50  ;;  %v2499_v42 = vadd.f32 %v8390_v51, %v1981_v49  ;;  %vm4709_vm2 = vcmp.eq.s32.totalorder %v11336_v22, %v10089_v41  ;;  %v8068_v52 = vsel %vm625_vm15, 1.0, %v9775_v16 }
 0x188   : > { %v8197_v5 = vsel %vm1143_vm0, 1.0, %v9775_v16  ;;  %vm1661_vm3 = vcmp.eq.s32.totalorder %v11341_v61, %v10026_v10  ;;  %vm2179_vm4 = vcmp.eq.s32.totalorder %v11341_v61, %v10049_v23  ;;  %vm2698_vm5 = vcmp.eq.s32.totalorder %v11341_v61, %v10055_v26 }
 0x189   : > { %v5162_v63 = vadd.f32 %v9103_v57, %v4643_v30  ;;  %v3018_v43 = vadd.f32 %v8519_v55, %v2499_v42  ;;  %v1527_v60 = vadd.f32 %v8197_v5, %v8068_v52  ;;  %v8326_v0 = vsel %vm1661_vm3, 1.0, %v9775_v16 }
 0x18a   : > { %v8454_v51 = vsel %vm2179_vm4, 1.0, %v9775_v16  ;;  %vm3216_vm6 = vcmp.eq.s32.totalorder %v11341_v61, %v10066_v31  ;;  %vm3735_vm7 = vcmp.eq.s32.totalorder %v11341_v61, %v10075_v35  ;;  %v8905_v57 = vsel %vm4190_vm1, 1.0, %v9775_v16 }
 0x18b   : > { %5441 = vmatpush.msra.mxu3 %v5162_v63  ;;  %v3536_v50 = vadd.f32 %v8647_v4, %v3018_v43  ;;  %v9034_v49 = vsel %vm4709_vm2, 1.0, %v9775_v16  ;;  %v2045_v55 = vadd.f32 %v8326_v0, %v1527_v60  ;;  %v8583_v30 = vsel %vm2698_vm5, 1.0, %v9775_v16 }
 0x18c   : > { %v8711_v42 = vsel %vm3216_vm6, 1.0, %v9775_v16  ;;  %v8840_v52 = vsel %vm3735_vm7, 1.0, %v9775_v16  ;;  %vm562_vm8 = vcmp.eq.s32.totalorder %v11336_v22, %v10028_v12  ;;  %vm4254_vm9 = vcmp.eq.s32.totalorder %v11341_v61, %v10083_v39 }
 0x18d   : > { %v4055_v4 = vadd.f32 %v8776_v18, %v3536_v50  ;;  %v2563_v5 = vadd.f32 %v8454_v51, %v2045_v55  ;;  %vm4773_vm10 = vcmp.eq.s32.totalorder %v11341_v61, %v10089_v41  ;;  %v8005_v63 = vsel %vm562_vm8, 1.0, %v9775_v16 }
 0x18e   : > { %vm1080_vm11 = vcmp.eq.s32.totalorder %v11336_v22, %v10030_v13  ;;  %vm1598_vm12 = vcmp.eq.s32.totalorder %v11336_v22, %v10097_v45  ;;  %vm2116_vm13 = vcmp.eq.s32.totalorder %v11336_v22, %v10132_v62  ;;  %v8969_v51 = vsel %vm4254_vm9, 1.0, %v9775_v16 }
 0x18f   : > { %v4574_v43 = vadd.f32 %v8905_v57, %v4055_v4  ;;  %v3082_v18 = vadd.f32 %v8583_v30, %v2563_v5  ;;  %v8134_v60 = vsel %vm1080_vm11, 1.0, %v9775_v16  ;;  %v8263_v0 = vsel %vm1598_vm12, 1.0, %v9775_v16 }
 0x190   : > { %v1464_v50 = vadd.f32 %v8134_v60, %v8005_v63  ;;  %vm2635_vm14 = vcmp.eq.s32.totalorder %v11336_v22, %v10137_v8  ;;  %vm3153_vm15 = vcmp.eq.s32.totalorder %v11336_v22, %v10142_v17  ;;  %v9098_v15 = vsel %vm4773_vm10, 1.0, %v9775_v16 }
 0x191   : > { %v5093_v55 = vadd.f32 %v9034_v49, %v4574_v43  ;;  %v3600_v38 = vadd.f32 %v8711_v42, %v3082_v18  ;;  %v8391_v57 = vsel %vm2116_vm13, 1.0, %v9775_v16  ;;  %v8520_v4 = vsel %vm2635_vm14, 1.0, %v9775_v16 }
 0x192   : > { %v1982_v30 = vadd.f32 %v8263_v0, %v1464_v50  ;;  %v8648_v5 = vsel %vm3153_vm15, 1.0, %v9775_v16  ;;  %vm3672_vm0 = vcmp.eq.s32.totalorder %v11336_v22, %v10148_v20  ;;  %vm4191_vm1 = vcmp.eq.s32.totalorder %v11336_v22, %v10151_v21 }
 0x193   : > { %5247 = vmatpush.msra.mxu0 %v5093_v55  ;;  %v4119_v63 = vadd.f32 %v8840_v52, %v3600_v38  ;;  %v8777_v60 = vsel %vm3672_vm0, 1.0, %v9775_v16  ;;  %vm4710_vm2 = vcmp.eq.s32.totalorder %v11336_v22, %v10166_v33  ;;  %vm626_vm3 = vcmp.eq.s32.totalorder %v11341_v61, %v10028_v12 }
 0x194   : > { %v2500_v49 = vadd.f32 %v8391_v57, %v1982_v30  ;;  %vm1144_vm4 = vcmp.eq.s32.totalorder %v11341_v61, %v10030_v13  ;;  %vm1662_vm5 = vcmp.eq.s32.totalorder %v11341_v61, %v10097_v45  ;;  %v8069_v38 = vsel %vm626_vm3, 1.0, %v9775_v16 }
 0x195   : > { %v4638_v42 = vadd.f32 %v8969_v51, %v4119_v63  ;;  %v8198_v52 = vsel %vm1144_vm4, 1.0, %v9775_v16  ;;  %v8327_v43 = vsel %vm1662_vm5, 1.0, %v9775_v16  ;;  %vm2180_vm6 = vcmp.eq.s32.totalorder %v11341_v61, %v10132_v62 }
 0x196   : > { %v3019_v18 = vadd.f32 %v8520_v4, %v2500_v49  ;;  %v1528_v0 = vadd.f32 %v8198_v52, %v8069_v38  ;;  %vm2699_vm7 = vcmp.eq.s32.totalorder %v11341_v61, %v10137_v8  ;;  %v8906_v55 = vsel %vm4191_vm1, 1.0, %v9775_v16 }
 0x197   : > { %v5157_v50 = vadd.f32 %v9098_v15, %v4638_v42  ;;  %v8455_v57 = vsel %vm2180_vm6, 1.0, %v9775_v16  ;;  %vm3217_vm8 = vcmp.eq.s32.totalorder %v11341_v61, %v10142_v17  ;;  %v9035_v30 = vsel %vm4710_vm2, 1.0, %v9775_v16 }
 0x198   : > { %v3537_v51 = vadd.f32 %v8648_v5, %v3019_v18  ;;  %v2046_v4 = vadd.f32 %v8327_v43, %v1528_v0  ;;  %vm3736_vm9 = vcmp.eq.s32.totalorder %v11341_v61, %v10148_v20  ;;  %v8584_v15 = vsel %vm2699_vm7, 1.0, %v9775_v16 }
 0x199   : > { %5312 = vmatpush.msra.mxu1 %v5157_v50  ;;  %v8712_v63 = vsel %vm3217_vm8, 1.0, %v9775_v16  ;;  %v8841_v49 = vsel %vm3736_vm9, 1.0, %v9775_v16  ;;  %vm557_vm10 = vcmp.eq.s32.totalorder %v11362_v44, %v10018_v6  ;;  %vm4255_vm11 = vcmp.eq.s32.totalorder %v11341_v61, %v10151_v21 }
 0x19a   : > { %v4056_v5 = vadd.f32 %v8777_v60, %v3537_v51  ;;  %v2564_v42 = vadd.f32 %v8455_v57, %v2046_v4  ;;  %vm4774_vm12 = vcmp.eq.s32.totalorder %v11341_v61, %v10166_v33  ;;  %v8000_v38 = vsel %vm557_vm10, 1.0, %v9775_v16 }
 0x19b   : > { %vm1075_vm13 = vcmp.eq.s32.totalorder %v11362_v44, %v10020_v7  ;;  %vm1593_vm14 = vcmp.eq.s32.totalorder %v11362_v44, %v10026_v10  ;;  %vm2111_vm15 = vcmp.eq.s32.totalorder %v11362_v44, %v10049_v23  ;;  %v8970_v0 = vsel %vm4255_vm11, 1.0, %v9775_v16 }
 0x19c   : > { %v4575_v52 = vadd.f32 %v8906_v55, %v4056_v5  ;;  %v3083_v60 = vadd.f32 %v8584_v15, %v2564_v42  ;;  %v8129_v43 = vsel %vm1075_vm13, 1.0, %v9775_v16  ;;  %v8258_v18 = vsel %vm1593_vm14, 1.0, %v9775_v16 }
 0x19d   : > { %v1459_v50 = vadd.f32 %v8129_v43, %v8000_v38  ;;  %vm2630_vm0 = vcmp.eq.s32.totalorder %v11362_v44, %v10055_v26  ;;  %vm3148_vm1 = vcmp.eq.s32.totalorder %v11362_v44, %v10066_v31  ;;  %v9099_v4 = vsel %vm4774_vm12, 1.0, %v9775_v16 }
 0x19e   : > { %v5094_v57 = vadd.f32 %v9035_v30, %v4575_v52  ;;  %v3601_v51 = vadd.f32 %v8712_v63, %v3083_v60  ;;  %v8386_v55 = vsel %vm2111_vm15, 1.0, %v9775_v16  ;;  %v8515_v5 = vsel %vm2630_vm0, 1.0, %v9775_v16 }
 0x19f   : > { %v1977_v15 = vadd.f32 %v8258_v18, %v1459_v50  ;;  %v8643_v42 = vsel %vm3148_vm1, 1.0, %v9775_v16  ;;  %vm3667_vm2 = vcmp.eq.s32.totalorder %v11362_v44, %v10075_v35  ;;  %vm4186_vm3 = vcmp.eq.s32.totalorder %v11362_v44, %v10083_v39 }
 0x1a0   : > { %5377 = vmatpush.msra.mxu2 %v5094_v57  ;;  %v4120_v38 = vadd.f32 %v8841_v49, %v3601_v51  ;;  %v8772_v43 = vsel %vm3667_vm2, 1.0, %v9775_v16  ;;  %vm4705_vm4 = vcmp.eq.s32.totalorder %v11362_v44, %v10089_v41  ;;  %vm621_vm5 = vcmp.eq.s32.totalorder %v11366_v34, %v10018_v6 }
 0x1a1   : > { %v2495_v30 = vadd.f32 %v8386_v55, %v1977_v15  ;;  %vm1139_vm6 = vcmp.eq.s32.totalorder %v11366_v34, %v10020_v7  ;;  %vm1657_vm7 = vcmp.eq.s32.totalorder %v11366_v34, %v10026_v10  ;;  %v8064_v49 = vsel %vm621_vm5, 1.0, %v9775_v16 }
 0x1a2   : > { %v4639_v63 = vadd.f32 %v8970_v0, %v4120_v38  ;;  %v8193_v52 = vsel %vm1139_vm6, 1.0, %v9775_v16  ;;  %v8322_v60 = vsel %vm1657_vm7, 1.0, %v9775_v16  ;;  %vm2175_vm8 = vcmp.eq.s32.totalorder %v11366_v34, %v10049_v23 }
 0x1a3   : > { %v3014_v18 = vadd.f32 %v8515_v5, %v2495_v30  ;;  %v1523_v50 = vadd.f32 %v8193_v52, %v8064_v49  ;;  %vm2694_vm9 = vcmp.eq.s32.totalorder %v11366_v34, %v10055_v26  ;;  %v8901_v51 = vsel %vm4186_vm3, 1.0, %v9775_v16 }
 0x1a4   : > { %v5158_v57 = vadd.f32 %v9099_v4, %v4639_v63  ;;  %v8450_v55 = vsel %vm2175_vm8, 1.0, %v9775_v16  ;;  %vm3212_vm10 = vcmp.eq.s32.totalorder %v11366_v34, %v10066_v31  ;;  %v9030_v15 = vsel %vm4705_vm4, 1.0, %v9775_v16 }
 0x1a5   : > { %v3532_v0 = vadd.f32 %v8643_v42, %v3014_v18  ;;  %v2041_v5 = vadd.f32 %v8322_v60, %v1523_v50  ;;  %vm3731_vm11 = vcmp.eq.s32.totalorder %v11366_v34, %v10075_v35  ;;  %v8579_v4 = vsel %vm2694_vm9, 1.0, %v9775_v16 }
 0x1a6   : > { %5442 = vmatpush.msra.mxu3 %v5158_v57  ;;  %v8707_v38 = vsel %vm3212_vm10, 1.0, %v9775_v16  ;;  %v8836_v30 = vsel %vm3731_vm11, 1.0, %v9775_v16  ;;  %vm558_vm12 = vcmp.eq.s32.totalorder %v11362_v44, %v10028_v12  ;;  %vm4250_vm13 = vcmp.eq.s32.totalorder %v11366_v34, %v10083_v39 }
 0x1a7   : > { %v4051_v42 = vadd.f32 %v8772_v43, %v3532_v0  ;;  %v2559_v63 = vadd.f32 %v8450_v55, %v2041_v5  ;;  %vm4769_vm14 = vcmp.eq.s32.totalorder %v11366_v34, %v10089_v41  ;;  %v8001_v49 = vsel %vm558_vm12, 1.0, %v9775_v16 }
 0x1a8   : > { %vm1076_vm15 = vcmp.eq.s32.totalorder %v11362_v44, %v10030_v13  ;;  %vm1594_vm0 = vcmp.eq.s32.totalorder %v11362_v44, %v10097_v45  ;;  %vm2112_vm1 = vcmp.eq.s32.totalorder %v11362_v44, %v10132_v62  ;;  %v8965_v50 = vsel %vm4250_vm13, 1.0, %v9775_v16 }
 0x1a9   : > { %v4570_v52 = vadd.f32 %v8901_v51, %v4051_v42  ;;  %v3078_v43 = vadd.f32 %v8579_v4, %v2559_v63  ;;  %v8130_v60 = vsel %vm1076_vm15, 1.0, %v9775_v16  ;;  %v8259_v18 = vsel %vm1594_vm0, 1.0, %v9775_v16 }
 0x1aa   : > { %v1460_v57 = vadd.f32 %v8130_v60, %v8001_v49  ;;  %vm2631_vm2 = vcmp.eq.s32.totalorder %v11362_v44, %v10137_v8  ;;  %vm3149_vm3 = vcmp.eq.s32.totalorder %v11362_v44, %v10142_v17  ;;  %v9094_v5 = vsel %vm4769_vm14, 1.0, %v9775_v16 }
 0x1ab   : > { %v5089_v55 = vadd.f32 %v9030_v15, %v4570_v52  ;;  %v3596_v0 = vadd.f32 %v8707_v38, %v3078_v43  ;;  %v8387_v51 = vsel %vm2112_vm1, 1.0, %v9775_v16  ;;  %v8516_v42 = vsel %vm2631_vm2, 1.0, %v9775_v16 }
 0x1ac   : > { %v1978_v4 = vadd.f32 %v8259_v18, %v1460_v57  ;;  %v8644_v63 = vsel %vm3149_vm3, 1.0, %v9775_v16  ;;  %vm3668_vm4 = vcmp.eq.s32.totalorder %v11362_v44, %v10148_v20  ;;  %vm4187_vm5 = vcmp.eq.s32.totalorder %v11362_v44, %v10151_v21 }
 0x1ad   : > { %5248 = vmatpush.msra.mxu0 %v5089_v55  ;;  %v4115_v49 = vadd.f32 %v8836_v30, %v3596_v0  ;;  %v8773_v60 = vsel %vm3668_vm4, 1.0, %v9775_v16  ;;  %vm4706_vm6 = vcmp.eq.s32.totalorder %v11362_v44, %v10166_v33  ;;  %vm622_vm7 = vcmp.eq.s32.totalorder %v11366_v34, %v10028_v12 }
 0x1ae   : > { %v2496_v15 = vadd.f32 %v8387_v51, %v1978_v4  ;;  %vm1140_vm8 = vcmp.eq.s32.totalorder %v11366_v34, %v10030_v13  ;;  %vm1658_vm9 = vcmp.eq.s32.totalorder %v11366_v34, %v10097_v45  ;;  %v8065_v30 = vsel %vm622_vm7, 1.0, %v9775_v16 }
 0x1af   : > { %v4634_v38 = vadd.f32 %v8965_v50, %v4115_v49  ;;  %v8194_v52 = vsel %vm1140_vm8, 1.0, %v9775_v16  ;;  %v8323_v43 = vsel %vm1658_vm9, 1.0, %v9775_v16  ;;  %vm2176_vm10 = vcmp.eq.s32.totalorder %v11366_v34, %v10132_v62 }
 0x1b0   : > { %v3015_v18 = vadd.f32 %v8516_v42, %v2496_v15  ;;  %v1524_v57 = vadd.f32 %v8194_v52, %v8065_v30  ;;  %vm2695_vm11 = vcmp.eq.s32.totalorder %v11366_v34, %v10137_v8  ;;  %v8902_v0 = vsel %vm4187_vm5, 1.0, %v9775_v16 }
 0x1b1   : > { %v5153_v55 = vadd.f32 %v9094_v5, %v4634_v38  ;;  %v8451_v51 = vsel %vm2176_vm10, 1.0, %v9775_v16  ;;  %vm3213_vm12 = vcmp.eq.s32.totalorder %v11366_v34, %v10142_v17  ;;  %v9031_v4 = vsel %vm4706_vm6, 1.0, %v9775_v16 }
 0x1b2   : > { %v3533_v50 = vadd.f32 %v8644_v63, %v3015_v18  ;;  %v2042_v42 = vadd.f32 %v8323_v43, %v1524_v57  ;;  %vm3732_vm13 = vcmp.eq.s32.totalorder %v11366_v34, %v10148_v20  ;;  %v8580_v5 = vsel %vm2695_vm11, 1.0, %v9775_v16 }
 0x1b3   : > { %5313 = vmatpush.msra.mxu1 %v5153_v55  ;;  %v8708_v49 = vsel %vm3213_vm12, 1.0, %v9775_v16  ;;  %v8837_v15 = vsel %vm3732_vm13, 1.0, %v9775_v16  ;;  %v11575_v38 = vadd.s32 24, %v10008_v1  ;;  %vm4251_vm14 = vcmp.eq.s32.totalorder %v11366_v34, %v10151_v21 }
 0x1b4   : > { %v4052_v63 = vadd.f32 %v8773_v60, %v3533_v50  ;;  %v2560_v30 = vadd.f32 %v8451_v51, %v2042_v42  ;;  %vm4770_vm15 = vcmp.eq.s32.totalorder %v11366_v34, %v10166_v33  ;;  %v8966_v57 = vsel %vm4251_vm14, 1.0, %v9775_v16 }
 0x1b5   : > { %16656 = vst [vmem:[#allocation34_spill] sm:$0xff] %v11575_v38  ;;  %vm553_vm0 = vcmp.eq.s32.totalorder %v11575_v38, %v10018_v6  ;;  %vm1071_vm1 = vcmp.eq.s32.totalorder %v11575_v38, %v10020_v7  ;;  %vm1589_vm2 = vcmp.eq.s32.totalorder %v11575_v38, %v10026_v10  ;;  %vm2107_vm3 = vcmp.eq.s32.totalorder %v11575_v38, %v10049_v23 }
 0x1b6   : > { %v4571_v60 = vadd.f32 %v8902_v0, %v4052_v63  ;;  %v3079_v52 = vadd.f32 %v8580_v5, %v2560_v30  ;;  %v7996_v43 = vsel %vm553_vm0, 1.0, %v9775_v16  ;;  %v8125_v18 = vsel %vm1071_vm1, 1.0, %v9775_v16 }
 0x1b7   : > { %v1455_v55 = vadd.f32 %v8125_v18, %v7996_v43  ;;  %v8254_v51 = vsel %vm1589_vm2, 1.0, %v9775_v16  ;;  %vm2626_vm4 = vcmp.eq.s32.totalorder %v11575_v38, %v10055_v26  ;;  %v8382_v44 = vsel %vm2107_vm3, 1.0, %v9775_v16 }
 0x1b8   : > { %v5090_v50 = vadd.f32 %v9031_v4, %v4571_v60  ;;  %v3597_v42 = vadd.f32 %v8708_v49, %v3079_v52  ;;  %vm3144_vm5 = vcmp.eq.s32.totalorder %v11575_v38, %v10066_v31  ;;  %v9095_v0 = vsel %vm4770_vm15, 1.0, %v9775_v16 }
 0x1b9   : > { %v1973_v5 = vadd.f32 %v8254_v51, %v1455_v55  ;;  %vm3663_vm6 = vcmp.eq.s32.totalorder %v11575_v38, %v10075_v35  ;;  %vm4182_vm7 = vcmp.eq.s32.totalorder %v11575_v38, %v10083_v39  ;;  %v8511_v49 = vsel %vm2626_vm4, 1.0, %v9775_v16 }
 0x1ba   : > { %5378 = vmatpush.msra.mxu2 %v5090_v50  ;;  %v4116_v4 = vadd.f32 %v8837_v15, %v3597_v42  ;;  %v8639_v63 = vsel %vm3144_vm5, 1.0, %v9775_v16  ;;  %vm4701_vm8 = vcmp.eq.s32.totalorder %v11575_v38, %v10089_v41  ;;  %v8768_v60 = vsel %vm3663_vm6, 1.0, %v9775_v16 }
 0x1bb   : > { %v2491_v30 = vadd.f32 %v8382_v44, %v1973_v5  ;;  %v8897_v52 = vsel %vm4182_vm7, 1.0, %v9775_v16  ;;  %v11613_v43 = vadd.s32 152, %v10008_v1  ;;  %v9026_v55 = vsel %vm4701_vm8, 1.0, %v9775_v16 }
 0x1bc   : > { %v4635_v18 = vadd.f32 %v8966_v57, %v4116_v4  ;;  %vm554_vm9 = vcmp.eq.s32.totalorder %v11575_v38, %v10028_v12  ;;  %vm1072_vm10 = vcmp.eq.s32.totalorder %v11575_v38, %v10030_v13  ;;  %vm1590_vm2 = vcmp.eq.s32.totalorder %v11575_v38, %v10097_v45 }
 0x1bd   : > { %16657 = vst [vmem:[#allocation35_spill] sm:$0xff] %v11613_v43  ;;  %v3010_v15 = vadd.f32 %v8511_v49, %v2491_v30  ;;  %vm617_vm11 = vcmp.eq.s32.totalorder %v11613_v43, %v10018_v6  ;;  %vm1135_vm12 = vcmp.eq.s32.totalorder %v11613_v43, %v10020_v7  ;;  %vm1653_vm13 = vcmp.eq.s32.totalorder %v11613_v43, %v10026_v10 }
 0x1be   : > { %v5154_v44 = vadd.f32 %v9095_v0, %v4635_v18  ;;  %v8060_v57 = vsel %vm617_vm11, 1.0, %v9775_v16  ;;  %v8189_v51 = vsel %vm1135_vm12, 1.0, %v9775_v16  ;;  %v8318_v50 = vsel %vm1653_vm13, 1.0, %v9775_v16 }
 0x1bf   : > { %v3528_v42 = vadd.f32 %v8639_v63, %v3010_v15  ;;  %v1519_v5 = vadd.f32 %v8189_v51, %v8060_v57  ;;  %vm2171_vm14 = vcmp.eq.s32.totalorder %v11613_v43, %v10049_v23  ;;  %vm2690_vm15 = vcmp.eq.s32.totalorder %v11613_v43, %v10055_v26 }
 0x1c0   : > { %5443 = vmatpush.msra.mxu3 %v5154_v44  ;;  %v8446_v4 = vsel %vm2171_vm14, 1.0, %v9775_v16  ;;  %vm3208_vm0 = vcmp.eq.s32.totalorder %v11613_v43, %v10066_v31  ;;  %vm3727_vm1 = vcmp.eq.s32.totalorder %v11613_v43, %v10075_v35  ;;  %v8575_v63 = vsel %vm2690_vm15, 1.0, %v9775_v16 }
 0x1c1   : > { %v4047_v0 = vadd.f32 %v8768_v60, %v3528_v42  ;;  %v2037_v49 = vadd.f32 %v8318_v50, %v1519_v5  ;;  %v7997_v30 = vsel %vm554_vm9, 1.0, %v9775_v16  ;;  %v8703_v18 = vsel %vm3208_vm0, 1.0, %v9775_v16 }
 0x1c2   : > { %v8832_v15 = vsel %vm3727_vm1, 1.0, %v9775_v16  ;;  %vm4246_vm3 = vcmp.eq.s32.totalorder %v11613_v43, %v10083_v39  ;;  %v8126_v60 = vsel %vm1072_vm10, 1.0, %v9775_v16  ;;  %vm4765_vm4 = vcmp.eq.s32.totalorder %v11613_v43, %v10089_v41 }
 0x1c3   : > { %v4566_v44 = vadd.f32 %v8897_v52, %v4047_v0  ;;  %v2555_v57 = vadd.f32 %v8446_v4, %v2037_v49  ;;  %v8255_v51 = vsel %vm1590_vm2, 1.0, %v9775_v16  ;;  %v1456_v50 = vadd.f32 %v8126_v60, %v7997_v30 }
 0x1c4   : > { %vm2108_vm5 = vcmp.eq.s32.totalorder %v11575_v38, %v10132_v62  ;;  %vm2627_vm6 = vcmp.eq.s32.totalorder %v11575_v38, %v10137_v8  ;;  %vm3145_vm7 = vcmp.eq.s32.totalorder %v11575_v38, %v10142_v17  ;;  %v8961_v52 = vsel %vm4246_vm3, 1.0, %v9775_v16 }
 0x1c5   : > { %v5085_v42 = vadd.f32 %v9026_v55, %v4566_v44  ;;  %v3074_v5 = vadd.f32 %v8575_v63, %v2555_v57  ;;  %v8383_v4 = vsel %vm2108_vm5, 1.0, %v9775_v16  ;;  %v9090_v0 = vsel %vm4765_vm4, 1.0, %v9775_v16 }
 0x1c6   : > { %v1974_v49 = vadd.f32 %v8255_v51, %v1456_v50  ;;  %vm3664_vm8 = vcmp.eq.s32.totalorder %v11575_v38, %v10148_v20  ;;  %vm4183_vm9 = vcmp.eq.s32.totalorder %v11575_v38, %v10151_v21  ;;  %v8512_v60 = vsel %vm2627_vm6, 1.0, %v9775_v16 }
 0x1c7   : > { %5249 = vmatpush.msra.mxu0 %v5085_v42  ;;  %v3592_v30 = vadd.f32 %v8703_v18, %v3074_v5  ;;  %v8640_v55 = vsel %vm3145_vm7, 1.0, %v9775_v16  ;;  %v8769_v63 = vsel %vm3664_vm8, 1.0, %v9775_v16  ;;  %v8898_v57 = vsel %vm4183_vm9, 1.0, %v9775_v16 }
 0x1c8   : > { %v2492_v44 = vadd.f32 %v8383_v4, %v1974_v49  ;;  %vm618_vm10 = vcmp.eq.s32.totalorder %v11613_v43, %v10028_v12  ;;  %vm1136_vm11 = vcmp.eq.s32.totalorder %v11613_v43, %v10030_v13  ;;  %vm1654_vm12 = vcmp.eq.s32.totalorder %v11613_v43, %v10097_v45 }
 0x1c9   : > { %v4111_v51 = vadd.f32 %v8832_v15, %v3592_v30  ;;  %v8061_v50 = vsel %vm618_vm10, 1.0, %v9775_v16  ;;  %v8190_v18 = vsel %vm1136_vm11, 1.0, %v9775_v16  ;;  %v8319_v4 = vsel %vm1654_vm12, 1.0, %v9775_v16 }
 0x1ca   : > { %v3011_v42 = vadd.f32 %v8512_v60, %v2492_v44  ;;  %v1520_v5 = vadd.f32 %v8190_v18, %v8061_v50  ;;  %vm2172_vm13 = vcmp.eq.s32.totalorder %v11613_v43, %v10132_v62  ;;  %vm4702_vm14 = vcmp.eq.s32.totalorder %v11575_v38, %v10166_v33 }
 0x1cb   : > { %v4630_v49 = vadd.f32 %v8961_v52, %v4111_v51  ;;  %v8447_v15 = vsel %vm2172_vm13, 1.0, %v9775_v16  ;;  %vm2691_vm15 = vcmp.eq.s32.totalorder %v11613_v43, %v10137_v8  ;;  %vm3209_vm0 = vcmp.eq.s32.totalorder %v11613_v43, %v10142_v17 }
 0x1cc   : > { %v3529_v30 = vadd.f32 %v8640_v55, %v3011_v42  ;;  %v2038_v34 = vadd.f32 %v8319_v4, %v1520_v5  ;;  %v8576_v61 = vsel %vm2691_vm15, 1.0, %v9775_v16  ;;  %vm3728_vm1 = vcmp.eq.s32.totalorder %v11613_v43, %v10148_v20 }
 0x1cd   : > { %v5149_v60 = vadd.f32 %v9090_v0, %v4630_v49  ;;  %vm4247_vm2 = vcmp.eq.s32.totalorder %v11613_v43, %v10151_v21  ;;  %vm4766_vm3 = vcmp.eq.s32.totalorder %v11613_v43, %v10166_v33  ;;  %v9027_v44 = vsel %vm4702_vm14, 1.0, %v9775_v16 }
 0x1ce   : > { %v4048_v52 = vadd.f32 %v8769_v63, %v3529_v30  ;;  %v2556_v55 = vadd.f32 %v8447_v15, %v2038_v34  ;;  %v8704_v51 = vsel %vm3209_vm0, 1.0, %v9775_v16  ;;  %v8833_v50 = vsel %vm3728_vm1, 1.0, %v9775_v16 }
 0x1cf   : > { %5314 = vmatpush.msra.mxu1 %v5149_v60  ;;  %v8962_v0 = vsel %vm4247_vm2, 1.0, %v9775_v16  ;;  %v11703_v18 = vadd.s32 16, %v10008_v1  ;;  %v9091_v4 = vsel %vm4766_vm3, 1.0, %v9775_v16  ;;  %v11707_v49 = vadd.s32 144, %v10008_v1 }
 0x1d0   : > { %v4567_v42 = vadd.f32 %v8898_v57, %v4048_v52  ;;  %v3075_v5 = vadd.f32 %v8576_v61, %v2556_v55  ;;  %v11723_v60 = vadd.s32 8, %v10008_v1 }
 0x1d1   : > { %vm549_vm4 = vcmp.eq.s32.totalorder %v11703_v18, %v10018_v6  ;;  %vm1067_vm5 = vcmp.eq.s32.totalorder %v11703_v18, %v10020_v7  ;;  %vm1585_vm6 = vcmp.eq.s32.totalorder %v11703_v18, %v10026_v10  ;;  %vm2103_vm7 = vcmp.eq.s32.totalorder %v11703_v18, %v10049_v23 }
 0x1d2   : > { %v5086_v34 = vadd.f32 %v9027_v44, %v4567_v42  ;;  %v3593_v63 = vadd.f32 %v8704_v51, %v3075_v5  ;;  %v7992_v61 = vsel %vm549_vm4, 1.0, %v9775_v16  ;;  %v8121_v57 = vsel %vm1067_vm5, 1.0, %v9775_v16 }
 0x1d3   : > { %v1451_v15 = vadd.f32 %v8121_v57, %v7992_v61  ;;  %v8250_v30 = vsel %vm1585_vm6, 1.0, %v9775_v16  ;;  %vm2622_vm8 = vcmp.eq.s32.totalorder %v11703_v18, %v10055_v26  ;;  %v8378_v55 = vsel %vm2103_vm7, 1.0, %v9775_v16 }
 0x1d4   : > { %5379 = vmatpush.msra.mxu2 %v5086_v34  ;;  %v4112_v52 = vadd.f32 %v8833_v50, %v3593_v63  ;;  %vm3140_vm9 = vcmp.eq.s32.totalorder %v11703_v18, %v10066_v31  ;;  %vm3659_vm10 = vcmp.eq.s32.totalorder %v11703_v18, %v10075_v35  ;;  %v8507_v51 = vsel %vm2622_vm8, 1.0, %v9775_v16 }
 0x1d5   : > { %v1969_v44 = vadd.f32 %v8250_v30, %v1451_v15  ;;  %v8635_v42 = vsel %vm3140_vm9, 1.0, %v9775_v16  ;;  %v11733_v5 = vadd.s32 136, %v10008_v1  ;;  %v8764_v34 = vsel %vm3659_vm10, 1.0, %v9775_v16 }
 0x1d6   : > { %v4631_v61 = vadd.f32 %v8962_v0, %v4112_v52  ;;  %vm4178_vm11 = vcmp.eq.s32.totalorder %v11703_v18, %v10083_v39  ;;  %vm613_vm12 = vcmp.eq.s32.totalorder %v11707_v49, %v10018_v6  ;;  %vm4697_vm13 = vcmp.eq.s32.totalorder %v11703_v18, %v10089_v41 }
 0x1d7   : > { %v2487_v50 = vadd.f32 %v8378_v55, %v1969_v44  ;;  %v8056_v63 = vsel %vm613_vm12, 1.0, %v9775_v16  ;;  %vm1131_vm14 = vcmp.eq.s32.totalorder %v11707_v49, %v10020_v7  ;;  %vm1649_vm15 = vcmp.eq.s32.totalorder %v11707_v49, %v10026_v10 }
 0x1d8   : > { %v5150_v57 = vadd.f32 %v9091_v4, %v4631_v61  ;;  %v8185_v0 = vsel %vm1131_vm14, 1.0, %v9775_v16  ;;  %vm2167_vm0 = vcmp.eq.s32.totalorder %v11707_v49, %v10049_v23  ;;  %v8893_v30 = vsel %vm4178_vm11, 1.0, %v9775_v16 }
 0x1d9   : > { %v3006_v15 = vadd.f32 %v8507_v51, %v2487_v50  ;;  %v1515_v52 = vadd.f32 %v8185_v0, %v8056_v63  ;;  %v8314_v55 = vsel %vm1649_vm15, 1.0, %v9775_v16  ;;  %v8442_v44 = vsel %vm2167_vm0, 1.0, %v9775_v16 }
 0x1da   : > { %5444 = vmatpush.msra.mxu3 %v5150_v57  ;;  %vm2686_vm1 = vcmp.eq.s32.totalorder %v11707_v49, %v10055_v26  ;;  %vm3204_vm2 = vcmp.eq.s32.totalorder %v11707_v49, %v10066_v31  ;;  %vm3723_vm3 = vcmp.eq.s32.totalorder %v11707_v49, %v10075_v35  ;;  %v9022_v51 = vsel %vm4697_vm13, 1.0, %v9775_v16 }
 0x1db   : > { %v3524_v4 = vadd.f32 %v8635_v42, %v3006_v15  ;;  %v2033_v61 = vadd.f32 %v8314_v55, %v1515_v52  ;;  %vm4242_vm4 = vcmp.eq.s32.totalorder %v11707_v49, %v10083_v39  ;;  %v8571_v50 = vsel %vm2686_vm1, 1.0, %v9775_v16 }
 0x1dc   : > { %v8699_v63 = vsel %vm3204_vm2, 1.0, %v9775_v16  ;;  %v8828_v57 = vsel %vm3723_vm3, 1.0, %v9775_v16  ;;  %vm550_vm5 = vcmp.eq.s32.totalorder %v11703_v18, %v10028_v12  ;;  %vm4761_vm6 = vcmp.eq.s32.totalorder %v11707_v49, %v10089_v41 }
 0x1dd   : > { %v4043_v0 = vadd.f32 %v8764_v34, %v3524_v4  ;;  %v2551_v42 = vadd.f32 %v8442_v44, %v2033_v61  ;;  %v7993_v15 = vsel %vm550_vm5, 1.0, %v9775_v16  ;;  %vm1068_vm7 = vcmp.eq.s32.totalorder %v11703_v18, %v10030_v13 }
 0x1de   : > { %vm1586_vm8 = vcmp.eq.s32.totalorder %v11703_v18, %v10097_v45  ;;  %vm2104_vm9 = vcmp.eq.s32.totalorder %v11703_v18, %v10132_v62  ;;  %vm2623_vm10 = vcmp.eq.s32.totalorder %v11703_v18, %v10137_v8  ;;  %v8122_v55 = vsel %vm1068_vm7, 1.0, %v9775_v16 }
 0x1df   : > { %v4562_v52 = vadd.f32 %v8893_v30, %v4043_v0  ;;  %v3070_v34 = vadd.f32 %v8571_v50, %v2551_v42  ;;  %v8251_v44 = vsel %vm1586_vm8, 1.0, %v9775_v16  ;;  %v8957_v4 = vsel %vm4242_vm4, 1.0, %v9775_v16 }
 0x1e0   : > { %v9086_v61 = vsel %vm4761_vm6, 1.0, %v9775_v16  ;;  %v1452_v43 = vadd.f32 %v8122_v55, %v7993_v15  ;;  %vm3141_vm11 = vcmp.eq.s32.totalorder %v11703_v18, %v10142_v17  ;;  %v8379_v30 = vsel %vm2104_vm9, 1.0, %v9775_v16 }
 0x1e1   : > { %v5081_v38 = vadd.f32 %v9022_v51, %v4562_v52  ;;  %v3588_v22 = vadd.f32 %v8699_v63, %v3070_v34  ;;  %vm3660_vm12 = vcmp.eq.s32.totalorder %v11703_v18, %v10148_v20  ;;  %v8508_v0 = vsel %vm2623_vm10, 1.0, %v9775_v16 }
 0x1e2   : > { %v1970_v50 = vadd.f32 %v8251_v44, %v1452_v43  ;;  %v8636_v42 = vsel %vm3141_vm11, 1.0, %v9775_v16  ;;  %v8765_v56 = vsel %vm3660_vm12, 1.0, %v9775_v16  ;;  %vm4179_vm13 = vcmp.eq.s32.totalorder %v11703_v18, %v10151_v21 }
 0x1e3   : > { %5250 = vmatpush.msra.mxu0 %v5081_v38  ;;  %v4107_v46 = vadd.f32 %v8828_v57, %v3588_v22  ;;  %vm4698_vm14 = vcmp.eq.s32.totalorder %v11703_v18, %v10166_v33  ;;  %vm614_vm15 = vcmp.eq.s32.totalorder %v11707_v49, %v10028_v12  ;;  %vm1132_vm0 = vcmp.eq.s32.totalorder %v11707_v49, %v10030_v13 }
 0x1e4   : > { %v2488_v51 = vadd.f32 %v8379_v30, %v1970_v50  ;;  %v8057_v43 = vsel %vm614_vm15, 1.0, %v9775_v16  ;;  %vm1650_vm1 = vcmp.eq.s32.totalorder %v11707_v49, %v10097_v45  ;;  %v8186_v22 = vsel %vm1132_vm0, 1.0, %v9775_v16 }
 0x1e5   : > { %v4626_v38 = vadd.f32 %v8957_v4, %v4107_v46  ;;  %v8315_v63 = vsel %vm1650_vm1, 1.0, %v9775_v16  ;;  %vm2168_vm2 = vcmp.eq.s32.totalorder %v11707_v49, %v10132_v62  ;;  %v8894_v15 = vsel %vm4179_vm13, 1.0, %v9775_v16 }
 0x1e6   : > { %v3007_v57 = vadd.f32 %v8508_v0, %v2488_v51  ;;  %v1516_v52 = vadd.f32 %v8186_v22, %v8057_v43  ;;  %vm2687_vm3 = vcmp.eq.s32.totalorder %v11707_v49, %v10137_v8  ;;  %v8443_v55 = vsel %vm2168_vm2, 1.0, %v9775_v16 }
 0x1e7   : > { %v5145_v34 = vadd.f32 %v9086_v61, %v4626_v38  ;;  %vm3205_vm4 = vcmp.eq.s32.totalorder %v11707_v49, %v10142_v17  ;;  %vm3724_vm5 = vcmp.eq.s32.totalorder %v11707_v49, %v10148_v20  ;;  %v9023_v44 = vsel %vm4698_vm14, 1.0, %v9775_v16 }
 0x1e8   : > { %v3525_v46 = vadd.f32 %v8636_v42, %v3007_v57  ;;  %v2034_v4 = vadd.f32 %v8315_v63, %v1516_v52  ;;  %v8572_v30 = vsel %vm2687_vm3, 1.0, %v9775_v16  ;;  %v8700_v61 = vsel %vm3205_vm4, 1.0, %v9775_v16 }
 0x1e9   : > { %5315 = vmatpush.msra.mxu1 %v5145_v34  ;;  %v8829_v50 = vsel %vm3724_vm5, 1.0, %v9775_v16  ;;  %vm545_vm6 = vcmp.eq.s32.totalorder %v11723_v60, %v10018_v6  ;;  %vm1063_vm7 = vcmp.eq.s32.totalorder %v11723_v60, %v10020_v7  ;;  %vm4243_vm8 = vcmp.eq.s32.totalorder %v11707_v49, %v10151_v21 }
 0x1ea   : > { %v4044_v0 = vadd.f32 %v8765_v56, %v3525_v46  ;;  %v2552_v42 = vadd.f32 %v8443_v55, %v2034_v4  ;;  %vm4762_vm9 = vcmp.eq.s32.totalorder %v11707_v49, %v10166_v33  ;;  %v7988_v51 = vsel %vm545_vm6, 1.0, %v9775_v16 }
 0x1eb   : > { %v8117_v43 = vsel %vm1063_vm7, 1.0, %v9775_v16  ;;  %vm1581_vm10 = vcmp.eq.s32.totalorder %v11723_v60, %v10026_v10  ;;  %vm2099_vm11 = vcmp.eq.s32.totalorder %v11723_v60, %v10049_v23  ;;  %vm2618_vm12 = vcmp.eq.s32.totalorder %v11723_v60, %v10055_v26 }
 0x1ec   : > { %v4563_v38 = vadd.f32 %v8894_v15, %v4044_v0  ;;  %v3071_v22 = vadd.f32 %v8572_v30, %v2552_v42  ;;  %v1447_v56 = vadd.f32 %v8117_v43, %v7988_v51  ;;  %v8246_v63 = vsel %vm1581_vm10, 1.0, %v9775_v16 }
 0x1ed   : > { %v8374_v57 = vsel %vm2099_vm11, 1.0, %v9775_v16  ;;  %vm3136_vm13 = vcmp.eq.s32.totalorder %v11723_v60, %v10066_v31  ;;  %vm3655_vm14 = vcmp.eq.s32.totalorder %v11723_v60, %v10075_v35  ;;  %v8958_v15 = vsel %vm4243_vm8, 1.0, %v9775_v16 }
 0x1ee   : > { %v5082_v52 = vadd.f32 %v9023_v44, %v4563_v38  ;;  %v3589_v34 = vadd.f32 %v8700_v61, %v3071_v22  ;;  %v1965_v55 = vadd.f32 %v8246_v63, %v1447_v56  ;;  %v9087_v46 = vsel %vm4762_vm9, 1.0, %v9775_v16 }
 0x1ef   : > { %v8503_v4 = vsel %vm2618_vm12, 1.0, %v9775_v16  ;;  %v8631_v30 = vsel %vm3136_vm13, 1.0, %v9775_v16  ;;  %v8760_v0 = vsel %vm3655_vm14, 1.0, %v9775_v16  ;;  %vm4174_vm15 = vcmp.eq.s32.totalorder %v11723_v60, %v10083_v39 }
 0x1f0   : > { %5380 = vmatpush.msra.mxu2 %v5082_v52  ;;  %v4108_v44 = vadd.f32 %v8829_v50, %v3589_v34  ;;  %v2483_v61 = vadd.f32 %v8374_v57, %v1965_v55  ;;  %vm4693_vm0 = vcmp.eq.s32.totalorder %v11723_v60, %v10089_v41  ;;  %vm609_vm1 = vcmp.eq.s32.totalorder %v11733_v5, %v10018_v6 }
 0x1f1   : > { %vm1127_vm2 = vcmp.eq.s32.totalorder %v11733_v5, %v10020_v7  ;;  %vm1645_vm3 = vcmp.eq.s32.totalorder %v11733_v5, %v10026_v10  ;;  %vm2163_vm4 = vcmp.eq.s32.totalorder %v11733_v5, %v10049_v23  ;;  %v8052_v51 = vsel %vm609_vm1, 1.0, %v9775_v16 }
 0x1f2   : > { %v4627_v50 = vadd.f32 %v8958_v15, %v4108_v44  ;;  %v3002_v42 = vadd.f32 %v8503_v4, %v2483_v61  ;;  %v8181_v43 = vsel %vm1127_vm2, 1.0, %v9775_v16  ;;  %v8889_v38 = vsel %vm4174_vm15, 1.0, %v9775_v16 }
 0x1f3   : > { %v1511_v22 = vadd.f32 %v8181_v43, %v8052_v51  ;;  %v8310_v56 = vsel %vm1645_vm3, 1.0, %v9775_v16  ;;  %vm2682_vm5 = vcmp.eq.s32.totalorder %v11733_v5, %v10055_v26  ;;  %v8438_v52 = vsel %vm2163_vm4, 1.0, %v9775_v16 }
 0x1f4   : > { %v5146_v63 = vadd.f32 %v9087_v46, %v4627_v50  ;;  %v3520_v57 = vadd.f32 %v8631_v30, %v3002_v42  ;;  %vm3200_vm6 = vcmp.eq.s32.totalorder %v11733_v5, %v10066_v31  ;;  %v9018_v34 = vsel %vm4693_vm0, 1.0, %v9775_v16 }
 0x1f5   : > { %v2029_v15 = vadd.f32 %v8310_v56, %v1511_v22  ;;  %v8567_v55 = vsel %vm2682_vm5, 1.0, %v9775_v16  ;;  %vm3719_vm7 = vcmp.eq.s32.totalorder %v11733_v5, %v10075_v35  ;;  %v8695_v46 = vsel %vm3200_vm6, 1.0, %v9775_v16 }
 0x1f6   : > { %5445 = vmatpush.msra.mxu3 %v5146_v63  ;;  %v4039_v4 = vadd.f32 %v8760_v0, %v3520_v57  ;;  %v8824_v30 = vsel %vm3719_vm7, 1.0, %v9775_v16  ;;  %vm4238_vm8 = vcmp.eq.s32.totalorder %v11733_v5, %v10083_v39  ;;  %vm4757_vm9 = vcmp.eq.s32.totalorder %v11733_v5, %v10089_v41 }
 0x1f7   : > { %v2547_v44 = vadd.f32 %v8438_v52, %v2029_v15  ;;  %vm546_vm10 = vcmp.eq.s32.totalorder %v11723_v60, %v10028_v12  ;;  %vm1064_vm11 = vcmp.eq.s32.totalorder %v11723_v60, %v10030_v13  ;;  %vm1582_vm12 = vcmp.eq.s32.totalorder %v11723_v60, %v10097_v45 }
 0x1f8   : > { %v4558_v61 = vadd.f32 %v8889_v38, %v4039_v4  ;;  %v7989_v0 = vsel %vm546_vm10, 1.0, %v9775_v16  ;;  %v8118_v50 = vsel %vm1064_vm11, 1.0, %v9775_v16  ;;  %v8247_v43 = vsel %vm1582_vm12, 1.0, %v9775_v16 }
 0x1f9   : > { %v3066_v42 = vadd.f32 %v8567_v55, %v2547_v44  ;;  %v1448_v51 = vadd.f32 %v8118_v50, %v7989_v0  ;;  %vm2100_vm13 = vcmp.eq.s32.totalorder %v11723_v60, %v10132_v62  ;;  %vm2619_vm14 = vcmp.eq.s32.totalorder %v11723_v60, %v10137_v8 }
 0x1fa   : > { %v5077_v22 = vadd.f32 %v9018_v34, %v4558_v61  ;;  %v8375_v56 = vsel %vm2100_vm13, 1.0, %v9775_v16  ;;  %vm3137_vm15 = vcmp.eq.s32.totalorder %v11723_v60, %v10142_v17  ;;  %v8953_v63 = vsel %vm4238_vm8, 1.0, %v9775_v16 }
 0x1fb   : > { %v3584_v38 = vadd.f32 %v8695_v46, %v3066_v42  ;;  %v9082_v57 = vsel %vm4757_vm9, 1.0, %v9775_v16  ;;  %v1966_v52 = vadd.f32 %v8247_v43, %v1448_v51  ;;  %v8504_v34 = vsel %vm2619_vm14, 1.0, %v9775_v16 }
 0x1fc   : > { %5251 = vmatpush.msra.mxu0 %v5077_v22  ;;  %v8632_v15 = vsel %vm3137_vm15, 1.0, %v9775_v16  ;;  %vm3656_vm0 = vcmp.eq.s32.totalorder %v11723_v60, %v10148_v20  ;;  %vm610_vm1 = vcmp.eq.s32.totalorder %v11733_v5, %v10028_v12  ;;  %vm4175_vm2 = vcmp.eq.s32.totalorder %v11723_v60, %v10151_v21 }
 0x1fd   : > { %v4103_v55 = vadd.f32 %v8824_v30, %v3584_v38  ;;  %v2484_v4 = vadd.f32 %v8375_v56, %v1966_v52  ;;  %vm4694_vm3 = vcmp.eq.s32.totalorder %v11723_v60, %v10166_v33  ;;  %v8761_v46 = vsel %vm3656_vm0, 1.0, %v9775_v16 }
 0x1fe   : > { %v8053_v44 = vsel %vm610_vm1, 1.0, %v9775_v16  ;;  %vm1128_vm4 = vcmp.eq.s32.totalorder %v11733_v5, %v10030_v13  ;;  %vm1646_vm5 = vcmp.eq.s32.totalorder %v11733_v5, %v10097_v45  ;;  %vm2164_vm6 = vcmp.eq.s32.totalorder %v11733_v5, %v10132_v62 }
 0x1ff   : > { %v4622_v61 = vadd.f32 %v8953_v63, %v4103_v55  ;;  %v3003_v0 = vadd.f32 %v8504_v34, %v2484_v4  ;;  %v8182_v30 = vsel %vm1128_vm4, 1.0, %v9775_v16  ;;  %v8311_v50 = vsel %vm1646_vm5, 1.0, %v9775_v16 }
 0x200   : > { %v1512_v42 = vadd.f32 %v8182_v30, %v8053_v44  ;;  %vm2683_vm7 = vcmp.eq.s32.totalorder %v11733_v5, %v10137_v8  ;;  %vm3201_vm8 = vcmp.eq.s32.totalorder %v11733_v5, %v10142_v17  ;;  %v8890_v22 = vsel %vm4175_vm2, 1.0, %v9775_v16 }
 0x201   : > { %v5141_v51 = vadd.f32 %v9082_v57, %v4622_v61  ;;  %v3521_v43 = vadd.f32 %v8632_v15, %v3003_v0  ;;  %v8439_v56 = vsel %vm2164_vm6, 1.0, %v9775_v16  ;;  %v9019_v38 = vsel %vm4694_vm3, 1.0, %v9775_v16 }
 0x202   : > { %v2030_v63 = vadd.f32 %v8311_v50, %v1512_v42  ;;  %v8568_v52 = vsel %vm2683_vm7, 1.0, %v9775_v16  ;;  %vm3720_vm9 = vcmp.eq.s32.totalorder %v11733_v5, %v10148_v20  ;;  %v8696_v34 = vsel %vm3201_vm8, 1.0, %v9775_v16 }
 0x203   : > { %5316 = vmatpush.msra.mxu1 %v5141_v51  ;;  %v4040_v57 = vadd.f32 %v8761_v46, %v3521_v43  ;;  %v8825_v15 = vsel %vm3720_vm9, 1.0, %v9775_v16  ;;  %vm4239_vm10 = vcmp.eq.s32.totalorder %v11733_v5, %v10151_v21  ;;  %vm4758_vm11 = vcmp.eq.s32.totalorder %v11733_v5, %v10166_v33 }
 0x204   : > { %v2548_v55 = vadd.f32 %v8439_v56, %v2030_v63  ;;  %vm541_vm12 = vcmp.eq.s32.totalorder %v10008_v1, %v10018_v6  ;;  %vm1059_vm13 = vcmp.eq.s32.totalorder %v10008_v1, %v10020_v7  ;;  %vm1577_vm14 = vcmp.eq.s32.totalorder %v10008_v1, %v10026_v10 }
 0x205   : > { %v4559_v4 = vadd.f32 %v8890_v22, %v4040_v57  ;;  %v7984_v46 = vsel %vm541_vm12, 1.0, %v9775_v16  ;;  %v8113_v44 = vsel %vm1059_vm13, 1.0, %v9775_v16  ;;  %v8242_v30 = vsel %vm1577_vm14, 1.0, %v9775_v16 }
 0x206   : > { %v3067_v61 = vadd.f32 %v8568_v52, %v2548_v55  ;;  %v1443_v0 = vadd.f32 %v8113_v44, %v7984_v46  ;;  %vm2095_vm15 = vcmp.eq.s32.totalorder %v10008_v1, %v10049_v23  ;;  %vm2614_vm0 = vcmp.eq.s32.totalorder %v10008_v1, %v10055_v26 }
 0x207   : > { %v5078_v50 = vadd.f32 %v9019_v38, %v4559_v4  ;;  %v8370_v42 = vsel %vm2095_vm15, 1.0, %v9775_v16  ;;  %vm3132_vm1 = vcmp.eq.s32.totalorder %v10008_v1, %v10066_v31  ;;  %v8954_v43 = vsel %vm4239_vm10, 1.0, %v9775_v16 }
 0x208   : > { %v3585_v51 = vadd.f32 %v8696_v34, %v3067_v61  ;;  %v9083_v22 = vsel %vm4758_vm11, 1.0, %v9775_v16  ;;  %v1961_v56 = vadd.f32 %v8242_v30, %v1443_v0  ;;  %v8499_v38 = vsel %vm2614_vm0, 1.0, %v9775_v16 }
 0x209   : > { %5381 = vmatpush.msra.mxu2 %v5078_v50  ;;  %v8627_v63 = vsel %vm3132_vm1, 1.0, %v9775_v16  ;;  %vm3651_vm2 = vcmp.eq.s32.totalorder %v10008_v1, %v10075_v35  ;;  %v11988_v52 = vadd.s32 128, %v10008_v1  ;;  %vm4170_vm3 = vcmp.eq.s32.totalorder %v10008_v1, %v10083_v39 }
 0x20a   : > { %v4104_v57 = vadd.f32 %v8825_v15, %v3585_v51  ;;  %v2479_v34 = vadd.f32 %v8370_v42, %v1961_v56  ;;  %vm4689_vm4 = vcmp.eq.s32.totalorder %v10008_v1, %v10089_v41  ;;  %v8756_v55 = vsel %vm3651_vm2, 1.0, %v9775_v16 }
 0x20b   : > { %vm605_vm5 = vcmp.eq.s32.totalorder %v11988_v52, %v10018_v6  ;;  %vm1123_vm6 = vcmp.eq.s32.totalorder %v11988_v52, %v10020_v7  ;;  %vm1641_vm7 = vcmp.eq.s32.totalorder %v11988_v52, %v10026_v10  ;;  %vm2159_vm8 = vcmp.eq.s32.totalorder %v11988_v52, %v10049_v23 }
 0x20c   : > { %v4623_v4 = vadd.f32 %v8954_v43, %v4104_v57  ;;  %v2998_v15 = vadd.f32 %v8499_v38, %v2479_v34  ;;  %v8048_v46 = vsel %vm605_vm5, 1.0, %v9775_v16  ;;  %v8177_v44 = vsel %vm1123_vm6, 1.0, %v9775_v16 }
 0x20d   : > { %v1507_v61 = vadd.f32 %v8177_v44, %v8048_v46  ;;  %v8306_v0 = vsel %vm1641_vm7, 1.0, %v9775_v16  ;;  %vm2678_vm9 = vcmp.eq.s32.totalorder %v11988_v52, %v10055_v26  ;;  %v8885_v10 = vsel %vm4170_vm3, 1.0, %v9775_v16 }
 0x20e   : > { %v5142_v6 = vadd.f32 %v9083_v22, %v4623_v4  ;;  %v3516_v7 = vadd.f32 %v8627_v63, %v2998_v15  ;;  %v8434_v30 = vsel %vm2159_vm8, 1.0, %v9775_v16  ;;  %v9014_v50 = vsel %vm4689_vm4, 1.0, %v9775_v16  ;;  %v5201_v4 = vld [vmem:[#allocation8] sm:$0xff] }
 0x20f   : > { %v2025_v42 = vadd.f32 %v8306_v0, %v1507_v61  ;;  %vm3196_vm10 = vcmp.eq.s32.totalorder %v11988_v52, %v10066_v31  ;;  %vm3715_vm11 = vcmp.eq.s32.totalorder %v11988_v52, %v10075_v35  ;;  %v8563_v26 = vsel %vm2678_vm9, 1.0, %v9775_v16 }
 0x210   : > { %5446 = vmatpush.msra.mxu3 %v5142_v6  ;;  %v4035_v23 = vadd.f32 %v8756_v55, %v3516_v7  ;;  %v8691_v51 = vsel %vm3196_vm10, 1.0, %v9775_v16  ;;  %vm4234_vm12 = vcmp.eq.s32.totalorder %v11988_v52, %v10083_v39  ;;  %v8820_v22 = vsel %vm3715_vm11, 1.0, %v9775_v16 }
 0x211   : > { %v2543_v43 = vadd.f32 %v8434_v30, %v2025_v42  ;;  %vm542_vm13 = vcmp.eq.s32.totalorder %v10008_v1, %v10028_v12  ;;  %vm1060_vm14 = vcmp.eq.s32.totalorder %v10008_v1, %v10030_v13  ;;  %vm4753_vm15 = vcmp.eq.s32.totalorder %v11988_v52, %v10089_v41 }
 0x212   : > { %v4554_v31 = vadd.f32 %v8885_v10, %v4035_v23  ;;  %v7985_v35 = vsel %vm542_vm13, 1.0, %v9775_v16  ;;  %v8114_v56 = vsel %vm1060_vm14, 1.0, %v9775_v16  ;;  %vm1578_vm0 = vcmp.eq.s32.totalorder %v10008_v1, %v10097_v45 }
 0x213   : > { %v3062_v38 = vadd.f32 %v8563_v26, %v2543_v43  ;;  %v1444_v63 = vadd.f32 %v8114_v56, %v7985_v35  ;;  %vm2096_vm1 = vcmp.eq.s32.totalorder %v10008_v1, %v10132_v62  ;;  %v8243_v34 = vsel %vm1578_vm0, 1.0, %v9775_v16 }
 0x214   : > { %v5073_v57 = vadd.f32 %v9014_v50, %v4554_v31  ;;  %v8371_v55 = vsel %vm2096_vm1, 1.0, %v9775_v16  ;;  %vm2615_vm2 = vcmp.eq.s32.totalorder %v10008_v1, %v10137_v8  ;;  %vm3133_vm3 = vcmp.eq.s32.totalorder %v10008_v1, %v10142_v17 }
 0x215   : > { %v3580_v15 = vadd.f32 %v8691_v51, %v3062_v38  ;;  %v1962_v46 = vadd.f32 %v8243_v34, %v1444_v63  ;;  %v8949_v44 = vsel %vm4234_vm12, 1.0, %v9775_v16  ;;  %v9078_v61 = vsel %vm4753_vm15, 1.0, %v9775_v16  ;;  %v5202_v51 = vld [vmem:[#allocation8 + $0x8] sm:$0xff] }
 0x216   : > { %5252 = vmatpush.msra.mxu0 %v5073_v57  ;;  %v8500_v0 = vsel %vm2615_vm2, 1.0, %v9775_v16  ;;  %vm3652_vm4 = vcmp.eq.s32.totalorder %v10008_v1, %v10148_v20  ;;  %v8628_v10 = vsel %vm3133_vm3, 1.0, %v9775_v16  ;;  %vm4171_vm5 = vcmp.eq.s32.totalorder %v10008_v1, %v10151_v21 }
 0x217   : > { %v4099_v6 = vadd.f32 %v8820_v22, %v3580_v15  ;;  %v2480_v7 = vadd.f32 %v8371_v55, %v1962_v46  ;;  %5253 = vmatmul.f32.vlgmr.msra.gmra.mxu0 %v5201_v4  ;;  %v8757_v39 = vsel %vm3652_vm4, 1.0, %v9775_v16  ;;  %vm606_vm6 = vcmp.eq.s32.totalorder %v11988_v52, %v10028_v12 }
 0x218   : > { %vm1124_vm7 = vcmp.eq.s32.totalorder %v11988_v52, %v10030_v13  ;;  %vm1642_vm8 = vcmp.eq.s32.totalorder %v11988_v52, %v10097_v45  ;;  %v8049_v50 = vsel %vm606_vm6, 1.0, %v9775_v16  ;;  %vm2160_vm9 = vcmp.eq.s32.totalorder %v11988_v52, %v10132_v62  ;;  %v5203_v62 = vld [vmem:[#allocation8 + $0x10] sm:$0xff] }
 0x219   : > { %v4618_v41 = vadd.f32 %v8949_v44, %v4099_v6  ;;  %v2999_v30 = vadd.f32 %v8500_v0, %v2480_v7  ;;  %v8178_v42 = vsel %vm1124_vm7, 1.0, %v9775_v16  ;;  %v8307_v26 = vsel %vm1642_vm8, 1.0, %v9775_v16  ;;  %v5205_v44 = vld [vmem:[#allocation8 + $0x20] sm:$0xff]  ;;  %v5206_v6 = vld [vmem:[#allocation8 + $0x28] sm:$0xff]  ;;  %v5207_v7 = vld [vmem:[#allocation8 + $0x30] sm:$0xff] }
 0x21a   : > { %v1508_v23 = vadd.f32 %v8178_v42, %v8049_v50  ;;  %vm2679_vm10 = vcmp.eq.s32.totalorder %v11988_v52, %v10137_v8  ;;  %vm4690_vm11 = vcmp.eq.s32.totalorder %v10008_v1, %v10166_v33  ;;  %v8435_v45 = vsel %vm2160_vm9, 1.0, %v9775_v16  ;;  %v5214_v50 = vld [vmem:[#allocation8 + $0x68] sm:$0xff]  ;;  %v5215_v42 = vld [vmem:[#allocation8 + $0x70] sm:$0xff] }
 0x21b   : > { %v5137_v12 = vadd.f32 %v9078_v61, %v4618_v41  ;;  %v3517_v13 = vadd.f32 %v8628_v10, %v2999_v30  ;;  %v8886_v43 = vsel %vm4171_vm5, 1.0, %v9775_v16  ;;  %vm3197_vm12 = vcmp.eq.s32.totalorder %v11988_v52, %v10142_v17  ;;  %v5209_v10 = vld [vmem:[#allocation8 + $0x40] sm:$0xff]  ;;  %v5212_v41 = vld [vmem:[#allocation8 + $0x58] sm:$0xff] }
 0x21c   : > { %v2026_v22 = vadd.f32 %v8307_v26, %v1508_v23  ;;  %v8564_v31 = vsel %vm2679_vm10, 1.0, %v9775_v16  ;;  %v9015_v35 = vsel %vm4690_vm11, 1.0, %v9775_v16  ;;  %vm3716_vm13 = vcmp.eq.s32.totalorder %v11988_v52, %v10148_v20  ;;  %v5204_v20 = vld [vmem:[#allocation8 + $0x18] sm:$0xff]  ;;  %v5213_v30 = vld [vmem:[#allocation8 + $0x60] sm:$0xff] }
 0x21d   : > { %5317 = vmatpush.msra.mxu1 %v5137_v12  ;;  %v4036_v8 = vadd.f32 %v8757_v39, %v3517_v13  ;;  %v8692_v63 = vsel %vm3197_vm12, 1.0, %v9775_v16  ;;  %vm4235_vm14 = vcmp.eq.s32.totalorder %v11988_v52, %v10151_v21  ;;  %v8821_v34 = vsel %vm3716_vm13, 1.0, %v9775_v16  ;;  %v5211_v39 = vld [vmem:[#allocation8 + $0x50] sm:$0xff]  ;;  %v5216_v23 = vld [vmem:[#allocation8 + $0x78] sm:$0xff]  ;;  %v5217_v26 = vld [vmem:[#allocation8 + $0x80] sm:$0xff] }
 0x21e   : > { %v2544_v56 = vadd.f32 %v8435_v45, %v2026_v22  ;;  %5318 = vmatmul.f32.vlgmr.msra.gmra.mxu1 %v5202_v51  ;;  %vm4754_vm15 = vcmp.eq.s32.totalorder %v11988_v52, %v10166_v33  ;;  %v8950_v15 = vsel %vm4235_vm14, 1.0, %v9775_v16  ;;  %v5208_v33 = vld [vmem:[#allocation8 + $0x38] sm:$0xff] }
 0x21f   : > { %v4555_v38 = vadd.f32 %v8886_v43, %v4036_v8  ;;  %5256 = vmatmul.f32.gmra.mxu0 %v5203_v62  ;;  %v9079_v61 = vsel %vm4754_vm15, 1.0, %v9775_v16  ;;  %v9473_v12 = vld [vmem:[%s9985_s19] ss:$4 sm:$0xf] }
 0x220   : > { %v3063_v57 = vadd.f32 %v8564_v31, %v2544_v56  ;;  %v12094_v13 = vperm.slane %v9473_v12, 2  ;;  %v9474_v45 = vld [vmem:[%s9985_s19 + $0x1] ss:$4 sm:$0xf]  ;;  %v12099_v43 = vperm.slane %v9473_v12, 3 }
 0x221   : > { %v5074_v17 = vadd.f32 %v9015_v35, %v4555_v38  ;;  %v12101_v22 = vperm.slane %v9474_v45, 3  ;;  %v12115_v31 = vld [vmem:[#allocation8 + $0x88] sm:$0xff] }
 0x222   : > { %v3581_v55 = vadd.f32 %v8692_v63, %v3063_v57  ;;  %vm603_vm0 = vcmp.eq.s32.totalorder %v10011_v2, %v12094_v13  ;;  %vm667_vm2 = vcmp.eq.s32.totalorder %v10014_v3, %v12094_v13  ;;  %v12122_v63 = vld [vmem:[#allocation8 + $0x90] sm:$0xff]  ;;  %vm604_vm6 = vcmp.eq.s32.totalorder %v10011_v2, %v12099_v43 }
 0x223   : > { %5382 = vmatpush.msra.mxu2 %v5074_v17  ;;  %v8046_v35 = vsel %vm603_vm0, 1.0, %v9775_v16  ;;  %v8110_v38 = vsel %vm667_vm2, 1.0, %v9775_v16  ;;  %v12127_v17 = vperm.slane %v10036_v14, 2  ;;  %vm1122_vm11 = vcmp.eq.s32.totalorder %v10011_v2, %v12101_v22 }
 0x224   : > { %v4100_v46 = vadd.f32 %v8821_v34, %v3581_v55  ;;  %5383 = vmatmul.f32.vlgmr.msra.gmra.mxu2 %v5201_v4  ;;  %v5210_v4 = vld [vmem:[#allocation8 + $0x48] sm:$0xff] }
 0x225   : > { %vm2157_vm7 = vcmp.eq.s32.totalorder %v10011_v2, %v12127_v17  ;;  %vm2221_vm8 = vcmp.eq.s32.totalorder %v10014_v3, %v12127_v17 }
 0x226   : > { %v4619_v0 = vadd.f32 %v8950_v15, %v4100_v46  ;;  %5321 = vmatmul.f32.gmra.mxu1 %v5204_v20  ;;  %v12139_v46 = vperm.slane %v10044_v19, 2 }
 0x227   : > { %5259 = vmatmul.f32.gmra.mxu0 %v5205_v44 }
 0x228   : > { %v5138_v21 = vadd.f32 %v9079_v61, %v4619_v0  ;;  %v8432_v61 = vsel %vm2157_vm7, 1.0, %v9775_v16  ;;  %vm2676_vm9 = vcmp.eq.s32.totalorder %v10011_v2, %v12139_v46  ;;  %vm2740_vm10 = vcmp.eq.s32.totalorder %v10014_v3, %v12139_v46 }
 0x22a   : > { %5447 = vmatpush.msra.mxu3 %v5138_v21  ;;  %v8047_v21 = vsel %vm604_vm6, 1.0, %v9775_v16 }
 0x22b   : > { %5448 = vmatmul.f32.vlgmr.msra.gmra.mxu3 %v5202_v51  ;;  %v12097_v51 = vperm.slane %v9474_v45, 2  ;;  %v8176_v45 = vsel %vm1122_vm11, 1.0, %v9775_v16  ;;  %vm1186_vm11 = vcmp.eq.s32.totalorder %v10014_v3, %v12101_v22 }
 0x22c   : > { %5386 = vmatmul.f32.gmra.mxu2 %v5203_v62  ;;  %v12108_v62 = vld [vmem:[%s9985_s19 + $0x2] ss:$4 sm:$0xf] }
 0x22d   : > { %vm1121_vm1 = vcmp.eq.s32.totalorder %v10011_v2, %v12097_v51  ;;  %v12111_v8 = vperm.slane %v12108_v62, 2  ;;  %vm1185_vm3 = vcmp.eq.s32.totalorder %v10014_v3, %v12097_v51 }
 0x22e   : > { %5324 = vmatmul.f32.gmra.mxu1 %v5206_v6  ;;  %v8175_v56 = vsel %vm1121_vm1, 1.0, %v9775_v16  ;;  %v8239_v34 = vsel %vm1185_vm3, 1.0, %v9775_v16 }
 0x22f   : > { %5262 = vmatmul.f32.gmra.mxu0 %v5207_v7  ;;  %v1505_v57 = vadd.f32 %v8175_v56, %v8046_v35  ;;  %vm1639_vm4 = vcmp.eq.s32.totalorder %v10011_v2, %v12111_v8  ;;  %v1569_v15 = vadd.f32 %v8239_v34, %v8110_v38  ;;  %vm1703_vm5 = vcmp.eq.s32.totalorder %v10014_v3, %v12111_v8  ;;  %v12170_v35 = vld [vmem:[#allocation8 + $0xa0] sm:$0xff] }
 0x230   : > { %v8304_v55 = vsel %vm1639_vm4, 1.0, %v9775_v16  ;;  %v12175_v38 = vperm.slane %v10068_v32, 2 }
 0x232   : > { %vm4232_vm0 = vcmp.eq.s32.totalorder %v10011_v2, %v12175_v38  ;;  %vm4296_vm1 = vcmp.eq.s32.totalorder %v10014_v3, %v12175_v38 }
 0x233   : > { %5451 = vmatmul.f32.gmra.mxu3 %v5204_v20  ;;  %v2023_v20 = vadd.f32 %v8304_v55, %v1505_v57  ;;  %v1506_v55 = vadd.f32 %v8176_v45, %v8047_v21 }
 0x234   : > { %5389 = vmatmul.f32.gmra.mxu2 %v5205_v44  ;;  %v8368_v44 = vsel %vm1703_vm5, 1.0, %v9775_v16 }
 0x235   : > { %v2087_v0 = vadd.f32 %v8368_v44, %v1569_v15  ;;  %v12185_v15 = vperm.slane %v10077_v36, 2  ;;  %v8947_v44 = vsel %vm4232_vm0, 1.0, %v9775_v16 }
 0x236   : > { %5327 = vmatmul.f32.gmra.mxu1 %v5208_v33 }
 0x237   : > { %5265 = vmatmul.f32.gmra.mxu0 %v5209_v10  ;;  %vm4751_vm2 = vcmp.eq.s32.totalorder %v10011_v2, %v12185_v15  ;;  %vm4815_vm3 = vcmp.eq.s32.totalorder %v10014_v3, %v12185_v15 }
 0x23b   : > { %5454 = vmatmul.f32.gmra.mxu3 %v5206_v6  ;;  %v2541_v6 = vadd.f32 %v8432_v61, %v2023_v20 }
 0x23c   : > { %5392 = vmatmul.f32.gmra.mxu2 %v5207_v7  ;;  %v12150_v7 = vperm.slane %v10051_v24, 2 }
 0x23e   : > { %5330 = vmatmul.f32.gmra.mxu1 %v5210_v4  ;;  %vm3194_vm12 = vcmp.eq.s32.totalorder %v10011_v2, %v12150_v7  ;;  %vm3258_vm13 = vcmp.eq.s32.totalorder %v10014_v3, %v12150_v7 }
 0x23f   : > { %5268 = vmatmul.f32.gmra.mxu0 %v5211_v39 }
 0x243   : > { %5457 = vmatmul.f32.gmra.mxu3 %v5208_v33  ;;  %v8496_v33 = vsel %vm2221_vm8, 1.0, %v9775_v16 }
 0x244   : > { %5395 = vmatmul.f32.gmra.mxu2 %v5209_v10  ;;  %v8561_v10 = vsel %vm2676_vm9, 1.0, %v9775_v16 }
 0x246   : > { %5333 = vmatmul.f32.gmra.mxu1 %v5212_v41 }
 0x247   : > { %5271 = vmatmul.f32.gmra.mxu0 %v5213_v30 }
 0x24b   : > { %5460 = vmatmul.f32.gmra.mxu3 %v5210_v4  ;;  %v2605_v4 = vadd.f32 %v8496_v33, %v2087_v0  ;;  %v12193_v0 = vperm.slane %v12108_v62, 3  ;;  %v9076_v33 = vsel %vm4751_vm2, 1.0, %v9775_v16 }
 0x24c   : > { %5398 = vmatmul.f32.gmra.mxu2 %v5211_v39  ;;  %v3060_v39 = vadd.f32 %v8561_v10, %v2541_v6  ;;  %v9011_v6 = vsel %vm4296_vm1, 1.0, %v9775_v16 }
 0x24d   : > { %vm1640_vm4 = vcmp.eq.s32.totalorder %v10011_v2, %v12193_v0 }
 0x24e   : > { %5336 = vmatmul.f32.gmra.mxu1 %v5214_v50  ;;  %v8305_v62 = vsel %vm1640_vm4, 1.0, %v9775_v16  ;;  %vm1117_vm4 = vcmp.eq.s32.totalorder %v10024_v9, %v12097_v51 }
 0x24f   : > { %5274 = vmatmul.f32.gmra.mxu0 %v5215_v42 }
 0x253   : > { %5463 = vmatmul.f32.gmra.mxu3 %v5212_v41  ;;  %v12161_v41 = vperm.slane %v10057_v27, 2 }
 0x254   : > { %5401 = vmatmul.f32.gmra.mxu2 %v5213_v30  ;;  %v8625_v30 = vsel %vm2740_vm10, 1.0, %v9775_v16  ;;  %vm668_vm10 = vcmp.eq.s32.totalorder %v10014_v3, %v12099_v43 }
 0x255   : > { %v3124_v12 = vadd.f32 %v8625_v30, %v2605_v4  ;;  %vm3713_vm14 = vcmp.eq.s32.totalorder %v10011_v2, %v12161_v41  ;;  %vm3777_vm15 = vcmp.eq.s32.totalorder %v10014_v3, %v12161_v41  ;;  %v9140_v4 = vsel %vm4815_vm3, 1.0, %v9775_v16 }
 0x256   : > { %5339 = vmatmul.f32.gmra.mxu1 %v5216_v23  ;;  %v8818_v57 = vsel %vm3713_vm14, 1.0, %v9775_v16  ;;  %v8882_v20 = vsel %vm3777_vm15, 1.0, %v9775_v16  ;;  %v12206_v30 = vperm.slane %v10036_v14, 3  ;;  %v12228_v14 = vperm.slane %v10068_v32, 3 }
 0x257   : > { %5277 = vmatmul.f32.gmra.mxu0 %v5217_v26  ;;  %vm599_vm3 = vcmp.eq.s32.totalorder %v10024_v9, %v12094_v13 }
 0x258   : > { %vm2158_vm5 = vcmp.eq.s32.totalorder %v10011_v2, %v12206_v30  ;;  %vm4233_vm9 = vcmp.eq.s32.totalorder %v10011_v2, %v12228_v14  ;;  %vm2222_vm14 = vcmp.eq.s32.totalorder %v10014_v3, %v12206_v30  ;;  %vm4297_vm2 = vcmp.eq.s32.totalorder %v10014_v3, %v12228_v14 }
 0x25b   : > { %5466 = vmatmul.f32.gmra.mxu3 %v5214_v50  ;;  %v12164_v50 = vld [vmem:[#allocation8 + $0x98] sm:$0xff] }
 0x25c   : > { %5404 = vmatmul.f32.gmra.mxu2 %v5215_v42  ;;  %v8689_v42 = vsel %vm3194_vm12, 1.0, %v9775_v16 }
 0x25d   : > { %v3578_v56 = vadd.f32 %v8689_v42, %v3060_v39  ;;  %v12209_v42 = vperm.slane %v10044_v19, 3  ;;  %v12231_v19 = vperm.slane %v10077_v36, 3 }
 0x25e   : > { %5342 = vmatmul.f32.gmra.mxu1 %v12115_v31 }
 0x25f   : > { %5280 = vmatmul.f32.gmra.mxu0 %v12122_v63  ;;  %vm2677_vm6 = vcmp.eq.s32.totalorder %v10011_v2, %v12209_v42  ;;  %vm4752_vm12 = vcmp.eq.s32.totalorder %v10011_v2, %v12231_v19  ;;  %vm2741_vm15 = vcmp.eq.s32.totalorder %v10014_v3, %v12209_v42 }
 0x263   : > { %5469 = vmatmul.f32.gmra.mxu3 %v5216_v23  ;;  %v8753_v23 = vsel %vm3258_vm13, 1.0, %v9775_v16  ;;  %vm1704_vm13 = vcmp.eq.s32.totalorder %v10014_v3, %v12193_v0 }
 0x264   : > { %5407 = vmatmul.f32.gmra.mxu2 %v5217_v26  ;;  %v3642_v34 = vadd.f32 %v8753_v23, %v3124_v12  ;;  %v4097_v26 = vadd.f32 %v8818_v57, %v3578_v56  ;;  %v12212_v12 = vld [vmem:[#allocation8 + $0xa8] sm:$0xff]  ;;  %v2024_v56 = vadd.f32 %v8305_v62, %v1506_v55  ;;  %v12215_v23 = vperm.slane %v10051_v24, 3 }
 0x265   : > { %v12218_v57 = vperm.slane %v10057_v27, 3  ;;  %v8433_v24 = vsel %vm2158_vm5, 1.0, %v9775_v16  ;;  %v8562_v27 = vsel %vm2677_vm6, 1.0, %v9775_v16  ;;  %v8111_v55 = vsel %vm668_vm10, 1.0, %v9775_v16 }
 0x266   : > { %5345 = vmatmul.f32.gmra.mxu1 %v12164_v50  ;;  %v4161_v61 = vadd.f32 %v8882_v20, %v3642_v34  ;;  %v4616_v21 = vadd.f32 %v8947_v44, %v4097_v26  ;;  %v12221_v34 = vld [vmem:[#allocation8 + $0xb0] sm:$0xff]  ;;  %vm3195_vm7 = vcmp.eq.s32.totalorder %v10011_v2, %v12215_v23  ;;  %v8240_v26 = vsel %vm1186_vm11, 1.0, %v9775_v16 }
 0x267   : > { %5283 = vmatmul.f32.gmra.mxu0 %v12170_v35  ;;  %vm3714_vm8 = vcmp.eq.s32.totalorder %v10011_v2, %v12218_v57  ;;  %v8690_v32 = vsel %vm3195_vm7, 1.0, %v9775_v16  ;;  %v1570_v20 = vadd.f32 %v8240_v26, %v8111_v55  ;;  %v8497_v2 = vsel %vm2222_vm14, 1.0, %v9775_v16 }
 0x268   : > { %v4680_v10 = vadd.f32 %v9011_v6, %v4161_v61  ;;  %v5135_v39 = vadd.f32 %v9076_v33, %v4616_v21  ;;  %v8819_v36 = vsel %vm3714_vm8, 1.0, %v9775_v16  ;;  %v8948_v61 = vsel %vm4233_vm9, 1.0, %v9775_v16  ;;  %v12263_v6 = vld [vmem:[#allocation8 + $0xb8] sm:$0xff] }
 0x269   : > { %v8369_v21 = vsel %vm1704_vm13, 1.0, %v9775_v16  ;;  %v9077_v33 = vsel %vm4752_vm12, 1.0, %v9775_v16  ;;  %vm3259_vm0 = vcmp.eq.s32.totalorder %v10014_v3, %v12215_v23  ;;  %vm3778_vm1 = vcmp.eq.s32.totalorder %v10014_v3, %v12218_v57 }
 0x26a   : > { %v5199_v45 = vadd.f32 %v9140_v4, %v4680_v10  ;;  %5497 = vmatpush.msrb.mxu0 %v5135_v39  ;;  %v2088_v10 = vadd.f32 %v8369_v21, %v1570_v20  ;;  %v12271_v4 = vld [vmem:[#allocation8 + $0xc0] sm:$0xff]  ;;  %v8626_v62 = vsel %vm2741_vm15, 1.0, %v9775_v16  ;;  %vm4816_vm5 = vcmp.eq.s32.totalorder %v10014_v3, %v12231_v19 }
 0x26b   : > { %5472 = vmatmul.f32.gmra.mxu3 %v12115_v31  ;;  %v2542_v31 = vadd.f32 %v8433_v24, %v2024_v56  ;;  %v8883_v56 = vsel %vm3778_vm1, 1.0, %v9775_v16  ;;  %v8042_v24 = vsel %vm599_vm3, 1.0, %v9775_v16  ;;  %vm1635_vm6 = vcmp.eq.s32.totalorder %v10024_v9, %v12111_v8 }
 0x26c   : > { %5410 = vmatmul.f32.gmra.mxu2 %v12122_v63  ;;  %5562 = vmatpush.msrb.mxu1 %v5199_v45  ;;  %v2606_v45 = vadd.f32 %v8497_v2, %v2088_v10  ;;  %vm2153_vm7 = vcmp.eq.s32.totalorder %v10024_v9, %v12127_v17  ;;  %vm2672_vm8 = vcmp.eq.s32.totalorder %v10024_v9, %v12139_v46  ;;  %v9012_v20 = vsel %vm4297_vm2, 1.0, %v9775_v16 }
 0x26d   : > { %v3061_v63 = vadd.f32 %v8562_v27, %v2542_v31  ;;  %v8171_v27 = vsel %vm1117_vm4, 1.0, %v9775_v16  ;;  %v8428_v55 = vsel %vm2153_vm7, 1.0, %v9775_v16  ;;  %vm3190_vm9 = vcmp.eq.s32.totalorder %v10024_v9, %v12150_v7 }
 0x26e   : > { %5348 = vmatmul.f32.gmra.mxu1 %v12212_v12  ;;  %v3125_v31 = vadd.f32 %v8626_v62, %v2606_v45  ;;  %v8557_v21 = vsel %vm2672_vm8, 1.0, %v9775_v16  ;;  %v8685_v2 = vsel %vm3190_vm9, 1.0, %v9775_v16  ;;  %vm3709_vm10 = vcmp.eq.s32.totalorder %v10024_v9, %v12161_v41 }
 0x26f   : > { %5286 = vmatmul.f32.gmra.mxu0 %v12221_v34  ;;  %v3579_v44 = vadd.f32 %v8690_v32, %v3061_v63  ;;  %v1501_v32 = vadd.f32 %v8171_v27, %v8042_v24  ;;  %v8300_v63 = vsel %vm1635_vm6, 1.0, %v9775_v16  ;;  %vm4228_vm11 = vcmp.eq.s32.totalorder %v10024_v9, %v12175_v38 }
 0x270   : > { %vm4747_vm12 = vcmp.eq.s32.totalorder %v10024_v9, %v12185_v15  ;;  %v8814_v3 = vsel %vm3709_vm10, 1.0, %v9775_v16  ;;  %vm663_vm13 = vcmp.eq.s32.totalorder %v10156_v28, %v12094_v13  ;;  %vm1181_vm14 = vcmp.eq.s32.totalorder %v10156_v28, %v12097_v51 }
 0x271   : > { %v4098_v39 = vadd.f32 %v8819_v36, %v3579_v44  ;;  %v2019_v44 = vadd.f32 %v8300_v63, %v1501_v32  ;;  %vm1699_vm15 = vcmp.eq.s32.totalorder %v10156_v28, %v12111_v8  ;;  %v8235_v45 = vsel %vm1181_vm14, 1.0, %v9775_v16 }
 0x272   : > { %vm2736_vm1 = vcmp.eq.s32.totalorder %v10156_v28, %v12139_v46  ;;  %v8943_v27 = vsel %vm4228_vm11, 1.0, %v9775_v16  ;;  %v9072_v32 = vsel %vm4747_vm12, 1.0, %v9775_v16  ;;  %vm3254_vm2 = vcmp.eq.s32.totalorder %v10156_v28, %v12150_v7 }
 0x273   : > { %5475 = vmatmul.f32.gmra.mxu3 %v12164_v50  ;;  %v8754_v50 = vsel %vm3259_vm0, 1.0, %v9775_v16  ;;  %vm2217_vm0 = vcmp.eq.s32.totalorder %v10156_v28, %v12127_v17  ;;  %vm3773_vm3 = vcmp.eq.s32.totalorder %v10156_v28, %v12161_v41  ;;  %vm4292_vm4 = vcmp.eq.s32.totalorder %v10156_v28, %v12175_v38 }
 0x274   : > { %5413 = vmatmul.f32.gmra.mxu2 %v12170_v35  ;;  %v4617_v35 = vadd.f32 %v8948_v61, %v4098_v39  ;;  %v3643_v26 = vadd.f32 %v8754_v50, %v3125_v31  ;;  %v9141_v61 = vsel %vm4816_vm5, 1.0, %v9775_v16  ;;  %v2537_v39 = vadd.f32 %v8428_v55, %v2019_v44 }
 0x275   : > { %v8106_v50 = vsel %vm663_vm13, 1.0, %v9775_v16  ;;  %v8492_v31 = vsel %vm2217_vm0, 1.0, %v9775_v16  ;;  %v8621_v55 = vsel %vm2736_vm1, 1.0, %v9775_v16  ;;  %v8878_v44 = vsel %vm3773_vm3, 1.0, %v9775_v16 }
 0x276   : > { %5351 = vmatmul.f32.gmra.mxu1 %v12263_v6  ;;  %v5136_v36 = vadd.f32 %v9077_v33, %v4617_v35  ;;  %v12311_v33 = vld [vmem:[#allocation8 + $0xc8] sm:$0xff]  ;;  %v4162_v10 = vadd.f32 %v8883_v56, %v3643_v26  ;;  %v3056_v62 = vadd.f32 %v8557_v21, %v2537_v39  ;;  %v8364_v56 = vsel %vm1699_vm15, 1.0, %v9775_v16 }
 0x277   : > { %5289 = vmatmul.f32.gmra.mxu0 %v12271_v4  ;;  %v8749_v26 = vsel %vm3254_vm2, 1.0, %v9775_v16  ;;  %vm600_vm5 = vcmp.eq.s32.totalorder %v10024_v9, %v12099_v43  ;;  %vm1118_vm6 = vcmp.eq.s32.totalorder %v10024_v9, %v12101_v22  ;;  %vm4811_vm7 = vcmp.eq.s32.totalorder %v10156_v28, %v12185_v15 }
 0x278   : > { %5627 = vmatpush.msrb.mxu2 %v5136_v36  ;;  %v3574_v24 = vadd.f32 %v8685_v2, %v3056_v62  ;;  %v8043_v21 = vsel %vm600_vm5, 1.0, %v9775_v16  ;;  %v8172_v2 = vsel %vm1118_vm6, 1.0, %v9775_v16  ;;  %vm1636_vm8 = vcmp.eq.s32.totalorder %v10024_v9, %v12193_v0 }
 0x279   : > { %v1502_v39 = vadd.f32 %v8172_v2, %v8043_v21  ;;  %vm2154_vm9 = vcmp.eq.s32.totalorder %v10024_v9, %v12206_v30  ;;  %vm2673_vm10 = vcmp.eq.s32.totalorder %v10024_v9, %v12209_v42  ;;  %vm3191_vm11 = vcmp.eq.s32.totalorder %v10024_v9, %v12215_v23 }
 0x27a   : > { %v4093_v63 = vadd.f32 %v8814_v3, %v3574_v24  ;;  %vm3710_vm12 = vcmp.eq.s32.totalorder %v10024_v9, %v12218_v57  ;;  %vm4229_vm13 = vcmp.eq.s32.totalorder %v10024_v9, %v12228_v14  ;;  %vm4748_vm14 = vcmp.eq.s32.totalorder %v10024_v9, %v12231_v19 }
 0x27b   : > { %5478 = vmatmul.f32.gmra.mxu3 %v12212_v12  ;;  %v4681_v12 = vadd.f32 %v9012_v20, %v4162_v10  ;;  %vm664_vm15 = vcmp.eq.s32.totalorder %v10156_v28, %v12099_v43  ;;  %vm1182_vm0 = vcmp.eq.s32.totalorder %v10156_v28, %v12101_v22  ;;  %vm1700_vm1 = vcmp.eq.s32.totalorder %v10156_v28, %v12193_v0 }
 0x27c   : > { %5416 = vmatmul.f32.gmra.mxu2 %v12221_v34  ;;  %v1565_v34 = vadd.f32 %v8235_v45, %v8106_v50  ;;  %v9136_v45 = vsel %vm4811_vm7, 1.0, %v9775_v16  ;;  %vm2218_vm2 = vcmp.eq.s32.totalorder %v10156_v28, %v12206_v30  ;;  %vm2737_vm3 = vcmp.eq.s32.totalorder %v10156_v28, %v12209_v42 }
 0x27d   : > { %v5200_v35 = vadd.f32 %v9141_v61, %v4681_v12  ;;  %v4612_v61 = vadd.f32 %v8943_v27, %v4093_v63  ;;  %v8429_v12 = vsel %vm2154_vm9, 1.0, %v9775_v16  ;;  %v8815_v27 = vsel %vm3710_vm12, 1.0, %v9775_v16 }
 0x27e   : > { %5354 = vmatmul.f32.gmra.mxu1 %v12311_v33  ;;  %v2083_v36 = vadd.f32 %v8364_v56, %v1565_v34  ;;  %v8558_v34 = vsel %vm2673_vm10, 1.0, %v9775_v16  ;;  %v8686_v56 = vsel %vm3191_vm11, 1.0, %v9775_v16  ;;  %v8236_v63 = vsel %vm1182_vm0, 1.0, %v9775_v16 }
 0x27f   : > { %5692 = vmatpush.msrb.mxu3 %v5200_v35  ;;  %v5131_v3 = vadd.f32 %v9072_v32, %v4612_v61  ;;  %v8944_v61 = vsel %vm4229_vm13, 1.0, %v9775_v16  ;;  %v8493_v21 = vsel %vm2218_vm2, 1.0, %v9775_v16  ;;  %vm3774_vm5 = vcmp.eq.s32.totalorder %v10156_v28, %v12218_v57 }
 0x280   : > { %v2601_v20 = vadd.f32 %v8492_v31, %v2083_v36  ;;  %v8107_v36 = vsel %vm664_vm15, 1.0, %v9775_v16  ;;  %vm4293_vm6 = vcmp.eq.s32.totalorder %v10156_v28, %v12228_v14  ;;  %v8879_v9 = vsel %vm3774_vm5, 1.0, %v9775_v16 }
 0x281   : > { %5498 = vmatpush.msrb.mxu0 %v5131_v3  ;;  %vm595_vm7 = vcmp.eq.s32.totalorder %v10327_v59, %v12094_v13  ;;  %vm4812_vm9 = vcmp.eq.s32.totalorder %v10156_v28, %v12231_v19  ;;  %vm1631_vm10 = vcmp.eq.s32.totalorder %v10327_v59, %v12111_v8  ;;  %vm2149_vm11 = vcmp.eq.s32.totalorder %v10327_v59, %v12127_v17 }
 0x282   : > { %v3120_v10 = vadd.f32 %v8621_v55, %v2601_v20  ;;  %v1566_v55 = vadd.f32 %v8236_v63, %v8107_v36  ;;  %vm2668_vm12 = vcmp.eq.s32.totalorder %v10327_v59, %v12139_v46  ;;  %vm3186_vm13 = vcmp.eq.s32.totalorder %v10327_v59, %v12150_v7 }
 0x283   : > { %5481 = vmatmul.f32.gmra.mxu3 %v12263_v6  ;;  %v8301_v6 = vsel %vm1636_vm8, 1.0, %v9775_v16  ;;  %vm1113_vm8 = vcmp.eq.s32.totalorder %v10327_v59, %v12097_v51  ;;  %v8553_v36 = vsel %vm2668_vm12, 1.0, %v9775_v16  ;;  %v8681_v63 = vsel %vm3186_vm13, 1.0, %v9775_v16 }
 0x284   : > { %5419 = vmatmul.f32.gmra.mxu2 %v12271_v4  ;;  %v3638_v62 = vadd.f32 %v8749_v26, %v3120_v10  ;;  %v9007_v4 = vsel %vm4292_vm4, 1.0, %v9775_v16  ;;  %v2020_v50 = vadd.f32 %v8301_v6, %v1502_v39  ;;  %v8365_v26 = vsel %vm1700_vm1, 1.0, %v9775_v16 }
 0x285   : > { %v2084_v2 = vadd.f32 %v8365_v26, %v1566_v55  ;;  %vm3255_vm4 = vcmp.eq.s32.totalorder %v10156_v28, %v12215_v23  ;;  %v8622_v39 = vsel %vm2737_vm3, 1.0, %v9775_v16  ;;  %vm4224_vm15 = vcmp.eq.s32.totalorder %v10327_v59, %v12175_v38 }
 0x286   : > { %v4157_v35 = vadd.f32 %v8878_v44, %v3638_v62  ;;  %v2538_v24 = vadd.f32 %v8429_v12, %v2020_v50  ;;  %v8750_v3 = vsel %vm3255_vm4, 1.0, %v9775_v16  ;;  %v8038_v62 = vsel %vm595_vm7, 1.0, %v9775_v16 }
 0x287   : > { %v2602_v6 = vadd.f32 %v8493_v21, %v2084_v2  ;;  %vm4743_vm0 = vcmp.eq.s32.totalorder %v10327_v59, %v12185_v15  ;;  %vm659_vm1 = vcmp.eq.s32.totalorder %v10365_v47, %v12094_v13  ;;  %vm1177_vm2 = vcmp.eq.s32.totalorder %v10365_v47, %v12097_v51 }
 0x288   : > { %v4676_v31 = vadd.f32 %v9007_v4, %v4157_v35  ;;  %v3057_v32 = vadd.f32 %v8558_v34, %v2538_v24  ;;  %v8167_v4 = vsel %vm1113_vm8, 1.0, %v9775_v16  ;;  %v8424_v35 = vsel %vm2149_vm11, 1.0, %v9775_v16 }
 0x289   : > { %v3121_v50 = vadd.f32 %v8622_v39, %v2602_v6  ;;  %vm1695_vm3 = vcmp.eq.s32.totalorder %v10365_v47, %v12111_v8  ;;  %v8231_v21 = vsel %vm1177_vm2, 1.0, %v9775_v16  ;;  %vm2213_vm4 = vcmp.eq.s32.totalorder %v10365_v47, %v12127_v17 }
 0x28a   : > { %v5195_v20 = vadd.f32 %v9136_v45, %v4676_v31  ;;  %v3575_v44 = vadd.f32 %v8686_v56, %v3057_v32  ;;  %v1497_v45 = vadd.f32 %v8167_v4, %v8038_v62  ;;  %v8296_v56 = vsel %vm1631_vm10, 1.0, %v9775_v16 }
 0x28b   : > { %5484 = vmatmul.f32.gmra.mxu3 %v12311_v33  ;;  %v9073_v33 = vsel %vm4748_vm14, 1.0, %v9775_v16  ;;  %v3639_v24 = vadd.f32 %v8750_v3, %v3121_v50  ;;  %v9137_v32 = vsel %vm4812_vm9, 1.0, %v9775_v16  ;;  %vm3705_vm14 = vcmp.eq.s32.totalorder %v10327_v59, %v12161_v41 }
 0x28c   : > { %5563 = vmatpush.msrb.mxu1 %v5195_v20  ;;  %v4094_v10 = vadd.f32 %v8815_v27, %v3575_v44  ;;  %v9008_v27 = vsel %vm4293_vm6, 1.0, %v9775_v16  ;;  %v2015_v31 = vadd.f32 %v8296_v56, %v1497_v45  ;;  %v8810_v20 = vsel %vm3705_vm14, 1.0, %v9775_v16 }
 0x28d   : > { %v4158_v55 = vadd.f32 %v8879_v9, %v3639_v24  ;;  %v8360_v2 = vsel %vm1695_vm3, 1.0, %v9775_v16  ;;  %vm2732_vm5 = vcmp.eq.s32.totalorder %v10365_v47, %v12139_v46  ;;  %v8939_v3 = vsel %vm4224_vm15, 1.0, %v9775_v16 }
 0x28e   : > { %v4613_v12 = vadd.f32 %v8944_v61, %v4094_v10  ;;  %v2533_v26 = vadd.f32 %v8424_v35, %v2015_v31  ;;  %v8102_v61 = vsel %vm659_vm1, 1.0, %v9775_v16  ;;  %v8488_v6 = vsel %vm2213_vm4, 1.0, %v9775_v16 }
 0x28f   : > { %v4677_v28 = vadd.f32 %v9008_v27, %v4158_v55  ;;  %v9068_v9 = vsel %vm4743_vm0, 1.0, %v9775_v16  ;;  %vm3250_vm6 = vcmp.eq.s32.totalorder %v10365_v47, %v12150_v7  ;;  %vm3769_vm7 = vcmp.eq.s32.totalorder %v10365_v47, %v12161_v41 }
 0x290   : > { %v5132_v34 = vadd.f32 %v9073_v33, %v4613_v12  ;;  %v3052_v44 = vadd.f32 %v8553_v36, %v2533_v26  ;;  %v1561_v33 = vadd.f32 %v8231_v21, %v8102_v61  ;;  %v8617_v4 = vsel %vm2732_vm5, 1.0, %v9775_v16 }
 0x291   : > { %v5196_v10 = vadd.f32 %v9137_v32, %v4677_v28  ;;  %v8745_v50 = vsel %vm3250_vm6, 1.0, %v9775_v16  ;;  %vm4288_vm8 = vcmp.eq.s32.totalorder %v10365_v47, %v12175_v38  ;;  %vm596_vm9 = vcmp.eq.s32.totalorder %v10327_v59, %v12099_v43 }
 0x292   : > { %5628 = vmatpush.msrb.mxu2 %v5132_v34  ;;  %v3570_v39 = vadd.f32 %v8681_v63, %v3052_v44  ;;  %v2079_v12 = vadd.f32 %v8360_v2, %v1561_v33  ;;  %v8874_v34 = vsel %vm3769_vm7, 1.0, %v9775_v16  ;;  %vm1114_vm10 = vcmp.eq.s32.totalorder %v10327_v59, %v12101_v22 }
 0x293   : > { %5693 = vmatpush.msrb.mxu3 %v5196_v10  ;;  %vm4807_vm11 = vcmp.eq.s32.totalorder %v10365_v47, %v12185_v15  ;;  %v8039_v35 = vsel %vm596_vm9, 1.0, %v9775_v16  ;;  %v8168_v24 = vsel %vm1114_vm10, 1.0, %v9775_v16  ;;  %vm1632_vm12 = vcmp.eq.s32.totalorder %v10327_v59, %v12193_v0 }
 0x294   : > { %v4089_v62 = vadd.f32 %v8810_v20, %v3570_v39  ;;  %v2597_v45 = vadd.f32 %v8488_v6, %v2079_v12  ;;  %v1498_v31 = vadd.f32 %v8168_v24, %v8039_v35  ;;  %vm2150_vm13 = vcmp.eq.s32.totalorder %v10327_v59, %v12206_v30 }
 0x295   : > { %v8297_v36 = vsel %vm1632_vm12, 1.0, %v9775_v16  ;;  %v8425_v63 = vsel %vm2150_vm13, 1.0, %v9775_v16  ;;  %vm2669_vm14 = vcmp.eq.s32.totalorder %v10327_v59, %v12209_v42  ;;  %v9003_v26 = vsel %vm4288_vm8, 1.0, %v9775_v16 }
 0x296   : > { %v4608_v56 = vadd.f32 %v8939_v3, %v4089_v62  ;;  %v3116_v27 = vadd.f32 %v8617_v4, %v2597_v45  ;;  %v2016_v20 = vadd.f32 %v8297_v36, %v1498_v31  ;;  %vm3187_vm15 = vcmp.eq.s32.totalorder %v10327_v59, %v12215_v23 }
 0x297   : > { %v9132_v28 = vsel %vm4807_vm11, 1.0, %v9775_v16  ;;  %v8554_v44 = vsel %vm2669_vm14, 1.0, %v9775_v16  ;;  %v8682_v61 = vsel %vm3187_vm15, 1.0, %v9775_v16  ;;  %vm3706_vm0 = vcmp.eq.s32.totalorder %v10327_v59, %v12218_v57 }
 0x298   : > { %v5127_v32 = vadd.f32 %v9068_v9, %v4608_v56  ;;  %v3634_v55 = vadd.f32 %v8745_v50, %v3116_v27  ;;  %v2534_v33 = vadd.f32 %v8425_v63, %v2016_v20  ;;  %vm4225_vm1 = vcmp.eq.s32.totalorder %v10327_v59, %v12228_v14 }
 0x299   : > { %vm4744_vm2 = vcmp.eq.s32.totalorder %v10327_v59, %v12231_v19  ;;  %v8811_v2 = vsel %vm3706_vm0, 1.0, %v9775_v16  ;;  %vm660_vm3 = vcmp.eq.s32.totalorder %v10365_v47, %v12099_v43  ;;  %vm1178_vm4 = vcmp.eq.s32.totalorder %v10365_v47, %v12101_v22 }
 0x29a   : > { %5499 = vmatpush.msrb.mxu0 %v5127_v32  ;;  %v4153_v21 = vadd.f32 %v8874_v34, %v3634_v55  ;;  %vm1696_vm5 = vcmp.eq.s32.totalorder %v10365_v47, %v12193_v0  ;;  %v3053_v39 = vadd.f32 %v8554_v44, %v2534_v33  ;;  %v8103_v3 = vsel %vm660_vm3, 1.0, %v9775_v16 }
 0x29b   : > { %v8232_v6 = vsel %vm1178_vm4, 1.0, %v9775_v16  ;;  %v8361_v12 = vsel %vm1696_vm5, 1.0, %v9775_v16  ;;  %vm2214_vm6 = vcmp.eq.s32.totalorder %v10365_v47, %v12206_v30  ;;  %vm2733_vm7 = vcmp.eq.s32.totalorder %v10365_v47, %v12209_v42 }
 0x29c   : > { %v4672_v10 = vadd.f32 %v9003_v26, %v4153_v21  ;;  %v1562_v9 = vadd.f32 %v8232_v6, %v8103_v3  ;;  %v3571_v4 = vadd.f32 %v8682_v61, %v3053_v39  ;;  %v8940_v50 = vsel %vm4225_vm1, 1.0, %v9775_v16 }
 0x29d   : > { %v8489_v45 = vsel %vm2214_vm6, 1.0, %v9775_v16  ;;  %v9069_v34 = vsel %vm4744_vm2, 1.0, %v9775_v16  ;;  %vm3251_vm8 = vcmp.eq.s32.totalorder %v10365_v47, %v12215_v23  ;;  %vm3770_vm9 = vcmp.eq.s32.totalorder %v10365_v47, %v12218_v57 }
 0x29e   : > { %v5191_v62 = vadd.f32 %v9132_v28, %v4672_v10  ;;  %v2080_v56 = vadd.f32 %v8361_v12, %v1562_v9  ;;  %v4090_v35 = vadd.f32 %v8811_v2, %v3571_v4  ;;  %v8618_v24 = vsel %vm2733_vm7, 1.0, %v9775_v16  ;;  %v5227_v9 = vld [vmem:[#allocation8 + $0xd0] sm:$0xff]  ;;  %v5228_v12 = vld [vmem:[#allocation8 + $0xd8] sm:$0xff] }
 0x29f   : > { %v8746_v27 = vsel %vm3251_vm8, 1.0, %v9775_v16  ;;  %vm4289_vm10 = vcmp.eq.s32.totalorder %v10365_v47, %v12228_v14  ;;  %v8875_v59 = vsel %vm3770_vm9, 1.0, %v9775_v16  ;;  %vm591_vm11 = vcmp.eq.s32.totalorder %v10455_v25, %v12094_v13  ;;  %5292 = vmatmul.f32.gmra.mxu0 %v5227_v9  ;;  %5357 = vmatmul.f32.gmra.mxu1 %v5228_v12 }
 0x2a0   : > { %5564 = vmatpush.msrb.mxu1 %v5191_v62  ;;  %v2598_v31 = vadd.f32 %v8489_v45, %v2080_v56  ;;  %vm1109_vm12 = vcmp.eq.s32.totalorder %v10455_v25, %v12097_v51  ;;  %v4609_v32 = vadd.f32 %v8940_v50, %v4090_v35  ;;  %vm4808_vm13 = vcmp.eq.s32.totalorder %v10365_v47, %v12231_v19 }
 0x2a1   : > { %v8034_v36 = vsel %vm591_vm11, 1.0, %v9775_v16  ;;  %v8163_v63 = vsel %vm1109_vm12, 1.0, %v9775_v16  ;;  %vm1627_vm14 = vcmp.eq.s32.totalorder %v10455_v25, %v12111_v8  ;;  %vm2145_vm15 = vcmp.eq.s32.totalorder %v10455_v25, %v12127_v17  ;;  %5422 = vmatmul.f32.gmra.mxu2 %v5227_v9  ;;  %5487 = vmatmul.f32.gmra.mxu3 %v5228_v12 }
 0x2a2   : > { %v3117_v55 = vadd.f32 %v8618_v24, %v2598_v31  ;;  %v1493_v26 = vadd.f32 %v8163_v63, %v8034_v36  ;;  %v5128_v20 = vadd.f32 %v9069_v34, %v4609_v32  ;;  %v8292_v28 = vsel %vm1627_vm14, 1.0, %v9775_v16 }
 0x2a3   : > { %v8420_v44 = vsel %vm2145_vm15, 1.0, %v9775_v16  ;;  %vm2664_vm0 = vcmp.eq.s32.totalorder %v10455_v25, %v12139_v46  ;;  %v9004_v21 = vsel %vm4289_vm10, 1.0, %v9775_v16  ;;  %vm3182_vm1 = vcmp.eq.s32.totalorder %v10455_v25, %v12150_v7 }
 0x2a4   : > { %v3635_v61 = vadd.f32 %v8746_v27, %v3117_v55  ;;  %v2011_v33 = vadd.f32 %v8292_v28, %v1493_v26  ;;  %5629 = vmatpush.msrb.mxu2 %v5128_v20  ;;  %v9133_v2 = vsel %vm4808_vm13, 1.0, %v9775_v16  ;;  %v8549_v10 = vsel %vm2664_vm0, 1.0, %v9775_v16 }
 0x2a5   : > { %v8677_v39 = vsel %vm3182_vm1, 1.0, %v9775_v16  ;;  %vm3701_vm2 = vcmp.eq.s32.totalorder %v10455_v25, %v12161_v41  ;;  %vm4220_vm3 = vcmp.eq.s32.totalorder %v10455_v25, %v12175_v38  ;;  %vm4739_vm4 = vcmp.eq.s32.totalorder %v10455_v25, %v12185_v15 }
 0x2a6   : > { %v4154_v3 = vadd.f32 %v8875_v59, %v3635_v61  ;;  %v2529_v6 = vadd.f32 %v8420_v44, %v2011_v33  ;;  %v8806_v47 = vsel %vm3701_vm2, 1.0, %v9775_v16  ;;  %vm655_vm5 = vcmp.eq.s32.totalorder %v10459_v37, %v12094_v13 }
 0x2a7   : > { %vm1173_vm6 = vcmp.eq.s32.totalorder %v10459_v37, %v12097_v51  ;;  %vm1691_vm7 = vcmp.eq.s32.totalorder %v10459_v37, %v12111_v8  ;;  %v8098_v50 = vsel %vm655_vm5, 1.0, %v9775_v16  ;;  %vm2209_vm8 = vcmp.eq.s32.totalorder %v10459_v37, %v12127_v17 }
 0x2a8   : > { %v4673_v62 = vadd.f32 %v9004_v21, %v4154_v3  ;;  %v3048_v4 = vadd.f32 %v8549_v10, %v2529_v6  ;;  %v8227_v45 = vsel %vm1173_vm6, 1.0, %v9775_v16  ;;  %v8356_v56 = vsel %vm1691_vm7, 1.0, %v9775_v16 }
 0x2a9   : > { %v1557_v34 = vadd.f32 %v8227_v45, %v8098_v50  ;;  %vm2728_vm9 = vcmp.eq.s32.totalorder %v10459_v37, %v12139_v46  ;;  %v8935_v27 = vsel %vm4220_vm3, 1.0, %v9775_v16  ;;  %v8484_v31 = vsel %vm2209_vm8, 1.0, %v9775_v16 }
 0x2aa   : > { %v5192_v35 = vadd.f32 %v9133_v2, %v4673_v62  ;;  %v3566_v24 = vadd.f32 %v8677_v39, %v3048_v4  ;;  %v9064_v59 = vsel %vm4739_vm4, 1.0, %v9775_v16  ;;  %vm3246_vm10 = vcmp.eq.s32.totalorder %v10459_v37, %v12150_v7 }
 0x2ab   : > { %v2075_v32 = vadd.f32 %v8356_v56, %v1557_v34  ;;  %vm3765_vm11 = vcmp.eq.s32.totalorder %v10459_v37, %v12161_v41  ;;  %v8613_v63 = vsel %vm2728_vm9, 1.0, %v9775_v16  ;;  %v8741_v55 = vsel %vm3246_vm10, 1.0, %v9775_v16 }
 0x2ac   : > { %5694 = vmatpush.msrb.mxu3 %v5192_v35  ;;  %v4085_v36 = vadd.f32 %v8806_v47, %v3566_v24  ;;  %vm4284_vm12 = vcmp.eq.s32.totalorder %v10459_v37, %v12175_v38  ;;  %v8870_v20 = vsel %vm3765_vm11, 1.0, %v9775_v16  ;;  %vm592_vm13 = vcmp.eq.s32.totalorder %v10455_v25, %v12099_v43 }
 0x2ad   : > { %v2593_v26 = vadd.f32 %v8484_v31, %v2075_v32  ;;  %vm1110_vm14 = vcmp.eq.s32.totalorder %v10455_v25, %v12101_v22  ;;  %vm4803_vm15 = vcmp.eq.s32.totalorder %v10459_v37, %v12185_v15  ;;  %v8035_v44 = vsel %vm592_vm13, 1.0, %v9775_v16 }
 0x2ae   : > { %v4604_v28 = vadd.f32 %v8935_v27, %v4085_v36  ;;  %v8164_v61 = vsel %vm1110_vm14, 1.0, %v9775_v16  ;;  %vm1628_vm0 = vcmp.eq.s32.totalorder %v10455_v25, %v12193_v0  ;;  %vm2146_vm1 = vcmp.eq.s32.totalorder %v10455_v25, %v12206_v30 }
 0x2af   : > { %v3112_v21 = vadd.f32 %v8613_v63, %v2593_v26  ;;  %v1494_v33 = vadd.f32 %v8164_v61, %v8035_v44  ;;  %v8293_v10 = vsel %vm1628_vm0, 1.0, %v9775_v16  ;;  %v8421_v39 = vsel %vm2146_vm1, 1.0, %v9775_v16 }
 0x2b0   : > { %v5123_v2 = vadd.f32 %v9064_v59, %v4604_v28  ;;  %vm2665_vm2 = vcmp.eq.s32.totalorder %v10455_v25, %v12209_v42  ;;  %v8999_v6 = vsel %vm4284_vm12, 1.0, %v9775_v16  ;;  %vm3183_vm3 = vcmp.eq.s32.totalorder %v10455_v25, %v12215_v23 }
 0x2b1   : > { %v3630_v3 = vadd.f32 %v8741_v55, %v3112_v21  ;;  %v2012_v9 = vadd.f32 %v8293_v10, %v1494_v33  ;;  %v9128_v12 = vsel %vm4803_vm15, 1.0, %v9775_v16  ;;  %v8550_v47 = vsel %vm2665_vm2, 1.0, %v9775_v16 }
 0x2b2   : > { %5500 = vmatpush.msrb.mxu0 %v5123_v2  ;;  %v8678_v62 = vsel %vm3183_vm3, 1.0, %v9775_v16  ;;  %vm3702_vm4 = vcmp.eq.s32.totalorder %v10455_v25, %v12218_v57  ;;  %vm4221_vm5 = vcmp.eq.s32.totalorder %v10455_v25, %v12228_v14  ;;  %vm4740_vm6 = vcmp.eq.s32.totalorder %v10455_v25, %v12231_v19 }
 0x2b3   : > { %v4149_v4 = vadd.f32 %v8870_v20, %v3630_v3  ;;  %v2530_v50 = vadd.f32 %v8421_v39, %v2012_v9  ;;  %v8807_v45 = vsel %vm3702_vm4, 1.0, %v9775_v16  ;;  %vm656_vm7 = vcmp.eq.s32.totalorder %v10459_v37, %v12099_v43 }
 0x2b4   : > { %vm1174_vm8 = vcmp.eq.s32.totalorder %v10459_v37, %v12101_v22  ;;  %vm1692_vm9 = vcmp.eq.s32.totalorder %v10459_v37, %v12193_v0  ;;  %v8099_v35 = vsel %vm656_vm7, 1.0, %v9775_v16  ;;  %vm2210_vm10 = vcmp.eq.s32.totalorder %v10459_v37, %v12206_v30 }
 0x2b5   : > { %v4668_v34 = vadd.f32 %v8999_v6, %v4149_v4  ;;  %v3049_v56 = vadd.f32 %v8550_v47, %v2530_v50  ;;  %v8228_v24 = vsel %vm1174_vm8, 1.0, %v9775_v16  ;;  %v8357_v31 = vsel %vm1692_vm9, 1.0, %v9775_v16 }
 0x2b6   : > { %v1558_v27 = vadd.f32 %v8228_v24, %v8099_v35  ;;  %vm2729_vm11 = vcmp.eq.s32.totalorder %v10459_v37, %v12209_v42  ;;  %v8936_v36 = vsel %vm4221_vm5, 1.0, %v9775_v16  ;;  %v8485_v63 = vsel %vm2210_vm10, 1.0, %v9775_v16 }
 0x2b7   : > { %v5187_v59 = vadd.f32 %v9128_v12, %v4668_v34  ;;  %v3567_v32 = vadd.f32 %v8678_v62, %v3049_v56  ;;  %v9065_v55 = vsel %vm4740_vm6, 1.0, %v9775_v16  ;;  %vm3247_vm12 = vcmp.eq.s32.totalorder %v10459_v37, %v12215_v23 }
 0x2b8   : > { %v2076_v26 = vadd.f32 %v8357_v31, %v1558_v27  ;;  %vm3766_vm13 = vcmp.eq.s32.totalorder %v10459_v37, %v12218_v57  ;;  %v8614_v28 = vsel %vm2729_vm11, 1.0, %v9775_v16  ;;  %v8742_v44 = vsel %vm3247_vm12, 1.0, %v9775_v16 }
 0x2b9   : > { %5565 = vmatpush.msrb.mxu1 %v5187_v59  ;;  %v4086_v20 = vadd.f32 %v8807_v45, %v3567_v32  ;;  %vm4285_vm14 = vcmp.eq.s32.totalorder %v10459_v37, %v12228_v14  ;;  %v8871_v25 = vsel %vm3766_vm13, 1.0, %v9775_v16  ;;  %vm587_vm15 = vcmp.eq.s32.totalorder %v10475_v48, %v12094_v13 }
 0x2ba   : > { %v2594_v61 = vadd.f32 %v8485_v63, %v2076_v26  ;;  %vm1105_vm0 = vcmp.eq.s32.totalorder %v10475_v48, %v12097_v51  ;;  %vm4804_vm1 = vcmp.eq.s32.totalorder %v10459_v37, %v12231_v19  ;;  %v8030_v33 = vsel %vm587_vm15, 1.0, %v9775_v16 }
 0x2bb   : > { %v4605_v21 = vadd.f32 %v8936_v36, %v4086_v20  ;;  %v8159_v2 = vsel %vm1105_vm0, 1.0, %v9775_v16  ;;  %vm1623_vm2 = vcmp.eq.s32.totalorder %v10475_v48, %v12111_v8  ;;  %vm2141_vm3 = vcmp.eq.s32.totalorder %v10475_v48, %v12127_v17 }
 0x2bc   : > { %v3113_v10 = vadd.f32 %v8614_v28, %v2594_v61  ;;  %v1489_v39 = vadd.f32 %v8159_v2, %v8030_v33  ;;  %v8288_v6 = vsel %vm1623_vm2, 1.0, %v9775_v16  ;;  %v8416_v9 = vsel %vm2141_vm3, 1.0, %v9775_v16 }
 0x2bd   : > { %v5124_v3 = vadd.f32 %v9065_v55, %v4605_v21  ;;  %vm2660_vm4 = vcmp.eq.s32.totalorder %v10475_v48, %v12139_v46  ;;  %v9000_v47 = vsel %vm4285_vm14, 1.0, %v9775_v16  ;;  %vm3178_vm5 = vcmp.eq.s32.totalorder %v10475_v48, %v12150_v7 }
 0x2be   : > { %v3631_v12 = vadd.f32 %v8742_v44, %v3113_v10  ;;  %v2007_v62 = vadd.f32 %v8288_v6, %v1489_v39  ;;  %v9129_v4 = vsel %vm4804_vm1, 1.0, %v9775_v16  ;;  %v8545_v50 = vsel %vm2660_vm4, 1.0, %v9775_v16 }
 0x2bf   : > { %5630 = vmatpush.msrb.mxu2 %v5124_v3  ;;  %v8673_v45 = vsel %vm3178_vm5, 1.0, %v9775_v16  ;;  %vm3697_vm6 = vcmp.eq.s32.totalorder %v10475_v48, %v12161_v41  ;;  %vm4216_vm7 = vcmp.eq.s32.totalorder %v10475_v48, %v12175_v38  ;;  %vm4735_vm8 = vcmp.eq.s32.totalorder %v10475_v48, %v12185_v15 }
 0x2c0   : > { %v4150_v34 = vadd.f32 %v8871_v25, %v3631_v12  ;;  %v2525_v56 = vadd.f32 %v8416_v9, %v2007_v62  ;;  %v8802_v35 = vsel %vm3697_vm6, 1.0, %v9775_v16  ;;  %vm651_vm9 = vcmp.eq.s32.totalorder %v10485_v54, %v12094_v13 }
 0x2c1   : > { %vm1169_vm10 = vcmp.eq.s32.totalorder %v10485_v54, %v12097_v51  ;;  %vm1687_vm11 = vcmp.eq.s32.totalorder %v10485_v54, %v12111_v8  ;;  %v8094_v27 = vsel %vm651_vm9, 1.0, %v9775_v16  ;;  %vm2205_vm12 = vcmp.eq.s32.totalorder %v10485_v54, %v12127_v17 }
 0x2c2   : > { %v4669_v37 = vadd.f32 %v9000_v47, %v4150_v34  ;;  %v3044_v24 = vadd.f32 %v8545_v50, %v2525_v56  ;;  %v8223_v31 = vsel %vm1169_vm10, 1.0, %v9775_v16  ;;  %v8352_v32 = vsel %vm1687_vm11, 1.0, %v9775_v16 }
 0x2c3   : > { %v1553_v59 = vadd.f32 %v8223_v31, %v8094_v27  ;;  %vm2724_vm13 = vcmp.eq.s32.totalorder %v10485_v54, %v12139_v46  ;;  %v8931_v55 = vsel %vm4216_vm7, 1.0, %v9775_v16  ;;  %v8480_v26 = vsel %vm2205_vm12, 1.0, %v9775_v16 }
 0x2c4   : > { %v5188_v36 = vadd.f32 %v9129_v4, %v4669_v37  ;;  %v3562_v63 = vadd.f32 %v8673_v45, %v3044_v24  ;;  %v9060_v20 = vsel %vm4735_vm8, 1.0, %v9775_v16  ;;  %vm3242_vm14 = vcmp.eq.s32.totalorder %v10485_v54, %v12150_v7 }
 0x2c5   : > { %v2071_v28 = vadd.f32 %v8352_v32, %v1553_v59  ;;  %vm3761_vm15 = vcmp.eq.s32.totalorder %v10485_v54, %v12161_v41  ;;  %v8609_v61 = vsel %vm2724_vm13, 1.0, %v9775_v16  ;;  %v8737_v25 = vsel %vm3242_vm14, 1.0, %v9775_v16 }
 0x2c6   : > { %5695 = vmatpush.msrb.mxu3 %v5188_v36  ;;  %v4081_v44 = vadd.f32 %v8802_v35, %v3562_v63  ;;  %vm4280_vm0 = vcmp.eq.s32.totalorder %v10485_v54, %v12175_v38  ;;  %v8866_v33 = vsel %vm3761_vm15, 1.0, %v9775_v16  ;;  %vm588_vm1 = vcmp.eq.s32.totalorder %v10475_v48, %v12099_v43 }
 0x2c7   : > { %v2589_v21 = vadd.f32 %v8480_v26, %v2071_v28  ;;  %vm1106_vm2 = vcmp.eq.s32.totalorder %v10475_v48, %v12101_v22  ;;  %vm4799_vm3 = vcmp.eq.s32.totalorder %v10485_v54, %v12185_v15  ;;  %v8031_v10 = vsel %vm588_vm1, 1.0, %v9775_v16 }
 0x2c8   : > { %v4600_v2 = vadd.f32 %v8931_v55, %v4081_v44  ;;  %v8160_v39 = vsel %vm1106_vm2, 1.0, %v9775_v16  ;;  %vm1624_vm4 = vcmp.eq.s32.totalorder %v10475_v48, %v12193_v0  ;;  %vm2142_vm5 = vcmp.eq.s32.totalorder %v10475_v48, %v12206_v30 }
 0x2c9   : > { %v3108_v3 = vadd.f32 %v8609_v61, %v2589_v21  ;;  %v1490_v6 = vadd.f32 %v8160_v39, %v8031_v10  ;;  %v8289_v12 = vsel %vm1624_vm4, 1.0, %v9775_v16  ;;  %v8417_v47 = vsel %vm2142_vm5, 1.0, %v9775_v16 }
 0x2ca   : > { %v5119_v9 = vadd.f32 %v9060_v20, %v4600_v2  ;;  %vm2661_vm6 = vcmp.eq.s32.totalorder %v10475_v48, %v12209_v42  ;;  %v8995_v4 = vsel %vm4280_vm0, 1.0, %v9775_v16  ;;  %vm3179_vm7 = vcmp.eq.s32.totalorder %v10475_v48, %v12215_v23 }
 0x2cb   : > { %v3626_v62 = vadd.f32 %v8737_v25, %v3108_v3  ;;  %v2008_v50 = vadd.f32 %v8289_v12, %v1490_v6  ;;  %v9124_v45 = vsel %vm4799_vm3, 1.0, %v9775_v16  ;;  %v8546_v34 = vsel %vm2661_vm6, 1.0, %v9775_v16 }
 0x2cc   : > { %5501 = vmatpush.msrb.mxu0 %v5119_v9  ;;  %v8674_v56 = vsel %vm3179_vm7, 1.0, %v9775_v16  ;;  %vm3698_vm8 = vcmp.eq.s32.totalorder %v10475_v48, %v12218_v57  ;;  %vm4217_vm9 = vcmp.eq.s32.totalorder %v10475_v48, %v12228_v14  ;;  %vm4736_vm10 = vcmp.eq.s32.totalorder %v10475_v48, %v12231_v19 }
 0x2cd   : > { %v4145_v35 = vadd.f32 %v8866_v33, %v3626_v62  ;;  %v2526_v37 = vadd.f32 %v8417_v47, %v2008_v50  ;;  %v8803_v24 = vsel %vm3698_vm8, 1.0, %v9775_v16  ;;  %vm652_vm11 = vcmp.eq.s32.totalorder %v10485_v54, %v12099_v43 }
 0x2ce   : > { %vm1170_vm12 = vcmp.eq.s32.totalorder %v10485_v54, %v12101_v22  ;;  %vm1688_vm13 = vcmp.eq.s32.totalorder %v10485_v54, %v12193_v0  ;;  %v8095_v59 = vsel %vm652_vm11, 1.0, %v9775_v16  ;;  %vm2206_vm14 = vcmp.eq.s32.totalorder %v10485_v54, %v12206_v30 }
 0x2cf   : > { %v4664_v27 = vadd.f32 %v8995_v4, %v4145_v35  ;;  %v3045_v31 = vadd.f32 %v8546_v34, %v2526_v37  ;;  %v8224_v32 = vsel %vm1170_vm12, 1.0, %v9775_v16  ;;  %v8353_v63 = vsel %vm1688_vm13, 1.0, %v9775_v16 }
 0x2d0   : > { %v1554_v36 = vadd.f32 %v8224_v32, %v8095_v59  ;;  %vm2725_vm15 = vcmp.eq.s32.totalorder %v10485_v54, %v12209_v42  ;;  %v8932_v20 = vsel %vm4217_vm9, 1.0, %v9775_v16  ;;  %v8481_v28 = vsel %vm2206_vm14, 1.0, %v9775_v16 }
 0x2d1   : > { %v5183_v55 = vadd.f32 %v9124_v45, %v4664_v27  ;;  %v3563_v26 = vadd.f32 %v8674_v56, %v3045_v31  ;;  %v9061_v44 = vsel %vm4736_vm10, 1.0, %v9775_v16  ;;  %vm3243_vm0 = vcmp.eq.s32.totalorder %v10485_v54, %v12215_v23 }
 0x2d2   : > { %v2072_v61 = vadd.f32 %v8353_v63, %v1554_v36  ;;  %vm3762_vm1 = vcmp.eq.s32.totalorder %v10485_v54, %v12218_v57  ;;  %v8610_v21 = vsel %vm2725_vm15, 1.0, %v9775_v16  ;;  %v8738_v33 = vsel %vm3243_vm0, 1.0, %v9775_v16 }
 0x2d3   : > { %5566 = vmatpush.msrb.mxu1 %v5183_v55  ;;  %v4082_v25 = vadd.f32 %v8803_v24, %v3563_v26  ;;  %vm4281_vm2 = vcmp.eq.s32.totalorder %v10485_v54, %v12228_v14  ;;  %v8867_v48 = vsel %vm3762_vm1, 1.0, %v9775_v16  ;;  %vm583_vm3 = vcmp.eq.s32.totalorder %v10712_v29, %v12094_v13 }
 0x2d4   : > { %v2590_v2 = vadd.f32 %v8481_v28, %v2072_v61  ;;  %vm1101_vm4 = vcmp.eq.s32.totalorder %v10712_v29, %v12097_v51  ;;  %vm4800_vm5 = vcmp.eq.s32.totalorder %v10485_v54, %v12231_v19  ;;  %v8026_v39 = vsel %vm583_vm3, 1.0, %v9775_v16 }
 0x2d5   : > { %v4601_v10 = vadd.f32 %v8932_v20, %v4082_v25  ;;  %v8155_v3 = vsel %vm1101_vm4, 1.0, %v9775_v16  ;;  %vm1619_vm6 = vcmp.eq.s32.totalorder %v10712_v29, %v12111_v8  ;;  %vm2137_vm7 = vcmp.eq.s32.totalorder %v10712_v29, %v12127_v17 }
 0x2d6   : > { %v3109_v6 = vadd.f32 %v8610_v21, %v2590_v2  ;;  %v1485_v9 = vadd.f32 %v8155_v3, %v8026_v39  ;;  %v8284_v47 = vsel %vm1619_vm6, 1.0, %v9775_v16  ;;  %v8412_v62 = vsel %vm2137_vm7, 1.0, %v9775_v16 }
 0x2d7   : > { %v5120_v12 = vadd.f32 %v9061_v44, %v4601_v10  ;;  %vm2656_vm8 = vcmp.eq.s32.totalorder %v10712_v29, %v12139_v46  ;;  %v8996_v50 = vsel %vm4281_vm2, 1.0, %v9775_v16  ;;  %vm3174_vm9 = vcmp.eq.s32.totalorder %v10712_v29, %v12150_v7 }
 0x2d8   : > { %v3627_v4 = vadd.f32 %v8738_v33, %v3109_v6  ;;  %v2003_v45 = vadd.f32 %v8284_v47, %v1485_v9  ;;  %v9125_v34 = vsel %vm4800_vm5, 1.0, %v9775_v16  ;;  %v8541_v56 = vsel %vm2656_vm8, 1.0, %v9775_v16 }
 0x2d9   : > { %5631 = vmatpush.msrb.mxu2 %v5120_v12  ;;  %v8669_v35 = vsel %vm3174_vm9, 1.0, %v9775_v16  ;;  %vm3693_vm10 = vcmp.eq.s32.totalorder %v10712_v29, %v12161_v41  ;;  %vm4212_vm11 = vcmp.eq.s32.totalorder %v10712_v29, %v12175_v38  ;;  %vm4731_vm12 = vcmp.eq.s32.totalorder %v10712_v29, %v12185_v15 }
 0x2da   : > { %v4146_v37 = vadd.f32 %v8867_v48, %v3627_v4  ;;  %v2521_v24 = vadd.f32 %v8412_v62, %v2003_v45  ;;  %v8798_v27 = vsel %vm3693_vm10, 1.0, %v9775_v16  ;;  %vm647_vm13 = vcmp.eq.s32.totalorder %v10717_v40, %v12094_v13 }
 0x2db   : > { %vm1165_vm14 = vcmp.eq.s32.totalorder %v10717_v40, %v12097_v51  ;;  %vm1683_vm15 = vcmp.eq.s32.totalorder %v10717_v40, %v12111_v8  ;;  %v8090_v59 = vsel %vm647_vm13, 1.0, %v9775_v16  ;;  %vm2201_vm0 = vcmp.eq.s32.totalorder %v10717_v40, %v12127_v17 }
 0x2dc   : > { %v4665_v54 = vadd.f32 %v8996_v50, %v4146_v37  ;;  %v3040_v31 = vadd.f32 %v8541_v56, %v2521_v24  ;;  %v8219_v32 = vsel %vm1165_vm14, 1.0, %v9775_v16  ;;  %v8348_v63 = vsel %vm1683_vm15, 1.0, %v9775_v16 }
 0x2dd   : > { %v1549_v36 = vadd.f32 %v8219_v32, %v8090_v59  ;;  %vm2720_vm1 = vcmp.eq.s32.totalorder %v10717_v40, %v12139_v46  ;;  %v8927_v20 = vsel %vm4212_vm11, 1.0, %v9775_v16  ;;  %v8476_v28 = vsel %vm2201_vm0, 1.0, %v9775_v16 }
 0x2de   : > { %v5184_v55 = vadd.f32 %v9125_v34, %v4665_v54  ;;  %v3558_v26 = vadd.f32 %v8669_v35, %v3040_v31  ;;  %v9056_v44 = vsel %vm4731_vm12, 1.0, %v9775_v16  ;;  %vm3238_vm2 = vcmp.eq.s32.totalorder %v10717_v40, %v12150_v7 }
 0x2df   : > { %v2067_v61 = vadd.f32 %v8348_v63, %v1549_v36  ;;  %vm3757_vm3 = vcmp.eq.s32.totalorder %v10717_v40, %v12161_v41  ;;  %v8605_v21 = vsel %vm2720_vm1, 1.0, %v9775_v16  ;;  %v8733_v33 = vsel %vm3238_vm2, 1.0, %v9775_v16 }
 0x2e0   : > { %5696 = vmatpush.msrb.mxu3 %v5184_v55  ;;  %v4077_v25 = vadd.f32 %v8798_v27, %v3558_v26  ;;  %vm4276_vm4 = vcmp.eq.s32.totalorder %v10717_v40, %v12175_v38  ;;  %v8862_v48 = vsel %vm3757_vm3, 1.0, %v9775_v16  ;;  %vm584_vm5 = vcmp.eq.s32.totalorder %v10712_v29, %v12099_v43 }
 0x2e1   : > { %v2585_v2 = vadd.f32 %v8476_v28, %v2067_v61  ;;  %vm1102_vm6 = vcmp.eq.s32.totalorder %v10712_v29, %v12101_v22  ;;  %vm4795_vm7 = vcmp.eq.s32.totalorder %v10717_v40, %v12185_v15  ;;  %v8027_v39 = vsel %vm584_vm5, 1.0, %v9775_v16 }
 0x2e2   : > { %v4596_v10 = vadd.f32 %v8927_v20, %v4077_v25  ;;  %v8156_v3 = vsel %vm1102_vm6, 1.0, %v9775_v16  ;;  %vm1620_vm8 = vcmp.eq.s32.totalorder %v10712_v29, %v12193_v0  ;;  %vm2138_vm9 = vcmp.eq.s32.totalorder %v10712_v29, %v12206_v30 }
 0x2e3   : > { %v3104_v6 = vadd.f32 %v8605_v21, %v2585_v2  ;;  %v1486_v9 = vadd.f32 %v8156_v3, %v8027_v39  ;;  %v8285_v47 = vsel %vm1620_vm8, 1.0, %v9775_v16  ;;  %v8413_v62 = vsel %vm2138_vm9, 1.0, %v9775_v16 }
 0x2e4   : > { %v5115_v12 = vadd.f32 %v9056_v44, %v4596_v10  ;;  %vm2657_vm10 = vcmp.eq.s32.totalorder %v10712_v29, %v12209_v42  ;;  %v8991_v50 = vsel %vm4276_vm4, 1.0, %v9775_v16  ;;  %vm3175_vm11 = vcmp.eq.s32.totalorder %v10712_v29, %v12215_v23 }
 0x2e5   : > { %v3622_v4 = vadd.f32 %v8733_v33, %v3104_v6  ;;  %v2004_v45 = vadd.f32 %v8285_v47, %v1486_v9  ;;  %v9120_v34 = vsel %vm4795_vm7, 1.0, %v9775_v16  ;;  %v8542_v56 = vsel %vm2657_vm10, 1.0, %v9775_v16 }
 0x2e6   : > { %5502 = vmatpush.msrb.mxu0 %v5115_v12  ;;  %v8670_v35 = vsel %vm3175_vm11, 1.0, %v9775_v16  ;;  %vm3694_vm12 = vcmp.eq.s32.totalorder %v10712_v29, %v12218_v57  ;;  %vm4213_vm13 = vcmp.eq.s32.totalorder %v10712_v29, %v12228_v14  ;;  %vm4732_vm14 = vcmp.eq.s32.totalorder %v10712_v29, %v12231_v19 }
 0x2e7   : > { %v4141_v37 = vadd.f32 %v8862_v48, %v3622_v4  ;;  %v2522_v24 = vadd.f32 %v8413_v62, %v2004_v45  ;;  %v8799_v27 = vsel %vm3694_vm12, 1.0, %v9775_v16  ;;  %vm648_vm15 = vcmp.eq.s32.totalorder %v10717_v40, %v12099_v43 }
 0x2e8   : > { %vm1166_vm0 = vcmp.eq.s32.totalorder %v10717_v40, %v12101_v22  ;;  %vm1684_vm1 = vcmp.eq.s32.totalorder %v10717_v40, %v12193_v0  ;;  %v8091_v59 = vsel %vm648_vm15, 1.0, %v9775_v16  ;;  %vm2202_vm2 = vcmp.eq.s32.totalorder %v10717_v40, %v12206_v30 }
 0x2e9   : > { %v4660_v54 = vadd.f32 %v8991_v50, %v4141_v37  ;;  %v3041_v31 = vadd.f32 %v8542_v56, %v2522_v24  ;;  %v8220_v32 = vsel %vm1166_vm0, 1.0, %v9775_v16  ;;  %v8349_v63 = vsel %vm1684_vm1, 1.0, %v9775_v16 }
 0x2ea   : > { %v1550_v36 = vadd.f32 %v8220_v32, %v8091_v59  ;;  %vm2721_vm3 = vcmp.eq.s32.totalorder %v10717_v40, %v12209_v42  ;;  %v8928_v20 = vsel %vm4213_vm13, 1.0, %v9775_v16  ;;  %v8477_v28 = vsel %vm2202_vm2, 1.0, %v9775_v16 }
 0x2eb   : > { %v5179_v55 = vadd.f32 %v9120_v34, %v4660_v54  ;;  %v3559_v26 = vadd.f32 %v8670_v35, %v3041_v31  ;;  %v9057_v44 = vsel %vm4732_vm14, 1.0, %v9775_v16  ;;  %vm3239_vm4 = vcmp.eq.s32.totalorder %v10717_v40, %v12215_v23 }
 0x2ec   : > { %v2068_v61 = vadd.f32 %v8349_v63, %v1550_v36  ;;  %vm3758_vm5 = vcmp.eq.s32.totalorder %v10717_v40, %v12218_v57  ;;  %v8606_v21 = vsel %vm2721_vm3, 1.0, %v9775_v16  ;;  %v8734_v33 = vsel %vm3239_vm4, 1.0, %v9775_v16 }
 0x2ed   : > { %5567 = vmatpush.msrb.mxu1 %v5179_v55  ;;  %v4078_v25 = vadd.f32 %v8799_v27, %v3559_v26  ;;  %vm4277_vm6 = vcmp.eq.s32.totalorder %v10717_v40, %v12228_v14  ;;  %v8863_v29 = vsel %vm3758_vm5, 1.0, %v9775_v16  ;;  %vm579_vm7 = vcmp.eq.s32.totalorder %v10738_v53, %v12094_v13 }
 0x2ee   : > { %v2586_v2 = vadd.f32 %v8477_v28, %v2068_v61  ;;  %vm1097_vm8 = vcmp.eq.s32.totalorder %v10738_v53, %v12097_v51  ;;  %vm4796_vm9 = vcmp.eq.s32.totalorder %v10717_v40, %v12231_v19  ;;  %v8022_v10 = vsel %vm579_vm7, 1.0, %v9775_v16 }
 0x2ef   : > { %v4597_v48 = vadd.f32 %v8928_v20, %v4078_v25  ;;  %v8151_v39 = vsel %vm1097_vm8, 1.0, %v9775_v16  ;;  %vm1615_vm10 = vcmp.eq.s32.totalorder %v10738_v53, %v12111_v8  ;;  %vm2133_vm11 = vcmp.eq.s32.totalorder %v10738_v53, %v12127_v17 }
 0x2f0   : > { %v3105_v3 = vadd.f32 %v8606_v21, %v2586_v2  ;;  %v1481_v6 = vadd.f32 %v8151_v39, %v8022_v10  ;;  %v8280_v12 = vsel %vm1615_vm10, 1.0, %v9775_v16  ;;  %v8408_v47 = vsel %vm2133_vm11, 1.0, %v9775_v16 }
 0x2f1   : > { %v5116_v9 = vadd.f32 %v9057_v44, %v4597_v48  ;;  %vm2652_vm12 = vcmp.eq.s32.totalorder %v10738_v53, %v12139_v46  ;;  %v8992_v4 = vsel %vm4277_vm6, 1.0, %v9775_v16  ;;  %vm3170_vm13 = vcmp.eq.s32.totalorder %v10738_v53, %v12150_v7 }
 0x2f2   : > { %v3623_v62 = vadd.f32 %v8734_v33, %v3105_v3  ;;  %v1999_v50 = vadd.f32 %v8280_v12, %v1481_v6  ;;  %v9121_v45 = vsel %vm4796_vm9, 1.0, %v9775_v16  ;;  %v8537_v34 = vsel %vm2652_vm12, 1.0, %v9775_v16 }
 0x2f3   : > { %5632 = vmatpush.msrb.mxu2 %v5116_v9  ;;  %v8665_v56 = vsel %vm3170_vm13, 1.0, %v9775_v16  ;;  %vm3689_vm14 = vcmp.eq.s32.totalorder %v10738_v53, %v12161_v41  ;;  %vm4208_vm15 = vcmp.eq.s32.totalorder %v10738_v53, %v12175_v38  ;;  %vm4727_vm0 = vcmp.eq.s32.totalorder %v10738_v53, %v12185_v15 }
 0x2f4   : > { %v4142_v35 = vadd.f32 %v8863_v29, %v3623_v62  ;;  %v2517_v37 = vadd.f32 %v8408_v47, %v1999_v50  ;;  %v8794_v24 = vsel %vm3689_vm14, 1.0, %v9775_v16  ;;  %vm643_vm1 = vcmp.eq.s32.totalorder %v10742_v58, %v12094_v13 }
 0x2f5   : > { %vm1161_vm2 = vcmp.eq.s32.totalorder %v10742_v58, %v12097_v51  ;;  %vm1679_vm3 = vcmp.eq.s32.totalorder %v10742_v58, %v12111_v8  ;;  %v8086_v54 = vsel %vm643_vm1, 1.0, %v9775_v16  ;;  %vm2197_vm4 = vcmp.eq.s32.totalorder %v10742_v58, %v12127_v17 }
 0x2f6   : > { %v4661_v40 = vadd.f32 %v8992_v4, %v4142_v35  ;;  %v3036_v27 = vadd.f32 %v8537_v34, %v2517_v37  ;;  %v8215_v31 = vsel %vm1161_vm2, 1.0, %v9775_v16  ;;  %v8344_v32 = vsel %vm1679_vm3, 1.0, %v9775_v16 }
 0x2f7   : > { %v1545_v59 = vadd.f32 %v8215_v31, %v8086_v54  ;;  %vm2716_vm5 = vcmp.eq.s32.totalorder %v10742_v58, %v12139_v46  ;;  %v8923_v55 = vsel %vm4208_vm15, 1.0, %v9775_v16  ;;  %v8472_v26 = vsel %vm2197_vm4, 1.0, %v9775_v16 }
 0x2f8   : > { %v5180_v36 = vadd.f32 %v9121_v45, %v4661_v40  ;;  %v3554_v63 = vadd.f32 %v8665_v56, %v3036_v27  ;;  %v9052_v20 = vsel %vm4727_vm0, 1.0, %v9775_v16  ;;  %vm3234_vm6 = vcmp.eq.s32.totalorder %v10742_v58, %v12150_v7 }
 0x2f9   : > { %v2063_v28 = vadd.f32 %v8344_v32, %v1545_v59  ;;  %vm3753_vm7 = vcmp.eq.s32.totalorder %v10742_v58, %v12161_v41  ;;  %v8601_v61 = vsel %vm2716_vm5, 1.0, %v9775_v16  ;;  %v8729_v25 = vsel %vm3234_vm6, 1.0, %v9775_v16 }
 0x2fa   : > { %5697 = vmatpush.msrb.mxu3 %v5180_v36  ;;  %v4073_v44 = vadd.f32 %v8794_v24, %v3554_v63  ;;  %vm4272_vm8 = vcmp.eq.s32.totalorder %v10742_v58, %v12175_v38  ;;  %v8858_v33 = vsel %vm3753_vm7, 1.0, %v9775_v16  ;;  %vm580_vm9 = vcmp.eq.s32.totalorder %v10738_v53, %v12099_v43 }
 0x2fb   : > { %v2581_v21 = vadd.f32 %v8472_v26, %v2063_v28  ;;  %vm1098_vm10 = vcmp.eq.s32.totalorder %v10738_v53, %v12101_v22  ;;  %vm4791_vm11 = vcmp.eq.s32.totalorder %v10742_v58, %v12185_v15  ;;  %v8023_v29 = vsel %vm580_vm9, 1.0, %v9775_v16 }
 0x2fc   : > { %v4592_v2 = vadd.f32 %v8923_v55, %v4073_v44  ;;  %v8152_v48 = vsel %vm1098_vm10, 1.0, %v9775_v16  ;;  %vm1616_vm12 = vcmp.eq.s32.totalorder %v10738_v53, %v12193_v0  ;;  %vm2134_vm13 = vcmp.eq.s32.totalorder %v10738_v53, %v12206_v30 }
 0x2fd   : > { %v3100_v10 = vadd.f32 %v8601_v61, %v2581_v21  ;;  %v1482_v39 = vadd.f32 %v8152_v48, %v8023_v29  ;;  %v8281_v6 = vsel %vm1616_vm12, 1.0, %v9775_v16  ;;  %v8409_v9 = vsel %vm2134_vm13, 1.0, %v9775_v16 }
 0x2fe   : > { %v5111_v3 = vadd.f32 %v9052_v20, %v4592_v2  ;;  %vm2653_vm14 = vcmp.eq.s32.totalorder %v10738_v53, %v12209_v42  ;;  %v8987_v47 = vsel %vm4272_vm8, 1.0, %v9775_v16  ;;  %vm3171_vm15 = vcmp.eq.s32.totalorder %v10738_v53, %v12215_v23 }
 0x2ff   : > { %v3618_v12 = vadd.f32 %v8729_v25, %v3100_v10  ;;  %v2000_v62 = vadd.f32 %v8281_v6, %v1482_v39  ;;  %v9116_v4 = vsel %vm4791_vm11, 1.0, %v9775_v16  ;;  %v8538_v50 = vsel %vm2653_vm14, 1.0, %v9775_v16 }
 0x300   : > { %5503 = vmatpush.msrb.mxu0 %v5111_v3  ;;  %v8666_v45 = vsel %vm3171_vm15, 1.0, %v9775_v16  ;;  %vm3690_vm0 = vcmp.eq.s32.totalorder %v10738_v53, %v12218_v57  ;;  %vm4209_vm1 = vcmp.eq.s32.totalorder %v10738_v53, %v12228_v14  ;;  %vm4728_vm2 = vcmp.eq.s32.totalorder %v10738_v53, %v12231_v19 }
 0x301   : > { %v4137_v34 = vadd.f32 %v8858_v33, %v3618_v12  ;;  %v2518_v56 = vadd.f32 %v8409_v9, %v2000_v62  ;;  %v8795_v35 = vsel %vm3690_vm0, 1.0, %v9775_v16  ;;  %vm644_vm3 = vcmp.eq.s32.totalorder %v10742_v58, %v12099_v43 }
 0x302   : > { %vm1162_vm4 = vcmp.eq.s32.totalorder %v10742_v58, %v12101_v22  ;;  %vm1680_vm5 = vcmp.eq.s32.totalorder %v10742_v58, %v12193_v0  ;;  %v8087_v40 = vsel %vm644_vm3, 1.0, %v9775_v16  ;;  %vm2198_vm6 = vcmp.eq.s32.totalorder %v10742_v58, %v12206_v30 }
 0x303   : > { %v4656_v37 = vadd.f32 %v8987_v47, %v4137_v34  ;;  %v3037_v24 = vadd.f32 %v8538_v50, %v2518_v56  ;;  %v8216_v27 = vsel %vm1162_vm4, 1.0, %v9775_v16  ;;  %v8345_v31 = vsel %vm1680_vm5, 1.0, %v9775_v16  ;;  %v5230_v34 = vld [vmem:[#allocation8 + $0xe8] sm:$0xff]  ;;  %v16658_v56 = vld [vmem:[#allocation25_spill] sm:$0xff] }
 0x304   : > { %v1546_v54 = vadd.f32 %v8216_v27, %v8087_v40  ;;  %vm2717_vm7 = vcmp.eq.s32.totalorder %v10742_v58, %v12209_v42  ;;  %v8924_v36 = vsel %vm4209_vm1, 1.0, %v9775_v16  ;;  %v8473_v63 = vsel %vm2198_vm6, 1.0, %v9775_v16  ;;  %5360 = vmatmul.f32.gmra.mxu1 %v5230_v34  ;;  %5490 = vmatmul.f32.gmra.mxu3 %v5230_v34 }
 0x305   : > { %v5175_v59 = vadd.f32 %v9116_v4, %v4656_v37  ;;  %v3555_v32 = vadd.f32 %v8666_v45, %v3037_v24  ;;  %v9053_v55 = vsel %vm4728_vm2, 1.0, %v9775_v16  ;;  %vm3235_vm8 = vcmp.eq.s32.totalorder %v10742_v58, %v12215_v23  ;;  %v5229_v45 = vld [vmem:[#allocation8 + $0xe0] sm:$0xff] }
 0x306   : > { %v2064_v26 = vadd.f32 %v8345_v31, %v1546_v54  ;;  %vm3754_vm9 = vcmp.eq.s32.totalorder %v10742_v58, %v12218_v57  ;;  %v8602_v28 = vsel %vm2717_vm7, 1.0, %v9775_v16  ;;  %v8730_v44 = vsel %vm3235_vm8, 1.0, %v9775_v16  ;;  %5295 = vmatmul.f32.gmra.mxu0 %v5229_v45  ;;  %5425 = vmatmul.f32.gmra.mxu2 %v5229_v45 }
 0x307   : > { %5568 = vmatpush.msrb.mxu1 %v5175_v59  ;;  %v4074_v20 = vadd.f32 %v8795_v35, %v3555_v32  ;;  %vm4273_vm10 = vcmp.eq.s32.totalorder %v10742_v58, %v12228_v14  ;;  %v8859_v53 = vsel %vm3754_vm9, 1.0, %v9775_v16  ;;  %vm575_vm11 = vcmp.eq.s32.totalorder %v10951_v11, %v12094_v13 }
 0x308   : > { %v2582_v61 = vadd.f32 %v8473_v63, %v2064_v26  ;;  %vm1093_vm12 = vcmp.eq.s32.totalorder %v10951_v11, %v12097_v51  ;;  %vm4792_vm13 = vcmp.eq.s32.totalorder %v10742_v58, %v12231_v19  ;;  %v8018_v21 = vsel %vm575_vm11, 1.0, %v9775_v16 }
 0x309   : > { %v4593_v25 = vadd.f32 %v8924_v36, %v4074_v20  ;;  %v8147_v33 = vsel %vm1093_vm12, 1.0, %v9775_v16  ;;  %vm1611_vm14 = vcmp.eq.s32.totalorder %v10951_v11, %v12111_v8  ;;  %vm2129_vm15 = vcmp.eq.s32.totalorder %v10951_v11, %v12127_v17 }
 0x30a   : > { %v3101_v2 = vadd.f32 %v8602_v28, %v2582_v61  ;;  %v1477_v29 = vadd.f32 %v8147_v33, %v8018_v21  ;;  %v8276_v10 = vsel %vm1611_vm14, 1.0, %v9775_v16  ;;  %v8404_v39 = vsel %vm2129_vm15, 1.0, %v9775_v16 }
 0x30b   : > { %v5112_v48 = vadd.f32 %v9053_v55, %v4593_v25  ;;  %vm2648_vm0 = vcmp.eq.s32.totalorder %v10951_v11, %v12139_v46  ;;  %v8988_v6 = vsel %vm4273_vm10, 1.0, %v9775_v16  ;;  %vm3166_vm1 = vcmp.eq.s32.totalorder %v10951_v11, %v12150_v7 }
 0x30c   : > { %v3619_v3 = vadd.f32 %v8730_v44, %v3101_v2  ;;  %v1995_v9 = vadd.f32 %v8276_v10, %v1477_v29  ;;  %v9117_v12 = vsel %vm4792_vm13, 1.0, %v9775_v16  ;;  %v8533_v47 = vsel %vm2648_vm0, 1.0, %v9775_v16 }
 0x30d   : > { %5633 = vmatpush.msrb.mxu2 %v5112_v48  ;;  %v8661_v62 = vsel %vm3166_vm1, 1.0, %v9775_v16  ;;  %vm3685_vm2 = vcmp.eq.s32.totalorder %v10951_v11, %v12161_v41  ;;  %vm4204_vm3 = vcmp.eq.s32.totalorder %v10951_v11, %v12175_v38  ;;  %vm4723_vm4 = vcmp.eq.s32.totalorder %v10951_v11, %v12185_v15 }
 0x30e   : > { %v4138_v4 = vadd.f32 %v8859_v53, %v3619_v3  ;;  %v2513_v50 = vadd.f32 %v8404_v39, %v1995_v9  ;;  %v8790_v58 = vsel %vm3685_vm2, 1.0, %v9775_v16  ;;  %vm639_vm5 = vcmp.eq.s32.totalorder %v16658_v56, %v12094_v13 }
 0x30f   : > { %vm1157_vm6 = vcmp.eq.s32.totalorder %v16658_v56, %v12097_v51  ;;  %vm1675_vm7 = vcmp.eq.s32.totalorder %v16658_v56, %v12111_v8  ;;  %v8082_v24 = vsel %vm639_vm5, 1.0, %v9775_v16  ;;  %vm2193_vm8 = vcmp.eq.s32.totalorder %v16658_v56, %v12127_v17 }
 0x310   : > { %v4657_v35 = vadd.f32 %v8988_v6, %v4138_v4  ;;  %v3032_v37 = vadd.f32 %v8533_v47, %v2513_v50  ;;  %v8211_v40 = vsel %vm1157_vm6, 1.0, %v9775_v16  ;;  %v8340_v54 = vsel %vm1675_vm7, 1.0, %v9775_v16 }
 0x311   : > { %v1541_v27 = vadd.f32 %v8211_v40, %v8082_v24  ;;  %vm2712_vm9 = vcmp.eq.s32.totalorder %v16658_v56, %v12139_v46  ;;  %v8919_v32 = vsel %vm4204_vm3, 1.0, %v9775_v16  ;;  %v8468_v36 = vsel %vm2193_vm8, 1.0, %v9775_v16 }
 0x312   : > { %v5176_v31 = vadd.f32 %v9117_v12, %v4657_v35  ;;  %v3550_v59 = vadd.f32 %v8661_v62, %v3032_v37  ;;  %v9048_v63 = vsel %vm4723_vm4, 1.0, %v9775_v16  ;;  %vm3230_vm10 = vcmp.eq.s32.totalorder %v16658_v56, %v12150_v7 }
 0x313   : > { %v2059_v55 = vadd.f32 %v8340_v54, %v1541_v27  ;;  %vm3749_vm11 = vcmp.eq.s32.totalorder %v16658_v56, %v12161_v41  ;;  %v8597_v20 = vsel %vm2712_vm9, 1.0, %v9775_v16  ;;  %v8725_v28 = vsel %vm3230_vm10, 1.0, %v9775_v16 }
 0x314   : > { %5698 = vmatpush.msrb.mxu3 %v5176_v31  ;;  %v4069_v26 = vadd.f32 %v8790_v58, %v3550_v59  ;;  %vm4268_vm12 = vcmp.eq.s32.totalorder %v16658_v56, %v12175_v38  ;;  %v8854_v61 = vsel %vm3749_vm11, 1.0, %v9775_v16  ;;  %vm576_vm13 = vcmp.eq.s32.totalorder %v10951_v11, %v12099_v43 }
 0x315   : > { %v2577_v44 = vadd.f32 %v8468_v36, %v2059_v55  ;;  %vm1094_vm14 = vcmp.eq.s32.totalorder %v10951_v11, %v12101_v22  ;;  %vm4787_vm15 = vcmp.eq.s32.totalorder %v16658_v56, %v12185_v15  ;;  %v8019_v25 = vsel %vm576_vm13, 1.0, %v9775_v16 }
 0x316   : > { %v4588_v53 = vadd.f32 %v8919_v32, %v4069_v26  ;;  %v8148_v21 = vsel %vm1094_vm14, 1.0, %v9775_v16  ;;  %vm1612_vm0 = vcmp.eq.s32.totalorder %v10951_v11, %v12193_v0  ;;  %vm2130_vm1 = vcmp.eq.s32.totalorder %v10951_v11, %v12206_v30 }
 0x317   : > { %v3096_v33 = vadd.f32 %v8597_v20, %v2577_v44  ;;  %v1478_v2 = vadd.f32 %v8148_v21, %v8019_v25  ;;  %v8277_v48 = vsel %vm1612_vm0, 1.0, %v9775_v16  ;;  %v8405_v10 = vsel %vm2130_vm1, 1.0, %v9775_v16  ;;  %v16659_v20 = vld [vmem:[#allocation26_spill] sm:$0xff] }
 0x318   : > { %v5107_v29 = vadd.f32 %v9048_v63, %v4588_v53  ;;  %vm2649_vm2 = vcmp.eq.s32.totalorder %v10951_v11, %v12209_v42  ;;  %v8983_v3 = vsel %vm4268_vm12, 1.0, %v9775_v16  ;;  %vm3167_vm3 = vcmp.eq.s32.totalorder %v10951_v11, %v12215_v23 }
 0x319   : > { %v3614_v39 = vadd.f32 %v8725_v28, %v3096_v33  ;;  %v1996_v6 = vadd.f32 %v8277_v48, %v1478_v2  ;;  %v9112_v9 = vsel %vm4787_vm15, 1.0, %v9775_v16  ;;  %v8534_v12 = vsel %vm2649_vm2, 1.0, %v9775_v16 }
 0x31a   : > { %5504 = vmatpush.msrb.mxu0 %v5107_v29  ;;  %v8662_v47 = vsel %vm3167_vm3, 1.0, %v9775_v16  ;;  %vm3686_vm4 = vcmp.eq.s32.totalorder %v10951_v11, %v12218_v57  ;;  %vm4205_vm5 = vcmp.eq.s32.totalorder %v10951_v11, %v12228_v14  ;;  %vm4724_vm6 = vcmp.eq.s32.totalorder %v10951_v11, %v12231_v19 }
 0x31b   : > { %v4133_v62 = vadd.f32 %v8854_v61, %v3614_v39  ;;  %v2514_v4 = vadd.f32 %v8405_v10, %v1996_v6  ;;  %v8791_v50 = vsel %vm3686_vm4, 1.0, %v9775_v16  ;;  %vm640_vm7 = vcmp.eq.s32.totalorder %v16658_v56, %v12099_v43 }
 0x31c   : > { %vm1158_vm8 = vcmp.eq.s32.totalorder %v16658_v56, %v12101_v22  ;;  %vm1676_vm9 = vcmp.eq.s32.totalorder %v16658_v56, %v12193_v0  ;;  %v8083_v58 = vsel %vm640_vm7, 1.0, %v9775_v16  ;;  %vm2194_vm10 = vcmp.eq.s32.totalorder %v16658_v56, %v12206_v30 }
 0x31d   : > { %v4652_v45 = vadd.f32 %v8983_v3, %v4133_v62  ;;  %v3033_v34 = vadd.f32 %v8534_v12, %v2514_v4  ;;  %v8212_v35 = vsel %vm1158_vm8, 1.0, %v9775_v16  ;;  %v8341_v24 = vsel %vm1676_vm9, 1.0, %v9775_v16 }
 0x31e   : > { %v1542_v37 = vadd.f32 %v8212_v35, %v8083_v58  ;;  %vm2713_vm11 = vcmp.eq.s32.totalorder %v16658_v56, %v12209_v42  ;;  %v8920_v54 = vsel %vm4205_vm5, 1.0, %v9775_v16  ;;  %v8469_v31 = vsel %vm2194_vm10, 1.0, %v9775_v16 }
 0x31f   : > { %v5171_v40 = vadd.f32 %v9112_v9, %v4652_v45  ;;  %v3551_v27 = vadd.f32 %v8662_v47, %v3033_v34  ;;  %v9049_v59 = vsel %vm4724_vm6, 1.0, %v9775_v16  ;;  %vm3231_vm12 = vcmp.eq.s32.totalorder %v16658_v56, %v12215_v23 }
 0x320   : > { %v2060_v32 = vadd.f32 %v8341_v24, %v1542_v37  ;;  %vm3750_vm13 = vcmp.eq.s32.totalorder %v16658_v56, %v12218_v57  ;;  %v8598_v63 = vsel %vm2713_vm11, 1.0, %v9775_v16  ;;  %v8726_v55 = vsel %vm3231_vm12, 1.0, %v9775_v16 }
 0x321   : > { %5569 = vmatpush.msrb.mxu1 %v5171_v40  ;;  %v4070_v36 = vadd.f32 %v8791_v50, %v3551_v27  ;;  %vm4269_vm14 = vcmp.eq.s32.totalorder %v16658_v56, %v12228_v14  ;;  %v8855_v11 = vsel %vm3750_vm13, 1.0, %v9775_v16  ;;  %vm571_vm15 = vcmp.eq.s32.totalorder %v16659_v20, %v12094_v13 }
 0x322   : > { %v2578_v26 = vadd.f32 %v8469_v31, %v2060_v32  ;;  %vm1089_vm0 = vcmp.eq.s32.totalorder %v16659_v20, %v12097_v51  ;;  %vm4788_vm1 = vcmp.eq.s32.totalorder %v16658_v56, %v12231_v19  ;;  %v8014_v44 = vsel %vm571_vm15, 1.0, %v9775_v16  ;;  %v16660_v56 = vld [vmem:[#allocation27_spill] sm:$0xff] }
 0x323   : > { %v4589_v28 = vadd.f32 %v8920_v54, %v4070_v36  ;;  %v8143_v61 = vsel %vm1089_vm0, 1.0, %v9775_v16  ;;  %vm1607_vm2 = vcmp.eq.s32.totalorder %v16659_v20, %v12111_v8  ;;  %vm2125_vm3 = vcmp.eq.s32.totalorder %v16659_v20, %v12127_v17 }
 0x324   : > { %v3097_v53 = vadd.f32 %v8598_v63, %v2578_v26  ;;  %v1473_v25 = vadd.f32 %v8143_v61, %v8014_v44  ;;  %v8272_v33 = vsel %vm1607_vm2, 1.0, %v9775_v16  ;;  %v8400_v2 = vsel %vm2125_vm3, 1.0, %v9775_v16 }
 0x325   : > { %v5108_v21 = vadd.f32 %v9049_v59, %v4589_v28  ;;  %vm2644_vm4 = vcmp.eq.s32.totalorder %v16659_v20, %v12139_v46  ;;  %v8984_v48 = vsel %vm4269_vm14, 1.0, %v9775_v16  ;;  %vm3162_vm5 = vcmp.eq.s32.totalorder %v16659_v20, %v12150_v7 }
 0x326   : > { %v3615_v29 = vadd.f32 %v8726_v55, %v3097_v53  ;;  %v1991_v10 = vadd.f32 %v8272_v33, %v1473_v25  ;;  %v9113_v39 = vsel %vm4788_vm1, 1.0, %v9775_v16  ;;  %v8529_v3 = vsel %vm2644_vm4, 1.0, %v9775_v16 }
 0x327   : > { %5634 = vmatpush.msrb.mxu2 %v5108_v21  ;;  %v8657_v6 = vsel %vm3162_vm5, 1.0, %v9775_v16  ;;  %vm3681_vm6 = vcmp.eq.s32.totalorder %v16659_v20, %v12161_v41  ;;  %vm4200_vm7 = vcmp.eq.s32.totalorder %v16659_v20, %v12175_v38  ;;  %vm4719_vm8 = vcmp.eq.s32.totalorder %v16659_v20, %v12185_v15 }
 0x328   : > { %v4134_v9 = vadd.f32 %v8855_v11, %v3615_v29  ;;  %v2509_v12 = vadd.f32 %v8400_v2, %v1991_v10  ;;  %v8786_v47 = vsel %vm3681_vm6, 1.0, %v9775_v16  ;;  %vm635_vm9 = vcmp.eq.s32.totalorder %v16660_v56, %v12094_v13 }
 0x329   : > { %vm1153_vm10 = vcmp.eq.s32.totalorder %v16660_v56, %v12097_v51  ;;  %vm1671_vm11 = vcmp.eq.s32.totalorder %v16660_v56, %v12111_v8  ;;  %v8078_v50 = vsel %vm635_vm9, 1.0, %v9775_v16  ;;  %vm2189_vm12 = vcmp.eq.s32.totalorder %v16660_v56, %v12127_v17 }
 0x32a   : > { %v4653_v62 = vadd.f32 %v8984_v48, %v4134_v9  ;;  %v3028_v4 = vadd.f32 %v8529_v3, %v2509_v12  ;;  %v8207_v45 = vsel %vm1153_vm10, 1.0, %v9775_v16  ;;  %v8336_v58 = vsel %vm1671_vm11, 1.0, %v9775_v16 }
 0x32b   : > { %v1537_v34 = vadd.f32 %v8207_v45, %v8078_v50  ;;  %vm2708_vm13 = vcmp.eq.s32.totalorder %v16660_v56, %v12139_v46  ;;  %v8915_v24 = vsel %vm4200_vm7, 1.0, %v9775_v16  ;;  %v8464_v40 = vsel %vm2189_vm12, 1.0, %v9775_v16 }
 0x32c   : > { %v5172_v35 = vadd.f32 %v9113_v39, %v4653_v62  ;;  %v3546_v37 = vadd.f32 %v8657_v6, %v3028_v4  ;;  %v9044_v27 = vsel %vm4719_vm8, 1.0, %v9775_v16  ;;  %vm3226_vm14 = vcmp.eq.s32.totalorder %v16660_v56, %v12150_v7 }
 0x32d   : > { %v2055_v54 = vadd.f32 %v8336_v58, %v1537_v34  ;;  %vm3745_vm15 = vcmp.eq.s32.totalorder %v16660_v56, %v12161_v41  ;;  %v8593_v59 = vsel %vm2708_vm13, 1.0, %v9775_v16  ;;  %v8721_v32 = vsel %vm3226_vm14, 1.0, %v9775_v16 }
 0x32e   : > { %5699 = vmatpush.msrb.mxu3 %v5172_v35  ;;  %v4065_v31 = vadd.f32 %v8786_v47, %v3546_v37  ;;  %vm4264_vm0 = vcmp.eq.s32.totalorder %v16660_v56, %v12175_v38  ;;  %v8850_v63 = vsel %vm3745_vm15, 1.0, %v9775_v16  ;;  %vm572_vm1 = vcmp.eq.s32.totalorder %v16659_v20, %v12099_v43 }
 0x32f   : > { %v2573_v36 = vadd.f32 %v8464_v40, %v2055_v54  ;;  %vm1090_vm2 = vcmp.eq.s32.totalorder %v16659_v20, %v12101_v22  ;;  %vm4783_vm3 = vcmp.eq.s32.totalorder %v16660_v56, %v12185_v15  ;;  %v8015_v26 = vsel %vm572_vm1, 1.0, %v9775_v16 }
 0x330   : > { %v4584_v55 = vadd.f32 %v8915_v24, %v4065_v31  ;;  %v8144_v11 = vsel %vm1090_vm2, 1.0, %v9775_v16  ;;  %vm1608_vm4 = vcmp.eq.s32.totalorder %v16659_v20, %v12193_v0  ;;  %vm2126_vm5 = vcmp.eq.s32.totalorder %v16659_v20, %v12206_v30 }
 0x331   : > { %v3092_v28 = vadd.f32 %v8593_v59, %v2573_v36  ;;  %v1474_v44 = vadd.f32 %v8144_v11, %v8015_v26  ;;  %v8273_v53 = vsel %vm1608_vm4, 1.0, %v9775_v16  ;;  %v8401_v25 = vsel %vm2126_vm5, 1.0, %v9775_v16  ;;  %v16661_v59 = vld [vmem:[#allocation28_spill] sm:$0xff] }
 0x332   : > { %v5103_v61 = vadd.f32 %v9044_v27, %v4584_v55  ;;  %vm2645_vm6 = vcmp.eq.s32.totalorder %v16659_v20, %v12209_v42  ;;  %v8979_v33 = vsel %vm4264_vm0, 1.0, %v9775_v16  ;;  %vm3163_vm7 = vcmp.eq.s32.totalorder %v16659_v20, %v12215_v23 }
 0x333   : > { %v3610_v21 = vadd.f32 %v8721_v32, %v3092_v28  ;;  %v1992_v2 = vadd.f32 %v8273_v53, %v1474_v44  ;;  %v9108_v29 = vsel %vm4783_vm3, 1.0, %v9775_v16  ;;  %v8530_v48 = vsel %vm2645_vm6, 1.0, %v9775_v16 }
 0x334   : > { %5505 = vmatpush.msrb.mxu0 %v5103_v61  ;;  %v8658_v10 = vsel %vm3163_vm7, 1.0, %v9775_v16  ;;  %vm3682_vm8 = vcmp.eq.s32.totalorder %v16659_v20, %v12218_v57  ;;  %vm4201_vm9 = vcmp.eq.s32.totalorder %v16659_v20, %v12228_v14  ;;  %vm4720_vm10 = vcmp.eq.s32.totalorder %v16659_v20, %v12231_v19 }
 0x335   : > { %v4129_v39 = vadd.f32 %v8850_v63, %v3610_v21  ;;  %v2510_v3 = vadd.f32 %v8401_v25, %v1992_v2  ;;  %v8787_v6 = vsel %vm3682_vm8, 1.0, %v9775_v16  ;;  %vm636_vm11 = vcmp.eq.s32.totalorder %v16660_v56, %v12099_v43 }
 0x336   : > { %vm1154_vm12 = vcmp.eq.s32.totalorder %v16660_v56, %v12101_v22  ;;  %vm1672_vm13 = vcmp.eq.s32.totalorder %v16660_v56, %v12193_v0  ;;  %v8079_v47 = vsel %vm636_vm11, 1.0, %v9775_v16  ;;  %vm2190_vm14 = vcmp.eq.s32.totalorder %v16660_v56, %v12206_v30 }
 0x337   : > { %v4648_v9 = vadd.f32 %v8979_v33, %v4129_v39  ;;  %v3029_v12 = vadd.f32 %v8530_v48, %v2510_v3  ;;  %v8208_v62 = vsel %vm1154_vm12, 1.0, %v9775_v16  ;;  %v8337_v50 = vsel %vm1672_vm13, 1.0, %v9775_v16 }
 0x338   : > { %v1538_v4 = vadd.f32 %v8208_v62, %v8079_v47  ;;  %vm2709_vm15 = vcmp.eq.s32.totalorder %v16660_v56, %v12209_v42  ;;  %v8916_v58 = vsel %vm4201_vm9, 1.0, %v9775_v16  ;;  %v8465_v35 = vsel %vm2190_vm14, 1.0, %v9775_v16 }
 0x339   : > { %v5167_v45 = vadd.f32 %v9108_v29, %v4648_v9  ;;  %v3547_v34 = vadd.f32 %v8658_v10, %v3029_v12  ;;  %v9045_v37 = vsel %vm4720_vm10, 1.0, %v9775_v16  ;;  %vm3227_vm0 = vcmp.eq.s32.totalorder %v16660_v56, %v12215_v23 }
 0x33a   : > { %v2056_v24 = vadd.f32 %v8337_v50, %v1538_v4  ;;  %vm3746_vm1 = vcmp.eq.s32.totalorder %v16660_v56, %v12218_v57  ;;  %v8594_v27 = vsel %vm2709_vm15, 1.0, %v9775_v16  ;;  %v8722_v54 = vsel %vm3227_vm0, 1.0, %v9775_v16 }
 0x33b   : > { %5570 = vmatpush.msrb.mxu1 %v5167_v45  ;;  %v4066_v40 = vadd.f32 %v8787_v6, %v3547_v34  ;;  %vm4265_vm2 = vcmp.eq.s32.totalorder %v16660_v56, %v12228_v14  ;;  %v8851_v20 = vsel %vm3746_vm1, 1.0, %v9775_v16  ;;  %vm567_vm3 = vcmp.eq.s32.totalorder %v16661_v59, %v12094_v13 }
 0x33c   : > { %v2574_v31 = vadd.f32 %v8465_v35, %v2056_v24  ;;  %vm1085_vm4 = vcmp.eq.s32.totalorder %v16661_v59, %v12097_v51  ;;  %vm4784_vm5 = vcmp.eq.s32.totalorder %v16660_v56, %v12231_v19  ;;  %v8010_v36 = vsel %vm567_vm3, 1.0, %v9775_v16  ;;  %v16662_v56 = vld [vmem:[#allocation29_spill] sm:$0xff] }
 0x33d   : > { %v4585_v32 = vadd.f32 %v8916_v58, %v4066_v40  ;;  %v8139_v63 = vsel %vm1085_vm4, 1.0, %v9775_v16  ;;  %vm1603_vm6 = vcmp.eq.s32.totalorder %v16661_v59, %v12111_v8  ;;  %vm2121_vm7 = vcmp.eq.s32.totalorder %v16661_v59, %v12127_v17 }
 0x33e   : > { %v3093_v55 = vadd.f32 %v8594_v27, %v2574_v31  ;;  %v1469_v26 = vadd.f32 %v8139_v63, %v8010_v36  ;;  %v8268_v28 = vsel %vm1603_vm6, 1.0, %v9775_v16  ;;  %v8396_v44 = vsel %vm2121_vm7, 1.0, %v9775_v16 }
 0x33f   : > { %v5104_v11 = vadd.f32 %v9045_v37, %v4585_v32  ;;  %vm2640_vm8 = vcmp.eq.s32.totalorder %v16661_v59, %v12139_v46  ;;  %v8980_v53 = vsel %vm4265_vm2, 1.0, %v9775_v16  ;;  %vm3158_vm9 = vcmp.eq.s32.totalorder %v16661_v59, %v12150_v7 }
 0x340   : > { %v3611_v61 = vadd.f32 %v8722_v54, %v3093_v55  ;;  %v1987_v25 = vadd.f32 %v8268_v28, %v1469_v26  ;;  %v9109_v21 = vsel %vm4784_vm5, 1.0, %v9775_v16  ;;  %v8525_v33 = vsel %vm2640_vm8, 1.0, %v9775_v16 }
 0x341   : > { %5635 = vmatpush.msrb.mxu2 %v5104_v11  ;;  %v8653_v2 = vsel %vm3158_vm9, 1.0, %v9775_v16  ;;  %vm3677_vm10 = vcmp.eq.s32.totalorder %v16661_v59, %v12161_v41  ;;  %vm4196_vm11 = vcmp.eq.s32.totalorder %v16661_v59, %v12175_v38  ;;  %vm4715_vm12 = vcmp.eq.s32.totalorder %v16661_v59, %v12185_v15 }
 0x342   : > { %v4130_v29 = vadd.f32 %v8851_v20, %v3611_v61  ;;  %v2505_v48 = vadd.f32 %v8396_v44, %v1987_v25  ;;  %v8782_v10 = vsel %vm3677_vm10, 1.0, %v9775_v16  ;;  %vm631_vm13 = vcmp.eq.s32.totalorder %v16662_v56, %v12094_v13 }
 0x343   : > { %vm1149_vm14 = vcmp.eq.s32.totalorder %v16662_v56, %v12097_v51  ;;  %vm1667_vm15 = vcmp.eq.s32.totalorder %v16662_v56, %v12111_v8  ;;  %v8074_v6 = vsel %vm631_vm13, 1.0, %v9775_v16  ;;  %vm2185_vm0 = vcmp.eq.s32.totalorder %v16662_v56, %v12127_v17 }
 0x344   : > { %v4649_v39 = vadd.f32 %v8980_v53, %v4130_v29  ;;  %v3024_v3 = vadd.f32 %v8525_v33, %v2505_v48  ;;  %v8203_v9 = vsel %vm1149_vm14, 1.0, %v9775_v16  ;;  %v8332_v47 = vsel %vm1667_vm15, 1.0, %v9775_v16 }
 0x345   : > { %v1533_v12 = vadd.f32 %v8203_v9, %v8074_v6  ;;  %vm2704_vm1 = vcmp.eq.s32.totalorder %v16662_v56, %v12139_v46  ;;  %v8911_v50 = vsel %vm4196_vm11, 1.0, %v9775_v16  ;;  %v8460_v45 = vsel %vm2185_vm0, 1.0, %v9775_v16 }
 0x346   : > { %v5168_v62 = vadd.f32 %v9109_v21, %v4649_v39  ;;  %v3542_v4 = vadd.f32 %v8653_v2, %v3024_v3  ;;  %v9040_v34 = vsel %vm4715_vm12, 1.0, %v9775_v16  ;;  %vm3222_vm2 = vcmp.eq.s32.totalorder %v16662_v56, %v12150_v7 }
 0x347   : > { %v2051_v58 = vadd.f32 %v8332_v47, %v1533_v12  ;;  %vm3741_vm3 = vcmp.eq.s32.totalorder %v16662_v56, %v12161_v41  ;;  %v8589_v37 = vsel %vm2704_vm1, 1.0, %v9775_v16  ;;  %v8717_v24 = vsel %vm3222_vm2, 1.0, %v9775_v16 }
 0x348   : > { %5700 = vmatpush.msrb.mxu3 %v5168_v62  ;;  %v4061_v35 = vadd.f32 %v8782_v10, %v3542_v4  ;;  %vm4260_vm4 = vcmp.eq.s32.totalorder %v16662_v56, %v12175_v38  ;;  %v8846_v27 = vsel %vm3741_vm3, 1.0, %v9775_v16  ;;  %vm568_vm5 = vcmp.eq.s32.totalorder %v16661_v59, %v12099_v43 }
 0x349   : > { %v2569_v40 = vadd.f32 %v8460_v45, %v2051_v58  ;;  %vm1086_vm6 = vcmp.eq.s32.totalorder %v16661_v59, %v12101_v22  ;;  %vm4779_vm7 = vcmp.eq.s32.totalorder %v16662_v56, %v12185_v15  ;;  %v8011_v31 = vsel %vm568_vm5, 1.0, %v9775_v16 }
 0x34a   : > { %v4580_v54 = vadd.f32 %v8911_v50, %v4061_v35  ;;  %v8140_v20 = vsel %vm1086_vm6, 1.0, %v9775_v16  ;;  %vm1604_vm8 = vcmp.eq.s32.totalorder %v16661_v59, %v12193_v0  ;;  %vm2122_vm9 = vcmp.eq.s32.totalorder %v16661_v59, %v12206_v30 }
 0x34b   : > { %v3088_v32 = vadd.f32 %v8589_v37, %v2569_v40  ;;  %v1470_v36 = vadd.f32 %v8140_v20, %v8011_v31  ;;  %v8269_v55 = vsel %vm1604_vm8, 1.0, %v9775_v16  ;;  %v8397_v26 = vsel %vm2122_vm9, 1.0, %v9775_v16  ;;  %v16663_v37 = vld [vmem:[#allocation30_spill] sm:$0xff] }
 0x34c   : > { %v5099_v63 = vadd.f32 %v9040_v34, %v4580_v54  ;;  %vm2641_vm10 = vcmp.eq.s32.totalorder %v16661_v59, %v12209_v42  ;;  %v8975_v28 = vsel %vm4260_vm4, 1.0, %v9775_v16  ;;  %vm3159_vm11 = vcmp.eq.s32.totalorder %v16661_v59, %v12215_v23 }
 0x34d   : > { %v3606_v11 = vadd.f32 %v8717_v24, %v3088_v32  ;;  %v1988_v44 = vadd.f32 %v8269_v55, %v1470_v36  ;;  %v9104_v61 = vsel %vm4779_vm7, 1.0, %v9775_v16  ;;  %v8526_v53 = vsel %vm2641_vm10, 1.0, %v9775_v16 }
 0x34e   : > { %5506 = vmatpush.msrb.mxu0 %v5099_v63  ;;  %v8654_v25 = vsel %vm3159_vm11, 1.0, %v9775_v16  ;;  %vm3678_vm12 = vcmp.eq.s32.totalorder %v16661_v59, %v12218_v57  ;;  %vm4197_vm13 = vcmp.eq.s32.totalorder %v16661_v59, %v12228_v14  ;;  %vm4716_vm14 = vcmp.eq.s32.totalorder %v16661_v59, %v12231_v19 }
 0x34f   : > { %v4125_v21 = vadd.f32 %v8846_v27, %v3606_v11  ;;  %v2506_v33 = vadd.f32 %v8397_v26, %v1988_v44  ;;  %v8783_v2 = vsel %vm3678_vm12, 1.0, %v9775_v16  ;;  %vm632_vm15 = vcmp.eq.s32.totalorder %v16662_v56, %v12099_v43 }
 0x350   : > { %vm1150_vm0 = vcmp.eq.s32.totalorder %v16662_v56, %v12101_v22  ;;  %vm1668_vm1 = vcmp.eq.s32.totalorder %v16662_v56, %v12193_v0  ;;  %v8075_v10 = vsel %vm632_vm15, 1.0, %v9775_v16  ;;  %vm2186_vm2 = vcmp.eq.s32.totalorder %v16662_v56, %v12206_v30 }
 0x351   : > { %v4644_v29 = vadd.f32 %v8975_v28, %v4125_v21  ;;  %v3025_v48 = vadd.f32 %v8526_v53, %v2506_v33  ;;  %v8204_v39 = vsel %vm1150_vm0, 1.0, %v9775_v16  ;;  %v8333_v6 = vsel %vm1668_vm1, 1.0, %v9775_v16 }
 0x352   : > { %v1534_v3 = vadd.f32 %v8204_v39, %v8075_v10  ;;  %vm2705_vm3 = vcmp.eq.s32.totalorder %v16662_v56, %v12209_v42  ;;  %v8912_v47 = vsel %vm4197_vm13, 1.0, %v9775_v16  ;;  %v8461_v62 = vsel %vm2186_vm2, 1.0, %v9775_v16 }
 0x353   : > { %v5163_v9 = vadd.f32 %v9104_v61, %v4644_v29  ;;  %v3543_v12 = vadd.f32 %v8654_v25, %v3025_v48  ;;  %v9041_v4 = vsel %vm4716_vm14, 1.0, %v9775_v16  ;;  %vm3223_vm4 = vcmp.eq.s32.totalorder %v16662_v56, %v12215_v23 }
 0x354   : > { %v2052_v50 = vadd.f32 %v8333_v6, %v1534_v3  ;;  %vm3742_vm5 = vcmp.eq.s32.totalorder %v16662_v56, %v12218_v57  ;;  %v8590_v34 = vsel %vm2705_vm3, 1.0, %v9775_v16  ;;  %v8718_v58 = vsel %vm3223_vm4, 1.0, %v9775_v16 }
 0x355   : > { %5571 = vmatpush.msrb.mxu1 %v5163_v9  ;;  %v4062_v45 = vadd.f32 %v8783_v2, %v3543_v12  ;;  %vm4261_vm6 = vcmp.eq.s32.totalorder %v16662_v56, %v12228_v14  ;;  %v8847_v59 = vsel %vm3742_vm5, 1.0, %v9775_v16  ;;  %vm563_vm7 = vcmp.eq.s32.totalorder %v16663_v37, %v12094_v13 }
 0x356   : > { %v2570_v35 = vadd.f32 %v8461_v62, %v2052_v50  ;;  %vm1081_vm8 = vcmp.eq.s32.totalorder %v16663_v37, %v12097_v51  ;;  %vm4780_vm9 = vcmp.eq.s32.totalorder %v16662_v56, %v12231_v19  ;;  %v8006_v40 = vsel %vm563_vm7, 1.0, %v9775_v16  ;;  %v16664_v56 = vld [vmem:[#allocation31_spill] sm:$0xff] }
 0x357   : > { %v4581_v24 = vadd.f32 %v8912_v47, %v4062_v45  ;;  %v8135_v27 = vsel %vm1081_vm8, 1.0, %v9775_v16  ;;  %vm1599_vm10 = vcmp.eq.s32.totalorder %v16663_v37, %v12111_v8  ;;  %vm2117_vm11 = vcmp.eq.s32.totalorder %v16663_v37, %v12127_v17 }
 0x358   : > { %v3089_v54 = vadd.f32 %v8590_v34, %v2570_v35  ;;  %v1465_v31 = vadd.f32 %v8135_v27, %v8006_v40  ;;  %v8264_v32 = vsel %vm1599_vm10, 1.0, %v9775_v16  ;;  %v8392_v36 = vsel %vm2117_vm11, 1.0, %v9775_v16 }
 0x359   : > { %v5100_v20 = vadd.f32 %v9041_v4, %v4581_v24  ;;  %vm2636_vm12 = vcmp.eq.s32.totalorder %v16663_v37, %v12139_v46  ;;  %v8976_v55 = vsel %vm4261_vm6, 1.0, %v9775_v16  ;;  %vm3154_vm13 = vcmp.eq.s32.totalorder %v16663_v37, %v12150_v7 }
 0x35a   : > { %v3607_v63 = vadd.f32 %v8718_v58, %v3089_v54  ;;  %v1983_v26 = vadd.f32 %v8264_v32, %v1465_v31  ;;  %v9105_v11 = vsel %vm4780_vm9, 1.0, %v9775_v16  ;;  %v8521_v28 = vsel %vm2636_vm12, 1.0, %v9775_v16 }
 0x35b   : > { %5636 = vmatpush.msrb.mxu2 %v5100_v20  ;;  %v8649_v44 = vsel %vm3154_vm13, 1.0, %v9775_v16  ;;  %vm3673_vm14 = vcmp.eq.s32.totalorder %v16663_v37, %v12161_v41  ;;  %vm4192_vm15 = vcmp.eq.s32.totalorder %v16663_v37, %v12175_v38  ;;  %vm4711_vm0 = vcmp.eq.s32.totalorder %v16663_v37, %v12185_v15 }
 0x35c   : > { %v4126_v61 = vadd.f32 %v8847_v59, %v3607_v63  ;;  %v2501_v53 = vadd.f32 %v8392_v36, %v1983_v26  ;;  %v8778_v25 = vsel %vm3673_vm14, 1.0, %v9775_v16  ;;  %vm627_vm1 = vcmp.eq.s32.totalorder %v16664_v56, %v12094_v13 }
 0x35d   : > { %vm1145_vm2 = vcmp.eq.s32.totalorder %v16664_v56, %v12097_v51  ;;  %vm1663_vm3 = vcmp.eq.s32.totalorder %v16664_v56, %v12111_v8  ;;  %v8070_v2 = vsel %vm627_vm1, 1.0, %v9775_v16  ;;  %vm2181_vm4 = vcmp.eq.s32.totalorder %v16664_v56, %v12127_v17 }
 0x35e   : > { %v4645_v21 = vadd.f32 %v8976_v55, %v4126_v61  ;;  %v3020_v33 = vadd.f32 %v8521_v28, %v2501_v53  ;;  %v8199_v29 = vsel %vm1145_vm2, 1.0, %v9775_v16  ;;  %v8328_v10 = vsel %vm1663_vm3, 1.0, %v9775_v16 }
 0x35f   : > { %v1529_v48 = vadd.f32 %v8199_v29, %v8070_v2  ;;  %vm2700_vm5 = vcmp.eq.s32.totalorder %v16664_v56, %v12139_v46  ;;  %v8907_v6 = vsel %vm4192_vm15, 1.0, %v9775_v16  ;;  %v8456_v9 = vsel %vm2181_vm4, 1.0, %v9775_v16 }
 0x360   : > { %v5164_v39 = vadd.f32 %v9105_v11, %v4645_v21  ;;  %v3538_v3 = vadd.f32 %v8649_v44, %v3020_v33  ;;  %v9036_v12 = vsel %vm4711_vm0, 1.0, %v9775_v16  ;;  %vm3218_vm6 = vcmp.eq.s32.totalorder %v16664_v56, %v12150_v7 }
 0x361   : > { %v2047_v47 = vadd.f32 %v8328_v10, %v1529_v48  ;;  %vm3737_vm7 = vcmp.eq.s32.totalorder %v16664_v56, %v12161_v41  ;;  %v8585_v4 = vsel %vm2700_vm5, 1.0, %v9775_v16  ;;  %v8713_v50 = vsel %vm3218_vm6, 1.0, %v9775_v16 }
 0x362   : > { %5701 = vmatpush.msrb.mxu3 %v5164_v39  ;;  %v4057_v62 = vadd.f32 %v8778_v25, %v3538_v3  ;;  %vm4256_vm8 = vcmp.eq.s32.totalorder %v16664_v56, %v12175_v38  ;;  %v8842_v34 = vsel %vm3737_vm7, 1.0, %v9775_v16  ;;  %vm564_vm9 = vcmp.eq.s32.totalorder %v16663_v37, %v12099_v43 }
 0x363   : > { %v2565_v45 = vadd.f32 %v8456_v9, %v2047_v47  ;;  %vm1082_vm10 = vcmp.eq.s32.totalorder %v16663_v37, %v12101_v22  ;;  %vm4775_vm11 = vcmp.eq.s32.totalorder %v16664_v56, %v12185_v15  ;;  %v8007_v35 = vsel %vm564_vm9, 1.0, %v9775_v16 }
 0x364   : > { %v4576_v58 = vadd.f32 %v8907_v6, %v4057_v62  ;;  %v8136_v59 = vsel %vm1082_vm10, 1.0, %v9775_v16  ;;  %vm1600_vm12 = vcmp.eq.s32.totalorder %v16663_v37, %v12193_v0  ;;  %vm2118_vm13 = vcmp.eq.s32.totalorder %v16663_v37, %v12206_v30 }
 0x365   : > { %v3084_v24 = vadd.f32 %v8585_v4, %v2565_v45  ;;  %v1466_v40 = vadd.f32 %v8136_v59, %v8007_v35  ;;  %v8265_v54 = vsel %vm1600_vm12, 1.0, %v9775_v16  ;;  %v8393_v31 = vsel %vm2118_vm13, 1.0, %v9775_v16  ;;  %v16665_v4 = vld [vmem:[#allocation32_spill] sm:$0xff] }
 0x366   : > { %v5095_v27 = vadd.f32 %v9036_v12, %v4576_v58  ;;  %vm2637_vm14 = vcmp.eq.s32.totalorder %v16663_v37, %v12209_v42  ;;  %v8971_v32 = vsel %vm4256_vm8, 1.0, %v9775_v16  ;;  %vm3155_vm15 = vcmp.eq.s32.totalorder %v16663_v37, %v12215_v23 }
 0x367   : > { %v3602_v20 = vadd.f32 %v8713_v50, %v3084_v24  ;;  %v1984_v36 = vadd.f32 %v8265_v54, %v1466_v40  ;;  %v9100_v63 = vsel %vm4775_vm11, 1.0, %v9775_v16  ;;  %v8522_v55 = vsel %vm2637_vm14, 1.0, %v9775_v16 }
 0x368   : > { %5507 = vmatpush.msrb.mxu0 %v5095_v27  ;;  %v8650_v26 = vsel %vm3155_vm15, 1.0, %v9775_v16  ;;  %vm3674_vm0 = vcmp.eq.s32.totalorder %v16663_v37, %v12218_v57  ;;  %vm4193_vm1 = vcmp.eq.s32.totalorder %v16663_v37, %v12228_v14  ;;  %vm4712_vm2 = vcmp.eq.s32.totalorder %v16663_v37, %v12231_v19 }
 0x369   : > { %v4121_v11 = vadd.f32 %v8842_v34, %v3602_v20  ;;  %v2502_v28 = vadd.f32 %v8393_v31, %v1984_v36  ;;  %v8779_v44 = vsel %vm3674_vm0, 1.0, %v9775_v16  ;;  %vm628_vm3 = vcmp.eq.s32.totalorder %v16664_v56, %v12099_v43 }
 0x36a   : > { %vm1146_vm4 = vcmp.eq.s32.totalorder %v16664_v56, %v12101_v22  ;;  %vm1664_vm5 = vcmp.eq.s32.totalorder %v16664_v56, %v12193_v0  ;;  %v8071_v25 = vsel %vm628_vm3, 1.0, %v9775_v16  ;;  %vm2182_vm6 = vcmp.eq.s32.totalorder %v16664_v56, %v12206_v30 }
 0x36b   : > { %v4640_v61 = vadd.f32 %v8971_v32, %v4121_v11  ;;  %v3021_v53 = vadd.f32 %v8522_v55, %v2502_v28  ;;  %v8200_v21 = vsel %vm1146_vm4, 1.0, %v9775_v16  ;;  %v8329_v2 = vsel %vm1664_vm5, 1.0, %v9775_v16  ;;  %v5232_v11 = vld [vmem:[#allocation8 + $0xf8] sm:$0xff] }
 0x36c   : > { %v1530_v33 = vadd.f32 %v8200_v21, %v8071_v25  ;;  %vm2701_vm7 = vcmp.eq.s32.totalorder %v16664_v56, %v12209_v42  ;;  %v8908_v10 = vsel %vm4193_vm1, 1.0, %v9775_v16  ;;  %v8457_v39 = vsel %vm2182_vm6, 1.0, %v9775_v16  ;;  %v16666_v28 = vld [vmem:[#allocation33_spill] sm:$0xff]  ;;  %5363 = vmatmul.f32.gmra.mxu1 %v5232_v11  ;;  %5493 = vmatmul.f32.gmra.mxu3 %v5232_v11 }
 0x36d   : > { %v5159_v29 = vadd.f32 %v9100_v63, %v4640_v61  ;;  %v3539_v48 = vadd.f32 %v8650_v26, %v3021_v53  ;;  %v9037_v3 = vsel %vm4712_vm2, 1.0, %v9775_v16  ;;  %vm3219_vm8 = vcmp.eq.s32.totalorder %v16664_v56, %v12215_v23  ;;  %v5231_v26 = vld [vmem:[#allocation8 + $0xf0] sm:$0xff] }
 0x36e   : > { %v2048_v6 = vadd.f32 %v8329_v2, %v1530_v33  ;;  %vm3738_vm9 = vcmp.eq.s32.totalorder %v16664_v56, %v12218_v57  ;;  %v8586_v12 = vsel %vm2701_vm7, 1.0, %v9775_v16  ;;  %v8714_v47 = vsel %vm3219_vm8, 1.0, %v9775_v16  ;;  %5298 = vmatmul.f32.gmra.mxu0 %v5231_v26  ;;  %5428 = vmatmul.f32.gmra.mxu2 %v5231_v26 }
 0x36f   : > { %5572 = vmatpush.msrb.mxu1 %v5159_v29  ;;  %v4058_v9 = vadd.f32 %v8779_v44, %v3539_v48  ;;  %vm4257_vm10 = vcmp.eq.s32.totalorder %v16664_v56, %v12228_v14  ;;  %v8843_v37 = vsel %vm3738_vm9, 1.0, %v9775_v16  ;;  %vm559_vm11 = vcmp.eq.s32.totalorder %v16665_v4, %v12094_v13 }
 0x370   : > { %v2566_v62 = vadd.f32 %v8457_v39, %v2048_v6  ;;  %vm1077_vm12 = vcmp.eq.s32.totalorder %v16665_v4, %v12097_v51  ;;  %vm4776_vm13 = vcmp.eq.s32.totalorder %v16664_v56, %v12231_v19  ;;  %v8002_v45 = vsel %vm559_vm11, 1.0, %v9775_v16 }
 0x371   : > { %v4577_v50 = vadd.f32 %v8908_v10, %v4058_v9  ;;  %v8131_v34 = vsel %vm1077_vm12, 1.0, %v9775_v16  ;;  %vm1595_vm14 = vcmp.eq.s32.totalorder %v16665_v4, %v12111_v8  ;;  %vm2113_vm15 = vcmp.eq.s32.totalorder %v16665_v4, %v12127_v17 }
 0x372   : > { %v3085_v58 = vadd.f32 %v8586_v12, %v2566_v62  ;;  %v1461_v35 = vadd.f32 %v8131_v34, %v8002_v45  ;;  %v8260_v24 = vsel %vm1595_vm14, 1.0, %v9775_v16  ;;  %v8388_v40 = vsel %vm2113_vm15, 1.0, %v9775_v16 }
 0x373   : > { %v5096_v59 = vadd.f32 %v9037_v3, %v4577_v50  ;;  %vm2632_vm0 = vcmp.eq.s32.totalorder %v16665_v4, %v12139_v46  ;;  %v8972_v54 = vsel %vm4257_vm10, 1.0, %v9775_v16  ;;  %vm3150_vm1 = vcmp.eq.s32.totalorder %v16665_v4, %v12150_v7 }
 0x374   : > { %v3603_v27 = vadd.f32 %v8714_v47, %v3085_v58  ;;  %v1979_v31 = vadd.f32 %v8260_v24, %v1461_v35  ;;  %v9101_v20 = vsel %vm4776_vm13, 1.0, %v9775_v16  ;;  %v8517_v32 = vsel %vm2632_vm0, 1.0, %v9775_v16 }
 0x375   : > { %5637 = vmatpush.msrb.mxu2 %v5096_v59  ;;  %v8645_v36 = vsel %vm3150_vm1, 1.0, %v9775_v16  ;;  %vm3669_vm2 = vcmp.eq.s32.totalorder %v16665_v4, %v12161_v41  ;;  %vm4188_vm3 = vcmp.eq.s32.totalorder %v16665_v4, %v12175_v38  ;;  %vm4707_vm4 = vcmp.eq.s32.totalorder %v16665_v4, %v12185_v15 }
 0x376   : > { %v4122_v63 = vadd.f32 %v8843_v37, %v3603_v27  ;;  %v2497_v55 = vadd.f32 %v8388_v40, %v1979_v31  ;;  %v8774_v56 = vsel %vm3669_vm2, 1.0, %v9775_v16  ;;  %vm623_vm5 = vcmp.eq.s32.totalorder %v16666_v28, %v12094_v13 }
 0x377   : > { %vm1141_vm6 = vcmp.eq.s32.totalorder %v16666_v28, %v12097_v51  ;;  %vm1659_vm7 = vcmp.eq.s32.totalorder %v16666_v28, %v12111_v8  ;;  %v8066_v53 = vsel %vm623_vm5, 1.0, %v9775_v16  ;;  %vm2177_vm8 = vcmp.eq.s32.totalorder %v16666_v28, %v12127_v17 }
 0x378   : > { %v4641_v44 = vadd.f32 %v8972_v54, %v4122_v63  ;;  %v3016_v61 = vadd.f32 %v8517_v32, %v2497_v55  ;;  %v8195_v25 = vsel %vm1141_vm6, 1.0, %v9775_v16  ;;  %v8324_v33 = vsel %vm1659_vm7, 1.0, %v9775_v16 }
 0x379   : > { %v1525_v21 = vadd.f32 %v8195_v25, %v8066_v53  ;;  %vm2696_vm9 = vcmp.eq.s32.totalorder %v16666_v28, %v12139_v46  ;;  %v8903_v48 = vsel %vm4188_vm3, 1.0, %v9775_v16  ;;  %v8452_v10 = vsel %vm2177_vm8, 1.0, %v9775_v16 }
 0x37a   : > { %v5160_v2 = vadd.f32 %v9101_v20, %v4641_v44  ;;  %v3534_v29 = vadd.f32 %v8645_v36, %v3016_v61  ;;  %v9032_v39 = vsel %vm4707_vm4, 1.0, %v9775_v16  ;;  %vm3214_vm10 = vcmp.eq.s32.totalorder %v16666_v28, %v12150_v7 }
 0x37b   : > { %v2043_v3 = vadd.f32 %v8324_v33, %v1525_v21  ;;  %vm3733_vm11 = vcmp.eq.s32.totalorder %v16666_v28, %v12161_v41  ;;  %v8581_v9 = vsel %vm2696_vm9, 1.0, %v9775_v16  ;;  %v8709_v12 = vsel %vm3214_vm10, 1.0, %v9775_v16 }
 0x37c   : > { %5702 = vmatpush.msrb.mxu3 %v5160_v2  ;;  %v4053_v6 = vadd.f32 %v8774_v56, %v3534_v29  ;;  %vm4252_vm12 = vcmp.eq.s32.totalorder %v16666_v28, %v12175_v38  ;;  %v8838_v62 = vsel %vm3733_vm11, 1.0, %v9775_v16  ;;  %vm560_vm13 = vcmp.eq.s32.totalorder %v16665_v4, %v12099_v43 }
 0x37d   : > { %v2561_v47 = vadd.f32 %v8452_v10, %v2043_v3  ;;  %vm1078_vm14 = vcmp.eq.s32.totalorder %v16665_v4, %v12101_v22  ;;  %vm4771_vm15 = vcmp.eq.s32.totalorder %v16666_v28, %v12185_v15  ;;  %v8003_v50 = vsel %vm560_vm13, 1.0, %v9775_v16 }
 0x37e   : > { %v4572_v37 = vadd.f32 %v8903_v48, %v4053_v6  ;;  %v8132_v45 = vsel %vm1078_vm14, 1.0, %v9775_v16  ;;  %vm1596_vm0 = vcmp.eq.s32.totalorder %v16665_v4, %v12193_v0  ;;  %vm2114_vm1 = vcmp.eq.s32.totalorder %v16665_v4, %v12206_v30 }
 0x37f   : > { %v3080_v34 = vadd.f32 %v8581_v9, %v2561_v47  ;;  %v1462_v58 = vadd.f32 %v8132_v45, %v8003_v50  ;;  %v8261_v59 = vsel %vm1596_vm0, 1.0, %v9775_v16  ;;  %v8389_v24 = vsel %vm2114_vm1, 1.0, %v9775_v16  ;;  %v16667_v9 = vld [vmem:[#allocation34_spill] sm:$0xff] }
 0x380   : > { %v5091_v35 = vadd.f32 %v9032_v39, %v4572_v37  ;;  %vm2633_vm2 = vcmp.eq.s32.totalorder %v16665_v4, %v12209_v42  ;;  %v8967_v27 = vsel %vm4252_vm12, 1.0, %v9775_v16  ;;  %vm3151_vm3 = vcmp.eq.s32.totalorder %v16665_v4, %v12215_v23 }
 0x381   : > { %v3598_v40 = vadd.f32 %v8709_v12, %v3080_v34  ;;  %v1980_v54 = vadd.f32 %v8261_v59, %v1462_v58  ;;  %v9096_v31 = vsel %vm4771_vm15, 1.0, %v9775_v16  ;;  %v8518_v20 = vsel %vm2633_vm2, 1.0, %v9775_v16 }
 0x382   : > { %5508 = vmatpush.msrb.mxu0 %v5091_v35  ;;  %v8646_v32 = vsel %vm3151_vm3, 1.0, %v9775_v16  ;;  %vm3670_vm4 = vcmp.eq.s32.totalorder %v16665_v4, %v12218_v57  ;;  %vm4189_vm5 = vcmp.eq.s32.totalorder %v16665_v4, %v12228_v14  ;;  %vm4708_vm6 = vcmp.eq.s32.totalorder %v16665_v4, %v12231_v19 }
 0x383   : > { %v4117_v36 = vadd.f32 %v8838_v62, %v3598_v40  ;;  %v2498_v63 = vadd.f32 %v8389_v24, %v1980_v54  ;;  %v8775_v55 = vsel %vm3670_vm4, 1.0, %v9775_v16  ;;  %vm624_vm7 = vcmp.eq.s32.totalorder %v16666_v28, %v12099_v43 }
 0x384   : > { %vm1142_vm8 = vcmp.eq.s32.totalorder %v16666_v28, %v12101_v22  ;;  %vm1660_vm9 = vcmp.eq.s32.totalorder %v16666_v28, %v12193_v0  ;;  %v8067_v56 = vsel %vm624_vm7, 1.0, %v9775_v16  ;;  %vm2178_vm10 = vcmp.eq.s32.totalorder %v16666_v28, %v12206_v30 }
 0x385   : > { %v4636_v26 = vadd.f32 %v8967_v27, %v4117_v36  ;;  %v3017_v11 = vadd.f32 %v8518_v20, %v2498_v63  ;;  %v8196_v44 = vsel %vm1142_vm8, 1.0, %v9775_v16  ;;  %v8325_v53 = vsel %vm1660_vm9, 1.0, %v9775_v16 }
 0x386   : > { %v1526_v61 = vadd.f32 %v8196_v44, %v8067_v56  ;;  %vm2697_vm11 = vcmp.eq.s32.totalorder %v16666_v28, %v12209_v42  ;;  %v8904_v33 = vsel %vm4189_vm5, 1.0, %v9775_v16  ;;  %v8453_v2 = vsel %vm2178_vm10, 1.0, %v9775_v16 }
 0x387   : > { %v5155_v25 = vadd.f32 %v9096_v31, %v4636_v26  ;;  %v3535_v21 = vadd.f32 %v8646_v32, %v3017_v11  ;;  %v9033_v29 = vsel %vm4708_vm6, 1.0, %v9775_v16  ;;  %vm3215_vm12 = vcmp.eq.s32.totalorder %v16666_v28, %v12215_v23 }
 0x388   : > { %v2044_v48 = vadd.f32 %v8325_v53, %v1526_v61  ;;  %vm3734_vm13 = vcmp.eq.s32.totalorder %v16666_v28, %v12218_v57  ;;  %v8582_v39 = vsel %vm2697_vm11, 1.0, %v9775_v16  ;;  %v8710_v3 = vsel %vm3215_vm12, 1.0, %v9775_v16 }
 0x389   : > { %5573 = vmatpush.msrb.mxu1 %v5155_v25  ;;  %v4054_v10 = vadd.f32 %v8775_v55, %v3535_v21  ;;  %vm4253_vm14 = vcmp.eq.s32.totalorder %v16666_v28, %v12228_v14  ;;  %v8839_v4 = vsel %vm3734_vm13, 1.0, %v9775_v16  ;;  %vm555_vm15 = vcmp.eq.s32.totalorder %v16667_v9, %v12094_v13 }
 0x38a   : > { %v2562_v6 = vadd.f32 %v8453_v2, %v2044_v48  ;;  %vm1073_vm0 = vcmp.eq.s32.totalorder %v16667_v9, %v12097_v51  ;;  %vm4772_vm1 = vcmp.eq.s32.totalorder %v16666_v28, %v12231_v19  ;;  %v7998_v47 = vsel %vm555_vm15, 1.0, %v9775_v16  ;;  %v16668_v28 = vld [vmem:[#allocation35_spill] sm:$0xff] }
 0x38b   : > { %v4573_v12 = vadd.f32 %v8904_v33, %v4054_v10  ;;  %v8127_v62 = vsel %vm1073_vm0, 1.0, %v9775_v16  ;;  %vm1591_vm2 = vcmp.eq.s32.totalorder %v16667_v9, %v12111_v8  ;;  %vm2109_vm3 = vcmp.eq.s32.totalorder %v16667_v9, %v12127_v17 }
 0x38c   : > { %v3081_v37 = vadd.f32 %v8582_v39, %v2562_v6  ;;  %v1457_v50 = vadd.f32 %v8127_v62, %v7998_v47  ;;  %v8256_v34 = vsel %vm1591_vm2, 1.0, %v9775_v16  ;;  %v8384_v58 = vsel %vm2109_vm3, 1.0, %v9775_v16 }
 0x38d   : > { %v5092_v45 = vadd.f32 %v9033_v29, %v4573_v12  ;;  %vm2628_vm4 = vcmp.eq.s32.totalorder %v16667_v9, %v12139_v46  ;;  %v8968_v59 = vsel %vm4253_vm14, 1.0, %v9775_v16  ;;  %vm3146_vm5 = vcmp.eq.s32.totalorder %v16667_v9, %v12150_v7 }
 0x38e   : > { %v3599_v35 = vadd.f32 %v8710_v3, %v3081_v37  ;;  %v1975_v24 = vadd.f32 %v8256_v34, %v1457_v50  ;;  %v9097_v40 = vsel %vm4772_vm1, 1.0, %v9775_v16  ;;  %v8513_v27 = vsel %vm2628_vm4, 1.0, %v9775_v16 }
 0x38f   : > { %5638 = vmatpush.msrb.mxu2 %v5092_v45  ;;  %v8641_v54 = vsel %vm3146_vm5, 1.0, %v9775_v16  ;;  %vm3665_vm6 = vcmp.eq.s32.totalorder %v16667_v9, %v12161_v41  ;;  %vm4184_vm7 = vcmp.eq.s32.totalorder %v16667_v9, %v12175_v38  ;;  %vm4703_vm8 = vcmp.eq.s32.totalorder %v16667_v9, %v12185_v15 }
 0x390   : > { %v4118_v31 = vadd.f32 %v8839_v4, %v3599_v35  ;;  %v2493_v20 = vadd.f32 %v8384_v58, %v1975_v24  ;;  %v8770_v32 = vsel %vm3665_vm6, 1.0, %v9775_v16  ;;  %vm619_vm9 = vcmp.eq.s32.totalorder %v16668_v28, %v12094_v13 }
 0x391   : > { %vm1137_vm10 = vcmp.eq.s32.totalorder %v16668_v28, %v12097_v51  ;;  %vm1655_vm11 = vcmp.eq.s32.totalorder %v16668_v28, %v12111_v8  ;;  %v8062_v55 = vsel %vm619_vm9, 1.0, %v9775_v16  ;;  %vm2173_vm12 = vcmp.eq.s32.totalorder %v16668_v28, %v12127_v17 }
 0x392   : > { %v4637_v36 = vadd.f32 %v8968_v59, %v4118_v31  ;;  %v3012_v63 = vadd.f32 %v8513_v27, %v2493_v20  ;;  %v8191_v26 = vsel %vm1137_vm10, 1.0, %v9775_v16  ;;  %v8320_v56 = vsel %vm1655_vm11, 1.0, %v9775_v16 }
 0x393   : > { %v1521_v11 = vadd.f32 %v8191_v26, %v8062_v55  ;;  %vm2692_vm13 = vcmp.eq.s32.totalorder %v16668_v28, %v12139_v46  ;;  %v8899_v53 = vsel %vm4184_vm7, 1.0, %v9775_v16  ;;  %v8448_v25 = vsel %vm2173_vm12, 1.0, %v9775_v16 }
 0x394   : > { %v5156_v44 = vadd.f32 %v9097_v40, %v4637_v36  ;;  %v3530_v61 = vadd.f32 %v8641_v54, %v3012_v63  ;;  %v9028_v21 = vsel %vm4703_vm8, 1.0, %v9775_v16  ;;  %vm3210_vm14 = vcmp.eq.s32.totalorder %v16668_v28, %v12150_v7 }
 0x395   : > { %v2039_v33 = vadd.f32 %v8320_v56, %v1521_v11  ;;  %vm3729_vm15 = vcmp.eq.s32.totalorder %v16668_v28, %v12161_v41  ;;  %v8577_v29 = vsel %vm2692_vm13, 1.0, %v9775_v16  ;;  %v8705_v48 = vsel %vm3210_vm14, 1.0, %v9775_v16 }
 0x396   : > { %5703 = vmatpush.msrb.mxu3 %v5156_v44  ;;  %v4049_v2 = vadd.f32 %v8770_v32, %v3530_v61  ;;  %vm4248_vm0 = vcmp.eq.s32.totalorder %v16668_v28, %v12175_v38  ;;  %v8834_v39 = vsel %vm3729_vm15, 1.0, %v9775_v16  ;;  %vm556_vm1 = vcmp.eq.s32.totalorder %v16667_v9, %v12099_v43 }
 0x397   : > { %v2557_v10 = vadd.f32 %v8448_v25, %v2039_v33  ;;  %vm1074_vm2 = vcmp.eq.s32.totalorder %v16667_v9, %v12101_v22  ;;  %vm4767_vm3 = vcmp.eq.s32.totalorder %v16668_v28, %v12185_v15  ;;  %v7999_v6 = vsel %vm556_vm1, 1.0, %v9775_v16 }
 0x398   : > { %v4568_v3 = vadd.f32 %v8899_v53, %v4049_v2  ;;  %v8128_v4 = vsel %vm1074_vm2, 1.0, %v9775_v16  ;;  %vm1592_vm4 = vcmp.eq.s32.totalorder %v16667_v9, %v12193_v0  ;;  %vm2110_vm5 = vcmp.eq.s32.totalorder %v16667_v9, %v12206_v30 }
 0x399   : > { %v3076_v12 = vadd.f32 %v8577_v29, %v2557_v10  ;;  %v1458_v47 = vadd.f32 %v8128_v4, %v7999_v6  ;;  %v8257_v37 = vsel %vm1592_vm4, 1.0, %v9775_v16  ;;  %v8385_v50 = vsel %vm2110_vm5, 1.0, %v9775_v16 }
 0x39a   : > { %v5087_v62 = vadd.f32 %v9028_v21, %v4568_v3  ;;  %vm2629_vm6 = vcmp.eq.s32.totalorder %v16667_v9, %v12209_v42  ;;  %v8963_v34 = vsel %vm4248_vm0, 1.0, %v9775_v16  ;;  %vm3147_vm7 = vcmp.eq.s32.totalorder %v16667_v9, %v12215_v23 }
 0x39b   : > { %v3594_v45 = vadd.f32 %v8705_v48, %v3076_v12  ;;  %v1976_v58 = vadd.f32 %v8257_v37, %v1458_v47  ;;  %v9092_v35 = vsel %vm4767_vm3, 1.0, %v9775_v16  ;;  %v8514_v59 = vsel %vm2629_vm6, 1.0, %v9775_v16 }
 0x39c   : > { %5509 = vmatpush.msrb.mxu0 %v5087_v62  ;;  %v8642_v24 = vsel %vm3147_vm7, 1.0, %v9775_v16  ;;  %vm3666_vm8 = vcmp.eq.s32.totalorder %v16667_v9, %v12218_v57  ;;  %vm4185_vm9 = vcmp.eq.s32.totalorder %v16667_v9, %v12228_v14  ;;  %vm4704_vm10 = vcmp.eq.s32.totalorder %v16667_v9, %v12231_v19 }
 0x39d   : > { %v4113_v40 = vadd.f32 %v8834_v39, %v3594_v45  ;;  %v2494_v27 = vadd.f32 %v8385_v50, %v1976_v58  ;;  %v8771_v54 = vsel %vm3666_vm8, 1.0, %v9775_v16  ;;  %vm620_vm11 = vcmp.eq.s32.totalorder %v16668_v28, %v12099_v43 }
 0x39e   : > { %vm1138_vm12 = vcmp.eq.s32.totalorder %v16668_v28, %v12101_v22  ;;  %vm1656_vm13 = vcmp.eq.s32.totalorder %v16668_v28, %v12193_v0  ;;  %v8063_v32 = vsel %vm620_vm11, 1.0, %v9775_v16  ;;  %vm2174_vm14 = vcmp.eq.s32.totalorder %v16668_v28, %v12206_v30 }
 0x39f   : > { %v4632_v31 = vadd.f32 %v8963_v34, %v4113_v40  ;;  %v3013_v20 = vadd.f32 %v8514_v59, %v2494_v27  ;;  %v8192_v36 = vsel %vm1138_vm12, 1.0, %v9775_v16  ;;  %v8321_v55 = vsel %vm1656_vm13, 1.0, %v9775_v16 }
 0x3a0   : > { %v1522_v63 = vadd.f32 %v8192_v36, %v8063_v32  ;;  %vm2693_vm15 = vcmp.eq.s32.totalorder %v16668_v28, %v12209_v42  ;;  %v8900_v56 = vsel %vm4185_vm9, 1.0, %v9775_v16  ;;  %v8449_v44 = vsel %vm2174_vm14, 1.0, %v9775_v16 }
 0x3a1   : > { %v5151_v26 = vadd.f32 %v9092_v35, %v4632_v31  ;;  %v3531_v11 = vadd.f32 %v8642_v24, %v3013_v20  ;;  %v9029_v61 = vsel %vm4704_vm10, 1.0, %v9775_v16  ;;  %vm3211_vm0 = vcmp.eq.s32.totalorder %v16668_v28, %v12215_v23 }
 0x3a2   : > { %v2040_v53 = vadd.f32 %v8321_v55, %v1522_v63  ;;  %vm3730_vm1 = vcmp.eq.s32.totalorder %v16668_v28, %v12218_v57  ;;  %v8578_v21 = vsel %vm2693_vm15, 1.0, %v9775_v16  ;;  %v8706_v33 = vsel %vm3211_vm0, 1.0, %v9775_v16 }
 0x3a3   : > { %5574 = vmatpush.msrb.mxu1 %v5151_v26  ;;  %v4050_v25 = vadd.f32 %v8771_v54, %v3531_v11  ;;  %vm4249_vm2 = vcmp.eq.s32.totalorder %v16668_v28, %v12228_v14  ;;  %v8835_v9 = vsel %vm3730_vm1, 1.0, %v9775_v16  ;;  %vm551_vm3 = vcmp.eq.s32.totalorder %v11703_v18, %v12094_v13 }
 0x3a4   : > { %v2558_v2 = vadd.f32 %v8449_v44, %v2040_v53  ;;  %vm1069_vm4 = vcmp.eq.s32.totalorder %v11703_v18, %v12097_v51  ;;  %vm4768_vm5 = vcmp.eq.s32.totalorder %v16668_v28, %v12231_v19  ;;  %v7994_v48 = vsel %vm551_vm3, 1.0, %v9775_v16 }
 0x3a5   : > { %v4569_v29 = vadd.f32 %v8900_v56, %v4050_v25  ;;  %v8123_v10 = vsel %vm1069_vm4, 1.0, %v9775_v16  ;;  %vm1587_vm6 = vcmp.eq.s32.totalorder %v11703_v18, %v12111_v8  ;;  %vm2105_vm7 = vcmp.eq.s32.totalorder %v11703_v18, %v12127_v17 }
 0x3a6   : > { %v3077_v39 = vadd.f32 %v8578_v21, %v2558_v2  ;;  %v1453_v3 = vadd.f32 %v8123_v10, %v7994_v48  ;;  %v8252_v4 = vsel %vm1587_vm6, 1.0, %v9775_v16  ;;  %v8380_v12 = vsel %vm2105_vm7, 1.0, %v9775_v16 }
 0x3a7   : > { %v5088_v6 = vadd.f32 %v9029_v61, %v4569_v29  ;;  %vm2624_vm8 = vcmp.eq.s32.totalorder %v11703_v18, %v12139_v46  ;;  %v8964_v62 = vsel %vm4249_vm2, 1.0, %v9775_v16  ;;  %vm3142_vm9 = vcmp.eq.s32.totalorder %v11703_v18, %v12150_v7 }
 0x3a8   : > { %v3595_v47 = vadd.f32 %v8706_v33, %v3077_v39  ;;  %v1971_v37 = vadd.f32 %v8252_v4, %v1453_v3  ;;  %v9093_v50 = vsel %vm4768_vm5, 1.0, %v9775_v16  ;;  %v8509_v45 = vsel %vm2624_vm8, 1.0, %v9775_v16 }
 0x3a9   : > { %5639 = vmatpush.msrb.mxu2 %v5088_v6  ;;  %v8637_v34 = vsel %vm3142_vm9, 1.0, %v9775_v16  ;;  %vm3661_vm10 = vcmp.eq.s32.totalorder %v11703_v18, %v12161_v41  ;;  %vm4180_vm11 = vcmp.eq.s32.totalorder %v11703_v18, %v12175_v38  ;;  %vm4699_vm12 = vcmp.eq.s32.totalorder %v11703_v18, %v12185_v15 }
 0x3aa   : > { %v4114_v58 = vadd.f32 %v8835_v9, %v3595_v47  ;;  %v2489_v35 = vadd.f32 %v8380_v12, %v1971_v37  ;;  %v8766_v59 = vsel %vm3661_vm10, 1.0, %v9775_v16  ;;  %vm615_vm13 = vcmp.eq.s32.totalorder %v11707_v49, %v12094_v13 }
 0x3ab   : > { %vm1133_vm14 = vcmp.eq.s32.totalorder %v11707_v49, %v12097_v51  ;;  %vm1651_vm15 = vcmp.eq.s32.totalorder %v11707_v49, %v12111_v8  ;;  %v8058_v40 = vsel %vm615_vm13, 1.0, %v9775_v16  ;;  %vm2169_vm0 = vcmp.eq.s32.totalorder %v11707_v49, %v12127_v17 }
 0x3ac   : > { %v4633_v28 = vadd.f32 %v8964_v62, %v4114_v58  ;;  %v3008_v24 = vadd.f32 %v8509_v45, %v2489_v35  ;;  %v8187_v27 = vsel %vm1133_vm14, 1.0, %v9775_v16  ;;  %v8316_v31 = vsel %vm1651_vm15, 1.0, %v9775_v16 }
 0x3ad   : > { %v1517_v54 = vadd.f32 %v8187_v27, %v8058_v40  ;;  %vm2688_vm1 = vcmp.eq.s32.totalorder %v11707_v49, %v12139_v46  ;;  %v8895_v36 = vsel %vm4180_vm11, 1.0, %v9775_v16  ;;  %v8444_v63 = vsel %vm2169_vm0, 1.0, %v9775_v16 }
 0x3ae   : > { %v5152_v20 = vadd.f32 %v9093_v50, %v4633_v28  ;;  %v3526_v32 = vadd.f32 %v8637_v34, %v3008_v24  ;;  %v9024_v55 = vsel %vm4699_vm12, 1.0, %v9775_v16  ;;  %vm3206_vm2 = vcmp.eq.s32.totalorder %v11707_v49, %v12150_v7 }
 0x3af   : > { %v2035_v26 = vadd.f32 %v8316_v31, %v1517_v54  ;;  %vm3725_vm3 = vcmp.eq.s32.totalorder %v11707_v49, %v12161_v41  ;;  %v8573_v56 = vsel %vm2688_vm1, 1.0, %v9775_v16  ;;  %v8701_v44 = vsel %vm3206_vm2, 1.0, %v9775_v16 }
 0x3b0   : > { %5704 = vmatpush.msrb.mxu3 %v5152_v20  ;;  %v4045_v11 = vadd.f32 %v8766_v59, %v3526_v32  ;;  %vm4244_vm4 = vcmp.eq.s32.totalorder %v11707_v49, %v12175_v38  ;;  %v8830_v53 = vsel %vm3725_vm3, 1.0, %v9775_v16  ;;  %vm552_vm5 = vcmp.eq.s32.totalorder %v11703_v18, %v12099_v43 }
 0x3b1   : > { %v2553_v61 = vadd.f32 %v8444_v63, %v2035_v26  ;;  %vm1070_vm6 = vcmp.eq.s32.totalorder %v11703_v18, %v12101_v22  ;;  %vm4763_vm7 = vcmp.eq.s32.totalorder %v11707_v49, %v12185_v15  ;;  %v7995_v21 = vsel %vm552_vm5, 1.0, %v9775_v16 }
 0x3b2   : > { %v4564_v25 = vadd.f32 %v8895_v36, %v4045_v11  ;;  %v8124_v33 = vsel %vm1070_vm6, 1.0, %v9775_v16  ;;  %vm1588_vm8 = vcmp.eq.s32.totalorder %v11703_v18, %v12193_v0  ;;  %vm2106_vm9 = vcmp.eq.s32.totalorder %v11703_v18, %v12206_v30 }
 0x3b3   : > { %v3072_v2 = vadd.f32 %v8573_v56, %v2553_v61  ;;  %v1454_v9 = vadd.f32 %v8124_v33, %v7995_v21  ;;  %v8253_v48 = vsel %vm1588_vm8, 1.0, %v9775_v16  ;;  %v8381_v10 = vsel %vm2106_vm9, 1.0, %v9775_v16 }
 0x3b4   : > { %v5083_v29 = vadd.f32 %v9024_v55, %v4564_v25  ;;  %vm2625_vm10 = vcmp.eq.s32.totalorder %v11703_v18, %v12209_v42  ;;  %v8959_v3 = vsel %vm4244_vm4, 1.0, %v9775_v16  ;;  %vm3143_vm11 = vcmp.eq.s32.totalorder %v11703_v18, %v12215_v23 }
 0x3b5   : > { %v3590_v39 = vadd.f32 %v8701_v44, %v3072_v2  ;;  %v1972_v6 = vadd.f32 %v8253_v48, %v1454_v9  ;;  %v9088_v4 = vsel %vm4763_vm7, 1.0, %v9775_v16  ;;  %v8510_v12 = vsel %vm2625_vm10, 1.0, %v9775_v16 }
 0x3b6   : > { %5510 = vmatpush.msrb.mxu0 %v5083_v29  ;;  %v8638_v47 = vsel %vm3143_vm11, 1.0, %v9775_v16  ;;  %vm3662_vm12 = vcmp.eq.s32.totalorder %v11703_v18, %v12218_v57  ;;  %vm4181_vm13 = vcmp.eq.s32.totalorder %v11703_v18, %v12228_v14  ;;  %vm4700_vm14 = vcmp.eq.s32.totalorder %v11703_v18, %v12231_v19 }
 0x3b7   : > { %v4109_v62 = vadd.f32 %v8830_v53, %v3590_v39  ;;  %v2490_v37 = vadd.f32 %v8381_v10, %v1972_v6  ;;  %v8767_v50 = vsel %vm3662_vm12, 1.0, %v9775_v16  ;;  %vm616_vm15 = vcmp.eq.s32.totalorder %v11707_v49, %v12099_v43 }
 0x3b8   : > { %vm1134_vm0 = vcmp.eq.s32.totalorder %v11707_v49, %v12101_v22  ;;  %vm1652_vm1 = vcmp.eq.s32.totalorder %v11707_v49, %v12193_v0  ;;  %v8059_v58 = vsel %vm616_vm15, 1.0, %v9775_v16  ;;  %vm2170_vm2 = vcmp.eq.s32.totalorder %v11707_v49, %v12206_v30 }
 0x3b9   : > { %v4628_v45 = vadd.f32 %v8959_v3, %v4109_v62  ;;  %v3009_v34 = vadd.f32 %v8510_v12, %v2490_v37  ;;  %v8188_v35 = vsel %vm1134_vm0, 1.0, %v9775_v16  ;;  %v8317_v28 = vsel %vm1652_vm1, 1.0, %v9775_v16 }
 0x3ba   : > { %v1518_v59 = vadd.f32 %v8188_v35, %v8059_v58  ;;  %vm2689_vm3 = vcmp.eq.s32.totalorder %v11707_v49, %v12209_v42  ;;  %v8445_v27 = vsel %vm2170_vm2, 1.0, %v9775_v16  ;;  %v8896_v54 = vsel %vm4181_vm13, 1.0, %v9775_v16 }
 0x3bb   : > { %v5147_v24 = vadd.f32 %v9088_v4, %v4628_v45  ;;  %v3527_v40 = vadd.f32 %v8638_v47, %v3009_v34  ;;  %vm3207_vm4 = vcmp.eq.s32.totalorder %v11707_v49, %v12215_v23  ;;  %vm3726_vm5 = vcmp.eq.s32.totalorder %v11707_v49, %v12218_v57 }
 0x3bc   : > { %v2036_v31 = vadd.f32 %v8317_v28, %v1518_v59  ;;  %v9025_v32 = vsel %vm4700_vm14, 1.0, %v9775_v16  ;;  %v8574_v36 = vsel %vm2689_vm3, 1.0, %v9775_v16  ;;  %vm4245_vm6 = vcmp.eq.s32.totalorder %v11707_v49, %v12228_v14 }
 0x3bd   : > { %5575 = vmatpush.msrb.mxu1 %v5147_v24  ;;  %v4046_v20 = vadd.f32 %v8767_v50, %v3527_v40  ;;  %v8702_v55 = vsel %vm3207_vm4, 1.0, %v9775_v16  ;;  %v8831_v26 = vsel %vm3726_vm5, 1.0, %v9775_v16  ;;  %vm547_vm7 = vcmp.eq.s32.totalorder %v11723_v60, %v12094_v13 }
 0x3be   : > { %v2554_v63 = vadd.f32 %v8445_v27, %v2036_v31  ;;  %vm4764_vm8 = vcmp.eq.s32.totalorder %v11707_v49, %v12231_v19  ;;  %v7990_v18 = vsel %vm547_vm7, 1.0, %v9775_v16  ;;  %vm1065_vm9 = vcmp.eq.s32.totalorder %v11723_v60, %v12097_v51 }
 0x3bf   : > { %v4565_v11 = vadd.f32 %v8896_v54, %v4046_v20  ;;  %v8119_v44 = vsel %vm1065_vm9, 1.0, %v9775_v16  ;;  %vm1583_vm10 = vcmp.eq.s32.totalorder %v11723_v60, %v12111_v8  ;;  %vm2101_vm11 = vcmp.eq.s32.totalorder %v11723_v60, %v12127_v17 }
 0x3c0   : > { %v3073_v56 = vadd.f32 %v8574_v36, %v2554_v63  ;;  %v1449_v53 = vadd.f32 %v8119_v44, %v7990_v18  ;;  %v8248_v25 = vsel %vm1583_vm10, 1.0, %v9775_v16  ;;  %v8376_v21 = vsel %vm2101_vm11, 1.0, %v9775_v16 }
 0x3c1   : > { %v5084_v61 = vadd.f32 %v9025_v32, %v4565_v11  ;;  %vm2620_vm12 = vcmp.eq.s32.totalorder %v11723_v60, %v12139_v46  ;;  %vm3138_vm13 = vcmp.eq.s32.totalorder %v11723_v60, %v12150_v7  ;;  %vm3657_vm14 = vcmp.eq.s32.totalorder %v11723_v60, %v12161_v41 }
 0x3c2   : > { %v3591_v33 = vadd.f32 %v8702_v55, %v3073_v56  ;;  %v8960_v2 = vsel %vm4245_vm6, 1.0, %v9775_v16  ;;  %v9089_v9 = vsel %vm4764_vm8, 1.0, %v9775_v16  ;;  %v1967_v29 = vadd.f32 %v8248_v25, %v1449_v53 }
 0x3c3   : > { %5640 = vmatpush.msrb.mxu2 %v5084_v61  ;;  %v8505_v48 = vsel %vm2620_vm12, 1.0, %v9775_v16  ;;  %v8633_v39 = vsel %vm3138_vm13, 1.0, %v9775_v16  ;;  %vm4176_vm15 = vcmp.eq.s32.totalorder %v11723_v60, %v12175_v38  ;;  %vm611_vm0 = vcmp.eq.s32.totalorder %v11733_v5, %v12094_v13 }
 0x3c4   : > { %v4110_v10 = vadd.f32 %v8831_v26, %v3591_v33  ;;  %v2485_v3 = vadd.f32 %v8376_v21, %v1967_v29  ;;  %v8762_v6 = vsel %vm3657_vm14, 1.0, %v9775_v16  ;;  %vm4695_vm1 = vcmp.eq.s32.totalorder %v11723_v60, %v12185_v15 }
 0x3c5   : > { %v8054_v49 = vsel %vm611_vm0, 1.0, %v9775_v16  ;;  %vm1129_vm2 = vcmp.eq.s32.totalorder %v11733_v5, %v12097_v51  ;;  %vm1647_vm3 = vcmp.eq.s32.totalorder %v11733_v5, %v12111_v8  ;;  %vm2165_vm4 = vcmp.eq.s32.totalorder %v11733_v5, %v12127_v17 }
 0x3c6   : > { %v4629_v4 = vadd.f32 %v8960_v2, %v4110_v10  ;;  %v3004_v12 = vadd.f32 %v8505_v48, %v2485_v3  ;;  %v8891_v47 = vsel %vm4176_vm15, 1.0, %v9775_v16  ;;  %v8183_v62 = vsel %vm1129_vm2, 1.0, %v9775_v16 }
 0x3c7   : > { %v8312_v37 = vsel %vm1647_vm3, 1.0, %v9775_v16  ;;  %v1513_v45 = vadd.f32 %v8183_v62, %v8054_v49  ;;  %vm2684_vm5 = vcmp.eq.s32.totalorder %v11733_v5, %v12139_v46  ;;  %vm3202_vm6 = vcmp.eq.s32.totalorder %v11733_v5, %v12150_v7  ;;  %v14114_v49 = vpop.f32.mrf.mxu0 }
 0x3c8   : > { %v5148_v50 = vadd.f32 %v9089_v9, %v4629_v4  ;;  %v3522_v34 = vadd.f32 %v8633_v39, %v3004_v12  ;;  %v9020_v58 = vsel %vm4695_vm1, 1.0, %v9775_v16  ;;  %v8440_v35 = vsel %vm2165_vm4, 1.0, %v9775_v16  ;;  %16669 = vst [vmem:[#allocation25_spill] sm:$0xff] %v14114_v49  ;;  %v14116_v4 = vpop.f32.mrf.mxu1 }
 0x3c9   : > { %vm3721_vm7 = vcmp.eq.s32.totalorder %v11733_v5, %v12161_v41  ;;  %v2031_v59 = vadd.f32 %v8312_v37, %v1513_v45  ;;  %v8569_v28 = vsel %vm2684_vm5, 1.0, %v9775_v16  ;;  %v8697_v24 = vsel %vm3202_vm6, 1.0, %v9775_v16  ;;  %16670 = vst [vmem:[#allocation26_spill] sm:$0xff] %v14116_v4 }
 0x3ca   : > { %5705 = vmatpush.msrb.mxu3 %v5148_v50  ;;  %v8826_v40 = vsel %vm3721_vm7, 1.0, %v9775_v16  ;;  %v4041_v27 = vadd.f32 %v8762_v6, %v3522_v34  ;;  %vm4240_vm8 = vcmp.eq.s32.totalorder %v11733_v5, %v12175_v38  ;;  %vm4759_vm9 = vcmp.eq.s32.totalorder %v11733_v5, %v12185_v15 }
 0x3cb   : > { %vm548_vm10 = vcmp.eq.s32.totalorder %v11723_v60, %v12099_v43  ;;  %v2549_v54 = vadd.f32 %v8440_v35, %v2031_v59  ;;  %vm1066_vm11 = vcmp.eq.s32.totalorder %v11723_v60, %v12101_v22  ;;  %vm1584_vm12 = vcmp.eq.s32.totalorder %v11723_v60, %v12193_v0 }
 0x3cc   : > { %v7991_v31 = vsel %vm548_vm10, 1.0, %v9775_v16  ;;  %v4560_v20 = vadd.f32 %v8891_v47, %v4041_v27  ;;  %v8120_v32 = vsel %vm1066_vm11, 1.0, %v9775_v16  ;;  %v8249_v36 = vsel %vm1584_vm12, 1.0, %v9775_v16 }
 0x3cd   : > { %vm2102_vm13 = vcmp.eq.s32.totalorder %v11723_v60, %v12206_v30  ;;  %v3068_v63 = vadd.f32 %v8569_v28, %v2549_v54  ;;  %v8955_v55 = vsel %vm4240_vm8, 1.0, %v9775_v16  ;;  %v1450_v26 = vadd.f32 %v8120_v32, %v7991_v31 }
 0x3ce   : > { %vm2621_vm14 = vcmp.eq.s32.totalorder %v11723_v60, %v12209_v42  ;;  %v5079_v11 = vadd.f32 %v9020_v58, %v4560_v20  ;;  %v8377_v18 = vsel %vm2102_vm13, 1.0, %v9775_v16  ;;  %vm3139_vm15 = vcmp.eq.s32.totalorder %v11723_v60, %v12215_v23 }
 0x3cf   : > { %vm3658_vm0 = vcmp.eq.s32.totalorder %v11723_v60, %v12218_v57  ;;  %v3586_v56 = vadd.f32 %v8697_v24, %v3068_v63  ;;  %v9084_v44 = vsel %vm4759_vm9, 1.0, %v9775_v16  ;;  %v1968_v61 = vadd.f32 %v8249_v36, %v1450_v26 }
 0x3d0   : > { %v8506_v53 = vsel %vm2621_vm14, 1.0, %v9775_v16  ;;  %5511 = vmatpush.msrb.mxu0 %v5079_v11  ;;  %v8634_v25 = vsel %vm3139_vm15, 1.0, %v9775_v16  ;;  %v8763_v21 = vsel %vm3658_vm0, 1.0, %v9775_v16  ;;  %vm612_vm1 = vcmp.eq.s32.totalorder %v11733_v5, %v12099_v43 }
 0x3d1   : > { %vm1130_vm2 = vcmp.eq.s32.totalorder %v11733_v5, %v12101_v22  ;;  %v4105_v33 = vadd.f32 %v8826_v40, %v3586_v56  ;;  %v2486_v2 = vadd.f32 %v8377_v18, %v1968_v61  ;;  %vm4177_vm3 = vcmp.eq.s32.totalorder %v11723_v60, %v12228_v14  ;;  %v14169_v61 = vpop.f32.mrf.mxu3 }
 0x3d2   : > { %vm4696_vm4 = vcmp.eq.s32.totalorder %v11723_v60, %v12231_v19  ;;  %v8055_v9 = vsel %vm612_vm1, 1.0, %v9775_v16  ;;  %v8184_v29 = vsel %vm1130_vm2, 1.0, %v9775_v16  ;;  %vm1648_vm5 = vcmp.eq.s32.totalorder %v11733_v5, %v12193_v0  ;;  %16672 = vst [vmem:[#allocation28_spill] sm:$0xff] %v14169_v61 }
 0x3d3   : > { %vm2166_vm6 = vcmp.eq.s32.totalorder %v11733_v5, %v12206_v30  ;;  %v4624_v48 = vadd.f32 %v8955_v55, %v4105_v33  ;;  %v3005_v10 = vadd.f32 %v8506_v53, %v2486_v2  ;;  %v1514_v39 = vadd.f32 %v8184_v29, %v8055_v9  ;;  %v14175_v33 = vpop.f32.mrf.mxu0  ;;  %v14177_v2 = vpop.f32.mrf.mxu1 }
 0x3d4   : > { %v8313_v3 = vsel %vm1648_vm5, 1.0, %v9775_v16  ;;  %v8441_v6 = vsel %vm2166_vm6, 1.0, %v9775_v16  ;;  %vm2685_vm7 = vcmp.eq.s32.totalorder %v11733_v5, %v12209_v42  ;;  %vm3203_vm8 = vcmp.eq.s32.totalorder %v11733_v5, %v12215_v23  ;;  %16673 = vst [vmem:[#allocation29_spill] sm:$0xff] %v14175_v33 }
 0x3d5   : > { %vm3722_vm9 = vcmp.eq.s32.totalorder %v11733_v5, %v12218_v57  ;;  %v5143_v12 = vadd.f32 %v9084_v44, %v4624_v48  ;;  %v3523_v47 = vadd.f32 %v8634_v25, %v3005_v10  ;;  %v8892_v62 = vsel %vm4177_vm3, 1.0, %v9775_v16  ;;  %16674 = vst [vmem:[#allocation30_spill] sm:$0xff] %v14177_v2 }
 0x3d6   : > { %v2032_v37 = vadd.f32 %v8313_v3, %v1514_v39  ;;  %v9021_v50 = vsel %vm4696_vm4, 1.0, %v9775_v16  ;;  %v8570_v45 = vsel %vm2685_vm7, 1.0, %v9775_v16  ;;  %v8698_v34 = vsel %vm3203_vm8, 1.0, %v9775_v16 }
 0x3d7   : > { %v8827_v58 = vsel %vm3722_vm9, 1.0, %v9775_v16  ;;  %5576 = vmatpush.msrb.mxu1 %v5143_v12  ;;  %v4042_v35 = vadd.f32 %v8763_v21, %v3523_v47  ;;  %vm4241_vm10 = vcmp.eq.s32.totalorder %v11733_v5, %v12228_v14  ;;  %vm4760_vm11 = vcmp.eq.s32.totalorder %v11733_v5, %v12231_v19  ;;  %v14167_v5 = vpop.f32.mrf.mxu2 }
 0x3d8   : > { %v2550_v59 = vadd.f32 %v8441_v6, %v2032_v37  ;;  %vm543_vm12 = vcmp.eq.s32.totalorder %v10008_v1, %v12094_v13  ;;  %vm1061_vm13 = vcmp.eq.s32.totalorder %v10008_v1, %v12097_v51  ;;  %vm1579_vm14 = vcmp.eq.s32.totalorder %v10008_v1, %v12111_v8  ;;  %16671 = vst [vmem:[#allocation27_spill] sm:$0xff] %v14167_v5 }
 0x3d9   : > { %vm2097_vm15 = vcmp.eq.s32.totalorder %v10008_v1, %v12127_v17  ;;  %v4561_v60 = vadd.f32 %v8892_v62, %v4042_v35  ;;  %v7986_v24 = vsel %vm543_vm12, 1.0, %v9775_v16  ;;  %v8115_v40 = vsel %vm1061_vm13, 1.0, %v9775_v16 }
 0x3da   : > { %v3069_v28 = vadd.f32 %v8570_v45, %v2550_v59  ;;  %v8956_v27 = vsel %vm4241_vm10, 1.0, %v9775_v16  ;;  %v1445_v54 = vadd.f32 %v8115_v40, %v7986_v24  ;;  %v8244_v31 = vsel %vm1579_vm14, 1.0, %v9775_v16 }
 0x3db   : > { %vm2616_vm0 = vcmp.eq.s32.totalorder %v10008_v1, %v12139_v46  ;;  %v5080_v20 = vadd.f32 %v9021_v50, %v4561_v60  ;;  %v8372_v36 = vsel %vm2097_vm15, 1.0, %v9775_v16  ;;  %vm3134_vm1 = vcmp.eq.s32.totalorder %v10008_v1, %v12150_v7  ;;  %v14223_v35 = vpop.f32.mrf.mxu0  ;;  %v14225_v59 = vpop.f32.mrf.mxu1 }
 0x3dc   : > { %v3587_v32 = vadd.f32 %v8698_v34, %v3069_v28  ;;  %v9085_v63 = vsel %vm4760_vm11, 1.0, %v9775_v16  ;;  %v1963_v55 = vadd.f32 %v8244_v31, %v1445_v54  ;;  %v8501_v26 = vsel %vm2616_vm0, 1.0, %v9775_v16  ;;  %v14215_v34 = vpop.f32.mrf.mxu3 }
 0x3dd   : > { %vm3653_vm2 = vcmp.eq.s32.totalorder %v10008_v1, %v12161_v41  ;;  %5641 = vmatpush.msrb.mxu2 %v5080_v20  ;;  %v8629_v18 = vsel %vm3134_vm1, 1.0, %v9775_v16  ;;  %vm4172_vm3 = vcmp.eq.s32.totalorder %v10008_v1, %v12175_v38  ;;  %vm4691_vm4 = vcmp.eq.s32.totalorder %v10008_v1, %v12185_v15  ;;  %16676 = vst [vmem:[#allocation32_spill] sm:$0xff] %v14215_v34 }
 0x3de   : > { %v4106_v11 = vadd.f32 %v8827_v58, %v3587_v32  ;;  %v8758_v56 = vsel %vm3653_vm2, 1.0, %v9775_v16  ;;  %v2481_v44 = vadd.f32 %v8372_v36, %v1963_v55  ;;  %vm607_vm5 = vcmp.eq.s32.totalorder %v11988_v52, %v12094_v13 }
 0x3df   : > { %vm1125_vm6 = vcmp.eq.s32.totalorder %v11988_v52, %v12097_v51  ;;  %v8050_v25 = vsel %vm607_vm5, 1.0, %v9775_v16  ;;  %vm1643_vm7 = vcmp.eq.s32.totalorder %v11988_v52, %v12111_v8  ;;  %vm2161_vm8 = vcmp.eq.s32.totalorder %v11988_v52, %v12127_v17  ;;  %v14213_v45 = vpop.f32.mrf.mxu2 }
 0x3e0   : > { %v4625_v53 = vadd.f32 %v8956_v27, %v4106_v11  ;;  %v8179_v21 = vsel %vm1125_vm6, 1.0, %v9775_v16  ;;  %v3000_v13 = vadd.f32 %v8501_v26, %v2481_v44  ;;  %v8308_v51 = vsel %vm1643_vm7, 1.0, %v9775_v16  ;;  %16675 = vst [vmem:[#allocation31_spill] sm:$0xff] %v14213_v45 }
 0x3e1   : > { %v1509_v9 = vadd.f32 %v8179_v21, %v8050_v25  ;;  %v8436_v48 = vsel %vm2161_vm8, 1.0, %v9775_v16  ;;  %vm2680_vm9 = vcmp.eq.s32.totalorder %v11988_v52, %v12139_v46  ;;  %vm3198_vm10 = vcmp.eq.s32.totalorder %v11988_v52, %v12150_v7 }
 0x3e2   : > { %v5144_v29 = vadd.f32 %v9085_v63, %v4625_v53  ;;  %v3518_v8 = vadd.f32 %v8629_v18, %v3000_v13  ;;  %v8887_v10 = vsel %vm4172_vm3, 1.0, %v9775_v16  ;;  %v9016_v17 = vsel %vm4691_vm4, 1.0, %v9775_v16 }
 0x3e3   : > { %v2027_v39 = vadd.f32 %v8308_v51, %v1509_v9  ;;  %v8565_v3 = vsel %vm2680_vm9, 1.0, %v9775_v16  ;;  %v8693_v46 = vsel %vm3198_vm10, 1.0, %v9775_v16  ;;  %vm3717_vm11 = vcmp.eq.s32.totalorder %v11988_v52, %v12161_v41  ;;  %v14268_v25 = vpop.f32.mrf.mxu0  ;;  %v14270_v21 = vpop.f32.mrf.mxu1 }
 0x3e4   : > { %5706 = vmatpush.msrb.mxu3 %v5144_v29  ;;  %vm544_vm12 = vcmp.eq.s32.totalorder %v10008_v1, %v12099_v43  ;;  %v4037_v7 = vadd.f32 %v8758_v56, %v3518_v8  ;;  %vm4236_vm13 = vcmp.eq.s32.totalorder %v11988_v52, %v12175_v38  ;;  %vm4755_vm14 = vcmp.eq.s32.totalorder %v11988_v52, %v12185_v15  ;;  %v9476_v38 = vld [vmem:[#allocation8] sm:$0xff]  ;;  %v9477_v29 = vld [vmem:[#allocation8 + $0x8] sm:$0xff] }
 0x3e5   : > { %v2545_v6 = vadd.f32 %v8436_v48, %v2027_v39  ;;  %v8822_v12 = vsel %vm3717_vm11, 1.0, %v9775_v16  ;;  %v7987_v47 = vsel %vm544_vm12, 1.0, %v9775_v16  ;;  %vm1062_vm15 = vcmp.eq.s32.totalorder %v10008_v1, %v12101_v22 }
 0x3e6   : > { %vm1580_vm0 = vcmp.eq.s32.totalorder %v10008_v1, %v12193_v0  ;;  %v4556_v41 = vadd.f32 %v8887_v10, %v4037_v7  ;;  %v8116_v37 = vsel %vm1062_vm15, 1.0, %v9775_v16  ;;  %vm2098_vm1 = vcmp.eq.s32.totalorder %v10008_v1, %v12206_v30 }
 0x3e7   : > { %v3064_v62 = vadd.f32 %v8565_v3, %v2545_v6  ;;  %v8245_v50 = vsel %vm1580_vm0, 1.0, %v9775_v16  ;;  %v1446_v58 = vadd.f32 %v8116_v37, %v7987_v47  ;;  %vm2617_vm2 = vcmp.eq.s32.totalorder %v10008_v1, %v12209_v42  ;;  %v14260_v44 = vpop.f32.mrf.mxu2 }
 0x3e8   : > { %vm3135_vm3 = vcmp.eq.s32.totalorder %v10008_v1, %v12215_v23  ;;  %v5075_v60 = vadd.f32 %v9016_v17, %v4556_v41  ;;  %v8373_v24 = vsel %vm2098_vm1, 1.0, %v9775_v16  ;;  %v8951_v40 = vsel %vm4236_vm13, 1.0, %v9775_v16  ;;  %16677 = vst [vmem:[#allocation33_spill] sm:$0xff] %v14260_v44  ;;  %v5234_v44 = vld [vmem:[%s14360_s23 + $0x8] sm:$0xff] }
 0x3e9   : > { %v3582_v28 = vadd.f32 %v8693_v46, %v3064_v62  ;;  %v9080_v27 = vsel %vm4755_vm14, 1.0, %v9775_v16  ;;  %v1964_v54 = vadd.f32 %v8245_v50, %v1446_v58  ;;  %v8502_v20 = vsel %vm2617_vm2, 1.0, %v9775_v16  ;;  %v9479_v62 = vld [vmem:[#allocation8 + $0x18] sm:$0xff] }
 0x3ea   : > { %5512 = vmatpush.msrb.mxu0 %v5075_v60  ;;  %v8630_v32 = vsel %vm3135_vm3, 1.0, %v9775_v16  ;;  %vm3654_vm4 = vcmp.eq.s32.totalorder %v10008_v1, %v12218_v57  ;;  %vm4173_vm5 = vcmp.eq.s32.totalorder %v10008_v1, %v12228_v14  ;;  %vm608_vm6 = vcmp.eq.s32.totalorder %v11988_v52, %v12099_v43 }
 0x3eb   : > { %v4101_v31 = vadd.f32 %v8822_v12, %v3582_v28  ;;  %v2482_v36 = vadd.f32 %v8373_v24, %v1964_v54  ;;  %vm1126_vm7 = vcmp.eq.s32.totalorder %v11988_v52, %v12101_v22  ;;  %5513 = vmatmul.f32.vlgmr.msrb.gmra.mxu0 %v9476_v38  ;;  %v8051_v63 = vsel %vm608_vm6, 1.0, %v9775_v16  ;;  %v14291_v12 = vpop.f32.mrf.mxu0  ;;  %v9481_v28 = vld [vmem:[#allocation8 + $0x28] sm:$0xff] }
 0x3ec   : > { %v8180_v55 = vsel %vm1126_vm7, 1.0, %v9775_v16  ;;  %vm1644_vm8 = vcmp.eq.s32.totalorder %v11988_v52, %v12193_v0  ;;  %vm2162_vm9 = vcmp.eq.s32.totalorder %v11988_v52, %v12206_v30  ;;  %v8759_v22 = vsel %vm3654_vm4, 1.0, %v9775_v16  ;;  %v14262_v0 = vpop.f32.mrf.mxu3 }
 0x3ed   : > { %v4620_v15 = vadd.f32 %v8951_v40, %v4101_v31  ;;  %v3001_v26 = vadd.f32 %v8502_v20, %v2482_v36  ;;  %v1510_v11 = vadd.f32 %v8180_v55, %v8051_v63  ;;  %v8309_v18 = vsel %vm1644_vm8, 1.0, %v9775_v16  ;;  %16678 = vst [vmem:[#allocation34_spill] sm:$0xff] %v14262_v0  ;;  %v9483_v31 = vld [vmem:[#allocation8 + $0x38] sm:$0xff]  ;;  %v9484_v20 = vld [vmem:[#allocation8 + $0x40] sm:$0xff]  ;;  %v9485_v63 = vld [vmem:[#allocation8 + $0x48] sm:$0xff] }
 0x3ee   : > { %v8437_v56 = vsel %vm2162_vm9, 1.0, %v9775_v16  ;;  %vm2681_vm10 = vcmp.eq.s32.totalorder %v11988_v52, %v12209_v42  ;;  %vm4692_vm11 = vcmp.eq.s32.totalorder %v10008_v1, %v12231_v19  ;;  %vm3199_vm12 = vcmp.eq.s32.totalorder %v11988_v52, %v12215_v23  ;;  %v9478_v1 = vld [vmem:[#allocation8 + $0x10] sm:$0xff] }
 0x3ef   : > { %v5139_v43 = vadd.f32 %v9080_v27, %v4620_v15  ;;  %v3519_v53 = vadd.f32 %v8630_v32, %v3001_v26  ;;  %v2028_v30 = vadd.f32 %v8309_v18, %v1510_v11  ;;  %v8888_v42 = vsel %vm4173_vm5, 1.0, %v9775_v16  ;;  %v14287_v46 = vpop.f32.mrf.mxu2  ;;  %v9486_v55 = vld [vmem:[#allocation8 + $0x50] sm:$0xff] }
 0x3f0   : > { %v8566_v13 = vsel %vm2681_vm10, 1.0, %v9775_v16  ;;  %vm3718_vm13 = vcmp.eq.s32.totalorder %v11988_v52, %v12218_v57  ;;  %v9017_v23 = vsel %vm4692_vm11, 1.0, %v9775_v16  ;;  %v8694_v48 = vsel %vm3199_vm12, 1.0, %v9775_v16  ;;  %16679 = vst [vmem:[#allocation35_spill] sm:$0xff] %v14287_v46 }
 0x3f1   : > { %5577 = vmatpush.msrb.mxu1 %v5139_v43  ;;  %v4038_v9 = vadd.f32 %v8759_v22, %v3519_v53  ;;  %v2546_v51 = vadd.f32 %v8437_v56, %v2028_v30  ;;  %vm4237_vm14 = vcmp.eq.s32.totalorder %v11988_v52, %v12228_v14  ;;  %v8823_v17 = vsel %vm3718_vm13, 1.0, %v9775_v16  ;;  %v14293_v14 = vpop.f32.mrf.mxu1  ;;  %v9487_v56 = vld [vmem:[#allocation8 + $0x58] sm:$0xff]  ;;  %v9488_v53 = vld [vmem:[#allocation8 + $0x60] sm:$0xff] }
 0x3f2   : > { %5578 = vmatmul.f32.vlgmr.msrb.gmra.mxu1 %v9477_v29  ;;  %vm4756_vm15 = vcmp.eq.s32.totalorder %v11988_v52, %v12231_v19  ;;  %v8952_v57 = vsel %vm4237_vm14, 1.0, %v9775_v16  ;;  %v9480_v52 = vld [vmem:[#allocation8 + $0x20] sm:$0xff]  ;;  %vm7121_vm0 = vcmask 523264  }
 0x3f3   : > { %v4557_v8 = vadd.f32 %v8888_v42, %v4038_v9  ;;  %v3065_v10 = vadd.f32 %v8566_v13, %v2546_v51  ;;  %5516 = vmatmul.f32.gmra.mxu0 %v9478_v1  ;;  %v9081_v47 = vsel %vm4756_vm15, 1.0, %v9775_v16  ;;  %v14300_v58 = vpop.f32.mrf.mxu0  ;;  %v9482_v16 = vld [vmem:[#allocation8 + $0x30] sm:$0xff] }
 0x3f4   : > { %v14289_v7 = vpop.f32.mrf.mxu3 }
 0x3f5   : > { %v5076_v39 = vadd.f32 %v9017_v23, %v4557_v8  ;;  %v3583_v3 = vadd.f32 %v8694_v48, %v3065_v10  ;;  %16680 = vst [vmem:[#allocation36_spill] sm:$0xff] %v14289_v7  ;;  %v9490_v23 = vld [vmem:[#allocation8 + $0x70] sm:$0xff] }
 0x3f7   : > { %5642 = vmatpush.msrb.mxu2 %v5076_v39  ;;  %v4102_v6 = vadd.f32 %v8823_v17, %v3583_v3  ;;  %v14296_v19 = vpop.f32.mrf.mxu2  ;;  %v9491_v17 = vld [vmem:[#allocation8 + $0x78] sm:$0xff]  ;;  %v9492_v39 = vld [vmem:[#allocation8 + $0x80] sm:$0xff] }
 0x3f8   : > { %5643 = vmatmul.f32.vlgmr.msrb.gmra.mxu2 %v9476_v38 }
 0x3f9   : > { %v4621_v41 = vadd.f32 %v8952_v57, %v4102_v6  ;;  %v14302_v60 = vpop.f32.mrf.mxu1 }
 0x3fa   : > { %5581 = vmatmul.f32.gmra.mxu1 %v9479_v62 }
 0x3fb   : > { %v5140_v37 = vadd.f32 %v9081_v47, %v4621_v41  ;;  %5519 = vmatmul.f32.gmra.mxu0 %v9480_v52  ;;  %v14308_v27 = vpop.f32.mrf.mxu0  ;;  %v9493_v41 = vld [vmem:[#allocation8 + $0x88] sm:$0xff] }
 0x3fc   : > { %v14298_v50 = vpop.f32.mrf.mxu3 }
 0x3fd   : > { %5707 = vmatpush.msrb.mxu3 %v5140_v37 }
 0x3fe   : > { %5708 = vmatmul.f32.vlgmr.msrb.gmra.mxu3 %v9477_v29  ;;  %v9489_v29 = vld [vmem:[#allocation8 + $0x68] sm:$0xff] }
 0x3ff   : > { %v14304_v24 = vpop.f32.mrf.mxu2 }
 0x400   : > { %5646 = vmatmul.f32.gmra.mxu2 %v9478_v1 }
 0x401   : > { %v14310_v54 = vpop.f32.mrf.mxu1 }
 0x402   : > { %5584 = vmatmul.f32.gmra.mxu1 %v9481_v28 }
 0x403   : > { %5522 = vmatmul.f32.gmra.mxu0 %v9482_v16  ;;  %v14316_v38 = vpop.f32.mrf.mxu0 }
 0x404   : > { %v14306_v40 = vpop.f32.mrf.mxu3 }
 0x406   : > { %5711 = vmatmul.f32.gmra.mxu3 %v9479_v62  ;;  %v9494_v62 = vld [vmem:[#allocation8 + $0x90] sm:$0xff] }
 0x407   : > { %v14312_v32 = vpop.f32.mrf.mxu2 }
 0x408   : > { %5649 = vmatmul.f32.gmra.mxu2 %v9480_v52 }
 0x409   : > { %v14318_v15 = vpop.f32.mrf.mxu1 }
 0x40a   : > { %5587 = vmatmul.f32.gmra.mxu1 %v9483_v31 }
 0x40b   : > { %5525 = vmatmul.f32.gmra.mxu0 %v9484_v20  ;;  %v5278_v18 = vpop.f32.mrf.mxu0 }
 0x40c   : > { %v14314_v36 = vpop.f32.mrf.mxu3 }
 0x40e   : > { %5714 = vmatmul.f32.gmra.mxu3 %v9481_v28 }
 0x40f   : > { %v14320_v26 = vpop.f32.mrf.mxu2 }
 0x410   : > { %5652 = vmatmul.f32.gmra.mxu2 %v9482_v16 }
 0x411   : > { %v5343_v43 = vpop.f32.mrf.mxu1 }
 0x412   : > { %5590 = vmatmul.f32.gmra.mxu1 %v9485_v63  ;;  %v14324_v22 = vadd.f32 %v5343_v43, %v5278_v18 }
 0x413   : > { %5528 = vmatmul.f32.gmra.mxu0 %v9486_v55  ;;  %v14328_v9 = vpop.f32.mrf.mxu0 }
 0x414   : > { %v14322_v11 = vpop.f32.mrf.mxu3  ;;  %16681 = vst [vmem:[#allocation37_spill] sm:$0xff] %v14324_v22 }
 0x416   : > { %5717 = vmatmul.f32.gmra.mxu3 %v9483_v31  ;;  %v9495_v31 = vld [vmem:[#allocation8 + $0x98] sm:$0xff] }
 0x417   : > { %v5408_v30 = vpop.f32.mrf.mxu2 }
 0x418   : > { %5655 = vmatmul.f32.gmra.mxu2 %v9484_v20  ;;  %v9496_v20 = vld [vmem:[#allocation8 + $0xa0] sm:$0xff] }
 0x419   : > { %v14330_v51 = vpop.f32.mrf.mxu1 }
 0x41a   : > { %5593 = vmatmul.f32.gmra.mxu1 %v9487_v56 }
 0x41b   : > { %5531 = vmatmul.f32.gmra.mxu0 %v9488_v53  ;;  %v14336_v10 = vpop.f32.mrf.mxu0 }
 0x41c   : > { %v5473_v42 = vpop.f32.mrf.mxu3 }
 0x41d   : > { %v14326_v13 = vadd.f32 %v5473_v42, %v5408_v30 }
 0x41e   : > { %5720 = vmatmul.f32.gmra.mxu3 %v9485_v63 }
 0x41f   : > { %16682 = vst [vmem:[#allocation38_spill] sm:$0xff] %v14326_v13  ;;  %v14332_v48 = vpop.f32.mrf.mxu2 }
 0x420   : > { %5658 = vmatmul.f32.gmra.mxu2 %v9486_v55 }
 0x421   : > { %v14338_v1 = vpop.f32.mrf.mxu1 }
 0x422   : > { %5596 = vmatmul.f32.gmra.mxu1 %v9489_v29 }
 0x423   : > { %5534 = vmatmul.f32.gmra.mxu0 %v9490_v23  ;;  %v14344_v6 = vpop.f32.mrf.mxu0 }
 0x424   : > { %v14334_v8 = vpop.f32.mrf.mxu3 }
 0x426   : > { %5723 = vmatmul.f32.gmra.mxu3 %v9487_v56  ;;  %v9497_v56 = vld [vmem:[#allocation8 + $0xa8] sm:$0xff] }
 0x427   : > { %v14340_v3 = vpop.f32.mrf.mxu2 }
 0x428   : > { %5661 = vmatmul.f32.gmra.mxu2 %v9488_v53  ;;  %v9498_v53 = vld [vmem:[#allocation8 + $0xb0] sm:$0xff] }
 0x429   : > { %v14346_v47 = vpop.f32.mrf.mxu1 }
 0x42a   : > { %5599 = vmatmul.f32.gmra.mxu1 %v9491_v17 }
 0x42b   : > { %5537 = vmatmul.f32.gmra.mxu0 %v9492_v39  ;;  %v5290_v28 = vpop.f32.mrf.mxu0 }
 0x42c   : > { %v14342_v57 = vpop.f32.mrf.mxu3 }
 0x42e   : > { %5726 = vmatmul.f32.gmra.mxu3 %v9489_v29 }
 0x42f   : > { %v14348_v37 = vpop.f32.mrf.mxu2 }
 0x430   : > { %5664 = vmatmul.f32.gmra.mxu2 %v9490_v23 }
 0x431   : > { %v5355_v16 = vpop.f32.mrf.mxu1 }
 0x432   : > { %5602 = vmatmul.f32.gmra.mxu1 %v9493_v41 }
 0x433   : > { %5540 = vmatmul.f32.gmra.mxu0 %v9494_v62  ;;  %v5293_v18 = vpop.f32.mrf.mxu0 }
 0x434   : > { %v14350_v52 = vpop.f32.mrf.mxu3 }
 0x436   : > { %5729 = vmatmul.f32.gmra.mxu3 %v9491_v17  ;;  %v9499_v17 = vld [vmem:[#allocation8 + $0xb8] sm:$0xff] }
 0x437   : > { %v5420_v63 = vpop.f32.mrf.mxu2 }
 0x438   : > { %5667 = vmatmul.f32.gmra.mxu2 %v9492_v39  ;;  %v9500_v39 = vld [vmem:[#allocation8 + $0xc0] sm:$0xff]  ;;  %v5421_v7 = vadd.f32 %v5420_v63, %v5234_v44  ;;  %v14384_v44 = vadd.f32 %v14338_v1, %v14336_v10  ;;  %v14402_v1 = vadd.f32 %v14330_v51, %v14328_v9 }
 0x439   : > { %v5358_v43 = vpop.f32.mrf.mxu1  ;;  %v14417_v9 = vld [vmem:[%s16272_s8 + $0x70] sm:$0xff] }
 0x43a   : > { %5605 = vmatmul.f32.gmra.mxu1 %v9495_v31  ;;  %v14370_v33 = vadd.f32 %v5358_v43, %v5293_v18  ;;  %16690 = vst [vmem:[#allocation46_spill] sm:$0xff] %v14384_v44  ;;  %v9504_v18 = vld [vmem:[#allocation8 + $0xe0] sm:$0xff]  ;;  %v14396_v43 = vadd.f32 %v14350_v52, %v14348_v37  ;;  %v9505_v37 = vld [vmem:[#allocation8 + $0xe8] sm:$0xff]  ;;  %v14434_v52 = vadd.f32 %v14322_v11, %v14320_v26 }
 0x43b   : > { %5543 = vmatmul.f32.gmra.mxu0 %v9496_v20  ;;  %v5296_v29 = vpop.f32.mrf.mxu0  ;;  %16694 = vst [vmem:[#allocation50_spill] sm:$0xff] %v14402_v1  ;;  %v16709_v11 = vld [vmem:[#allocation35_spill] sm:$0xff] }
 0x43c   : > { %v5485_v55 = vpop.f32.mrf.mxu3  ;;  %16686 = vst [vmem:[#allocation42_spill] sm:$0xff] %v14370_v33 }
 0x43d   : > { %16693 = vst [vmem:[#allocation49_spill] sm:$0xff] %v14396_v43 }
 0x43e   : > { %5732 = vmatmul.f32.gmra.mxu3 %v9493_v41  ;;  %16697 = vst [vmem:[#allocation53_spill] sm:$0xff] %v14417_v9 }
 0x43f   : > { %v5423_v30 = vpop.f32.mrf.mxu2  ;;  %16700 = vst [vmem:[#allocation56_spill] sm:$0xff] %v14434_v52 }
 0x440   : > { %5670 = vmatmul.f32.gmra.mxu2 %v9494_v62 }
 0x441   : > { %v5361_v23 = vpop.f32.mrf.mxu1 }
 0x442   : > { %5608 = vmatmul.f32.gmra.mxu1 %v9497_v56  ;;  %v14363_v45 = vadd.f32 %v5361_v23, %v5296_v29  ;;  %v16715_v29 = vld [vmem:[#allocation29_spill] sm:$0xff]  ;;  %v16716_v23 = vld [vmem:[#allocation30_spill] sm:$0xff] }
 0x443   : > { %5546 = vmatmul.f32.gmra.mxu0 %v9498_v53  ;;  %v5299_v61 = vpop.f32.mrf.mxu0 }
 0x444   : > { %v5488_v42 = vpop.f32.mrf.mxu3  ;;  %16683 = vst [vmem:[#allocation39_spill] sm:$0xff] %v14363_v45 }
 0x446   : > { %5735 = vmatmul.f32.gmra.mxu3 %v9495_v31  ;;  %v5233_v31 = vld [vmem:[%s14360_s23] sm:$0xff] }
 0x447   : > { %v5426_v41 = vpop.f32.mrf.mxu2  ;;  %v5291_v34 = vadd.f32 %v5290_v28, %v5233_v31 }
 0x448   : > { %5673 = vmatmul.f32.gmra.mxu2 %v9496_v20  ;;  %v9501_v20 = vld [vmem:[#allocation8 + $0xc8] sm:$0xff] }
 0x449   : > { %v5364_v5 = vpop.f32.mrf.mxu1  ;;  %v14368_v2 = vadd.f32 %v5355_v16, %v5291_v34  ;;  %v14378_v34 = vadd.f32 %v5488_v42, %v5423_v30  ;;  %v16710_v30 = vld [vmem:[#allocation36_spill] sm:$0xff] }
 0x44a   : > { %5611 = vmatmul.f32.gmra.mxu1 %v9499_v17  ;;  %v14365_v0 = vadd.f32 %v5364_v5, %v5299_v61  ;;  %v9776_v5 = vmov 0   ;;  %v9503_v61 = vld [vmem:[#allocation8 + $0xd8] sm:$0xff]  ;;  %v14480_v42 = vadd.f32 %v16710_v30, %v16709_v11 }
 0x44b   : > { %5549 = vmatmul.f32.gmra.mxu0 %v9500_v39  ;;  %16685 = vst [vmem:[#allocation41_spill] sm:$0xff] %v14368_v2  ;;  %9435 = vset.pattern.permute.xlu0 %v9776_v5  ;;  %v5781_v63 = vpack.c.bf16 %v14370_v33, %v14368_v2 }
 0x44c   : > { %v5491_v62 = vpop.f32.mrf.mxu3  ;;  %16684 = vst [vmem:[#allocation40_spill] sm:$0xff] %v14365_v0  ;;  %v5785_v4 = vpack.c.bf16 %v14365_v0, %v14363_v45  ;;  %9437 = vset.pattern.permute.xlu2 %v9776_v5  ;;  %9436 = vset.pattern.permute.xlu1 %v9776_v5 }
 0x44d   : > { %v14374_v46 = vadd.f32 %v5491_v62, %v5426_v41  ;;  %16689 = vst [vmem:[#allocation45_spill] sm:$0xff] %v14378_v34  ;;  %6249 = vperm.xlu0 %9435, %v14417_v9   ;;  %v16719_v41 = vld [vmem:[#allocation34_spill] sm:$0xff] }
 0x44e   : > { %5738 = vmatmul.f32.gmra.mxu3 %v9497_v56  ;;  %v9502_v56 = vld [vmem:[#allocation8 + $0xd0] sm:$0xff]  ;;  %5885 = vmatpush.bf16.msra.mxu0 %v5785_v4  ;;  %v14392_v4 = vadd.f32 %v5485_v55, %v5421_v7  ;;  %v14450_v55 = vadd.f32 %v14314_v36, %v14312_v32  ;;  %v14465_v32 = vadd.f32 %v14225_v59, %v14223_v35  ;;  %v16712_v59 = vld [vmem:[#allocation25_spill] sm:$0xff] }
 0x44f   : > { %v5429_v49 = vpop.f32.mrf.mxu2  ;;  %16687 = vst [vmem:[#allocation43_spill] sm:$0xff] %v14374_v46  ;;  %v14469_v36 = vadd.f32 %v14270_v21, %v14268_v25  ;;  %v16713_v25 = vld [vmem:[#allocation26_spill] sm:$0xff] }
 0x450   : > { %5676 = vmatmul.f32.gmra.mxu2 %v9498_v53  ;;  %16692 = vst [vmem:[#allocation48_spill] sm:$0xff] %v14392_v4  ;;  %v5782_v10 = vpack.c.bf16 %v14378_v34, %v14392_v4  ;;  %v14486_v21 = vadd.f32 %v16713_v25, %v16712_v59  ;;  %v14558_v59 = vld [vmem:[%s16272_s8 + $0x58] sm:$0xff]  ;;  %v14563_v25 = vld [vmem:[%s16272_s8 + $0x10] sm:$0xff] }
 0x451   : > { %16703 = vst [vmem:[#allocation59_spill] sm:$0xff] %v14450_v55 }
 0x452   : > { %5614 = vmatmul.f32.gmra.mxu1 %v9501_v20  ;;  %5886 = vmatpush.bf16.msra.mxu0 %v5781_v63  ;;  %16706 = vst [vmem:[#allocation62_spill] sm:$0xff] %v14465_v32 }
 0x453   : > { %5552 = vmatmul.f32.gmra.mxu0 %v9502_v56  ;;  %16707 = vst [vmem:[#allocation63_spill] sm:$0xff] %v14469_v36 }
 0x454   : > { %v5494_v53 = vpop.f32.mrf.mxu3  ;;  %16711 = vst [vmem:[#allocation35_spill] sm:$0xff] %v14480_v42 }
 0x455   : > { %v14376_v28 = vadd.f32 %v5494_v53, %v5429_v49  ;;  %v14388_v49 = vadd.f32 %v14346_v47, %v14344_v6  ;;  %v14408_v6 = vadd.f32 %v14342_v57, %v14340_v3  ;;  %v14412_v47 = vadd.f32 %v14334_v8, %v14332_v48  ;;  %v9506_v8 = vld [vmem:[#allocation8 + $0xf0] sm:$0xff]  ;;  %16714 = vst [vmem:[#allocation36_spill] sm:$0xff] %v14486_v21 }
 0x456   : > { %5741 = vmatmul.f32.gmra.mxu3 %v9499_v17  ;;  %v14423_v3 = vadd.f32 %v14310_v54, %v14308_v27  ;;  %v14427_v57 = vadd.f32 %v14318_v15, %v14316_v38  ;;  %v5773_v48 = vpack.c.bf16 %v14402_v1, %v14324_v22  ;;  %v14440_v54 = vadd.f32 %v14293_v14, %v14291_v12  ;;  %v9507_v14 = vld [vmem:[#allocation8 + $0xf8] sm:$0xff]  ;;  %v16723_v53 = vld [vmem:[#allocation32_spill] sm:$0xff] }
 0x457   : > { %16688 = vst [vmem:[#allocation44_spill] sm:$0xff] %v14376_v28  ;;  %v5786_v16 = vpack.c.bf16 %v14376_v28, %v14374_v46  ;;  %v5777_v7 = vpack.c.bf16 %v14388_v49, %v14384_v44  ;;  %v5778_v51 = vpack.c.bf16 %v14396_v43, %v14408_v6  ;;  %v5774_v27 = vpack.c.bf16 %v14412_v47, %v14326_v13  ;;  %v14660_v13 = vld [vmem:[#allocation10 + $0x20] sm:$0xff] }
 0x458   : > { %5679 = vmatmul.f32.gmra.mxu2 %v9500_v39  ;;  %16691 = vst [vmem:[#allocation47_spill] sm:$0xff] %v14388_v49  ;;  %v14444_v38 = vadd.f32 %v14302_v60, %v14300_v58  ;;  %v5769_v15 = vpack.c.bf16 %v14427_v57, %v14423_v3  ;;  %v14454_v12 = vadd.f32 %v14306_v40, %v14304_v24  ;;  %v14459_v58 = vld [vmem:[%s16272_s8 + $0x78] sm:$0xff]  ;;  %v16718_v39 = vld [vmem:[#allocation33_spill] sm:$0xff] }
 0x459   : > { %5954 = vmatpush.bf16.msra.mxu1 %v5786_v16  ;;  %16695 = vst [vmem:[#allocation51_spill] sm:$0xff] %v14408_v6  ;;  %5887 = vmatpush.bf16.msra.mxu0 %v5777_v7  ;;  %v5770_v60 = vpack.c.bf16 %v14434_v52, %v14450_v55  ;;  %v14476_v40 = vadd.f32 %v14298_v50, %v14296_v19 }
 0x45a   : > { %5617 = vmatmul.f32.gmra.mxu1 %v9503_v61  ;;  %16696 = vst [vmem:[#allocation52_spill] sm:$0xff] %v14412_v47  ;;  %6254 = vperm.xlu0 %9435, %v14459_v58   ;;  %v5765_v24 = vpack.c.bf16 %v14444_v38, %v14440_v54  ;;  %v14490_v17 = vadd.f32 %v16716_v23, %v16715_v29 }
 0x45b   : > { %5555 = vmatmul.f32.gmra.mxu0 %v9504_v18  ;;  %16698 = vst [vmem:[#allocation54_spill] sm:$0xff] %v14423_v3  ;;  %v5766_v35 = vpack.c.bf16 %v14454_v12, %v14476_v40  ;;  %v5761_v50 = vpack.c.bf16 %v14469_v36, %v14465_v32  ;;  %v14496_v62 = vadd.f32 %v16719_v41, %v16718_v39 }
 0x45c   : > { %16699 = vst [vmem:[#allocation55_spill] sm:$0xff] %v14427_v57  ;;  %v5757_v63 = vpack.c.bf16 %v14490_v17, %v14486_v21 }
 0x45d   : > { %5955 = vmatpush.bf16.msra.mxu1 %v5782_v10  ;;  %5888 = vmatpush.bf16.msra.mxu0 %v5773_v48  ;;  %16701 = vst [vmem:[#allocation57_spill] sm:$0xff] %v14440_v54  ;;  %v5762_v16 = vpack.c.bf16 %v14480_v42, %v14496_v62  ;;  %v16727_v10 = vld [vmem:[#allocation28_spill] sm:$0xff] }
 0x45e   : > { %5744 = vmatmul.f32.gmra.mxu3 %v9501_v20  ;;  %16702 = vst [vmem:[#allocation58_spill] sm:$0xff] %v14444_v38 }
 0x45f   : > { %16704 = vst [vmem:[#allocation60_spill] sm:$0xff] %v14454_v12  ;;  %v14646_v12 = vld [vmem:[#allocation10 + $0x18] sm:$0xff] }
 0x460   : > { %5682 = vmatmul.f32.gmra.mxu2 %v9502_v56  ;;  %16705 = vst [vmem:[#allocation61_spill] sm:$0xff] %v14459_v58  ;;  %v16722_v56 = vld [vmem:[#allocation31_spill] sm:$0xff] }
 0x461   : > { %5956 = vmatpush.bf16.msra.mxu1 %v5778_v51  ;;  %5889 = vmatpush.bf16.msra.mxu0 %v5769_v15  ;;  %16708 = vst [vmem:[#allocation64_spill] sm:$0xff] %v14476_v40  ;;  %v14504_v5 = vadd.f32 %v16723_v53, %v16722_v56  ;;  %v14535_v15 = vld [vmem:[%s16272_s8 + $0x50] sm:$0xff]  ;;  %v14582_v56 = vld [vmem:[%s16272_s8 + $0x48] sm:$0xff] }
 0x462   : > { %5620 = vmatmul.f32.gmra.mxu1 %v9505_v37  ;;  %16717 = vst [vmem:[#allocation25_spill] sm:$0xff] %v14490_v17  ;;  %6229 = vperm.xlu2 %9437, %v14535_v15   ;;  %v14587_v53 = vld [vmem:[%s16272_s8 + $0x30] sm:$0xff] }
 0x463   : > { %5558 = vmatmul.f32.gmra.mxu0 %v9506_v8  ;;  %16720 = vst [vmem:[#allocation26_spill] sm:$0xff] %v14496_v62 }
 0x464   : > { %16724 = vst [vmem:[#allocation30_spill] sm:$0xff] %v14504_v5 }
 0x465   : > { %5957 = vmatpush.bf16.msra.mxu1 %v5774_v27  ;;  %5890 = vmatpush.bf16.msra.mxu0 %v5765_v24  ;;  %v14530_v27 = vld [vmem:[%s16272_s8 + $0x60] sm:$0xff]  ;;  %16730 = vst [vmem:[#allocation32_spill] sm:$0xff] %v14535_v15 }
 0x466   : > { %5747 = vmatmul.f32.gmra.mxu3 %v9503_v61  ;;  %v14509_v61 = vld [vmem:[%s16272_s8 + $0x40] sm:$0xff]  ;;  %16729 = vst [vmem:[#allocation31_spill] sm:$0xff] %v14530_v27  ;;  %6239 = vperm.xlu1 %9436, %v14530_v27   ;;  %v5235_v27 = vld [vmem:[%s14360_s23 + $0x10] sm:$0xff] }
 0x467   : > { %16725 = vst [vmem:[#allocation33_spill] sm:$0xff] %v14509_v61  ;;  %6219 = vperm.xlu0 %9435, %v14509_v61  }
 0x468   : > { %5685 = vmatmul.f32.gmra.mxu2 %v9504_v18  ;;  %v5514_v26 = vpop.f32.mrf.mxu0  ;;  %v16726_v18 = vld [vmem:[#allocation27_spill] sm:$0xff]  ;;  %16733 = vst [vmem:[#allocation65_spill] sm:$0xff] %v14558_v59 }
 0x469   : > { %5958 = vmatpush.bf16.msra.mxu1 %v5770_v60  ;;  %5891 = vmatpush.bf16.msra.mxu0 %v5761_v50  ;;  %v14518_v7 = vadd.f32 %v16727_v10, %v16726_v18  ;;  %16734 = vst [vmem:[#allocation66_spill] sm:$0xff] %v14563_v25 }
 0x46a   : > { %5623 = vmatmul.f32.gmra.mxu1 %v9507_v14  ;;  %6234 = vperm.xlu2 %9437, %v14558_v59   ;;  %16736 = vst [vmem:[#allocation68_spill] sm:$0xff] %v14582_v56 }
 0x46b   : > { %16728 = vst [vmem:[#allocation34_spill] sm:$0xff] %v14518_v7  ;;  %v5758_v51 = vpack.c.bf16 %v14504_v5, %v14518_v7 }
 0x46c   : > { %16745 = vst [vmem:[#allocation77_spill] sm:$0xff] %v14646_v12 }
 0x46d   : > { %5959 = vmatpush.bf16.msra.mxu1 %v5766_v35  ;;  %5892 = vmatpush.bf16.msra.mxu0 %v5757_v63  ;;  %v14553_v35 = vld [vmem:[%s16272_s8 + $0x68] sm:$0xff]  ;;  %16748 = vst [vmem:[#allocation80_spill] sm:$0xff] %v14660_v13 }
 0x46e   : > { %5750 = vmatmul.f32.gmra.mxu3 %v9505_v37  ;;  %v14520_v37 = vld [vmem:[#allocation10] sm:$0xff]  ;;  %16732 = vst [vmem:[#allocation28_spill] sm:$0xff] %v14553_v35  ;;  %6244 = vperm.xlu1 %9436, %v14553_v35  }
 0x46f   : > { %v5579_v19 = vpop.f32.mrf.mxu1 }
 0x470   : > { %v14498_v31 = vadd.f32 %v5579_v19, %v5514_v26  ;;  %5688 = vmatmul.f32.gmra.mxu2 %v9506_v8  ;;  %v14500_v20 = vpop.f32.mrf.mxu0  ;;  %5893 = vmatmul.bf16.vlgmr.msra.gmra.mxu0 %v14520_v37  ;;  %v14540_v26 = vld [vmem:[%s16272_s8 + $0x38] sm:$0xff] }
 0x471   : > { %5960 = vmatpush.bf16.msra.mxu1 %v5762_v16  ;;  %6214 = vperm.xlu0 %9435, %v14540_v26   ;;  %v14572_v19 = vld [vmem:[#allocation10 + $0x8] sm:$0xff]  ;;  %v14592_v16 = vld [vmem:[%s16272_s8 + $0x8] sm:$0xff] }
 0x472   : > { %16721 = vst [vmem:[#allocation29_spill] sm:$0xff] %v14498_v31  ;;  %6209 = vperm.xlu2 %9437, %v14587_v53  }
 0x473   : > { %16737 = vst [vmem:[#allocation69_spill] sm:$0xff] %v14592_v16 }
 0x475   : > { %5961 = vmatpush.bf16.msra.mxu1 %v5758_v51 }
 0x476   : > { %5753 = vmatmul.f32.gmra.mxu3 %v9507_v14  ;;  %6224 = vperm.xlu1 %9436, %v14582_v56  }
 0x477   : > { %v14524_v48 = vpop.f32.mrf.mxu1 }
 0x478   : > { %v5520_v8 = vpop.f32.mrf.mxu0  ;;  %5962 = vmatmul.bf16.vlgmr.msra.gmra.mxu1 %v14520_v37 }
 0x479   : > { %6189 = vperm.xlu0 %9435, %v14563_v25  }
 0x47b   : > { %v5644_v14 = vpop.f32.mrf.mxu2 }
 0x47f   : > { %v5585_v60 = vpop.f32.mrf.mxu1 }
 0x480   : > { %v14546_v24 = vadd.f32 %v5585_v60, %v5520_v8  ;;  %v14548_v11 = vpop.f32.mrf.mxu0  ;;  %5898 = vmatmul.bf16.gmra.mxu0 %v14572_v19  ;;  %v14610_v60 = vld [vmem:[%s16272_s8 + $0x20] sm:$0xff] }
 0x481   : > { %v5709_v30 = vpop.f32.mrf.mxu3  ;;  %6184 = vperm.xlu0 %9435, %v14592_v16   ;;  %6199 = vperm.xlu1 %9436, %v14610_v60  }
 0x482   : > { %16731 = vst [vmem:[#allocation27_spill] sm:$0xff] %v14546_v24  ;;  %v14565_v29 = vadd.f32 %v5709_v30, %v5644_v14  ;;  %v14605_v14 = vld [vmem:[%s16272_s8 + $0x28] sm:$0xff] }
 0x483   : > { %v14569_v23 = vpop.f32.mrf.mxu2  ;;  %6204 = vperm.xlu2 %9437, %v14605_v14  }
 0x484   : > { %16735 = vst [vmem:[#allocation67_spill] sm:$0xff] %v14565_v29 }
 0x487   : > { %v14574_v50 = vpop.f32.mrf.mxu1 }
 0x488   : > { %v5526_v39 = vpop.f32.mrf.mxu0  ;;  %5967 = vmatmul.bf16.gmra.mxu1 %v14572_v19 }
 0x489   : > { %v14577_v41 = vpop.f32.mrf.mxu3 }
 0x48b   : > { %v5650_v63 = vpop.f32.mrf.mxu2 }
 0x48f   : > { %v5591_v18 = vpop.f32.mrf.mxu1 }
 0x490   : > { %v14598_v10 = vadd.f32 %v5591_v18, %v5526_v39  ;;  %v14600_v51 = vpop.f32.mrf.mxu0  ;;  %v14618_v18 = vld [vmem:[#allocation10 + $0x10] sm:$0xff] }
 0x491   : > { %v5715_v8 = vpop.f32.mrf.mxu3  ;;  %16740 = vst [vmem:[#allocation72_spill] sm:$0xff] %v14618_v18  ;;  %5903 = vmatmul.bf16.gmra.mxu0 %v14618_v18 }
 0x492   : > { %16738 = vst [vmem:[#allocation70_spill] sm:$0xff] %v14598_v10  ;;  %v14612_v30 = vadd.f32 %v5715_v8, %v5650_v63  ;;  %v14628_v63 = vld [vmem:[%s16272_s8 + $0x18] sm:$0xff]  ;;  %v14633_v8 = vld [vmem:[%s16272_s8] sm:$0xff] }
 0x493   : > { %v14616_v39 = vpop.f32.mrf.mxu2  ;;  %16741 = vst [vmem:[#allocation73_spill] sm:$0xff] %v14628_v63  ;;  %6194 = vperm.xlu1 %9436, %v14628_v63   ;;  %6179 = vperm.xlu2 %9437, %v14633_v8  }
 0x494   : > { %16739 = vst [vmem:[#allocation71_spill] sm:$0xff] %v14612_v30 }
 0x495   : > { %16742 = vst [vmem:[#allocation74_spill] sm:$0xff] %v14633_v8 }
 0x497   : > { %v14620_v61 = vpop.f32.mrf.mxu1 }
 0x498   : > { %v5532_v35 = vpop.f32.mrf.mxu0  ;;  %5972 = vmatmul.bf16.gmra.mxu1 %v14618_v18 }
 0x499   : > { %v14623_v7 = vpop.f32.mrf.mxu3 }
 0x49b   : > { %v5656_v5 = vpop.f32.mrf.mxu2 }
 0x49f   : > { %v5597_v62 = vpop.f32.mrf.mxu1 }
 0x4a0   : > { %v14638_v21 = vadd.f32 %v5597_v62, %v5532_v35  ;;  %v14640_v42 = vpop.f32.mrf.mxu0 }
 0x4a1   : > { %v5721_v17 = vpop.f32.mrf.mxu3  ;;  %5908 = vmatmul.bf16.gmra.mxu0 %v14646_v12 }
 0x4a2   : > { %16743 = vst [vmem:[#allocation75_spill] sm:$0xff] %v14638_v21  ;;  %v14642_v40 = vadd.f32 %v5721_v17, %v5656_v5 }
 0x4a3   : > { %v14644_v32 = vpop.f32.mrf.mxu2 }
 0x4a4   : > { %16744 = vst [vmem:[#allocation76_spill] sm:$0xff] %v14642_v40 }
 0x4a7   : > { %v14648_v36 = vpop.f32.mrf.mxu1 }
 0x4a8   : > { %v5538_v54 = vpop.f32.mrf.mxu0  ;;  %5977 = vmatmul.bf16.gmra.mxu1 %v14646_v12  ;;  %v14685_v12 = vld [vmem:[#allocation10 + $0x38] sm:$0xff] }
 0x4a9   : > { %v14651_v55 = vpop.f32.mrf.mxu3 }
 0x4ab   : > { %v5662_v38 = vpop.f32.mrf.mxu2 }
 0x4af   : > { %v5603_v62 = vpop.f32.mrf.mxu1 }
 0x4b0   : > { %v14654_v35 = vadd.f32 %v5603_v62, %v5538_v54  ;;  %v5541_v52 = vpop.f32.mrf.mxu0 }
 0x4b1   : > { %v5727_v17 = vpop.f32.mrf.mxu3  ;;  %5913 = vmatmul.bf16.gmra.mxu0 %v14660_v13 }
 0x4b2   : > { %16746 = vst [vmem:[#allocation78_spill] sm:$0xff] %v14654_v35  ;;  %v14656_v5 = vadd.f32 %v5727_v17, %v5662_v38  ;;  %v14670_v17 = vld [vmem:[#allocation10 + $0x28] sm:$0xff] }
 0x4b3   : > { %v14658_v3 = vpop.f32.mrf.mxu2  ;;  %16750 = vst [vmem:[#allocation82_spill] sm:$0xff] %v14670_v17 }
 0x4b4   : > { %16747 = vst [vmem:[#allocation79_spill] sm:$0xff] %v14656_v5 }
 0x4b7   : > { %v5606_v57 = vpop.f32.mrf.mxu1 }
 0x4b8   : > { %v5544_v47 = vpop.f32.mrf.mxu0  ;;  %5982 = vmatmul.bf16.gmra.mxu1 %v14660_v13 }
 0x4b9   : > { %v14663_v22 = vpop.f32.mrf.mxu3 }
 0x4bb   : > { %v5668_v6 = vpop.f32.mrf.mxu2 }
 0x4bf   : > { %v5609_v1 = vpop.f32.mrf.mxu1 }
 0x4c0   : > { %v5547_v54 = vpop.f32.mrf.mxu0 }
 0x4c1   : > { %v5733_v62 = vpop.f32.mrf.mxu3  ;;  %5918 = vmatmul.bf16.gmra.mxu0 %v14670_v17 }
 0x4c2   : > { %v14666_v43 = vadd.f32 %v5733_v62, %v5668_v6  ;;  %v14678_v62 = vld [vmem:[#allocation10 + $0x30] sm:$0xff] }
 0x4c3   : > { %v14668_v38 = vpop.f32.mrf.mxu2  ;;  %16751 = vst [vmem:[#allocation83_spill] sm:$0xff] %v14678_v62 }
 0x4c4   : > { %16749 = vst [vmem:[#allocation81_spill] sm:$0xff] %v14666_v43 }
 0x4c7   : > { %v5612_v44 = vpop.f32.mrf.mxu1 }
 0x4c8   : > { %v5550_v4 = vpop.f32.mrf.mxu0  ;;  %5987 = vmatmul.bf16.gmra.mxu1 %v14670_v17 }
 0x4c9   : > { %v14673_v49 = vpop.f32.mrf.mxu3  ;;  %v5551_v17 = vadd.f32 %v5550_v4, %v5235_v27  ;;  %v14699_v4 = vadd.f32 %v5612_v44, %v5547_v54 }
 0x4cb   : > { %v14675_v28 = vpop.f32.mrf.mxu2  ;;  %16757 = vst [vmem:[#allocation89_spill] sm:$0xff] %v14699_v4 }
 0x4cf   : > { %v5615_v34 = vpop.f32.mrf.mxu1 }
 0x4d0   : > { %v5553_v2 = vpop.f32.mrf.mxu0  ;;  %v14690_v18 = vadd.f32 %v5615_v34, %v5551_v17  ;;  %v14703_v34 = vadd.f32 %v5606_v57, %v5541_v52  ;;  %v14720_v57 = vadd.f32 %v14620_v61, %v14600_v51 }
 0x4d1   : > { %v5739_v46 = vpop.f32.mrf.mxu3  ;;  %5923 = vmatmul.bf16.gmra.mxu0 %v14678_v62 }
 0x4d2   : > { %16754 = vst [vmem:[#allocation86_spill] sm:$0xff] %v14690_v18  ;;  %v5775_v44 = vpack.c.bf16 %v14703_v34, %v14654_v35  ;;  %v5767_v61 = vpack.c.bf16 %v14720_v57, %v14598_v10 }
 0x4d3   : > { %v5677_v6 = vpop.f32.mrf.mxu2  ;;  %16758 = vst [vmem:[#allocation90_spill] sm:$0xff] %v14703_v34 }
 0x4d4   : > { %16760 = vst [vmem:[#allocation92_spill] sm:$0xff] %v14720_v57 }
 0x4d7   : > { %v5618_v0 = vpop.f32.mrf.mxu1 }
 0x4d8   : > { %v5556_v45 = vpop.f32.mrf.mxu0  ;;  %5992 = vmatmul.bf16.gmra.mxu1 %v14678_v62  ;;  %v14692_v16 = vadd.f32 %v5618_v0, %v5553_v2 }
 0x4d9   : > { %v5742_v33 = vpop.f32.mrf.mxu3 }
 0x4da   : > { %16755 = vst [vmem:[#allocation87_spill] sm:$0xff] %v14692_v16  ;;  %v5783_v27 = vpack.c.bf16 %v14692_v16, %v14690_v18  ;;  %v16795_v18 = vld [vmem:[#allocation39_spill] sm:$0xff] }
 0x4db   : > { %v5680_v56 = vpop.f32.mrf.mxu2 }
 0x4df   : > { %v5621_v15 = vpop.f32.mrf.mxu1 }
 0x4e0   : > { %v5559_v58 = vpop.f32.mrf.mxu0  ;;  %v14683_v13 = vadd.f32 %v5621_v15, %v5556_v45  ;;  %v14697_v45 = vadd.f32 %v5609_v1, %v5544_v47  ;;  %v14709_v15 = vadd.f32 %v14648_v36, %v14640_v42  ;;  %v5236_v47 = vld [vmem:[%s14360_s23 + $0x18] sm:$0xff]  ;;  %s17177_s23 = sld [smem:[#allocation174_spill]] }
 0x4e1   : > { %v5745_v59 = vpop.f32.mrf.mxu3  ;;  %5928 = vmatmul.bf16.gmra.mxu0 %v14685_v12  ;;  %v5681_v36 = vadd.f32 %v5680_v56, %v5236_v47 }
 0x4e2   : > { %16752 = vst [vmem:[#allocation84_spill] sm:$0xff] %v14683_v13  ;;  %v5779_v0 = vpack.c.bf16 %v14699_v4, %v14697_v45  ;;  %v5771_v54 = vpack.c.bf16 %v14709_v15, %v14638_v21  ;;  %v16792_v21 = vld [vmem:[#allocation68_spill] sm:$0xff]  ;;  %v14897_v4 = vld [vmem:[#allocation10 + $0x58] sm:$0xff] }
 0x4e3   : > { %v5683_v9 = vpop.f32.mrf.mxu2  ;;  %16756 = vst [vmem:[#allocation88_spill] sm:$0xff] %v14697_v45  ;;  %v14740_v56 = vadd.f32 %v5745_v59, %v5681_v36 }
 0x4e4   : > { %16759 = vst [vmem:[#allocation91_spill] sm:$0xff] %v14709_v15  ;;  %v16793_v15 = vld [vmem:[#allocation83_spill] sm:$0xff] }
 0x4e5   : > { %16765 = vst [vmem:[#allocation97_spill] sm:$0xff] %v14740_v56 }
 0x4e6   : > { %s7800_s17 = scalar_lea.hbm %s17177_s23, %s14353_s28  ;;  %s7790_s28 = scalar_lea.sflag [#allocation4], %s9981_s4 }
 0x4e7   : > { %v5624_v8 = vpop.f32.mrf.mxu1  ;;  %s7804_s5 = sshll.u32 %s7800_s17, 4  ;;  %s9708_s20 = scalar_lea.hbm %s17177_s23, 8  ;;  %s7805_s5 = int_to_ptr.hbm [resolvable:$true] %s7804_s5 }
 0x4e8   : > { %v14687_v63 = vadd.f32 %v5624_v8, %v5559_v58  ;;  %5997 = vmatmul.bf16.gmra.mxu1 %v14685_v12  ;;  %s9702_s22 = sshra.s32 %s7805_s5, 4  ;;  %s9703_s22 = int_to_ptr.hbm [resolvable:$true] %s9702_s22 }
 0x4e9   : > { %v5748_v62 = vpop.f32.mrf.mxu3  ;;  %s9704_s16 = scalar_lea.hbm %s9703_s22, 4  ;;  %p9709_p6 = scmp.lt.s32.totalorder %s9703_s22, %s17177_s23 }
 0x4ea   : > { %16753 = vst [vmem:[#allocation85_spill] sm:$0xff] %v14687_v63  ;;  %v5787_v25 = vpack.c.bf16 %v14687_v63, %v14683_v13  ;;  %p9705_p4 = scmp.ne.s32.totalorder %s9703_s22, %s9704_s16  ;;  %p9710_p10 = scmp.lt.s32.totalorder %s9708_s20, %s9704_s16 }
 0x4eb   : > { %v5686_v58 = vpop.f32.mrf.mxu2 }
 0x4ec   : > { %6023 = vmatpush.bf16.msra.mxu2 %v5787_v25  ;;  %p9706_p1 = pnand %p9705_p4, %p9898_p0  ;;  %p9711_p11 = por %p9710_p10, %p9709_p6 }
 0x4ed   : > { %v14713_v1 = vpop.f32.mrf.mxu0 }
 0x4ee   : > { %p9707_p7 = pneg %p9706_p1 }
 0x4f0   : > { %6024 = vmatpush.bf16.msra.mxu2 %v5783_v27  ;;  %v14728_v27 = vadd.f32 %v5748_v62, %v5683_v9  ;;  %p9712_p12 = pnand %p9711_p11, %p9707_p7 }
 0x4f1   : > { %v5751_v2 = vpop.f32.mrf.mxu3 }
 0x4f2   : > { %v14724_v42 = vadd.f32 %v5751_v2, %v5686_v58  ;;  %16763 = vst [vmem:[#allocation95_spill] sm:$0xff] %v14728_v27  ;;  %v14742_v58 = vadd.f32 %v5742_v33, %v5677_v6  ;;  %v5784_v9 = vpack.c.bf16 %v14728_v27, %v14740_v56  ;;  %v14755_v2 = vadd.f32 %v5739_v46, %v14675_v28  ;;  %v14874_v56 = vld [vmem:[#allocation10 + $0x50] sm:$0xff] }
 0x4f3   : > { %v5689_v25 = vpop.f32.mrf.mxu2  ;;  %v14759_v33 = vadd.f32 %v14673_v49, %v14668_v38  ;;  %v14769_v46 = vadd.f32 %v14663_v22, %v14658_v3  ;;  %v14778_v49 = vadd.f32 %v14651_v55, %v14644_v32  ;;  %v14786_v22 = vadd.f32 %v14623_v7, %v14616_v39 }
 0x4f4   : > { %6025 = vmatpush.bf16.msra.mxu2 %v5779_v0  ;;  %16761 = vst [vmem:[#allocation93_spill] sm:$0xff] %v14724_v42  ;;  %v5780_v59 = vpack.c.bf16 %v14742_v58, %v14755_v2  ;;  %v14794_v55 = vadd.f32 %v14577_v41, %v14569_v23  ;;  %v9777_v23 = vmov 2  }
 0x4f5   : > { %v14716_v8 = vpop.f32.mrf.mxu1  ;;  %v14738_v51 = vpop.f32.mrf.mxu0  ;;  %16766 = vst [vmem:[#allocation98_spill] sm:$0xff] %v14742_v58  ;;  %v5776_v28 = vpack.c.bf16 %v14759_v33, %v14666_v43  ;;  %v5772_v38 = vpack.c.bf16 %v14769_v46, %v14656_v5  ;;  %v5768_v3 = vpack.c.bf16 %v14778_v49, %v14642_v40  ;;  %v5764_v32 = vpack.c.bf16 %v14786_v22, %v14612_v30  ;;  %v16780_v30 = vld [vmem:[#allocation80_spill] sm:$0xff]  ;;  %v14854_v40 = vld [vmem:[#allocation10 + $0x48] sm:$0xff] }
 0x4f6   : > { %16768 = vst [vmem:[#allocation100_spill] sm:$0xff] %v14755_v2  ;;  %v5760_v7 = vpack.c.bf16 %v14794_v55, %v14565_v29  ;;  %9438 = vset.pattern.permute.xlu1 %v9777_v23  ;;  %9439 = vset.pattern.permute.xlu2 %v9777_v23  ;;  %v14862_v5 = vpop.permute.xlu1 %6239  ;;  %v16432_v43 = vmov 1   ;;  %v16785_v2 = vld [vmem:[#allocation53_spill] sm:$0xff]  ;;  %v14871_v58 = vpop.permute.xlu2 %6229 }
 0x4f7   : > { %16769 = vst [vmem:[#allocation101_spill] sm:$0xff] %v14759_v33  ;;  %6973 = vperm.xlu1 %9438, %v14587_v53   ;;  %6978 = vperm.xlu2 %9439, %v14540_v26   ;;  %v16783_v33 = vld [vmem:[#allocation61_spill] sm:$0xff] }
 0x4f8   : > { %6026 = vmatpush.bf16.msra.mxu2 %v5775_v44  ;;  %v14734_v44 = vadd.f32 %v14574_v50, %v14548_v11  ;;  %v14750_v11 = vadd.f32 %v14524_v48, %v14500_v20  ;;  %16770 = vst [vmem:[#allocation102_spill] sm:$0xff] %v14769_v46  ;;  %9440 = vset.pattern.permute.xlu0 %v9777_v23  ;;  %v14836_v23 = vld [vmem:[#allocation10 + $0x40] sm:$0xff] }
 0x4f9   : > { %v5754_v52 = vpop.f32.mrf.mxu3  ;;  %16771 = vst [vmem:[#allocation103_spill] sm:$0xff] %v14778_v49  ;;  %6963 = vperm.xlu0 %9440, %v14610_v60   ;;  %5933 = vmatmul.bf16.gmra.mxu0 %v14836_v23 }
 0x4fa   : > { %v14726_v17 = vadd.f32 %v5754_v52, %v5689_v25  ;;  %16764 = vst [vmem:[#allocation96_spill] sm:$0xff] %v14734_v44  ;;  %v5763_v50 = vpack.c.bf16 %v14734_v44, %v14546_v24  ;;  %v5759_v6 = vpack.c.bf16 %v14750_v11, %v14498_v31  ;;  %6002 = vmatmul.bf16.gmra.mxu1 %v14836_v23 }
 0x4fb   : > { %16767 = vst [vmem:[#allocation99_spill] sm:$0xff] %v14750_v11  ;;  %v16786_v11 = vld [vmem:[#allocation82_spill] sm:$0xff] }
 0x4fc   : > { %16762 = vst [vmem:[#allocation94_spill] sm:$0xff] %v14726_v17  ;;  %6027 = vmatpush.bf16.msra.mxu2 %v5771_v54  ;;  %v5788_v0 = vpack.c.bf16 %v14726_v17, %v14724_v42  ;;  %v16789_v17 = vld [vmem:[#allocation31_spill] sm:$0xff]  ;;  %v16791_v42 = vld [vmem:[#allocation32_spill] sm:$0xff] }
 0x4fd   : > { %v14746_v62 = vpop.f32.mrf.mxu1  ;;  %v14765_v20 = vpop.f32.mrf.mxu0  ;;  %16772 = vst [vmem:[#allocation104_spill] sm:$0xff] %v14786_v22 }
 0x4fe   : > { %6092 = vmatpush.bf16.msra.mxu3 %v5788_v0  ;;  %16773 = vst [vmem:[#allocation105_spill] sm:$0xff] %v14794_v55  ;;  %v16774_v0 = vld [vmem:[#allocation66_spill] sm:$0xff]  ;;  %v14876_v44 = vpop.permute.xlu1 %6244  ;;  %v14884_v27 = vpop.permute.xlu2 %6234 }
 0x4ff   : > { %6968 = vperm.xlu1 %9438, %v14605_v14   ;;  %6953 = vperm.xlu2 %9439, %v16774_v0   ;;  %16787 = vst [vmem:[#allocation80_spill] sm:$0xff] %v14874_v56 }
 0x500   : > { %6028 = vmatpush.bf16.msra.mxu2 %v5767_v61  ;;  %v16775_v61 = vld [vmem:[#allocation69_spill] sm:$0xff]  ;;  %16788 = vst [vmem:[#allocation61_spill] sm:$0xff] %v14876_v44 }
 0x501   : > { %6948 = vperm.xlu0 %9440, %v16775_v61   ;;  %16794 = vst [vmem:[#allocation53_spill] sm:$0xff] %v14897_v4 }
 0x502   : > { %6093 = vmatpush.bf16.msra.mxu3 %v5784_v9  ;;  %v16776_v9 = vld [vmem:[#allocation72_spill] sm:$0xff] }
 0x504   : > { %6029 = vmatpush.bf16.msra.mxu2 %v5763_v50 }
 0x505   : > { %v14773_v48 = vpop.f32.mrf.mxu1  ;;  %v14782_v47 = vpop.f32.mrf.mxu0 }
 0x506   : > { %6094 = vmatpush.bf16.msra.mxu3 %v5780_v59  ;;  %v16777_v59 = vld [vmem:[#allocation73_spill] sm:$0xff]  ;;  %v14887_v57 = vpop.permute.xlu1 %6224  ;;  %v14902_v16 = vpop.permute.xlu2 %6209 }
 0x507   : > { %6958 = vperm.xlu1 %9438, %v16777_v59   ;;  %16782 = vst [vmem:[#allocation73_spill] sm:$0xff] %v14862_v5 }
 0x508   : > { %6030 = vmatpush.bf16.msra.mxu2 %v5759_v6  ;;  %v16778_v6 = vld [vmem:[#allocation74_spill] sm:$0xff] }
 0x509   : > { %6943 = vperm.xlu2 %9439, %v16778_v6   ;;  %5938 = vmatmul.bf16.gmra.mxu0 %v14854_v40 }
 0x50a   : > { %6095 = vmatpush.bf16.msra.mxu3 %v5776_v28  ;;  %6007 = vmatmul.bf16.gmra.mxu1 %v14854_v40 }
 0x50b   : > { %6031 = vmatmul.bf16.vlgmr.msra.gmra.mxu2 %v14520_v37 }
 0x50d   : > { %v14790_v25 = vpop.f32.mrf.mxu1 }
 0x50e   : > { %6096 = vmatpush.bf16.msra.mxu3 %v5772_v38  ;;  %v14798_v52 = vpop.f32.mrf.mxu0 }
 0x512   : > { %6097 = vmatpush.bf16.msra.mxu3 %v5768_v3 }
 0x515   : > { %v14802_v39 = vpop.f32.mrf.mxu1 }
 0x516   : > { %6098 = vmatpush.bf16.msra.mxu3 %v5764_v32  ;;  %v14806_v54 = vpop.f32.mrf.mxu0  ;;  %v16779_v32 = vld [vmem:[#allocation77_spill] sm:$0xff] }
 0x519   : > { %5943 = vmatmul.bf16.gmra.mxu0 %v14874_v56 }
 0x51a   : > { %6099 = vmatpush.bf16.msra.mxu3 %v5760_v7  ;;  %6012 = vmatmul.bf16.gmra.mxu1 %v14874_v56 }
 0x51b   : > { %6036 = vmatmul.bf16.gmra.mxu2 %v14572_v19 }
 0x51d   : > { %6100 = vmatmul.bf16.vlgmr.msra.gmra.mxu3 %v14520_v37  ;;  %v14810_v41 = vpop.f32.mrf.mxu1 }
 0x51e   : > { %v14813_v36 = vpop.f32.mrf.mxu0 }
 0x525   : > { %v14817_v37 = vpop.f32.mrf.mxu1 }
 0x526   : > { %v14822_v50 = vpop.f32.mrf.mxu0 }
 0x529   : > { %5948 = vmatmul.bf16.gmra.mxu0 %v14897_v4 }
 0x52a   : > { %6017 = vmatmul.bf16.gmra.mxu1 %v14897_v4  ;;  %v14924_v4 = vpop.permute.xlu1 %6199 }
 0x52b   : > { %6041 = vmatmul.bf16.gmra.mxu2 %v16776_v9 }
 0x52d   : > { %6105 = vmatmul.bf16.gmra.mxu3 %v14572_v19  ;;  %v14826_v28 = vpop.f32.mrf.mxu1  ;;  %v9778_v19 = vmov 3  }
 0x52e   : > { %v14828_v38 = vpop.f32.mrf.mxu0  ;;  %9441 = vset.pattern.permute.xlu1 %v9778_v19  ;;  %9442 = vset.pattern.permute.xlu2 %v9778_v19 }
 0x52f   : > { %7094 = vperm.xlu1 %9441, %v14587_v53   ;;  %7098 = vperm.xlu2 %9442, %v14540_v26  }
 0x530   : > { %9443 = vset.pattern.permute.xlu0 %v9778_v19  ;;  %v14856_v19 = vpop.permute.xlu0 %6249 }
 0x531   : > { %7086 = vperm.xlu0 %9443, %v14610_v60   ;;  %16781 = vst [vmem:[#allocation72_spill] sm:$0xff] %v14856_v19 }
 0x535   : > { %v14830_v3 = vpop.f32.mrf.mxu1 }
 0x536   : > { %v14834_v7 = vpop.f32.mrf.mxu0 }
 0x537   : > { %7090 = vperm.xlu1 %9441, %v14605_v14   ;;  %7078 = vperm.xlu2 %9442, %v16774_v0   ;;  %v6293_v0 = vadd.f32 %v14887_v57, %v14834_v7 }
 0x538   : > { %v14867_v31 = vpop.permute.xlu0 %6254 }
 0x539   : > { %7074 = vperm.xlu0 %9443, %v16775_v61   ;;  %16784 = vst [vmem:[#allocation77_spill] sm:$0xff] %v14867_v31 }
 0x53b   : > { %6046 = vmatmul.bf16.gmra.mxu2 %v16779_v32 }
 0x53d   : > { %6110 = vmatmul.bf16.gmra.mxu3 %v16776_v9  ;;  %v14840_v29 = vpop.f32.mrf.mxu1 }
 0x53e   : > { %v14845_v9 = vpop.f32.mrf.mxu0 }
 0x53f   : > { %7082 = vperm.xlu1 %9441, %v16777_v59   ;;  %7070 = vperm.xlu2 %9442, %v16778_v6  }
 0x545   : > { %v14848_v55 = vpop.f32.mrf.mxu1 }
 0x546   : > { %v5921_v22 = vpop.f32.mrf.mxu0 }
 0x547   : > { %9444 = vset.pattern.permute.xlu1 %v16432_v43  ;;  %9445 = vset.pattern.permute.xlu2 %v16432_v43  ;;  %v16790_v43 = vld [vmem:[#allocation65_spill] sm:$0xff] }
 0x548   : > { %6558 = vperm.xlu1 %9444, %v16783_v33   ;;  %6554 = vperm.xlu2 %9445, %v16785_v2   ;;  %v14882_v2 = vpop.permute.xlu0 %6219 }
 0x549   : > { %v6289_v7 = vadd.f32 %v14882_v2, %v14828_v38 }
 0x54b   : > { %6051 = vmatmul.bf16.gmra.mxu2 %v16780_v30 }
 0x54d   : > { %6115 = vmatmul.bf16.gmra.mxu3 %v16779_v32  ;;  %v5990_v49 = vpop.f32.mrf.mxu1 }
 0x54e   : > { %v5924_v46 = vpop.f32.mrf.mxu0 }
 0x550   : > { %6546 = vperm.xlu1 %9444, %v16789_v17   ;;  %6542 = vperm.xlu2 %9445, %v16790_v43   ;;  %v14893_v34 = vpop.permute.xlu0 %6214 }
 0x551   : > { %v6285_v38 = vadd.f32 %v14893_v34, %v14822_v50  ;;  %v16817_v50 = vld [vmem:[#allocation37_spill] sm:$0xff] }
 0x555   : > { %v5993_v32 = vpop.f32.mrf.mxu1 }
 0x556   : > { %v5926_v24 = vpop.f32.mrf.mxu0 }
 0x557   : > { %v6309_v35 = vadd.f32 %v14876_v44, %v5926_v24  ;;  %v6301_v24 = vadd.f32 %v14884_v27, %v5921_v22  ;;  %v6297_v22 = vadd.f32 %v14871_v58, %v14845_v9  ;;  %v16804_v9 = vld [vmem:[#allocation47_spill] sm:$0xff] }
 0x558   : > { %6538 = vperm.xlu1 %9444, %v16791_v42   ;;  %6534 = vperm.xlu2 %9445, %v16792_v21   ;;  %v6305_v42 = vadd.f32 %v14862_v5, %v5924_v46  ;;  %v6306_v46 = vadd.f32 %v14862_v5, %v5993_v32  ;;  %v6302_v32 = vadd.f32 %v14884_v27, %v5990_v49 }
 0x559   : > { %v6365_v6 = vmul.f32 %v6301_v24, %v16804_v9  ;;  %v16809_v24 = vld [vmem:[#allocation46_spill] sm:$0xff] }
 0x55b   : > { %6056 = vmatmul.bf16.gmra.mxu2 %v16786_v11 }
 0x55d   : > { %6120 = vmatmul.bf16.gmra.mxu3 %v16780_v30  ;;  %v5995_v33 = vpop.f32.mrf.mxu1 }
 0x55e   : > { %v5929_v10 = vpop.f32.mrf.mxu0 }
 0x55f   : > { %v6313_v17 = vadd.f32 %v14856_v19, %v5929_v10  ;;  %v6310_v10 = vadd.f32 %v14876_v44, %v5995_v33  ;;  %v16799_v33 = vld [vmem:[#allocation41_spill] sm:$0xff] }
 0x560   : > { %6526 = vperm.xlu1 %9444, %v14540_v26   ;;  %6522 = vperm.xlu2 %9445, %v14587_v53  }
 0x561   : > { %v6377_v63 = vmul.f32 %v6313_v17, %v16795_v18 }
 0x565   : > { %v5998_v30 = vpop.f32.mrf.mxu1 }
 0x566   : > { %v6314_v43 = vadd.f32 %v14856_v19, %v5998_v30  ;;  %v5931_v45 = vpop.f32.mrf.mxu0  ;;  %v16797_v30 = vld [vmem:[#allocation40_spill] sm:$0xff] }
 0x567   : > { %v6317_v21 = vadd.f32 %v14867_v31, %v5931_v45  ;;  %v16798_v45 = vld [vmem:[#allocation43_spill] sm:$0xff] }
 0x568   : > { %v6378_v17 = vmul.f32 %v6314_v43, %v16798_v45  ;;  %v16802_v43 = vld [vmem:[#allocation45_spill] sm:$0xff]  ;;  %6518 = vperm.xlu1 %9444, %v14605_v14  }
 0x569   : > { %v6381_v19 = vmul.f32 %v6317_v21, %v16797_v30  ;;  %v14919_v21 = vadd.f32 %v6377_v63, %v16795_v18  ;;  %v6374_v5 = vmul.f32 %v6310_v10, %v16802_v43  ;;  %v16806_v18 = vld [vmem:[#allocation48_spill] sm:$0xff] }
 0x56a   : > { %v6370_v49 = vmul.f32 %v6306_v46, %v16806_v18  ;;  %v14941_v10 = vadd.f32 %v6378_v17, %v16798_v45  ;;  %v16811_v46 = vld [vmem:[#allocation49_spill] sm:$0xff] }
 0x56b   : > { %6061 = vmatmul.bf16.gmra.mxu2 %v16793_v15  ;;  %16800 = vst [vmem:[#allocation82_spill] sm:$0xff] %v14919_v21  ;;  %v14922_v44 = vadd.f32 %v6381_v19, %v16797_v30  ;;  %v6298_v19 = vadd.f32 %v14871_v58, %v14848_v55  ;;  %v6294_v55 = vadd.f32 %v14887_v57, %v14840_v29  ;;  %v14971_v29 = vpop.permute.xlu2 %6204 }
 0x56c   : > { %16807 = vst [vmem:[#allocation32_spill] sm:$0xff] %v14941_v10  ;;  %v6366_v17 = vmul.f32 %v6302_v32, %v16811_v46  ;;  %v14958_v45 = vadd.f32 %v6374_v5, %v16802_v43  ;;  %v6290_v5 = vadd.f32 %v14882_v2, %v14830_v3  ;;  %v16815_v32 = vld [vmem:[#allocation51_spill] sm:$0xff]  ;;  %v6286_v3 = vadd.f32 %v14893_v34, %v14826_v28  ;;  %v15002_v28 = vpop.permute.xlu1 %6194 }
 0x56d   : > { %6125 = vmatmul.bf16.gmra.mxu3 %v16786_v11  ;;  %v16796_v11 = vld [vmem:[#allocation42_spill] sm:$0xff]  ;;  %v6000_v56 = vpop.f32.mrf.mxu1  ;;  %16801 = vst [vmem:[#allocation31_spill] sm:$0xff] %v14922_v44  ;;  %v6493_v63 = vpack.c.bf16 %v14922_v44, %v14919_v21  ;;  %v14952_v21 = vpop.permute.xlu0 %6189 }
 0x56e   : > { %v6373_v13 = vmul.f32 %v6309_v35, %v16796_v11  ;;  %v6318_v61 = vadd.f32 %v14867_v31, %v6000_v56  ;;  %v6369_v35 = vmul.f32 %v6305_v42, %v16799_v33  ;;  %v16803_v56 = vld [vmem:[#allocation44_spill] sm:$0xff]  ;;  %16812 = vst [vmem:[#allocation106_spill] sm:$0xff] %v14958_v45 }
 0x56f   : > { %6609 = vmatpush.bf16.msrb.mxu0 %v6493_v63  ;;  %v14966_v63 = vadd.f32 %v6365_v6, %v16804_v9  ;;  %v6353_v6 = vmul.f32 %v6289_v7, %v16817_v50  ;;  %v16821_v7 = vld [vmem:[#allocation55_spill] sm:$0xff] }
 0x570   : > { %v6382_v31 = vmul.f32 %v6318_v61, %v16803_v56  ;;  %v14933_v42 = vadd.f32 %v6373_v13, %v16796_v11  ;;  %v6361_v13 = vmul.f32 %v6297_v22, %v16809_v24  ;;  %v14950_v11 = vadd.f32 %v6369_v35, %v16799_v33  ;;  %v16813_v22 = vld [vmem:[#allocation50_spill] sm:$0xff]  ;;  %6514 = vperm.xlu1 %9444, %v14610_v60  }
 0x571   : > { %v6357_v35 = vmul.f32 %v6293_v0, %v16813_v22  ;;  %16814 = vst [vmem:[#allocation107_spill] sm:$0xff] %v14966_v63  ;;  %v6281_v0 = vadd.f32 %v14902_v16, %v14813_v36  ;;  %v6277_v36 = vadd.f32 %v14971_v29, %v14806_v54  ;;  %v6273_v54 = vadd.f32 %v14924_v4, %v14798_v52 }
 0x572   : > { %16805 = vst [vmem:[#allocation65_spill] sm:$0xff] %v14933_v42  ;;  %v14944_v61 = vadd.f32 %v6382_v31, %v16803_v56  ;;  %v6489_v56 = vpack.c.bf16 %v14933_v42, %v14950_v11  ;;  %v14983_v43 = vadd.f32 %v6361_v13, %v16809_v24  ;;  %v6349_v13 = vmul.f32 %v6285_v38, %v16821_v7  ;;  %v16825_v38 = vld [vmem:[#allocation54_spill] sm:$0xff] }
 0x573   : > { %16810 = vst [vmem:[#allocation83_spill] sm:$0xff] %v14950_v11  ;;  %v16819_v11 = vld [vmem:[#allocation52_spill] sm:$0xff] }
 0x574   : > { %16808 = vst [vmem:[#allocation68_spill] sm:$0xff] %v14944_v61  ;;  %v6494_v31 = vpack.c.bf16 %v14944_v61, %v14941_v10  ;;  %v6362_v10 = vmul.f32 %v6298_v19, %v16815_v32  ;;  %v14977_v61 = vadd.f32 %v6370_v49, %v16806_v18  ;;  %6610 = vmatpush.bf16.msrb.mxu0 %v6489_v56 }
 0x575   : > { %16818 = vst [vmem:[#allocation109_spill] sm:$0xff] %v14983_v43  ;;  %v6358_v19 = vmul.f32 %v6294_v55, %v16819_v11  ;;  %v14990_v49 = vadd.f32 %v6366_v17, %v16811_v46  ;;  %v14998_v18 = vadd.f32 %v6357_v35, %v16813_v22  ;;  %v6485_v56 = vpack.c.bf16 %v14966_v63, %v14983_v43  ;;  %v16823_v17 = vld [vmem:[#allocation38_spill] sm:$0xff]  ;;  %v16827_v43 = vld [vmem:[#allocation56_spill] sm:$0xff] }
 0x576   : > { %16816 = vst [vmem:[#allocation108_spill] sm:$0xff] %v14977_v61  ;;  %6658 = vmatpush.bf16.msrb.mxu1 %v6494_v31  ;;  %v6490_v31 = vpack.c.bf16 %v14958_v45, %v14977_v61  ;;  %v6282_v55 = vadd.f32 %v14902_v16, %v14817_v37  ;;  %v6354_v46 = vmul.f32 %v6290_v5, %v16823_v17  ;;  %v16829_v5 = vld [vmem:[#allocation58_spill] sm:$0xff] }
 0x577   : > { %16820 = vst [vmem:[#allocation110_spill] sm:$0xff] %v14990_v49  ;;  %v15008_v61 = vadd.f32 %v6362_v10, %v16815_v32  ;;  %v6345_v35 = vmul.f32 %v6281_v0, %v16825_v38  ;;  %v15015_v45 = vadd.f32 %v6353_v6, %v16817_v50  ;;  %v6350_v63 = vmul.f32 %v6286_v3, %v16827_v43  ;;  %v15032_v6 = vpop.permute.xlu0 %6184  ;;  %v16842_v32 = vld [vmem:[#allocation64_spill] sm:$0xff] }
 0x578   : > { %16822 = vst [vmem:[#allocation111_spill] sm:$0xff] %v14998_v18  ;;  %6611 = vmatpush.bf16.msrb.mxu0 %v6485_v56  ;;  %v15019_v37 = vadd.f32 %v6358_v19, %v16819_v11  ;;  %v15027_v52 = vadd.f32 %v6349_v13, %v16821_v7  ;;  %v6278_v3 = vadd.f32 %v14971_v29, %v14810_v41  ;;  %v16831_v19 = vld [vmem:[#allocation59_spill] sm:$0xff]  ;;  %v15046_v11 = vpop.permute.xlu2 %6179 }
 0x579   : > { %16824 = vst [vmem:[#allocation112_spill] sm:$0xff] %v15008_v61  ;;  %v6486_v10 = vpack.c.bf16 %v14990_v49, %v15008_v61  ;;  %v6481_v0 = vpack.c.bf16 %v14998_v18, %v15015_v45  ;;  %v6346_v56 = vmul.f32 %v6282_v55, %v16831_v19  ;;  %v15038_v61 = vadd.f32 %v6354_v46, %v16823_v17  ;;  %v16838_v17 = vld [vmem:[#allocation60_spill] sm:$0xff] }
 0x57a   : > { %6659 = vmatpush.bf16.msrb.mxu1 %v6490_v31  ;;  %16826 = vst [vmem:[#allocation113_spill] sm:$0xff] %v15015_v45  ;;  %v6341_v31 = vmul.f32 %v6277_v36, %v16829_v5  ;;  %v16833_v36 = vld [vmem:[#allocation57_spill] sm:$0xff]  ;;  %v15044_v49 = vadd.f32 %v6345_v35, %v16825_v38  ;;  %v6274_v41 = vadd.f32 %v14924_v4, %v14802_v39  ;;  %v15242_v18 = vld [vmem:[#allocation10 + $0x90] sm:$0xff] }
 0x57b   : > { %6066 = vmatmul.bf16.gmra.mxu2 %v14685_v12  ;;  %16828 = vst [vmem:[#allocation114_spill] sm:$0xff] %v15019_v37  ;;  %v6337_v13 = vmul.f32 %v6273_v54, %v16833_v36  ;;  %v15051_v55 = vadd.f32 %v6350_v63, %v16827_v43  ;;  %v6482_v46 = vpack.c.bf16 %v15019_v37, %v15038_v61 }
 0x57c   : > { %16830 = vst [vmem:[#allocation115_spill] sm:$0xff] %v15027_v52  ;;  %6612 = vmatpush.bf16.msrb.mxu0 %v6481_v0  ;;  %v15059_v35 = vadd.f32 %v6341_v31, %v16829_v5  ;;  %v6477_v0 = vpack.c.bf16 %v15027_v52, %v15044_v49  ;;  %v6270_v39 = vadd.f32 %v15002_v28, %v14790_v25  ;;  %v15234_v52 = vpop.permute.xlu1 %6973 }
 0x57d   : > { %6130 = vmatmul.bf16.gmra.mxu3 %v16793_v15  ;;  %v6269_v15 = vadd.f32 %v15002_v28, %v14782_v47  ;;  %16832 = vst [vmem:[#allocation116_spill] sm:$0xff] %v15038_v61  ;;  %v6265_v47 = vadd.f32 %v14952_v21, %v14765_v20  ;;  %v6261_v20 = vadd.f32 %v15032_v6, %v14738_v51  ;;  %v16840_v61 = vld [vmem:[#allocation62_spill] sm:$0xff] }
 0x57e   : > { %6660 = vmatpush.bf16.msrb.mxu1 %v6486_v10  ;;  %16834 = vst [vmem:[#allocation117_spill] sm:$0xff] %v15044_v49  ;;  %v16836_v10 = vld [vmem:[#allocation63_spill] sm:$0xff]  ;;  %v6342_v63 = vmul.f32 %v6278_v3, %v16838_v17  ;;  %v15067_v43 = vadd.f32 %v6346_v56, %v16831_v19  ;;  %v6257_v51 = vadd.f32 %v15046_v11, %v14713_v1  ;;  %v16843_v56 = vld [vmem:[#allocation25_spill] sm:$0xff] }
 0x57f   : > { %16835 = vst [vmem:[#allocation118_spill] sm:$0xff] %v15051_v55  ;;  %v6333_v54 = vmul.f32 %v6269_v15, %v16836_v10  ;;  %v6329_v15 = vmul.f32 %v6265_v47, %v16840_v61  ;;  %v15073_v31 = vadd.f32 %v6337_v13, %v16833_v36  ;;  %v6266_v37 = vadd.f32 %v14952_v21, %v14773_v48  ;;  %v16845_v13 = vld [vmem:[#allocation35_spill] sm:$0xff] }
 0x580   : > { %16837 = vst [vmem:[#allocation119_spill] sm:$0xff] %v15059_v35  ;;  %6613 = vmatpush.bf16.msrb.mxu0 %v6477_v0  ;;  %v6338_v25 = vmul.f32 %v6274_v41, %v16842_v32  ;;  %v6478_v3 = vpack.c.bf16 %v15051_v55, %v15067_v43  ;;  %v6325_v19 = vmul.f32 %v6261_v20, %v16843_v56  ;;  %v16847_v41 = vld [vmem:[#allocation36_spill] sm:$0xff]  ;;  %v15240_v38 = vpop.permute.xlu2 %6978 }
 0x581   : > { %16839 = vst [vmem:[#allocation120_spill] sm:$0xff] %v15067_v43  ;;  %v6473_v1 = vpack.c.bf16 %v15059_v35, %v15073_v31  ;;  %v6262_v47 = vadd.f32 %v15032_v6, %v14746_v62  ;;  %v6334_v0 = vmul.f32 %v6270_v39, %v16845_v13  ;;  %v15090_v48 = vadd.f32 %v6342_v63, %v16838_v17  ;;  %v15215_v17 = vpop.f32.mrf.mxu1 }
 0x582   : > { %6661 = vmatpush.bf16.msrb.mxu1 %v6482_v46  ;;  %16841 = vst [vmem:[#allocation121_spill] sm:$0xff] %v15073_v31  ;;  %v15082_v46 = vadd.f32 %v6333_v54, %v16836_v10  ;;  %v6321_v49 = vmul.f32 %v6257_v51, %v16847_v41  ;;  %v15094_v43 = vadd.f32 %v6329_v15, %v16840_v61  ;;  %v16849_v54 = vld [vmem:[#allocation26_spill] sm:$0xff] }
 0x583   : > { %16846 = vst [vmem:[#allocation123_spill] sm:$0xff] %v15090_v48  ;;  %v6258_v20 = vadd.f32 %v15046_v11, %v14716_v8  ;;  %v6330_v55 = vmul.f32 %v6266_v37, %v16849_v54  ;;  %v15101_v62 = vadd.f32 %v6338_v25, %v16842_v32  ;;  %v15104_v39 = vadd.f32 %v6325_v19, %v16843_v56  ;;  %v16852_v51 = vld [vmem:[#allocation30_spill] sm:$0xff] }
 0x584   : > { %16844 = vst [vmem:[#allocation122_spill] sm:$0xff] %v15082_v46  ;;  %6614 = vmatpush.bf16.msrb.mxu0 %v6473_v1  ;;  %v6469_v63 = vpack.c.bf16 %v15082_v46, %v15094_v43  ;;  %v6326_v15 = vmul.f32 %v6262_v47, %v16852_v51  ;;  %v9780_v8 = vmov 4   ;;  %v15118_v19 = vadd.f32 %v6321_v49, %v16847_v41  ;;  %v16855_v25 = vld [vmem:[#allocation34_spill] sm:$0xff]  ;;  %v15226_v46 = vld [vmem:[#allocation10 + $0x88] sm:$0xff]  ;;  %v15247_v24 = vpop.permute.xlu1 %6968 }
 0x585   : > { %16848 = vst [vmem:[#allocation124_spill] sm:$0xff] %v15094_v43  ;;  %9449 = vset.pattern.permute.xlu1 %v9780_v8  ;;  %v6474_v37 = vpack.c.bf16 %v15090_v48, %v15101_v62  ;;  %v6322_v47 = vmul.f32 %v6258_v20, %v16855_v25  ;;  %9446 = vset.pattern.permute.xlu0 %v9780_v8  ;;  %v15210_v48 = vld [vmem:[#allocation10 + $0x80] sm:$0xff] }
 0x586   : > { %6662 = vmatpush.bf16.msrb.mxu1 %v6478_v3  ;;  %16850 = vst [vmem:[#allocation125_spill] sm:$0xff] %v15101_v62  ;;  %v15110_v3 = vadd.f32 %v6334_v0, %v16845_v13  ;;  %7324 = vperm.xlu1 %9449, %v14610_v60   ;;  %v15123_v0 = vadd.f32 %v6330_v55, %v16849_v54  ;;  %v15134_v60 = vld [vmem:[#allocation10 + $0x60] sm:$0xff] }
 0x587   : > { %16851 = vst [vmem:[#allocation126_spill] sm:$0xff] %v15104_v39  ;;  %7336 = vperm.xlu0 %9446, %v14540_v26   ;;  %9448 = vset.pattern.permute.xlu2 %v9780_v8  ;;  %v15129_v62 = vadd.f32 %v6326_v15, %v16852_v51  ;;  %v15137_v55 = vadd.f32 %v6322_v47, %v16855_v25 }
 0x588   : > { %16853 = vst [vmem:[#allocation127_spill] sm:$0xff] %v15110_v3  ;;  %6615 = vmatpush.bf16.msrb.mxu0 %v6469_v63  ;;  %v6470_v49 = vpack.c.bf16 %v15110_v3, %v15123_v0  ;;  %7332 = vperm.xlu2 %9448, %v14587_v53   ;;  %v16860_v63 = vmov 1   ;;  %v16861_v53 = vld [vmem:[#allocation28_spill] sm:$0xff]  ;;  %v15253_v33 = vpop.permute.xlu2 %6953 }
 0x589   : > { %16854 = vst [vmem:[#allocation128_spill] sm:$0xff] %v15118_v19  ;;  %v6466_v26 = vpack.c.bf16 %v15129_v62, %v15137_v55  ;;  %v15222_v41 = vpop.f32.mrf.mxu1 }
 0x58a   : > { %16856 = vst [vmem:[#allocation129_spill] sm:$0xff] %v15123_v0  ;;  %6663 = vmatpush.bf16.msrb.mxu1 %v6474_v37  ;;  %v16862_v37 = vld [vmem:[#allocation74_spill] sm:$0xff]  ;;  %v16873_v0 = vld [vmem:[#allocation53_spill] sm:$0xff] }
 0x58b   : > { %6071 = vmatmul.bf16.gmra.mxu2 %v14836_v23  ;;  %16857 = vst [vmem:[#allocation130_spill] sm:$0xff] %v15129_v62  ;;  %v15177_v62 = vld [vmem:[#allocation10 + $0x70] sm:$0xff] }
 0x58c   : > { %16858 = vst [vmem:[#allocation131_spill] sm:$0xff] %v15134_v60 }
 0x58d   : > { %6135 = vmatmul.bf16.gmra.mxu3 %v14685_v12  ;;  %v6465_v12 = vpack.c.bf16 %v15104_v39, %v15118_v19  ;;  %16859 = vst [vmem:[#allocation132_spill] sm:$0xff] %v15137_v55 }
 0x58e   : > { %v15113_v1 = vpop.f32.mrf.mxu2  ;;  %6664 = vmatpush.bf16.msrb.mxu1 %v6470_v49  ;;  %7320 = vperm.xlu1 %9449, %v16777_v59   ;;  %v15159_v49 = vld [vmem:[#allocation10 + $0x68] sm:$0xff]  ;;  %16878 = vst [vmem:[#allocation136_spill] sm:$0xff] %v15210_v48 }
 0x58f   : > { %6616 = vmatpush.bf16.msrb.mxu0 %v6465_v12  ;;  %9447 = vset.pattern.permute.xlu0 %v16860_v63  ;;  %v16864_v12 = vld [vmem:[#allocation33_spill] sm:$0xff]  ;;  %16865 = vst [vmem:[#allocation74_spill] sm:$0xff] %v15159_v49 }
 0x590   : > { %6550 = vperm.xlu0 %9447, %v16861_v53   ;;  %7328 = vperm.xlu2 %9448, %v14605_v14   ;;  %v16866_v14 = vld [vmem:[#allocation66_spill] sm:$0xff]  ;;  %v16868_v53 = vld [vmem:[#allocation69_spill] sm:$0xff]  ;;  %16879 = vst [vmem:[#allocation137_spill] sm:$0xff] %v15215_v17 }
 0x591   : > { %16871 = vst [vmem:[#allocation69_spill] sm:$0xff] %v15177_v62  ;;  %v15229_v61 = vpop.f32.mrf.mxu1 }
 0x592   : > { %6617 = vmatmul.bf16.vlgmr.msrb.gmra.mxu0 %v15134_v60  ;;  %6665 = vmatpush.bf16.msrb.mxu1 %v6466_v26  ;;  %16880 = vst [vmem:[#allocation138_spill] sm:$0xff] %v15222_v41 }
 0x593   : > { %16881 = vst [vmem:[#allocation139_spill] sm:$0xff] %v15226_v46 }
 0x594   : > { %16882 = vst [vmem:[#allocation140_spill] sm:$0xff] %v15229_v61  ;;  %v15264_v61 = vld [vmem:[#allocation10 + $0x98] sm:$0xff] }
 0x595   : > { %6666 = vmatmul.bf16.vlgmr.msrb.gmra.mxu1 %v15134_v60  ;;  %16884 = vst [vmem:[#allocation142_spill] sm:$0xff] %v15242_v18 }
 0x596   : > { %v15139_v20 = vpop.f32.mrf.mxu2  ;;  %9452 = vset.pattern.permute.xlu1 %v16860_v63  ;;  %16886 = vst [vmem:[#allocation144_spill] sm:$0xff] %v15247_v24 }
 0x597   : > { %6498 = vperm.xlu1 %9452, %v16862_v37   ;;  %16887 = vst [vmem:[#allocation145_spill] sm:$0xff] %v15253_v33 }
 0x598   : > { %6530 = vperm.xlu0 %9447, %v16864_v12   ;;  %9450 = vset.pattern.permute.xlu2 %v16860_v63  ;;  %v16869_v63 = vld [vmem:[#allocation80_spill] sm:$0xff] }
 0x599   : > { %6506 = vperm.xlu2 %9450, %v16866_v14   ;;  %v15236_v5 = vpop.f32.mrf.mxu1 }
 0x59a   : > { %16883 = vst [vmem:[#allocation141_spill] sm:$0xff] %v15236_v5 }
 0x59b   : > { %6076 = vmatmul.bf16.gmra.mxu2 %v14854_v40 }
 0x59d   : > { %6140 = vmatmul.bf16.gmra.mxu3 %v14836_v23 }
 0x59e   : > { %v15150_v15 = vpop.f32.mrf.mxu2 }
 0x59f   : > { %9454 = vset.pattern.permute.xlu1 %v9780_v8 }
 0x5a0   : > { %v15155_v47 = vpop.f32.mrf.mxu3  ;;  %7308 = vperm.xlu1 %9454, %v16862_v37   ;;  %6510 = vperm.xlu0 %9447, %v16777_v59  }
 0x5a1   : > { %16863 = vst [vmem:[#allocation28_spill] sm:$0xff] %v15155_v47  ;;  %6502 = vperm.xlu2 %9450, %v16868_v53   ;;  %v15245_v22 = vpop.f32.mrf.mxu1 }
 0x5a2   : > { %6622 = vmatmul.bf16.gmra.mxu0 %v15159_v49  ;;  %16885 = vst [vmem:[#allocation143_spill] sm:$0xff] %v15245_v22  ;;  %v16891_v22 = vld [vmem:[#allocation72_spill] sm:$0xff] }
 0x5a5   : > { %6671 = vmatmul.bf16.gmra.mxu1 %v15159_v49 }
 0x5a6   : > { %v15162_v26 = vpop.f32.mrf.mxu2 }
 0x5a8   : > { %v15165_v23 = vpop.f32.mrf.mxu3  ;;  %9451 = vset.pattern.permute.xlu0 %v9780_v8 }
 0x5a9   : > { %16867 = vst [vmem:[#allocation33_spill] sm:$0xff] %v15165_v23  ;;  %7316 = vperm.xlu0 %9451, %v16866_v14   ;;  %9453 = vset.pattern.permute.xlu2 %v9780_v8  ;;  %v15193_v14 = vld [vmem:[#allocation10 + $0x78] sm:$0xff]  ;;  %v15258_v41 = vpop.f32.mrf.mxu1 }
 0x5aa   : > { %7312 = vperm.xlu2 %9453, %v16868_v53   ;;  %16875 = vst [vmem:[#allocation133_spill] sm:$0xff] %v15193_v14  ;;  %v15198_v53 = vpop.f32.mrf.mxu0 }
 0x5ab   : > { %6081 = vmatmul.bf16.gmra.mxu2 %v16869_v63  ;;  %16889 = vst [vmem:[#allocation147_spill] sm:$0xff] %v15258_v41  ;;  %v16892_v41 = vld [vmem:[#allocation61_spill] sm:$0xff] }
 0x5ad   : > { %6145 = vmatmul.bf16.gmra.mxu3 %v14854_v40 }
 0x5ae   : > { %v15172_v12 = vpop.f32.mrf.mxu2 }
 0x5b0   : > { %v15175_v55 = vpop.f32.mrf.mxu3 }
 0x5b1   : > { %16870 = vst [vmem:[#allocation66_spill] sm:$0xff] %v15175_v55  ;;  %v16894_v55 = vld [vmem:[#allocation84_spill] sm:$0xff] }
 0x5b2   : > { %6627 = vmatmul.bf16.gmra.mxu0 %v15177_v62  ;;  %v15205_v54 = vpop.f32.mrf.mxu0 }
 0x5b5   : > { %6676 = vmatmul.bf16.gmra.mxu1 %v15177_v62 }
 0x5b6   : > { %v15181_v59 = vpop.f32.mrf.mxu2 }
 0x5b8   : > { %v15184_v37 = vpop.f32.mrf.mxu3 }
 0x5b9   : > { %16872 = vst [vmem:[#allocation80_spill] sm:$0xff] %v15184_v37 }
 0x5ba   : > { %v5939_v32 = vpop.f32.mrf.mxu0 }
 0x5bb   : > { %6086 = vmatmul.bf16.gmra.mxu2 %v16873_v0 }
 0x5bd   : > { %6150 = vmatmul.bf16.gmra.mxu3 %v16869_v63 }
 0x5be   : > { %v15188_v40 = vpop.f32.mrf.mxu2 }
 0x5c0   : > { %v15191_v25 = vpop.f32.mrf.mxu3 }
 0x5c1   : > { %16874 = vst [vmem:[#allocation53_spill] sm:$0xff] %v15191_v25  ;;  %v16897_v25 = vld [vmem:[#allocation85_spill] sm:$0xff] }
 0x5c2   : > { %6632 = vmatmul.bf16.gmra.mxu0 %v15193_v14  ;;  %v5941_v43 = vpop.f32.mrf.mxu0 }
 0x5c5   : > { %6681 = vmatmul.bf16.gmra.mxu1 %v15193_v14 }
 0x5c6   : > { %v15195_v8 = vpop.f32.mrf.mxu2 }
 0x5c8   : > { %v15200_v3 = vpop.f32.mrf.mxu3 }
 0x5c9   : > { %16876 = vst [vmem:[#allocation134_spill] sm:$0xff] %v15200_v3 }
 0x5ca   : > { %v5944_v31 = vpop.f32.mrf.mxu0 }
 0x5cd   : > { %6155 = vmatmul.bf16.gmra.mxu3 %v16873_v0 }
 0x5ce   : > { %v15203_v51 = vpop.f32.mrf.mxu2 }
 0x5d0   : > { %v15208_v63 = vpop.f32.mrf.mxu3 }
 0x5d1   : > { %16877 = vst [vmem:[#allocation135_spill] sm:$0xff] %v15208_v63 }
 0x5d2   : > { %6637 = vmatmul.bf16.gmra.mxu0 %v15210_v48  ;;  %v5946_v36 = vpop.f32.mrf.mxu0 }
 0x5d3   : > { %v7001_v17 = vadd.f32 %v15247_v24, %v5946_v36  ;;  %v16893_v24 = vld [vmem:[#allocation73_spill] sm:$0xff] }
 0x5d5   : > { %6686 = vmatmul.bf16.gmra.mxu1 %v15210_v48  ;;  %v7033_v23 = vmax.f32 %v7001_v17, 0.0 }
 0x5d6   : > { %v15212_v13 = vpop.f32.mrf.mxu2 }
 0x5d8   : > { %v15217_v19 = vpop.f32.mrf.mxu3 }
 0x5da   : > { %v5949_v50 = vpop.f32.mrf.mxu0 }
 0x5db   : > { %v7005_v9 = vadd.f32 %v15234_v52, %v5949_v50 }
 0x5dd   : > { %v7037_v48 = vmax.f32 %v7005_v9, 0.0  ;;  %v6989_v9 = vadd.f32 %v15253_v33, %v5939_v32 }
 0x5de   : > { %v15220_v39 = vpop.f32.mrf.mxu2 }
 0x5df   : > { %v7021_v32 = vmax.f32 %v6989_v9, 0.0 }
 0x5e0   : > { %v15224_v0 = vpop.f32.mrf.mxu3 }
 0x5e2   : > { %6642 = vmatmul.bf16.gmra.mxu0 %v15226_v46  ;;  %v5951_v30 = vpop.f32.mrf.mxu0 }
 0x5e3   : > { %v7009_v14 = vadd.f32 %v15240_v38, %v5951_v30 }
 0x5e5   : > { %6691 = vmatmul.bf16.gmra.mxu1 %v15226_v46  ;;  %v15255_v46 = vpop.permute.xlu0 %6963  ;;  %v7041_v5 = vmax.f32 %v7009_v14, 0.0 }
 0x5e6   : > { %v6059_v56 = vpop.f32.mrf.mxu2  ;;  %16888 = vst [vmem:[#allocation146_spill] sm:$0xff] %v15255_v46  ;;  %v6997_v50 = vadd.f32 %v15255_v46, %v5944_v31  ;;  %v15273_v31 = vpop.permute.xlu2 %6943 }
 0x5e7   : > { %v7065_v47 = vpack.c.bf16 %v7041_v5, %v7037_v48  ;;  %v6018_v48 = vpop.f32.mrf.mxu1 }
 0x5e8   : > { %v15231_v35 = vpop.f32.mrf.mxu3  ;;  %v7029_v14 = vmax.f32 %v6997_v50, 0.0 }
 0x5e9   : > { %7138 = vmatpush.bf16.msra.mxu0 %v7065_v47  ;;  %v6303_v47 = vadd.f32 %v14884_v27, %v6059_v56 }
 0x5ed   : > { %v15283_v63 = vpop.permute.xlu0 %6948 }
 0x5ee   : > { %v6062_v10 = vpop.f32.mrf.mxu2 }
 0x5ef   : > { %v6307_v46 = vadd.f32 %v16893_v24, %v6062_v10  ;;  %v6985_v10 = vadd.f32 %v15283_v63, %v15205_v54  ;;  %v6295_v54 = vadd.f32 %v14887_v57, %v15212_v13  ;;  %v6020_v13 = vpop.f32.mrf.mxu1 }
 0x5f0   : > { %v15238_v45 = vpop.f32.mrf.mxu3 }
 0x5f2   : > { %6647 = vmatmul.bf16.gmra.mxu0 %v15242_v18 }
 0x5f5   : > { %6696 = vmatmul.bf16.gmra.mxu1 %v15242_v18  ;;  %v15266_v18 = vpop.permute.xlu1 %6958 }
 0x5f6   : > { %v6064_v7 = vpop.f32.mrf.mxu2  ;;  %16890 = vst [vmem:[#allocation148_spill] sm:$0xff] %v15266_v18  ;;  %v6993_v30 = vadd.f32 %v15266_v18, %v5941_v43  ;;  %v6981_v43 = vadd.f32 %v15273_v31, %v15198_v53  ;;  %v16896_v18 = vld [vmem:[#allocation87_spill] sm:$0xff]  ;;  %v16898_v53 = vld [vmem:[#allocation86_spill] sm:$0xff] }
 0x5f7   : > { %v6311_v60 = vadd.f32 %v16892_v41, %v6064_v7  ;;  %v7061_v7 = vpack.c.bf16 %v7033_v23, %v7029_v14  ;;  %v6371_v9 = vmul.f32 %v6307_v46, %v16898_v53  ;;  %v16900_v14 = vld [vmem:[#allocation89_spill] sm:$0xff] }
 0x5f8   : > { %v15249_v42 = vpop.f32.mrf.mxu3  ;;  %v7025_v17 = vmax.f32 %v6993_v30, 0.0  ;;  %v7006_v30 = vadd.f32 %v15234_v52, %v6018_v48 }
 0x5f9   : > { %v6375_v33 = vmul.f32 %v6311_v60, %v16896_v18  ;;  %7139 = vmatpush.bf16.msra.mxu0 %v7061_v7  ;;  %v7013_v60 = vmax.f32 %v6981_v43, 0.0  ;;  %v16901_v43 = vld [vmem:[#allocation88_spill] sm:$0xff]  ;;  %v15310_v48 = vadd.f32 %v6371_v9, %v16898_v53 }
 0x5fb   : > { %16902 = vst [vmem:[#allocation61_spill] sm:$0xff] %v15310_v48 }
 0x5fe   : > { %v6067_v44 = vpop.f32.mrf.mxu2 }
 0x5ff   : > { %v6315_v49 = vadd.f32 %v16891_v22, %v6067_v44  ;;  %v16895_v44 = vld [vmem:[#allocation77_spill] sm:$0xff] }
 0x600   : > { %v15261_v62 = vpop.f32.mrf.mxu3 }
 0x601   : > { %v6379_v37 = vmul.f32 %v6315_v49, %v16894_v55  ;;  %v6299_v49 = vadd.f32 %v14871_v58, %v15220_v39  ;;  %v15302_v39 = vadd.f32 %v6375_v33, %v16896_v18 }
 0x602   : > { %6652 = vmatmul.bf16.gmra.mxu0 %v15264_v61 }
 0x603   : > { %v15291_v23 = vadd.f32 %v6379_v37, %v16894_v55  ;;  %v6291_v37 = vadd.f32 %v14882_v2, %v15203_v51  ;;  %v6363_v7 = vmul.f32 %v6299_v49, %v16901_v43  ;;  %v6491_v49 = vpack.c.bf16 %v15302_v39, %v15310_v48 }
 0x605   : > { %16899 = vst [vmem:[#allocation72_spill] sm:$0xff] %v15291_v23  ;;  %6701 = vmatmul.bf16.gmra.mxu1 %v15264_v61 }
 0x606   : > { %v6069_v36 = vpop.f32.mrf.mxu2 }
 0x607   : > { %v6319_v5 = vadd.f32 %v16895_v44, %v6069_v36  ;;  %v7057_v36 = vpack.c.bf16 %v7025_v17, %v7021_v32  ;;  %v7038_v32 = vmax.f32 %v7006_v30, 0.0  ;;  %v7010_v17 = vadd.f32 %v15240_v38, %v6020_v13  ;;  %v15324_v30 = vld [vmem:[%s16270_s6] sm:$0xff] }
 0x608   : > { %v6133_v50 = vpop.f32.mrf.mxu3  ;;  %v6279_v13 = vadd.f32 %v14971_v29, %v15181_v59  ;;  %v16909_v59 = vld [vmem:[#allocation75_spill] sm:$0xff] }
 0x609   : > { %v6383_v3 = vmul.f32 %v6319_v5, %v16897_v25  ;;  %v6367_v5 = vmul.f32 %v6303_v47, %v16900_v14  ;;  %7140 = vmatpush.bf16.msra.mxu0 %v7057_v36  ;;  %v6287_v47 = vadd.f32 %v14893_v34, %v15195_v8  ;;  %v7042_v9 = vmax.f32 %v7010_v17, 0.0  ;;  %v16905_v8 = vld [vmem:[#allocation78_spill] sm:$0xff]  ;;  %v16907_v17 = vld [vmem:[#allocation91_spill] sm:$0xff] }
 0x60b   : > { %v15294_v56 = vadd.f32 %v6383_v3, %v16897_v25  ;;  %v7017_v3 = vmax.f32 %v6985_v10, 0.0  ;;  %v15317_v10 = vadd.f32 %v6367_v5, %v16900_v14 }
 0x60d   : > { %v6495_v46 = vpack.c.bf16 %v15294_v56, %v15291_v23  ;;  %v7053_v33 = vpack.c.bf16 %v7017_v3, %v7013_v60  ;;  %v16903_v23 = vld [vmem:[#allocation90_spill] sm:$0xff]  ;;  %16904 = vst [vmem:[#allocation73_spill] sm:$0xff] %v15317_v10  ;;  %v6283_v60 = vadd.f32 %v14902_v16, %v15188_v40  ;;  %v7066_v3 = vpack.c.bf16 %v7042_v9, %v7038_v32 }
 0x60e   : > { %v6359_v36 = vmul.f32 %v6295_v54, %v16903_v23  ;;  %v15330_v54 = vadd.f32 %v6363_v7, %v16901_v43  ;;  %v6275_v32 = vadd.f32 %v14924_v4, %v15172_v12  ;;  %v6271_v9 = vadd.f32 %v15002_v28, %v15162_v26  ;;  %v16914_v26 = vld [vmem:[#allocation70_spill] sm:$0xff] }
 0x60f   : > { %6707 = vmatpush.bf16.msrb.mxu2 %v6495_v46  ;;  %7141 = vmatpush.bf16.msra.mxu0 %v7053_v33  ;;  %v6355_v46 = vmul.f32 %v6291_v37, %v16905_v8  ;;  %v15332_v5 = vpop.f32.mrf.mxu0  ;;  %v6351_v33 = vmul.f32 %v6287_v47, %v16907_v17  ;;  %v15342_v37 = vpop.f32.mrf.mxu2 }
 0x610   : > { %v6136_v51 = vpop.f32.mrf.mxu3  ;;  %16906 = vst [vmem:[#allocation84_spill] sm:$0xff] %v15330_v54  ;;  %v15338_v48 = vadd.f32 %v6359_v36, %v16903_v23  ;;  %v6487_v40 = vpack.c.bf16 %v15317_v10, %v15330_v54  ;;  %7167 = vmatpush.bf16.msra.mxu1 %v7066_v3  ;;  %v6312_v36 = vadd.f32 %v16892_v41, %v6133_v50  ;;  %v16911_v54 = vld [vmem:[#allocation92_spill] sm:$0xff] }
 0x611   : > { %v6316_v7 = vadd.f32 %v16891_v22, %v6136_v51  ;;  %v15351_v47 = vadd.f32 %v6355_v46, %v16905_v8  ;;  %v6343_v22 = vmul.f32 %v6279_v13, %v16911_v54  ;;  %v15358_v51 = vadd.f32 %v6351_v33, %v16907_v17  ;;  %v16913_v46 = vld [vmem:[#allocation93_spill] sm:$0xff] }
 0x612   : > { %16908 = vst [vmem:[#allocation77_spill] sm:$0xff] %v15338_v48  ;;  %9238 = vmatmul.msk.bf16.vlgmr.msra.gmra.mxu0 %vm7121_vm0, %v15324_v30  ;;  %v6267_v41 = vadd.f32 %v14952_v21, %v15150_v15  ;;  %v6339_v50 = vmul.f32 %v6275_v32, %v16914_v26 }
 0x613   : > { %6708 = vmatpush.bf16.msrb.mxu2 %v6491_v49  ;;  %v6347_v49 = vmul.f32 %v6283_v60, %v16909_v59  ;;  %16910 = vst [vmem:[#allocation87_spill] sm:$0xff] %v15351_v47  ;;  %v6483_v12 = vpack.c.bf16 %v15338_v48, %v15351_v47  ;;  %v6308_v60 = vadd.f32 %v16893_v24, %v15261_v62  ;;  %v16916_v48 = vld [vmem:[#allocation95_spill] sm:$0xff]  ;;  %v16917_v62 = vld [vmem:[#allocation94_spill] sm:$0xff] }
 0x614   : > { %16912 = vst [vmem:[#allocation85_spill] sm:$0xff] %v15358_v51  ;;  %v6380_v8 = vmul.f32 %v6316_v7, %v16913_v46  ;;  %v6304_v47 = vadd.f32 %v14884_v27, %v15249_v42  ;;  %v6376_v24 = vmul.f32 %v6312_v36, %v16916_v48  ;;  %v15382_v32 = vadd.f32 %v6343_v22, %v16911_v54  ;;  %v16920_v42 = vld [vmem:[#allocation97_spill] sm:$0xff]  ;;  %v16923_v22 = vld [vmem:[#allocation27_spill] sm:$0xff] }
 0x615   : > { %v15370_v13 = vadd.f32 %v6347_v49, %v16909_v59  ;;  %v6300_v27 = vadd.f32 %v14871_v58, %v15238_v45  ;;  %v6372_v36 = vmul.f32 %v6308_v60, %v16920_v42  ;;  %v6331_v54 = vmul.f32 %v6267_v41, %v16923_v22  ;;  %v16925_v45 = vld [vmem:[#allocation98_spill] sm:$0xff] }
 0x616   : > { %16919 = vst [vmem:[#allocation89_spill] sm:$0xff] %v15382_v32  ;;  %v6296_v58 = vadd.f32 %v14887_v57, %v15231_v35  ;;  %v6368_v60 = vmul.f32 %v6304_v47, %v16925_v45  ;;  %v6292_v57 = vadd.f32 %v14882_v2, %v15224_v0  ;;  %v16929_v35 = vld [vmem:[#allocation100_spill] sm:$0xff]  ;;  %v6288_v2 = vadd.f32 %v14893_v34, %v15217_v19  ;;  %v16933_v0 = vld [vmem:[#allocation101_spill] sm:$0xff] }
 0x617   : > { %6709 = vmatpush.bf16.msrb.mxu2 %v6487_v40  ;;  %16915 = vst [vmem:[#allocation86_spill] sm:$0xff] %v15370_v13  ;;  %v15372_v33 = vpop.f32.mrf.mxu0  ;;  %v6479_v49 = vpack.c.bf16 %v15358_v51, %v15370_v13  ;;  %v15401_v13 = vadd.f32 %v6339_v50, %v16914_v26  ;;  %v6364_v47 = vmul.f32 %v6300_v27, %v16929_v35  ;;  %v16937_v34 = vld [vmem:[#allocation81_spill] sm:$0xff] }
 0x618   : > { %v6138_v3 = vpop.f32.mrf.mxu3  ;;  %v6360_v27 = vmul.f32 %v6296_v58, %v16933_v0  ;;  %v6356_v19 = vmul.f32 %v6292_v57, %v16937_v34 }
 0x619   : > { %v6320_v40 = vadd.f32 %v16895_v44, %v6138_v3  ;;  %v6263_v44 = vadd.f32 %v15032_v6, %v15139_v20  ;;  %v16918_v3 = vld [vmem:[#allocation96_spill] sm:$0xff]  ;;  %16924 = vst [vmem:[#allocation150_spill] sm:$0xff] %v15401_v13  ;;  %v6475_v41 = vpack.c.bf16 %v15382_v32, %v15401_v13  ;;  %v15455_v58 = vadd.f32 %v6364_v47, %v16929_v35 }
 0x61a   : > { %v6335_v15 = vmul.f32 %v6271_v9, %v16918_v3  ;;  %v6259_v9 = vadd.f32 %v15046_v11, %v15113_v1 }
 0x61b   : > { %6710 = vmatpush.bf16.msrb.mxu2 %v6483_v12  ;;  %v6384_v7 = vmul.f32 %v6320_v40, %v16917_v62  ;;  %v15386_v12 = vpop.f32.mrf.mxu2  ;;  %v15392_v40 = vadd.f32 %v6380_v8, %v16913_v46  ;;  %v15407_v8 = vadd.f32 %v6376_v24, %v16916_v48  ;;  %v16927_v46 = vld [vmem:[#allocation99_spill] sm:$0xff]  ;;  %v15423_v24 = vadd.f32 %v6372_v36, %v16920_v42 }
 0x61c   : > { %v15413_v1 = vadd.f32 %v6335_v15, %v16918_v3  ;;  %v16931_v15 = vld [vmem:[#allocation29_spill] sm:$0xff]  ;;  %v15440_v36 = vadd.f32 %v6368_v60, %v16925_v45  ;;  %v16940_v60 = vld [vmem:[#allocation134_spill] sm:$0xff] }
 0x61d   : > { %16921 = vst [vmem:[#allocation88_spill] sm:$0xff] %v15392_v40  ;;  %v15395_v20 = vadd.f32 %v6384_v7, %v16917_v62  ;;  %v6327_v62 = vmul.f32 %v6263_v44, %v16927_v46  ;;  %v15428_v44 = vld [vmem:[%s16270_s6 + $0x8] sm:$0xff] }
 0x61e   : > { %16926 = vst [vmem:[#allocation151_spill] sm:$0xff] %v15407_v8  ;;  %v6488_v57 = vpack.c.bf16 %v15440_v36, %v15455_v58  ;;  %v16977_v3 = vld [vmem:[#allocation137_spill] sm:$0xff] }
 0x61f   : > { %16922 = vst [vmem:[#allocation149_spill] sm:$0xff] %v15395_v20  ;;  %6711 = vmatpush.bf16.msrb.mxu2 %v6479_v49  ;;  %v6496_v7 = vpack.c.bf16 %v15395_v20, %v15392_v40  ;;  %v6323_v49 = vmul.f32 %v6259_v9, %v16931_v15  ;;  %v15432_v40 = vadd.f32 %v6331_v54, %v16923_v22  ;;  %v15434_v20 = vpop.f32.mrf.mxu0 }
 0x620   : > { %16928 = vst [vmem:[#allocation152_spill] sm:$0xff] %v15413_v1  ;;  %v15417_v50 = vpop.f32.mrf.mxu3  ;;  %v15445_v42 = vadd.f32 %v6327_v62, %v16927_v46 }
 0x621   : > { %16930 = vst [vmem:[#allocation153_spill] sm:$0xff] %v15423_v24  ;;  %6756 = vmatpush.bf16.msrb.mxu3 %v6496_v7  ;;  %v6492_v7 = vpack.c.bf16 %v15407_v8, %v15423_v24  ;;  %v6471_v54 = vpack.c.bf16 %v15413_v1, %v15432_v40  ;;  %v15460_v62 = vadd.f32 %v6323_v49, %v16931_v15  ;;  %v16941_v8 = vld [vmem:[#allocation102_spill] sm:$0xff] }
 0x622   : > { %16932 = vst [vmem:[#allocation154_spill] sm:$0xff] %v15432_v40  ;;  %9239 = vmatmul.msk.bf16.gmra.mxu0 %vm7121_vm0, %v15428_v44  ;;  %v6280_v24 = vadd.f32 %v14971_v29, %v16940_v60  ;;  %v6352_v45 = vmul.f32 %v6288_v2, %v16941_v8  ;;  %v15478_v29 = vadd.f32 %v6356_v19, %v16937_v34 }
 0x623   : > { %6712 = vmatpush.bf16.msrb.mxu2 %v6475_v41  ;;  %16934 = vst [vmem:[#allocation155_spill] sm:$0xff] %v15440_v36  ;;  %v15449_v9 = vpop.f32.mrf.mxu2  ;;  %v16936_v41 = vld [vmem:[#allocation135_spill] sm:$0xff]  ;;  %v6467_v47 = vpack.c.bf16 %v15445_v42, %v15460_v62 }
 0x624   : > { %16935 = vst [vmem:[#allocation156_spill] sm:$0xff] %v15445_v42  ;;  %v6284_v48 = vadd.f32 %v14902_v16, %v16936_v41  ;;  %v15466_v16 = vadd.f32 %v6360_v27, %v16933_v0  ;;  %v16943_v41 = vld [vmem:[#allocation53_spill] sm:$0xff]  ;;  %v16946_v27 = vld [vmem:[#allocation80_spill] sm:$0xff]  ;;  %v15486_v0 = vadd.f32 %v6352_v45, %v16941_v8 }
 0x625   : > { %16938 = vst [vmem:[#allocation135_spill] sm:$0xff] %v15455_v58  ;;  %6757 = vmatpush.bf16.msrb.mxu3 %v6492_v7  ;;  %v6276_v49 = vadd.f32 %v14924_v4, %v16943_v41  ;;  %v6272_v60 = vadd.f32 %v15002_v28, %v16946_v27  ;;  %v16947_v58 = vld [vmem:[#allocation103_spill] sm:$0xff]  ;;  %v16954_v27 = vld [vmem:[#allocation104_spill] sm:$0xff] }
 0x626   : > { %16939 = vst [vmem:[#allocation157_spill] sm:$0xff] %v15460_v62  ;;  %v6344_v36 = vmul.f32 %v6280_v24, %v16947_v58  ;;  %v6484_v4 = vpack.c.bf16 %v15466_v16, %v15478_v29  ;;  %v16952_v28 = vld [vmem:[#allocation131_spill] sm:$0xff]  ;;  %v16953_v24 = vld [vmem:[#allocation33_spill] sm:$0xff]  ;;  %v16975_v62 = vld [vmem:[#allocation148_spill] sm:$0xff] }
 0x627   : > { %6713 = vmatpush.bf16.msrb.mxu2 %v6471_v54  ;;  %16942 = vst [vmem:[#allocation134_spill] sm:$0xff] %v15466_v16  ;;  %v16944_v54 = vld [vmem:[#allocation79_spill] sm:$0xff]  ;;  %v15480_v2 = vpop.f32.mrf.mxu0  ;;  %v6264_v45 = vadd.f32 %v15032_v6, %v16953_v24  ;;  %v6336_v8 = vmul.f32 %v6272_v60, %v16954_v27  ;;  %v15518_v6 = vld [vmem:[%s16270_s6 + $0x10] sm:$0xff]  ;;  %v16959_v60 = vld [vmem:[#allocation105_spill] sm:$0xff] }
 0x628   : > { %v15472_v7 = vpop.f32.mrf.mxu3  ;;  %v6348_v35 = vmul.f32 %v6284_v48, %v16944_v54  ;;  %16945 = vst [vmem:[#allocation53_spill] sm:$0xff] %v15478_v29  ;;  %v16949_v48 = vld [vmem:[#allocation66_spill] sm:$0xff]  ;;  %v15503_v29 = vadd.f32 %v6344_v36, %v16947_v58 }
 0x629   : > { %6758 = vmatpush.bf16.msrb.mxu3 %v6488_v57  ;;  %16948 = vst [vmem:[#allocation80_spill] sm:$0xff] %v15486_v0  ;;  %v6268_v19 = vadd.f32 %v14952_v21, %v16949_v48  ;;  %v16950_v57 = vld [vmem:[#allocation76_spill] sm:$0xff]  ;;  %v16957_v48 = vld [vmem:[#allocation71_spill] sm:$0xff]  ;;  %v6328_v24 = vmul.f32 %v6264_v45, %v16959_v60 }
 0x62a   : > { %v15496_v34 = vadd.f32 %v6348_v35, %v16944_v54  ;;  %16955 = vst [vmem:[#allocation131_spill] sm:$0xff] %v15503_v29 }
 0x62b   : > { %6714 = vmatpush.bf16.msrb.mxu2 %v6467_v47  ;;  %v15490_v41 = vpop.f32.mrf.mxu2  ;;  %v6340_v47 = vmul.f32 %v6276_v49, %v16950_v57  ;;  %v16956_v49 = vld [vmem:[#allocation28_spill] sm:$0xff] }
 0x62c   : > { %16951 = vst [vmem:[#allocation66_spill] sm:$0xff] %v15496_v34  ;;  %v6480_v16 = vpack.c.bf16 %v15486_v0, %v15496_v34  ;;  %v6260_v35 = vadd.f32 %v15046_v11, %v16956_v49  ;;  %v15524_v34 = vadd.f32 %v6336_v8, %v16954_v27  ;;  %v16961_v49 = vld [vmem:[#allocation67_spill] sm:$0xff] }
 0x62d   : > { %6759 = vmatpush.bf16.msrb.mxu3 %v6484_v4  ;;  %v6332_v4 = vmul.f32 %v6268_v19, %v16957_v48  ;;  %v15513_v54 = vadd.f32 %v6340_v47, %v16950_v57  ;;  %v15535_v57 = vadd.f32 %v6328_v24, %v16959_v60  ;;  %v16966_v24 = vld [vmem:[#allocation74_spill] sm:$0xff]  ;;  %v16969_v60 = vld [vmem:[#allocation147_spill] sm:$0xff] }
 0x62e   : > { %6715 = vmatmul.bf16.vlgmr.msrb.gmra.mxu2 %v16952_v28  ;;  %16960 = vst [vmem:[#allocation28_spill] sm:$0xff] %v15524_v34  ;;  %v6324_v47 = vmul.f32 %v6260_v35, %v16961_v49  ;;  %v15544_v35 = vpop.f32.mrf.mxu1 }
 0x62f   : > { %16958 = vst [vmem:[#allocation33_spill] sm:$0xff] %v15513_v54  ;;  %v15520_v36 = vpop.f32.mrf.mxu0  ;;  %v6476_v11 = vpack.c.bf16 %v15503_v29, %v15513_v54  ;;  %v16970_v29 = vld [vmem:[#allocation144_spill] sm:$0xff] }
 0x630   : > { %v15507_v21 = vpop.f32.mrf.mxu3  ;;  %16963 = vst [vmem:[#allocation159_spill] sm:$0xff] %v15535_v57  ;;  %v15542_v54 = vadd.f32 %v6324_v47, %v16961_v49  ;;  %v15555_v47 = vld [vmem:[%s16270_s6 + $0x18] sm:$0xff]  ;;  %v16968_v49 = vld [vmem:[#allocation146_spill] sm:$0xff]  ;;  %v7002_v27 = vadd.f32 %v16970_v29, %v16969_v60 }
 0x631   : > { %6760 = vmatpush.bf16.msrb.mxu3 %v6480_v16  ;;  %v15530_v16 = vadd.f32 %v6332_v4, %v16957_v48  ;;  %16965 = vst [vmem:[#allocation161_spill] sm:$0xff] %v15544_v35  ;;  %v16974_v35 = vld [vmem:[#allocation141_spill] sm:$0xff] }
 0x632   : > { %9240 = vmatmul.msk.bf16.gmra.mxu0 %vm7121_vm0, %v15518_v6  ;;  %16964 = vst [vmem:[#allocation160_spill] sm:$0xff] %v15542_v54  ;;  %v6994_v42 = vadd.f32 %v16975_v62, %v16974_v35  ;;  %v7034_v15 = vmax.f32 %v7002_v27, 0.0 }
 0x633   : > { %v6082_v19 = vpop.f32.mrf.mxu2  ;;  %16962 = vst [vmem:[#allocation158_spill] sm:$0xff] %v15530_v16  ;;  %v6472_v8 = vpack.c.bf16 %v15524_v34, %v15530_v16 }
 0x634   : > { %v7026_v46 = vmax.f32 %v6994_v42, 0.0 }
 0x635   : > { %6761 = vmatpush.bf16.msrb.mxu3 %v6476_v11  ;;  %v6468_v11 = vpack.c.bf16 %v15535_v57, %v15542_v54  ;;  %v16973_v57 = vld [vmem:[#allocation145_spill] sm:$0xff] }
 0x636   : > { %v15563_v54 = vpop.f32.mrf.mxu1 }
 0x637   : > { %v15546_v4 = vpop.f32.mrf.mxu0  ;;  %16971 = vst [vmem:[#allocation74_spill] sm:$0xff] %v15563_v54  ;;  %v16976_v54 = vld [vmem:[#allocation69_spill] sm:$0xff] }
 0x638   : > { %v15539_v45 = vpop.f32.mrf.mxu3 }
 0x639   : > { %6762 = vmatpush.bf16.msrb.mxu3 %v6472_v8  ;;  %v16967_v8 = vld [vmem:[#allocation143_spill] sm:$0xff] }
 0x63a   : > { %v6998_v34 = vadd.f32 %v16968_v49, %v16967_v8 }
 0x63b   : > { %v6084_v48 = vpop.f32.mrf.mxu2 }
 0x63c   : > { %v7030_v40 = vmax.f32 %v6998_v34, 0.0 }
 0x63d   : > { %6763 = vmatpush.bf16.msrb.mxu3 %v6468_v11 }
 0x63e   : > { %6720 = vmatmul.bf16.gmra.mxu2 %v16966_v24  ;;  %v7062_v13 = vpack.c.bf16 %v7034_v15, %v7030_v40  ;;  %v15577_v26 = vpop.f32.mrf.mxu1  ;;  %v6991_v15 = vadd.f32 %v16973_v57, %v15449_v9 }
 0x63f   : > { %v15561_v0 = vpop.f32.mrf.mxu0  ;;  %16978 = vst [vmem:[#allocation143_spill] sm:$0xff] %v15577_v26 }
 0x640   : > { %6764 = vmatmul.bf16.vlgmr.msrb.gmra.mxu3 %v16952_v28  ;;  %v6151_v16 = vpop.f32.mrf.mxu3  ;;  %v16972_v28 = vld [vmem:[#allocation140_spill] sm:$0xff]  ;;  %7168 = vmatpush.bf16.msra.mxu1 %v7062_v13 }
 0x641   : > { %v6990_v58 = vadd.f32 %v16973_v57, %v16972_v28  ;;  %v6982_v28 = vadd.f32 %v15273_v31, %v16977_v3  ;;  %v6995_v3 = vadd.f32 %v16975_v62, %v15490_v41 }
 0x642   : > { %9241 = vmatmul.msk.bf16.gmra.mxu0 %vm7121_vm0, %v15555_v47 }
 0x643   : > { %v6087_v11 = vpop.f32.mrf.mxu2  ;;  %v7022_v1 = vmax.f32 %v6990_v58, 0.0  ;;  %v16979_v58 = vld [vmem:[#allocation138_spill] sm:$0xff]  ;;  %v7027_v41 = vmax.f32 %v6995_v3, 0.0  ;;  %v6984_v3 = vadd.f32 %v15273_v31, %v15417_v50 }
 0x644   : > { %v7007_v32 = vadd.f32 %v15234_v52, %v6087_v11  ;;  %v6986_v42 = vadd.f32 %v15283_v63, %v16979_v58  ;;  %v6999_v11 = vadd.f32 %v16968_v49, %v6082_v19 }
 0x645   : > { %v7058_v27 = vpack.c.bf16 %v7026_v46, %v7022_v1  ;;  %v7014_v46 = vmax.f32 %v6982_v28, 0.0  ;;  %v7000_v28 = vadd.f32 %v16968_v49, %v6151_v16  ;;  %v6996_v49 = vadd.f32 %v16975_v62, %v15539_v45 }
 0x646   : > { %v7039_v35 = vmax.f32 %v7007_v32, 0.0  ;;  %v7031_v58 = vmax.f32 %v6999_v11, 0.0  ;;  %v7018_v9 = vmax.f32 %v6986_v42, 0.0 }
 0x647   : > { %v15571_v60 = vpop.f32.mrf.mxu0  ;;  %7169 = vmatpush.bf16.msra.mxu1 %v7058_v27  ;;  %v7023_v27 = vmax.f32 %v6991_v15, 0.0 }
 0x648   : > { %v6153_v8 = vpop.f32.mrf.mxu3 }
 0x649   : > { %v7059_v15 = vpack.c.bf16 %v7027_v41, %v7023_v27  ;;  %v16986_v41 = vld [vmem:[#allocation139_spill] sm:$0xff] }
 0x64b   : > { %v6089_v22 = vpop.f32.mrf.mxu2 }
 0x64c   : > { %v7011_v34 = vadd.f32 %v15240_v38, %v6089_v22  ;;  %v7003_v22 = vadd.f32 %v16970_v29, %v6084_v48  ;;  %v7054_v48 = vpack.c.bf16 %v7018_v9, %v7014_v46  ;;  %v7028_v46 = vmax.f32 %v6996_v49, 0.0 }
 0x64e   : > { %6725 = vmatmul.bf16.gmra.mxu2 %v16976_v54  ;;  %v7043_v13 = vmax.f32 %v7011_v34, 0.0  ;;  %v7035_v26 = vmax.f32 %v7003_v22, 0.0  ;;  %v6987_v34 = vadd.f32 %v15283_v63, %v15386_v12  ;;  %7170 = vmatpush.bf16.msra.mxu1 %v7054_v48  ;;  %v15639_v48 = vpop.permute.xlu1 %7094 }
 0x64f   : > { %v15589_v32 = vpop.f32.mrf.mxu0 }
 0x650   : > { %6769 = vmatmul.bf16.gmra.mxu3 %v16966_v24  ;;  %v6156_v40 = vpop.f32.mrf.mxu3  ;;  %v7067_v1 = vpack.c.bf16 %v7043_v13, %v7039_v35  ;;  %v6983_v24 = vadd.f32 %v15273_v31, %v15342_v37  ;;  %v7063_v51 = vpack.c.bf16 %v7035_v26, %v7031_v58  ;;  %v7004_v35 = vadd.f32 %v16970_v29, %v6153_v8  ;;  %v15598_v13 = vpop.f32.mrf.mxu1 }
 0x651   : > { %v7008_v19 = vadd.f32 %v15234_v52, %v6156_v40  ;;  %16980 = vst [vmem:[#allocation146_spill] sm:$0xff] %v15598_v13  ;;  %v7019_v37 = vmax.f32 %v6987_v34, 0.0  ;;  %v6992_v52 = vadd.f32 %v16973_v57, %v15507_v21  ;;  %v7032_v29 = vmax.f32 %v7000_v28, 0.0  ;;  %9242 = vmatmul.msk.bf16.vlgmr.msra.gmra.mxu1 %vm7121_vm0, %v15324_v30 }
 0x652   : > { %7196 = vmatpush.bf16.msra.mxu2 %v7067_v1  ;;  %v7015_v11 = vmax.f32 %v6983_v24, 0.0  ;;  %v7036_v16 = vmax.f32 %v7004_v35, 0.0  ;;  %v6988_v57 = vadd.f32 %v15283_v63, %v15472_v7  ;;  %v7016_v58 = vmax.f32 %v6984_v3, 0.0  ;;  %v16984_v7 = vld [vmem:[#allocation136_spill] sm:$0xff]  ;;  %v15643_v35 = vpop.permute.xlu2 %7098 }
 0x653   : > { %v7040_v12 = vmax.f32 %v7008_v19, 0.0  ;;  %v7024_v21 = vmax.f32 %v6992_v52, 0.0 }
 0x654   : > { %v7064_v62 = vpack.c.bf16 %v7036_v16, %v7032_v29  ;;  %v7020_v24 = vmax.f32 %v6988_v57, 0.0 }
 0x655   : > { %v7060_v34 = vpack.c.bf16 %v7028_v46, %v7024_v21 }
 0x656   : > { %7197 = vmatpush.bf16.msra.mxu2 %v7063_v51  ;;  %v16981_v51 = vld [vmem:[#allocation133_spill] sm:$0xff]  ;;  %v7056_v31 = vpack.c.bf16 %v7020_v24, %v7016_v58 }
 0x657   : > { %v15603_v26 = vpop.f32.mrf.mxu0 }
 0x658   : > { %v6158_v22 = vpop.f32.mrf.mxu3  ;;  %v15615_v45 = vpop.f32.mrf.mxu1 }
 0x659   : > { %v7012_v42 = vadd.f32 %v15240_v38, %v6158_v22  ;;  %v7055_v38 = vpack.c.bf16 %v7019_v37, %v7015_v11  ;;  %16982 = vst [vmem:[#allocation147_spill] sm:$0xff] %v15615_v45  ;;  %v15649_v37 = vpop.permute.xlu1 %7090 }
 0x65a   : > { %7198 = vmatpush.bf16.msra.mxu2 %v7059_v15  ;;  %v15655_v15 = vpop.permute.xlu2 %7078 }
 0x65b   : > { %v7044_v8 = vmax.f32 %v7012_v42, 0.0 }
 0x65d   : > { %v7068_v40 = vpack.c.bf16 %v7044_v8, %v7040_v12  ;;  %v16989_v12 = vld [vmem:[#allocation142_spill] sm:$0xff] }
 0x65e   : > { %6730 = vmatmul.bf16.gmra.mxu2 %v16981_v51 }
 0x65f   : > { %7225 = vmatpush.bf16.msra.mxu3 %v7068_v40  ;;  %7199 = vmatpush.bf16.msra.mxu2 %v7055_v38  ;;  %v15617_v1 = vpop.f32.mrf.mxu0 }
 0x660   : > { %6774 = vmatmul.bf16.gmra.mxu3 %v16976_v54  ;;  %v15623_v63 = vpop.f32.mrf.mxu1 }
 0x661   : > { %9243 = vmatmul.msk.bf16.gmra.mxu1 %vm7121_vm0, %v15428_v44  ;;  %16983 = vst [vmem:[#allocation144_spill] sm:$0xff] %v15623_v63  ;;  %v15659_v49 = vpop.permute.xlu1 %7082 }
 0x662   : > { %v15661_v16 = vpop.permute.xlu2 %7070 }
 0x663   : > { %7226 = vmatpush.bf16.msra.mxu3 %v7064_v62 }
 0x667   : > { %7227 = vmatpush.bf16.msra.mxu3 %v7060_v34  ;;  %v15619_v50 = vpop.f32.mrf.mxu0 }
 0x668   : > { %v15629_v9 = vpop.f32.mrf.mxu1 }
 0x669   : > { %16985 = vst [vmem:[#allocation140_spill] sm:$0xff] %v15629_v9 }
 0x66a   : > { %v15669_v38 = vpop.permute.xlu2 %6554 }
 0x66b   : > { %7228 = vmatpush.bf16.msra.mxu3 %v7056_v31  ;;  %v15686_v31 = vpop.permute.xlu0 %7086 }
 0x66e   : > { %6735 = vmatmul.bf16.gmra.mxu2 %v16984_v7 }
 0x66f   : > { %v15627_v54 = vpop.f32.mrf.mxu0 }
 0x670   : > { %6779 = vmatmul.bf16.gmra.mxu3 %v16981_v51  ;;  %v15636_v19 = vpop.f32.mrf.mxu1  ;;  %v15666_v51 = vpop.permute.xlu1 %6558 }
 0x671   : > { %9244 = vmatmul.msk.bf16.gmra.mxu1 %vm7121_vm0, %v15518_v6  ;;  %16987 = vst [vmem:[#allocation145_spill] sm:$0xff] %v15636_v19 }
 0x672   : > { %v15680_v62 = vpop.permute.xlu2 %6542 }
 0x673   : > { %v15702_v63 = vpop.permute.xlu0 %7074 }
 0x677   : > { %v15631_v27 = vpop.f32.mrf.mxu0 }
 0x678   : > { %v15645_v11 = vpop.f32.mrf.mxu1  ;;  %v15673_v57 = vpop.permute.xlu1 %6546 }
 0x679   : > { %16988 = vst [vmem:[#allocation141_spill] sm:$0xff] %v15645_v11 }
 0x67e   : > { %6740 = vmatmul.bf16.gmra.mxu2 %v16986_v41 }
 0x67f   : > { %v15641_v28 = vpop.f32.mrf.mxu0 }
 0x680   : > { %6784 = vmatmul.bf16.gmra.mxu3 %v16984_v7  ;;  %v15657_v52 = vpop.f32.mrf.mxu1  ;;  %v15684_v34 = vpop.permute.xlu1 %6538 }
 0x681   : > { %9245 = vmatmul.msk.bf16.gmra.mxu1 %vm7121_vm0, %v15555_v47  ;;  %16990 = vst [vmem:[#allocation148_spill] sm:$0xff] %v15657_v52 }
 0x687   : > { %v15647_v22 = vpop.f32.mrf.mxu0 }
 0x688   : > { %v15664_v8 = vpop.f32.mrf.mxu1  ;;  %v15694_v45 = vpop.permute.xlu1 %6526 }
 0x689   : > { %16991 = vst [vmem:[#allocation69_spill] sm:$0xff] %v15664_v8 }
 0x68e   : > { %6745 = vmatmul.bf16.gmra.mxu2 %v16989_v12 }
 0x68f   : > { %v7143_v42 = vpop.f32.mrf.mxu0 }
 0x690   : > { %6789 = vmatmul.bf16.gmra.mxu3 %v16986_v41  ;;  %v15671_v3 = vpop.f32.mrf.mxu1  ;;  %v15710_v8 = vpop.permute.xlu1 %6518 }
 0x691   : > { %16992 = vst [vmem:[#allocation137_spill] sm:$0xff] %v15671_v3 }
 0x697   : > { %v7145_v29 = vpop.f32.mrf.mxu0 }
 0x698   : > { %v15682_v58 = vpop.f32.mrf.mxu1 }
 0x699   : > { %16994 = vst [vmem:[#allocation133_spill] sm:$0xff] %v15682_v58 }
 0x69e   : > { %6750 = vmatmul.bf16.gmra.mxu2 %v15264_v61 }
 0x69f   : > { %v7148_v40 = vpop.f32.mrf.mxu0 }
 0x6a0   : > { %6794 = vmatmul.bf16.gmra.mxu3 %v16989_v12  ;;  %v15690_v12 = vpop.permute.xlu2 %6534  ;;  %v15692_v13 = vpop.f32.mrf.mxu1 }
 0x6a1   : > { %16996 = vst [vmem:[#allocation139_spill] sm:$0xff] %v15692_v13 }
 0x6a7   : > { %v7150_v21 = vpop.f32.mrf.mxu0 }
 0x6a8   : > { %v15706_v11 = vpop.permute.xlu2 %6522  ;;  %v15708_v52 = vpop.f32.mrf.mxu1  ;;  %v7151_v17 = vadd.f32 %v7150_v21, %v15659_v49 }
 0x6a9   : > { %16999 = vst [vmem:[#allocation163_spill] sm:$0xff] %v15708_v52  ;;  %v7149_v52 = vadd.f32 %v7148_v40, %v15655_v15  ;;  %v15735_v40 = vpop.permute.xlu1 %6514 }
 0x6ab   : > { %v7258_v21 = vmax.f32 %v7149_v52, 0.0 }
 0x6ae   : > { %9246 = vmatmul.msk.bf16.vlgmr.msra.gmra.mxu2 %vm7121_vm0, %v15324_v30 }
 0x6af   : > { %v7153_v24 = vpop.f32.mrf.mxu0 }
 0x6b0   : > { %6799 = vmatmul.bf16.gmra.mxu3 %v15264_v61  ;;  %v7154_v13 = vadd.f32 %v7153_v24, %v15686_v31  ;;  %v15728_v23 = vpop.f32.mrf.mxu1 }
 0x6b1   : > { %v15678_v46 = vpop.f32.mrf.mxu2  ;;  %17004 = vst [vmem:[#allocation168_spill] sm:$0xff] %v15728_v23 }
 0x6b2   : > { %16993 = vst [vmem:[#allocation138_spill] sm:$0xff] %v15678_v46  ;;  %v7266_v10 = vmax.f32 %v7154_v13, 0.0  ;;  %v7146_v13 = vadd.f32 %v7145_v29, %v15702_v63 }
 0x6b7   : > { %v7155_v41 = vpop.f32.mrf.mxu0 }
 0x6b8   : > { %v7156_v46 = vadd.f32 %v7155_v41, %v15649_v37 }
 0x6b9   : > { %v15688_v7 = vpop.f32.mrf.mxu2 }
 0x6ba   : > { %16995 = vst [vmem:[#allocation136_spill] sm:$0xff] %v15688_v7  ;;  %v15717_v7 = vpop.permute.xlu0 %7336 }
 0x6bb   : > { %17001 = vst [vmem:[#allocation165_spill] sm:$0xff] %v15717_v7  ;;  %v7144_v7 = vadd.f32 %v7143_v42, %v15661_v16 }
 0x6bd   : > { %v7250_v42 = vmax.f32 %v7144_v7, 0.0  ;;  %v6649_v7 = vadd.f32 %v15627_v54, %v15673_v57  ;;  %v6644_v54 = vadd.f32 %v15617_v1, %v15684_v34 }
 0x6be   : > { %9247 = vmatmul.msk.bf16.gmra.mxu2 %vm7121_vm0, %v15428_v44 }
 0x6bf   : > { %v7158_v9 = vpop.f32.mrf.mxu0 }
 0x6c0   : > { %9250 = vmatmul.msk.bf16.vlgmr.msra.gmra.mxu3 %vm7121_vm0, %v15324_v30  ;;  %v7159_v3 = vadd.f32 %v7158_v9, %v15639_v48  ;;  %v7270_v9 = vmax.f32 %v7156_v46, 0.0  ;;  %v7262_v46 = vmax.f32 %v7151_v17, 0.0  ;;  %v17006_v17 = vld [vmem:[#allocation40_spill] sm:$0xff] }
 0x6c1   : > { %v15698_v61 = vpop.f32.mrf.mxu2 }
 0x6c2   : > { %16997 = vst [vmem:[#allocation142_spill] sm:$0xff] %v15698_v61 }
 0x6c3   : > { %v15704_v19 = vpop.f32.mrf.mxu3 }
 0x6c4   : > { %16998 = vst [vmem:[#allocation162_spill] sm:$0xff] %v15704_v19  ;;  %v7274_v19 = vmax.f32 %v7159_v3, 0.0 }
 0x6c7   : > { %v7160_v30 = vpop.f32.mrf.mxu0 }
 0x6c8   : > { %v7161_v59 = vadd.f32 %v7160_v30, %v15643_v35  ;;  %v7299_v30 = vpack.c.bf16 %v7270_v9, %v7266_v10 }
 0x6c9   : > { %v15713_v58 = vpop.f32.mrf.mxu2 }
 0x6ca   : > { %17000 = vst [vmem:[#allocation164_spill] sm:$0xff] %v15713_v58  ;;  %v7278_v24 = vmax.f32 %v7161_v59, 0.0  ;;  %v15726_v58 = vpop.permute.xlu2 %7332 }
 0x6cb   : > { %v15719_v61 = vpop.f32.mrf.mxu3  ;;  %17003 = vst [vmem:[#allocation167_spill] sm:$0xff] %v15726_v58  ;;  %v7254_v58 = vmax.f32 %v7146_v13, 0.0  ;;  %v17008_v13 = vld [vmem:[#allocation39_spill] sm:$0xff] }
 0x6cc   : > { %17002 = vst [vmem:[#allocation166_spill] sm:$0xff] %v15719_v61  ;;  %v7303_v41 = vpack.c.bf16 %v7278_v24, %v7274_v19  ;;  %v6656_v19 = vadd.f32 %v15647_v22, %v15666_v51  ;;  %v15742_v24 = vpop.permute.xlu0 %6550  ;;  %v7295_v61 = vpack.c.bf16 %v7262_v46, %v7258_v21  ;;  %v15758_v46 = vpop.permute.xlu1 %7324 }
 0x6cd   : > { %v6651_v52 = vadd.f32 %v15631_v27, %v15742_v24  ;;  %v7291_v22 = vpack.c.bf16 %v7254_v58, %v7250_v42  ;;  %17009 = vst [vmem:[#allocation39_spill] sm:$0xff] %v15758_v46  ;;  %v6646_v27 = vadd.f32 %v15619_v50, %v15680_v62  ;;  %v17013_v58 = vld [vmem:[#allocation41_spill] sm:$0xff]  ;;  %v17014_v42 = vld [vmem:[#allocation82_spill] sm:$0xff]  ;;  %v6641_v50 = vadd.f32 %v15603_v26, %v15690_v12 }
 0x6ce   : > { %9248 = vmatmul.msk.bf16.gmra.mxu2 %vm7121_vm0, %v15518_v6  ;;  %7375 = vmatpush.bf16.msrb.mxu0 %v7303_v41  ;;  %v6865_v10 = vmul.f32 %v6656_v19, %v17006_v17  ;;  %v15751_v9 = vpop.f32.mrf.mxu1  ;;  %v17012_v17 = vld [vmem:[#allocation31_spill] sm:$0xff] }
 0x6d0   : > { %9251 = vmatmul.msk.bf16.gmra.mxu3 %vm7121_vm0, %v15428_v44  ;;  %v6654_v44 = vadd.f32 %v15641_v28, %v15669_v38 }
 0x6d1   : > { %v15731_v3 = vpop.f32.mrf.mxu2 }
 0x6d2   : > { %7376 = vmatpush.bf16.msrb.mxu0 %v7299_v30  ;;  %v15753_v41 = vpop.permute.xlu2 %7328  ;;  %v6861_v21 = vmul.f32 %v6654_v44, %v17008_v13  ;;  %v17011_v30 = vld [vmem:[#allocation42_spill] sm:$0xff] }
 0x6d3   : > { %v15738_v59 = vpop.f32.mrf.mxu3  ;;  %17007 = vst [vmem:[#allocation40_spill] sm:$0xff] %v15753_v41  ;;  %v6857_v19 = vmul.f32 %v6651_v52, %v17011_v30  ;;  %v17015_v52 = vld [vmem:[#allocation47_spill] sm:$0xff] }
 0x6d4   : > { %17005 = vst [vmem:[#allocation169_spill] sm:$0xff] %v15738_v59  ;;  %v6929_v59 = vadd.f32 %v6865_v10, %v17012_v17  ;;  %v6925_v44 = vadd.f32 %v6861_v21, %v17014_v42  ;;  %v15772_v13 = vpop.permute.xlu0 %6530  ;;  %v6849_v30 = vmul.f32 %v6646_v27, %v17015_v52  ;;  %v17016_v17 = vld [vmem:[#allocation65_spill] sm:$0xff]  ;;  %v15796_v46 = vpop.permute.xlu1 %7320  ;;  %v17025_v41 = vld [vmem:[#allocation55_spill] sm:$0xff] }
 0x6d5   : > { %17022 = vst [vmem:[#allocation31_spill] sm:$0xff] %v15796_v46 }
 0x6d6   : > { %7377 = vmatpush.bf16.msrb.mxu0 %v7295_v61  ;;  %v6853_v61 = vmul.f32 %v6649_v7, %v17013_v58  ;;  %v15782_v1 = vpop.f32.mrf.mxu1  ;;  %v17017_v7 = vld [vmem:[#allocation46_spill] sm:$0xff]  ;;  %v17018_v58 = vld [vmem:[#allocation83_spill] sm:$0xff] }
 0x6d7   : > { %v6845_v21 = vmul.f32 %v6644_v54, %v17017_v7  ;;  %v17023_v54 = vld [vmem:[#allocation37_spill] sm:$0xff] }
 0x6d8   : > { %v6917_v26 = vadd.f32 %v6853_v61, %v17018_v58  ;;  %v17024_v61 = vld [vmem:[#allocation109_spill] sm:$0xff]  ;;  %v6631_v58 = vadd.f32 %v15546_v4, %v15710_v8 }
 0x6d9   : > { %v15749_v29 = vpop.f32.mrf.mxu2  ;;  %v6909_v7 = vadd.f32 %v6845_v21, %v17024_v61  ;;  %v17028_v21 = vld [vmem:[#allocation113_spill] sm:$0xff] }
 0x6da   : > { %7378 = vmatpush.bf16.msrb.mxu0 %v7291_v22  ;;  %v6921_v22 = vadd.f32 %v6857_v19, %v17016_v17  ;;  %v15788_v42 = vpop.permute.xlu2 %6506  ;;  %v6636_v19 = vadd.f32 %v15571_v60, %v15694_v45 }
 0x6db   : > { %v15760_v28 = vpop.f32.mrf.mxu3 }
 0x6dc   : > { %17010 = vst [vmem:[#allocation170_spill] sm:$0xff] %v15760_v28  ;;  %v6833_v60 = vmul.f32 %v6636_v19, %v17025_v41  ;;  %v17030_v41 = vld [vmem:[#allocation58_spill] sm:$0xff] }
 0x6dd   : > { %v6825_v19 = vmul.f32 %v6631_v58, %v17030_v41 }
 0x6de   : > { %9249 = vmatmul.msk.bf16.gmra.mxu2 %vm7121_vm0, %v15555_v47  ;;  %7524 = vmatpush.msra.mxu0 %v6929_v59  ;;  %v6639_v59 = vadd.f32 %v15589_v32, %v15772_v13  ;;  %v6634_v32 = vadd.f32 %v15561_v0, %v15706_v11  ;;  %v6629_v0 = vadd.f32 %v15520_v36, %v15735_v40 }
 0x6df   : > { %v6624_v36 = vadd.f32 %v15434_v20, %v15788_v42 }
 0x6e0   : > { %7525 = vmatpush.msra.mxu0 %v6925_v44  ;;  %9252 = vmatmul.msk.bf16.gmra.mxu3 %vm7121_vm0, %v15518_v6  ;;  %v17020_v44 = vld [vmem:[#allocation50_spill] sm:$0xff]  ;;  %v17021_v6 = vld [vmem:[#allocation107_spill] sm:$0xff] }
 0x6e1   : > { %v15777_v10 = vpop.f32.mrf.mxu2  ;;  %v6841_v52 = vmul.f32 %v6641_v50, %v17020_v44  ;;  %v6913_v17 = vadd.f32 %v6849_v30, %v17021_v6  ;;  %v17026_v50 = vld [vmem:[#allocation111_spill] sm:$0xff]  ;;  %v15808_v44 = vpop.permute.xlu0 %6510 }
 0x6e2   : > { %7526 = vmatpush.msra.mxu0 %v6921_v22  ;;  %v6837_v22 = vmul.f32 %v6639_v59, %v17023_v54  ;;  %v17027_v59 = vld [vmem:[#allocation54_spill] sm:$0xff]  ;;  %v6626_v4 = vadd.f32 %v15480_v2, %v15808_v44 }
 0x6e3   : > { %v15790_v27 = vpop.f32.mrf.mxu3  ;;  %v6905_v30 = vadd.f32 %v6841_v52, %v17026_v50  ;;  %v6829_v6 = vmul.f32 %v6634_v32, %v17027_v59  ;;  %v17031_v52 = vld [vmem:[#allocation115_spill] sm:$0xff]  ;;  %v17032_v50 = vld [vmem:[#allocation57_spill] sm:$0xff]  ;;  %v15826_v59 = vpop.permute.xlu1 %6498 }
 0x6e4   : > { %17019 = vst [vmem:[#allocation42_spill] sm:$0xff] %v15790_v27  ;;  %7527 = vmatpush.msra.mxu0 %v6917_v26  ;;  %v7177_v26 = vpop.f32.mrf.mxu1  ;;  %v6897_v61 = vadd.f32 %v6833_v60, %v17031_v52  ;;  %v6821_v32 = vmul.f32 %v6629_v0, %v17032_v50  ;;  %v17035_v60 = vld [vmem:[#allocation119_spill] sm:$0xff]  ;;  %v6619_v0 = vadd.f32 %v15332_v5, %v15826_v59  ;;  %v17043_v5 = vld [vmem:[#allocation126_spill] sm:$0xff] }
 0x6e5   : > { %v6889_v41 = vadd.f32 %v6825_v19, %v17035_v60  ;;  %v17041_v19 = vld [vmem:[#allocation36_spill] sm:$0xff] }
 0x6e6   : > { %7528 = vmatpush.msra.mxu0 %v6913_v17  ;;  %v6901_v17 = vadd.f32 %v6837_v22, %v17028_v21  ;;  %v17034_v21 = vld [vmem:[#allocation63_spill] sm:$0xff]  ;;  %v6805_v60 = vmul.f32 %v6619_v0, %v17041_v19 }
 0x6e7   : > { %v6817_v58 = vmul.f32 %v6626_v4, %v17034_v21  ;;  %v17039_v4 = vld [vmem:[#allocation25_spill] sm:$0xff] }
 0x6e8   : > { %7529 = vmatpush.msra.mxu0 %v6909_v7  ;;  %v15820_v7 = vpop.permute.xlu2 %6502 }
 0x6e9   : > { %v15805_v28 = vpop.f32.mrf.mxu2  ;;  %v6621_v2 = vadd.f32 %v15372_v33, %v15820_v7 }
 0x6ea   : > { %7530 = vmatpush.msra.mxu0 %v6905_v30  ;;  %v17033_v30 = vld [vmem:[#allocation117_spill] sm:$0xff] }
 0x6eb   : > { %v15814_v54 = vpop.f32.mrf.mxu3  ;;  %v6893_v22 = vadd.f32 %v6829_v6, %v17033_v30  ;;  %v17036_v6 = vld [vmem:[#allocation62_spill] sm:$0xff]  ;;  %v6809_v30 = vmul.f32 %v6621_v2, %v17039_v4 }
 0x6ec   : > { %17029 = vst [vmem:[#allocation41_spill] sm:$0xff] %v15814_v54  ;;  %7531 = vmatpush.msra.mxu0 %v6901_v17  ;;  %v7179_v20 = vpop.f32.mrf.mxu1  ;;  %v6813_v52 = vmul.f32 %v6624_v36, %v17036_v6  ;;  %v7178_v54 = vadd.f32 %v7177_v26, %v15655_v15 }
 0x6ed   : > { %v6873_v36 = vadd.f32 %v6809_v30, %v17043_v5 }
 0x6ee   : > { %7532 = vmatpush.msra.mxu0 %v6897_v61  ;;  %v17037_v61 = vld [vmem:[#allocation121_spill] sm:$0xff] }
 0x6ef   : > { %v6885_v50 = vadd.f32 %v6821_v32, %v17037_v61  ;;  %v17044_v32 = vld [vmem:[#allocation128_spill] sm:$0xff] }
 0x6f0   : > { %7533 = vmatpush.msra.mxu0 %v6893_v22  ;;  %9253 = vmatmul.msk.bf16.gmra.mxu3 %vm7121_vm0, %v15555_v47  ;;  %v17040_v22 = vld [vmem:[#allocation122_spill] sm:$0xff]  ;;  %v17042_v47 = vld [vmem:[#allocation124_spill] sm:$0xff]  ;;  %v6869_v6 = vadd.f32 %v6805_v60, %v17044_v32 }
 0x6f1   : > { %v15831_v17 = vpop.f32.mrf.mxu2  ;;  %v6881_v21 = vadd.f32 %v6817_v58, %v17040_v22  ;;  %v6877_v46 = vadd.f32 %v6813_v52, %v17042_v47 }
 0x6f2   : > { %7534 = vmatpush.msra.mxu0 %v6889_v41 }
 0x6f3   : > { %v15840_v33 = vpop.f32.mrf.mxu3 }
 0x6f4   : > { %17038 = vst [vmem:[#allocation82_spill] sm:$0xff] %v15840_v33  ;;  %7535 = vmatpush.msra.mxu0 %v6885_v50  ;;  %v7182_v41 = vpop.f32.mrf.mxu1  ;;  %v7180_v33 = vadd.f32 %v7179_v20, %v15659_v49 }
 0x6f5   : > { %v7183_v30 = vadd.f32 %v7182_v41, %v15686_v31  ;;  %v7173_v41 = vadd.f32 %v15751_v9, %v15661_v16 }
 0x6f6   : > { %7536 = vmatpush.msra.mxu0 %v6881_v21 }
 0x6f7   : > { %v7267_v32 = vmax.f32 %v7183_v30, 0.0 }
 0x6f8   : > { %7537 = vmatpush.msra.mxu0 %v6877_v46 }
 0x6f9   : > { %v15846_v27 = vpop.f32.mrf.mxu2 }
 0x6fa   : > { %7538 = vmatpush.msra.mxu0 %v6873_v36 }
 0x6fb   : > { %v15850_v61 = vpop.f32.mrf.mxu3 }
 0x6fc   : > { %17045 = vst [vmem:[#allocation47_spill] sm:$0xff] %v15850_v61  ;;  %7539 = vmatpush.msra.mxu0 %v6869_v6  ;;  %v7184_v50 = vpop.f32.mrf.mxu1 }
 0x6fd   : > { %v7185_v19 = vadd.f32 %v7184_v50, %v15649_v37  ;;  %v7175_v50 = vadd.f32 %v15782_v1, %v15702_v63 }
 0x6ff   : > { %v7271_v6 = vmax.f32 %v7185_v19, 0.0  ;;  %v7255_v20 = vmax.f32 %v7175_v50, 0.0  ;;  %v17048_v50 = vld [vmem:[#allocation72_spill] sm:$0xff] }
 0x701   : > { %v6741_v2 = vpop.f32.mrf.mxu2  ;;  %v7300_v23 = vpack.c.bf16 %v7271_v6, %v7267_v32 }
 0x703   : > { %v15852_v58 = vpop.f32.mrf.mxu3 }
 0x704   : > { %17046 = vst [vmem:[#allocation65_spill] sm:$0xff] %v15852_v58  ;;  %v7187_v4 = vpop.f32.mrf.mxu1  ;;  %v7259_v58 = vmax.f32 %v7178_v54, 0.0  ;;  %v7251_v54 = vmax.f32 %v7173_v41, 0.0  ;;  %v6742_v41 = vadd.f32 %v6741_v2, %v15684_v34 }
 0x705   : > { %v7188_v52 = vadd.f32 %v7187_v4, %v15639_v48 }
 0x706   : > { %v6847_v2 = vmul.f32 %v6742_v41, %v16901_v43  ;;  %v17053_v43 = vld [vmem:[#allocation84_spill] sm:$0xff] }
 0x707   : > { %v7275_v47 = vmax.f32 %v7188_v52, 0.0  ;;  %v15871_v52 = vld [vmem:[%s16270_s6 + $0x20] sm:$0xff] }
 0x708   : > { %9278 = vmatmul.msk.bf16.vlgmr.msrb.gmra.mxu0 %vm7121_vm0, %v15871_v52 }
 0x709   : > { %v6743_v0 = vpop.f32.mrf.mxu2 }
 0x70b   : > { %v15854_v22 = vpop.f32.mrf.mxu3 }
 0x70c   : > { %17047 = vst [vmem:[#allocation46_spill] sm:$0xff] %v15854_v22  ;;  %v7189_v21 = vpop.f32.mrf.mxu1  ;;  %v7263_v22 = vmax.f32 %v7180_v33, 0.0 }
 0x70d   : > { %v7190_v60 = vadd.f32 %v7189_v21, %v15643_v35  ;;  %v7292_v21 = vpack.c.bf16 %v7255_v20, %v7251_v54  ;;  %v17049_v20 = vld [vmem:[#allocation61_spill] sm:$0xff] }
 0x70e   : > { %v7296_v33 = vpack.c.bf16 %v7263_v22, %v7259_v58 }
 0x70f   : > { %v7279_v36 = vmax.f32 %v7190_v60, 0.0 }
 0x711   : > { %v6746_v46 = vpop.f32.mrf.mxu2  ;;  %v7304_v61 = vpack.c.bf16 %v7279_v36, %v7275_v47  ;;  %v6744_v36 = vadd.f32 %v6743_v0, %v15680_v62 }
 0x712   : > { %v6747_v47 = vadd.f32 %v6746_v46, %v15673_v57 }
 0x713   : > { %v15860_v5 = vpop.f32.mrf.mxu3  ;;  %7404 = vmatpush.bf16.msrb.mxu1 %v7304_v61 }
 0x717   : > { %7405 = vmatpush.bf16.msrb.mxu1 %v7300_v23 }
 0x719   : > { %v6748_v4 = vpop.f32.mrf.mxu2 }
 0x71a   : > { %v6749_v19 = vadd.f32 %v6748_v4, %v15742_v24  ;;  %v6855_v4 = vmul.f32 %v6747_v47, %v16898_v53  ;;  %v6737_v53 = vadd.f32 %v15831_v17, %v15772_v13  ;;  %v17054_v47 = vld [vmem:[#allocation91_spill] sm:$0xff] }
 0x71b   : > { %v15873_v26 = vpop.f32.mrf.mxu3  ;;  %7406 = vmatpush.bf16.msrb.mxu1 %v7296_v33 }
 0x71c   : > { %v6859_v32 = vmul.f32 %v6749_v19, %v16896_v18  ;;  %v6851_v18 = vmul.f32 %v6744_v36, %v16900_v14  ;;  %v6919_v33 = vadd.f32 %v6855_v4, %v17049_v20  ;;  %v17050_v14 = vld [vmem:[#allocation90_spill] sm:$0xff]  ;;  %v6911_v19 = vadd.f32 %v6847_v2, %v17053_v43  ;;  %v17057_v4 = vld [vmem:[#allocation87_spill] sm:$0xff]  ;;  %v17066_v43 = vld [vmem:[#allocation89_spill] sm:$0xff] }
 0x71d   : > { %v17061_v2 = vld [vmem:[#allocation142_spill] sm:$0xff] }
 0x71e   : > { %v6722_v20 = vadd.f32 %v17061_v2, %v15788_v42  ;;  %v17074_v2 = vld [vmem:[#allocation156_spill] sm:$0xff] }
 0x71f   : > { %7407 = vmatpush.bf16.msrb.mxu1 %v7292_v21 }
 0x721   : > { %v6751_v61 = vpop.f32.mrf.mxu2 }
 0x722   : > { %v6752_v1 = vadd.f32 %v6751_v61, %v15669_v38  ;;  %9282 = vmatmul.msk.bf16.vlgmr.msrb.gmra.mxu1 %vm7121_vm0, %v15871_v52 }
 0x723   : > { %v15877_v9 = vpop.f32.mrf.mxu3 }
 0x724   : > { %v6863_v23 = vmul.f32 %v6752_v1, %v16894_v55  ;;  %v15900_v55 = vld [vmem:[%s16270_s6 + $0x28] sm:$0xff]  ;;  %v6732_v1 = vadd.f32 %v15777_v10, %v15706_v11  ;;  %v6727_v10 = vadd.f32 %v15731_v3, %v15735_v40 }
 0x725   : > { %9279 = vmatmul.msk.bf16.gmra.mxu0 %vm7121_vm0, %v15900_v55 }
 0x726   : > { %v6927_v54 = vadd.f32 %v6863_v23, %v17048_v50 }
 0x729   : > { %v6753_v30 = vpop.f32.mrf.mxu2 }
 0x72a   : > { %v6754_v60 = vadd.f32 %v6753_v30, %v15666_v51  ;;  %v17052_v30 = vld [vmem:[#allocation78_spill] sm:$0xff] }
 0x72b   : > { %v15885_v58 = vpop.f32.mrf.mxu3  ;;  %v6839_v17 = vmul.f32 %v6737_v53, %v17052_v30  ;;  %v17065_v30 = vld [vmem:[#allocation96_spill] sm:$0xff] }
 0x72c   : > { %v6867_v22 = vmul.f32 %v6754_v60, %v16897_v25  ;;  %v6739_v25 = vadd.f32 %v15846_v27, %v15690_v12  ;;  %v6734_v27 = vadd.f32 %v15805_v28, %v15694_v45  ;;  %v6729_v28 = vadd.f32 %v15749_v29, %v15710_v8 }
 0x72d   : > { %v6903_v50 = vadd.f32 %v6839_v17, %v17057_v4 }
 0x72e   : > { %v6931_v6 = vadd.f32 %v6867_v22, %v15294_v56  ;;  %v6923_v56 = vadd.f32 %v6859_v32, %v15302_v39  ;;  %v6843_v61 = vmul.f32 %v6739_v25, %v17050_v14  ;;  %v17051_v39 = vld [vmem:[#allocation73_spill] sm:$0xff]  ;;  %v6835_v23 = vmul.f32 %v6734_v27, %v17054_v47  ;;  %v17056_v32 = vld [vmem:[#allocation75_spill] sm:$0xff]  ;;  %v17063_v27 = vld [vmem:[#allocation86_spill] sm:$0xff] }
 0x72f   : > { %v6915_v21 = vadd.f32 %v6851_v18, %v17051_v39  ;;  %v17055_v22 = vld [vmem:[#allocation77_spill] sm:$0xff]  ;;  %v17059_v18 = vld [vmem:[#allocation92_spill] sm:$0xff]  ;;  %v15947_v39 = vld [vmem:[%s16270_s6 + $0x30] sm:$0xff] }
 0x730   : > { %7604 = vmatpush.msrb.mxu0 %v6931_v6  ;;  %v6907_v36 = vadd.f32 %v6843_v61, %v17055_v22  ;;  %v6831_v6 = vmul.f32 %v6732_v1, %v17056_v32  ;;  %v6827_v29 = vmul.f32 %v6729_v28, %v17059_v18  ;;  %v17067_v28 = vld [vmem:[#allocation138_spill] sm:$0xff] }
 0x731   : > { %v15895_v46 = vpop.f32.mrf.mxu2  ;;  %v6717_v47 = vadd.f32 %v17067_v28, %v15826_v59 }
 0x732   : > { %7605 = vmatpush.msrb.mxu0 %v6927_v54  ;;  %9283 = vmatmul.msk.bf16.gmra.mxu1 %vm7121_vm0, %v15900_v55  ;;  %v17058_v54 = vld [vmem:[#allocation164_spill] sm:$0xff]  ;;  %v6895_v14 = vadd.f32 %v6831_v6, %v17063_v27  ;;  %v17070_v6 = vld [vmem:[#allocation99_spill] sm:$0xff] }
 0x733   : > { %v15911_v0 = vpop.f32.mrf.mxu3  ;;  %v6724_v25 = vadd.f32 %v17058_v54, %v15808_v44 }
 0x734   : > { %7606 = vmatpush.msrb.mxu0 %v6923_v56  ;;  %v17060_v56 = vld [vmem:[#allocation85_spill] sm:$0xff] }
 0x735   : > { %v6899_v53 = vadd.f32 %v6835_v23, %v17060_v56  ;;  %v6819_v17 = vmul.f32 %v6724_v25, %v17065_v30  ;;  %9280 = vmatmul.msk.bf16.gmra.mxu0 %vm7121_vm0, %v15947_v39  ;;  %v17068_v23 = vld [vmem:[#allocation27_spill] sm:$0xff]  ;;  %v17072_v25 = vld [vmem:[#allocation29_spill] sm:$0xff] }
 0x736   : > { %7607 = vmatpush.msrb.mxu0 %v6919_v33  ;;  %v17062_v33 = vld [vmem:[#allocation70_spill] sm:$0xff]  ;;  %v6815_v22 = vmul.f32 %v6722_v20, %v17068_v23  ;;  %v6807_v18 = vmul.f32 %v6717_v47, %v17072_v25 }
 0x737   : > { %v6823_v3 = vmul.f32 %v6727_v10, %v17062_v33  ;;  %v17075_v33 = vld [vmem:[#allocation157_spill] sm:$0xff] }
 0x738   : > { %7608 = vmatpush.msrb.mxu0 %v6915_v21  ;;  %v17064_v21 = vld [vmem:[#allocation136_spill] sm:$0xff] }
 0x739   : > { %v15924_v60 = vpop.f32.mrf.mxu2  ;;  %v6719_v1 = vadd.f32 %v17064_v21, %v15820_v7  ;;  %v15974_v21 = vld [vmem:[%s16270_s6 + $0x38] sm:$0xff] }
 0x73a   : > { %7609 = vmatpush.msrb.mxu0 %v6911_v19  ;;  %v6891_v19 = vadd.f32 %v6827_v29, %v17066_v43  ;;  %v17073_v29 = vld [vmem:[#allocation154_spill] sm:$0xff] }
 0x73b   : > { %v15933_v41 = vpop.f32.mrf.mxu3  ;;  %v6811_v4 = vmul.f32 %v6719_v1, %v17070_v6  ;;  %v6879_v56 = vadd.f32 %v6815_v22, %v17073_v29 }
 0x73c   : > { %7610 = vmatpush.msrb.mxu0 %v6907_v36  ;;  %v17069_v36 = vld [vmem:[#allocation150_spill] sm:$0xff] }
 0x73d   : > { %v6887_v10 = vadd.f32 %v6823_v3, %v17069_v36  ;;  %v6875_v20 = vadd.f32 %v6811_v4, %v17074_v2  ;;  %v6871_v3 = vadd.f32 %v6807_v18, %v17075_v33  ;;  %v7204_v2 = vadd.f32 %v15924_v60, %v15702_v63  ;;  %v17080_v60 = vld [vmem:[#allocation133_spill] sm:$0xff] }
 0x73e   : > { %7611 = vmatpush.msrb.mxu0 %v6903_v50  ;;  %v17071_v50 = vld [vmem:[#allocation152_spill] sm:$0xff] }
 0x73f   : > { %v6883_v54 = vadd.f32 %v6819_v17, %v17071_v50 }
 0x740   : > { %7612 = vmatpush.msrb.mxu0 %v6899_v53 }
 0x741   : > { %v7206_v61 = vpop.f32.mrf.mxu2 }
 0x742   : > { %7613 = vmatpush.msrb.mxu0 %v6895_v14  ;;  %9284 = vmatmul.msk.bf16.gmra.mxu1 %vm7121_vm0, %v15947_v39  ;;  %v7207_v50 = vadd.f32 %v7206_v61, %v15655_v15 }
 0x743   : > { %v15959_v32 = vpop.f32.mrf.mxu3 }
 0x744   : > { %7614 = vmatpush.msrb.mxu0 %v6891_v19 }
 0x745   : > { %9281 = vmatmul.msk.bf16.gmra.mxu0 %vm7121_vm0, %v15974_v21 }
 0x746   : > { %7615 = vmatpush.msrb.mxu0 %v6887_v10 }
 0x748   : > { %7616 = vmatpush.msrb.mxu0 %v6883_v54 }
 0x749   : > { %v7208_v53 = vpop.f32.mrf.mxu2 }
 0x74a   : > { %7617 = vmatpush.msrb.mxu0 %v6879_v56  ;;  %v7209_v54 = vadd.f32 %v7208_v53, %v15659_v49  ;;  %v7202_v56 = vadd.f32 %v15895_v46, %v15661_v16  ;;  %v17077_v53 = vld [vmem:[#allocation163_spill] sm:$0xff] }
 0x74b   : > { %v15969_v27 = vpop.f32.mrf.mxu3 }
 0x74c   : > { %7618 = vmatpush.msrb.mxu0 %v6875_v20  ;;  %v7260_v20 = vmax.f32 %v7207_v50, 0.0  ;;  %v7264_v33 = vmax.f32 %v7209_v54, 0.0  ;;  %v17081_v50 = vld [vmem:[#allocation43_spill] sm:$0xff] }
 0x74e   : > { %7619 = vmatpush.msrb.mxu0 %v6871_v3 }
 0x751   : > { %v7211_v14 = vpop.f32.mrf.mxu2 }
 0x752   : > { %9285 = vmatmul.msk.bf16.gmra.mxu1 %vm7121_vm0, %v15974_v21  ;;  %v7212_v23 = vadd.f32 %v7211_v14, %v15686_v31  ;;  %v17076_v14 = vld [vmem:[#allocation168_spill] sm:$0xff] }
 0x753   : > { %v15978_v1 = vpop.f32.mrf.mxu3 }
 0x754   : > { %v7268_v25 = vmax.f32 %v7212_v23, 0.0  ;;  %v7297_v23 = vpack.c.bf16 %v7264_v33, %v7260_v20  ;;  %v17085_v33 = vld [vmem:[#allocation69_spill] sm:$0xff] }
 0x759   : > { %v7213_v30 = vpop.f32.mrf.mxu2 }
 0x75a   : > { %v7214_v22 = vadd.f32 %v7213_v30, %v15649_v37  ;;  %v6705_v30 = vadd.f32 %v17076_v14, %v15666_v51 }
 0x75b   : > { %v7237_v17 = vpop.f32.mrf.mxu3 }
 0x75c   : > { %v7272_v18 = vmax.f32 %v7214_v22, 0.0  ;;  %v17078_v22 = vld [vmem:[#allocation139_spill] sm:$0xff] }
 0x75d   : > { %v6700_v46 = vadd.f32 %v17078_v22, %v15742_v24 }
 0x75e   : > { %v7301_v3 = vpack.c.bf16 %v7272_v18, %v7268_v25  ;;  %v17082_v25 = vld [vmem:[#allocation137_spill] sm:$0xff] }
 0x75f   : > { %v6695_v18 = vadd.f32 %v17082_v25, %v15680_v62 }
 0x761   : > { %v7216_v43 = vpop.f32.mrf.mxu2 }
 0x762   : > { %v7217_v28 = vadd.f32 %v7216_v43, %v15639_v48  ;;  %v6703_v43 = vadd.f32 %v17077_v53, %v15669_v38  ;;  %v6693_v53 = vadd.f32 %v17085_v33, %v15684_v34 }
 0x763   : > { %v7240_v19 = vpop.f32.mrf.mxu3 }
 0x764   : > { %v7276_v10 = vmax.f32 %v7217_v28, 0.0  ;;  %v7252_v28 = vmax.f32 %v7202_v56, 0.0  ;;  %v6862_v54 = vmul.f32 %v6703_v43, %v17081_v50  ;;  %v17084_v56 = vld [vmem:[#allocation68_spill] sm:$0xff]  ;;  %v7241_v25 = vadd.f32 %v7240_v19, %v15686_v31 }
 0x765   : > { %v17095_v19 = vld [vmem:[#allocation52_spill] sm:$0xff] }
 0x769   : > { %v7218_v47 = vpop.f32.mrf.mxu2 }
 0x76a   : > { %v7219_v36 = vadd.f32 %v7218_v47, %v15643_v35  ;;  %v7256_v47 = vmax.f32 %v7204_v2, 0.0 }
 0x76b   : > { %v7242_v4 = vpop.f32.mrf.mxu3 }
 0x76c   : > { %v7280_v6 = vmax.f32 %v7219_v36, 0.0  ;;  %v17079_v36 = vld [vmem:[#allocation44_spill] sm:$0xff] }
 0x76e   : > { %v7305_v29 = vpack.c.bf16 %v7280_v6, %v7276_v10  ;;  %v6866_v10 = vmul.f32 %v6705_v30, %v17079_v36  ;;  %v6698_v6 = vadd.f32 %v17080_v60, %v15673_v57  ;;  %v17087_v36 = vld [vmem:[#allocation32_spill] sm:$0xff]  ;;  %v7243_v60 = vadd.f32 %v7242_v4, %v15649_v37 }
 0x76f   : > { %v6926_v43 = vadd.f32 %v6862_v54, %v17087_v36  ;;  %v17092_v54 = vld [vmem:[#allocation51_spill] sm:$0xff]  ;;  %v17093_v37 = vld [vmem:[#allocation108_spill] sm:$0xff] }
 0x770   : > { %7433 = vmatpush.bf16.msrb.mxu2 %v7305_v29  ;;  %v7293_v29 = vpack.c.bf16 %v7256_v47, %v7252_v28  ;;  %v6930_v2 = vadd.f32 %v6866_v10, %v17084_v56  ;;  %v17088_v47 = vld [vmem:[#allocation148_spill] sm:$0xff]  ;;  %v17089_v10 = vld [vmem:[#allocation49_spill] sm:$0xff] }
 0x771   : > { %v6850_v50 = vmul.f32 %v6695_v18, %v17089_v10  ;;  %v7273_v18 = vmax.f32 %v7243_v60, 0.0  ;;  %v7233_v60 = vadd.f32 %v15969_v27, %v15702_v63  ;;  %v17103_v63 = vld [vmem:[#allocation147_spill] sm:$0xff] }
 0x772   : > { %v6678_v27 = vadd.f32 %v17103_v63, %v15735_v40 }
 0x773   : > { %v7245_v61 = vpop.f32.mrf.mxu3 }
 0x774   : > { %7434 = vmatpush.bf16.msrb.mxu2 %v7301_v3  ;;  %v17083_v3 = vld [vmem:[#allocation45_spill] sm:$0xff]  ;;  %v7246_v20 = vadd.f32 %v7245_v61, %v15639_v48  ;;  %v17090_v48 = vld [vmem:[#allocation106_spill] sm:$0xff] }
 0x775   : > { %v6858_v14 = vmul.f32 %v6700_v46, %v17083_v3  ;;  %v6690_v46 = vadd.f32 %v17088_v47, %v15690_v12  ;;  %v17099_v47 = vld [vmem:[#allocation112_spill] sm:$0xff] }
 0x777   : > { %v6922_v61 = vadd.f32 %v6858_v14, %v17090_v48  ;;  %v17094_v14 = vld [vmem:[#allocation145_spill] sm:$0xff]  ;;  %v17101_v48 = vld [vmem:[#allocation56_spill] sm:$0xff] }
 0x778   : > { %7435 = vmatpush.bf16.msrb.mxu2 %v7297_v23  ;;  %v17086_v23 = vld [vmem:[#allocation48_spill] sm:$0xff]  ;;  %v6685_v31 = vadd.f32 %v17094_v14, %v15694_v45  ;;  %v17108_v14 = vld [vmem:[#allocation118_spill] sm:$0xff] }
 0x779   : > { %v6854_v22 = vmul.f32 %v6698_v6, %v17086_v23  ;;  %v17091_v6 = vld [vmem:[#allocation141_spill] sm:$0xff]  ;;  %v7269_v23 = vmax.f32 %v7241_v25, 0.0 }
 0x77a   : > { %v6688_v56 = vadd.f32 %v17091_v6, %v15772_v13  ;;  %v17104_v6 = vld [vmem:[#allocation59_spill] sm:$0xff] }
 0x77b   : > { %v7247_v30 = vpop.f32.mrf.mxu3  ;;  %v6918_v4 = vadd.f32 %v6854_v22, %v17093_v37  ;;  %v7302_v10 = vpack.c.bf16 %v7273_v18, %v7269_v23 }
 0x77c   : > { %7436 = vmatpush.bf16.msrb.mxu2 %v7293_v29  ;;  %v7248_v28 = vadd.f32 %v7247_v30, %v15643_v35  ;;  %v7277_v29 = vmax.f32 %v7246_v20, 0.0  ;;  %v7238_v35 = vadd.f32 %v7237_v17, %v15659_v49  ;;  %v6842_v20 = vmul.f32 %v6690_v46, %v17095_v19  ;;  %v17097_v49 = vld [vmem:[#allocation140_spill] sm:$0xff]  ;;  %v17109_v19 = vld [vmem:[#allocation143_spill] sm:$0xff] }
 0x77d   : > { %v7236_v30 = vadd.f32 %v15978_v1, %v15655_v15  ;;  %v6683_v17 = vadd.f32 %v17097_v49, %v15706_v11  ;;  %v17100_v15 = vld [vmem:[#allocation144_spill] sm:$0xff] }
 0x77e   : > { %v7281_v3 = vmax.f32 %v7248_v28, 0.0  ;;  %v7265_v28 = vmax.f32 %v7238_v35, 0.0  ;;  %v6680_v1 = vadd.f32 %v17100_v15, %v15710_v8  ;;  %v17105_v35 = vld [vmem:[#allocation116_spill] sm:$0xff]  ;;  %v17116_v15 = vld [vmem:[#allocation26_spill] sm:$0xff] }
 0x77f   : > { %9286 = vmatmul.msk.bf16.vlgmr.msrb.gmra.mxu2 %vm7121_vm0, %v15871_v52  ;;  %v7261_v25 = vmax.f32 %v7236_v30, 0.0  ;;  %v17110_v30 = vld [vmem:[#allocation64_spill] sm:$0xff] }
 0x780   : > { %7564 = vmatpush.msra.mxu2 %v6930_v2  ;;  %v6846_v2 = vmul.f32 %v6693_v53, %v17092_v54  ;;  %v7306_v33 = vpack.c.bf16 %v7281_v3, %v7277_v29  ;;  %v17096_v53 = vld [vmem:[#allocation110_spill] sm:$0xff]  ;;  %v7257_v54 = vmax.f32 %v7233_v60, 0.0  ;;  %v6822_v23 = vmul.f32 %v6678_v27, %v17110_v30 }
 0x781   : > { %v6914_v36 = vadd.f32 %v6850_v50, %v17096_v53  ;;  %v7231_v50 = vadd.f32 %v15959_v32, %v15661_v16  ;;  %v17102_v29 = vld [vmem:[#allocation114_spill] sm:$0xff]  ;;  %v6801_v27 = vadd.f32 %v15911_v0, %v15669_v38  ;;  %v17125_v38 = vld [vmem:[#allocation132_spill] sm:$0xff] }
 0x782   : > { %7565 = vmatpush.msra.mxu2 %v6926_v43  ;;  %7462 = vmatpush.bf16.msrb.mxu3 %v7306_v33  ;;  %v17098_v43 = vld [vmem:[#allocation38_spill] sm:$0xff]  ;;  %v6910_v46 = vadd.f32 %v6846_v2, %v17099_v47  ;;  %v6906_v3 = vadd.f32 %v6842_v20, %v17102_v29  ;;  %v7298_v2 = vpack.c.bf16 %v7265_v28, %v7261_v25  ;;  %v17107_v33 = vld [vmem:[#allocation60_spill] sm:$0xff]  ;;  %v17114_v28 = vld [vmem:[#allocation123_spill] sm:$0xff] }
 0x783   : > { %v6838_v22 = vmul.f32 %v6688_v56, %v17098_v43  ;;  %v6830_v56 = vmul.f32 %v6683_v17, %v17104_v6  ;;  %v6826_v16 = vmul.f32 %v6680_v1, %v17107_v33  ;;  %v7253_v32 = vmax.f32 %v7231_v50, 0.0  ;;  %v17112_v17 = vld [vmem:[#allocation74_spill] sm:$0xff] }
 0x784   : > { %7566 = vmatpush.msra.mxu2 %v6922_v61  ;;  %v6834_v61 = vmul.f32 %v6685_v31, %v17101_v48  ;;  %v6673_v20 = vadd.f32 %v17109_v19, %v15788_v42  ;;  %v6670_v43 = vadd.f32 %v17112_v17, %v15820_v7  ;;  %v17117_v48 = vld [vmem:[#allocation125_spill] sm:$0xff]  ;;  %v6803_v50 = vadd.f32 %v15933_v41, %v15666_v51  ;;  %v17118_v25 = vld [vmem:[#allocation30_spill] sm:$0xff] }
 0x785   : > { %v6902_v37 = vadd.f32 %v6838_v22, %v17105_v35  ;;  %v7294_v53 = vpack.c.bf16 %v7257_v54, %v7253_v32  ;;  %v17113_v22 = vld [vmem:[#allocation35_spill] sm:$0xff]  ;;  %v6890_v47 = vadd.f32 %v6826_v16, %v17114_v28  ;;  %v17120_v6 = vld [vmem:[#allocation34_spill] sm:$0xff]  ;;  %v17121_v54 = vld [vmem:[#allocation129_spill] sm:$0xff]  ;;  %v6798_v35 = vadd.f32 %v15885_v58, %v15742_v24 }
 0x786   : > { %7567 = vmatpush.msra.mxu2 %v6918_v4  ;;  %7463 = vmatpush.bf16.msrb.mxu3 %v7302_v10  ;;  %v17106_v4 = vld [vmem:[#allocation146_spill] sm:$0xff]  ;;  %v6898_v31 = vadd.f32 %v6834_v61, %v17108_v14  ;;  %v6814_v1 = vmul.f32 %v6673_v20, %v17116_v15  ;;  %v6886_v61 = vadd.f32 %v6822_v23, %v17117_v48  ;;  %v17126_v32 = vld [vmem:[#allocation95_spill] sm:$0xff]  ;;  %v17128_v19 = vld [vmem:[#allocation97_spill] sm:$0xff] }
 0x787   : > { %v6675_v18 = vadd.f32 %v17106_v4, %v15808_v44  ;;  %v6810_v29 = vmul.f32 %v6670_v43, %v17118_v25  ;;  %v17122_v51 = vld [vmem:[#allocation94_spill] sm:$0xff]  ;;  %v6796_v4 = vadd.f32 %v15877_v9, %v15673_v57  ;;  %v6793_v16 = vadd.f32 %v15873_v26, %v15680_v62  ;;  %v17129_v57 = vld [vmem:[#allocation88_spill] sm:$0xff]  ;;  %v17132_v62 = vld [vmem:[#allocation151_spill] sm:$0xff] }
 0x788   : > { %7568 = vmatpush.msra.mxu2 %v6914_v36  ;;  %v17111_v36 = vld [vmem:[#allocation120_spill] sm:$0xff]  ;;  %v6868_v41 = vmul.f32 %v6803_v50, %v17122_v51  ;;  %v6860_v14 = vmul.f32 %v6798_v35, %v17126_v32  ;;  %v6791_v58 = vadd.f32 %v15860_v5, %v15684_v34  ;;  %v17130_v30 = vld [vmem:[#allocation46_spill] sm:$0xff]  ;;  %v17135_v34 = vld [vmem:[#allocation153_spill] sm:$0xff] }
 0x789   : > { %v6894_v49 = vadd.f32 %v6830_v56, %v17111_v36  ;;  %v6818_v60 = vmul.f32 %v6675_v18, %v17113_v22  ;;  %v17124_v18 = vld [vmem:[#allocation93_spill] sm:$0xff]  ;;  %v6856_v20 = vmul.f32 %v6796_v4, %v17128_v19  ;;  %v6788_v23 = vadd.f32 %v17130_v30, %v15690_v12  ;;  %v17134_v43 = vld [vmem:[#allocation100_spill] sm:$0xff]  ;;  %v17139_v15 = vld [vmem:[#allocation82_spill] sm:$0xff] }
 0x78a   : > { %7569 = vmatpush.msra.mxu2 %v6910_v46  ;;  %7464 = vmatpush.bf16.msrb.mxu3 %v7298_v2  ;;  %v17115_v46 = vld [vmem:[#allocation161_spill] sm:$0xff]  ;;  %v6878_v2 = vadd.f32 %v6814_v1, %v17121_v54  ;;  %v6864_v33 = vmul.f32 %v6801_v27, %v17124_v18  ;;  %v6924_v26 = vadd.f32 %v6860_v14, %v17132_v62  ;;  %v17141_v50 = vld [vmem:[#allocation135_spill] sm:$0xff]  ;;  %v17153_v32 = vld [vmem:[#allocation66_spill] sm:$0xff] }
 0x78b   : > { %v6668_v10 = vadd.f32 %v17115_v46, %v15826_v59  ;;  %v6848_v22 = vmul.f32 %v6791_v58, %v17134_v43  ;;  %v6920_v5 = vadd.f32 %v6856_v20, %v17135_v34  ;;  %v17137_v12 = vld [vmem:[#allocation101_spill] sm:$0xff]  ;;  %v17138_v46 = vld [vmem:[#allocation155_spill] sm:$0xff]  ;;  %v6781_v1 = vadd.f32 %v17139_v15, %v15706_v11  ;;  %v17155_v58 = vld [vmem:[#allocation104_spill] sm:$0xff] }
 0x78c   : > { %7570 = vmatpush.msra.mxu2 %v6906_v3  ;;  %v17119_v3 = vld [vmem:[#allocation127_spill] sm:$0xff]  ;;  %v6928_v9 = vadd.f32 %v6864_v33, %v17129_v57  ;;  %v17140_v48 = vld [vmem:[#allocation81_spill] sm:$0xff] }
 0x78d   : > { %v6882_v63 = vadd.f32 %v6818_v60, %v17119_v3  ;;  %v6806_v56 = vmul.f32 %v6668_v10, %v17120_v6  ;;  %v17136_v60 = vld [vmem:[#allocation47_spill] sm:$0xff]  ;;  %v6912_v25 = vadd.f32 %v6848_v22, %v17141_v50  ;;  %v17144_v6 = vld [vmem:[#allocation134_spill] sm:$0xff]  ;;  %v17147_v35 = vld [vmem:[#allocation53_spill] sm:$0xff] }
 0x78e   : > { %7571 = vmatpush.msra.mxu2 %v6902_v37  ;;  %7465 = vmatpush.bf16.msrb.mxu3 %v7294_v53  ;;  %v17131_v53 = vld [vmem:[#allocation98_spill] sm:$0xff]  ;;  %v6783_v28 = vadd.f32 %v17136_v60, %v15694_v45  ;;  %v17142_v45 = vld [vmem:[#allocation41_spill] sm:$0xff]  ;;  %v17156_v20 = vld [vmem:[#allocation131_spill] sm:$0xff] }
 0x78f   : > { %9287 = vmatmul.msk.bf16.gmra.mxu2 %vm7121_vm0, %v15900_v55  ;;  %v6870_v0 = vadd.f32 %v6806_v56, %v17125_v38  ;;  %v6852_v36 = vmul.f32 %v6793_v16, %v17131_v53  ;;  %v6778_v3 = vadd.f32 %v17142_v45, %v15710_v8  ;;  %v17145_v56 = vld [vmem:[#allocation42_spill] sm:$0xff]  ;;  %v17150_v8 = vld [vmem:[#allocation80_spill] sm:$0xff]  ;;  %v17151_v38 = vld [vmem:[#allocation169_spill] sm:$0xff] }
 0x790   : > { %7572 = vmatpush.msra.mxu2 %v6898_v31  ;;  %v17127_v31 = vld [vmem:[#allocation149_spill] sm:$0xff]  ;;  %v6776_v54 = vadd.f32 %v17145_v56, %v15735_v40  ;;  %v17152_v16 = vld [vmem:[#allocation76_spill] sm:$0xff]  ;;  %v17162_v43 = vld [vmem:[#allocation67_spill] sm:$0xff] }
 0x791   : > { %9290 = vmatmul.msk.bf16.vlgmr.msrb.gmra.mxu3 %vm7121_vm0, %v15871_v52  ;;  %v17123_v52 = vld [vmem:[#allocation130_spill] sm:$0xff]  ;;  %v6932_v24 = vadd.f32 %v6868_v41, %v17127_v31  ;;  %v6916_v10 = vadd.f32 %v6852_v36, %v17138_v46  ;;  %v17159_v53 = vld [vmem:[#allocation33_spill] sm:$0xff]  ;;  %v17164_v60 = vld [vmem:[#allocation159_spill] sm:$0xff] }
 0x792   : > { %7573 = vmatpush.msra.mxu2 %v6894_v49  ;;  %v6874_v37 = vadd.f32 %v6810_v29, %v17123_v52  ;;  %v17133_v49 = vld [vmem:[#allocation65_spill] sm:$0xff]  ;;  %v17148_v41 = vld [vmem:[#allocation170_spill] sm:$0xff]  ;;  %v6824_v40 = vmul.f32 %v6776_v54, %v17152_v16 }
 0x793   : > { %v6786_v17 = vadd.f32 %v17133_v49, %v15772_v13  ;;  %v16107_v13 = vpop.f32.mrf.mxu0  ;;  %v6773_v52 = vadd.f32 %v17148_v41, %v15808_v44  ;;  %v17160_v62 = vld [vmem:[#allocation105_spill] sm:$0xff] }
 0x794   : > { %7574 = vmatpush.msra.mxu2 %v6890_v47  ;;  %v6844_v47 = vmul.f32 %v6788_v23, %v17137_v12  ;;  %v17158_v23 = vld [vmem:[#allocation71_spill] sm:$0xff]  ;;  %v6888_v36 = vadd.f32 %v6824_v40, %v17159_v53  ;;  %v17165_v12 = vld [vmem:[#allocation160_spill] sm:$0xff] }
 0x795   : > { %v6820_v19 = vmul.f32 %v6773_v52, %v17155_v58 }
 0x796   : > { %7575 = vmatpush.msra.mxu2 %v6886_v61  ;;  %v6840_v61 = vmul.f32 %v6786_v17, %v17140_v48 }
 0x798   : > { %7576 = vmatpush.msra.mxu2 %v6882_v63  ;;  %v17143_v63 = vld [vmem:[#allocation102_spill] sm:$0xff]  ;;  %v6904_v51 = vadd.f32 %v6840_v61, %v17147_v35 }
 0x799   : > { %v6836_v27 = vmul.f32 %v6783_v28, %v17143_v63 }
 0x79a   : > { %7577 = vmatpush.msra.mxu2 %v6878_v2  ;;  %v17146_v2 = vld [vmem:[#allocation79_spill] sm:$0xff] }
 0x79b   : > { %v6832_v11 = vmul.f32 %v6781_v1, %v17146_v2  ;;  %v6900_v18 = vadd.f32 %v6836_v27, %v17150_v8  ;;  %v16127_v33 = vpop.f32.mrf.mxu0  ;;  %v17167_v27 = vld [vmem:[#allocation40_spill] sm:$0xff]  ;;  %v17170_v8 = vld [vmem:[#allocation31_spill] sm:$0xff] }
 0x79c   : > { %7578 = vmatpush.msra.mxu2 %v6874_v37  ;;  %v17149_v37 = vld [vmem:[#allocation103_spill] sm:$0xff] }
 0x79d   : > { %v6828_v4 = vmul.f32 %v6778_v3, %v17149_v37  ;;  %v6896_v14 = vadd.f32 %v6832_v11, %v17153_v32  ;;  %v17169_v11 = vld [vmem:[#allocation39_spill] sm:$0xff] }
 0x79e   : > { %7579 = vmatpush.msra.mxu2 %v6870_v0  ;;  %v6771_v0 = vadd.f32 %v17151_v38, %v15788_v42 }
 0x79f   : > { %9288 = vmatmul.msk.bf16.gmra.mxu2 %vm7121_vm0, %v15947_v39  ;;  %v16113_v29 = vpop.f32.mrf.mxu1  ;;  %v6892_v57 = vadd.f32 %v6828_v4, %v17156_v20 }
 0x7a0   : > { %7644 = vmatpush.msrb.mxu2 %v6932_v24  ;;  %v17154_v24 = vld [vmem:[#allocation166_spill] sm:$0xff]  ;;  %v6816_v42 = vmul.f32 %v6771_v0, %v17158_v23  ;;  %v16164_v0 = vpop.permute.xlu0 %7316 }
 0x7a1   : > { %9291 = vmatmul.msk.bf16.gmra.mxu3 %vm7121_vm0, %v15900_v55  ;;  %v6908_v55 = vadd.f32 %v6844_v47, %v17144_v6  ;;  %v6768_v44 = vadd.f32 %v17154_v24, %v15820_v7  ;;  %v17161_v7 = vld [vmem:[#allocation28_spill] sm:$0xff]  ;;  %v16168_v24 = vpop.permute.xlu2 %7312 }
 0x7a2   : > { %7645 = vmatpush.msrb.mxu2 %v6928_v9  ;;  %v17157_v9 = vld [vmem:[#allocation162_spill] sm:$0xff]  ;;  %v6884_v49 = vadd.f32 %v6820_v19, %v17161_v7  ;;  %v7309_v19 = vpop.permute.xlu1 %7308 }
 0x7a3   : > { %v6766_v30 = vadd.f32 %v17157_v9, %v15826_v59  ;;  %v7385_v17 = vpop.f32.mrf.mxu0  ;;  %v17163_v59 = vld [vmem:[#allocation158_spill] sm:$0xff]  ;;  %v7410_v9 = vadd.f32 %v16113_v29, %v7309_v19 }
 0x7a4   : > { %7646 = vmatpush.msrb.mxu2 %v6924_v26  ;;  %v6812_v26 = vmul.f32 %v6768_v44, %v17160_v62  ;;  %v6880_v34 = vadd.f32 %v6816_v42, %v17163_v59  ;;  %v7386_v23 = vadd.f32 %v7385_v17, %v16164_v0 }
 0x7a5   : > { %v6808_v22 = vmul.f32 %v6766_v30, %v17162_v43  ;;  %v7488_v62 = vmax.f32 %v7410_v9, 0.0 }
 0x7a6   : > { %7647 = vmatpush.msrb.mxu2 %v6920_v5  ;;  %v6876_v28 = vadd.f32 %v6812_v26, %v17164_v60  ;;  %v7495_v53 = vmax.f32 %v7386_v23, 0.0 }
 0x7a7   : > { %v16133_v31 = vpop.f32.mrf.mxu1  ;;  %v6872_v47 = vadd.f32 %v6808_v22, %v17165_v12 }
 0x7a8   : > { %7648 = vmatpush.msrb.mxu2 %v6916_v10  ;;  %v7412_v20 = vadd.f32 %v16133_v31, %v16168_v24  ;;  %v7381_v31 = vadd.f32 %v16107_v13, %v7309_v19  ;;  %v7519_v13 = vld [vmem:[#allocation11] sm:$0xff] }
 0x7a9   : > { %7540 = vmatmul.f32.vlgmr.msra.gmra.mxu0 %v7519_v13 }
 0x7aa   : > { %7649 = vmatpush.msrb.mxu2 %v6912_v25  ;;  %v17166_v25 = vld [vmem:[#allocation167_spill] sm:$0xff]  ;;  %v7492_v42 = vmax.f32 %v7412_v20, 0.0  ;;  %v7487_v29 = vmax.f32 %v7381_v31, 0.0 }
 0x7ab   : > { %v7387_v46 = vpop.f32.mrf.mxu0 }
 0x7ac   : > { %7650 = vmatpush.msrb.mxu2 %v6908_v55  ;;  %v17168_v55 = vld [vmem:[#allocation165_spill] sm:$0xff]  ;;  %v7388_v16 = vadd.f32 %v7387_v46, %v17170_v8 }
 0x7ae   : > { %7651 = vmatpush.msrb.mxu2 %v6904_v51 }
 0x7af   : > { %9289 = vmatmul.msk.bf16.gmra.mxu2 %vm7121_vm0, %v15974_v21  ;;  %v7414_v5 = vpop.f32.mrf.mxu1 }
 0x7b0   : > { %7652 = vmatpush.msrb.mxu2 %v6900_v18 }
 0x7b1   : > { %9292 = vmatmul.msk.bf16.gmra.mxu3 %vm7121_vm0, %v15947_v39  ;;  %7620 = vmatmul.f32.vlgmr.msrb.gmra.mxu0 %v7519_v13 }
 0x7b2   : > { %7653 = vmatpush.msrb.mxu2 %v6896_v14  ;;  %v7415_v14 = vadd.f32 %v7414_v5, %v16164_v0 }
 0x7b3   : > { %v7390_v39 = vpop.f32.mrf.mxu0 }
 0x7b4   : > { %7654 = vmatpush.msrb.mxu2 %v6892_v57  ;;  %v7391_v52 = vadd.f32 %v7390_v39, %v17169_v11  ;;  %v7499_v57 = vmax.f32 %v7388_v16, 0.0  ;;  %v7496_v30 = vmax.f32 %v7415_v14, 0.0 }
 0x7b6   : > { %7655 = vmatpush.msrb.mxu2 %v6888_v36  ;;  %v7503_v44 = vmax.f32 %v7391_v52, 0.0  ;;  %v7383_v36 = vadd.f32 %v16127_v33, %v16168_v24 }
 0x7b7   : > { %v7416_v10 = vpop.f32.mrf.mxu1 }
 0x7b8   : > { %7656 = vmatpush.msrb.mxu2 %v6884_v49  ;;  %v7417_v18 = vadd.f32 %v7416_v10, %v17170_v8  ;;  %v7491_v26 = vmax.f32 %v7383_v36, 0.0 }
 0x7ba   : > { %7657 = vmatpush.msrb.mxu2 %v6880_v34  ;;  %v7500_v58 = vmax.f32 %v7417_v18, 0.0 }
 0x7bb   : > { %v7392_v1 = vpop.f32.mrf.mxu0 }
 0x7bc   : > { %7658 = vmatpush.msrb.mxu2 %v6876_v28  ;;  %v7393_v2 = vadd.f32 %v7392_v1, %v17167_v27  ;;  %v16181_v28 = vld [vmem:[#allocation11 + $0x8] sm:$0xff] }
 0x7be   : > { %7659 = vmatpush.msrb.mxu2 %v6872_v47  ;;  %v7507_v40 = vmax.f32 %v7393_v2, 0.0 }
 0x7bf   : > { %v7419_v15 = vpop.f32.mrf.mxu1  ;;  %7580 = vmatmul.f32.vlgmr.msra.gmra.mxu2 %v7519_v13 }
 0x7c0   : > { %v7420_v35 = vadd.f32 %v7419_v15, %v17169_v11 }
 0x7c1   : > { %9293 = vmatmul.msk.bf16.gmra.mxu3 %vm7121_vm0, %v15974_v21 }
 0x7c2   : > { %v7504_v32 = vmax.f32 %v7420_v35, 0.0 }
 0x7c3   : > { %v7395_v61 = vpop.f32.mrf.mxu0 }
 0x7c4   : > { %v7396_v3 = vadd.f32 %v7395_v61, %v17166_v25 }
 0x7c6   : > { %v7511_v37 = vmax.f32 %v7396_v3, 0.0 }
 0x7c7   : > { %v7421_v48 = vpop.f32.mrf.mxu1  ;;  %7660 = vmatmul.f32.vlgmr.msrb.gmra.mxu2 %v7519_v13 }
 0x7c8   : > { %v7422_v6 = vadd.f32 %v7421_v48, %v17167_v27 }
 0x7ca   : > { %v7508_v38 = vmax.f32 %v7422_v6, 0.0  ;;  %v9781_v6 = vmov 5  }
 0x7cb   : > { %v7397_v54 = vpop.f32.mrf.mxu0  ;;  %9455 = vset.pattern.permute.xlu2 %v9781_v6  ;;  %9456 = vset.pattern.permute.xlu0 %v9781_v6 }
 0x7cc   : > { %v7398_v21 = vadd.f32 %v7397_v54, %v17168_v55 }
 0x7ce   : > { %v7515_v4 = vmax.f32 %v7398_v21, 0.0 }
 0x7cf   : > { %v7424_v50 = vpop.f32.mrf.mxu1 }
 0x7d0   : > { %v7425_v45 = vadd.f32 %v7424_v50, %v17166_v25  ;;  %7552 = vmatpush.msra.mxu1 %v7515_v4 }
 0x7d2   : > { %v7512_v51 = vmax.f32 %v7425_v45, 0.0  ;;  %7553 = vmatpush.msra.mxu1 %v7511_v37 }
 0x7d4   : > { %7554 = vmatpush.msra.mxu1 %v7507_v40 }
 0x7d6   : > { %7555 = vmatpush.msra.mxu1 %v7503_v44 }
 0x7d7   : > { %v7426_v63 = vpop.f32.mrf.mxu1 }
 0x7d8   : > { %v7427_v56 = vadd.f32 %v7426_v63, %v17168_v55  ;;  %7556 = vmatpush.msra.mxu1 %v7499_v57  ;;  %v7684_v63 = vld [vmem:[%s16272_s8] sm:$0x1] }
 0x7d9   : > { %7687 = vperm.xlu2 %9455, %v7684_v63  }
 0x7da   : > { %v7516_v41 = vmax.f32 %v7427_v56, 0.0  ;;  %7557 = vmatpush.msra.mxu1 %v7495_v53 }
 0x7dc   : > { %7592 = vmatpush.msra.mxu3 %v7516_v41  ;;  %7558 = vmatpush.msra.mxu1 %v7491_v26 }
 0x7de   : > { %7593 = vmatpush.msra.mxu3 %v7512_v51  ;;  %7559 = vmatpush.msra.mxu1 %v7487_v29 }
 0x7df   : > { %9294 = vmatmul.msk.f32.vlgmr.msra.gmra.mxu1 %vm7121_vm0, %v16181_v28 }
 0x7e0   : > { %7594 = vmatpush.msra.mxu3 %v7508_v38 }
 0x7e2   : > { %7595 = vmatpush.msra.mxu3 %v7504_v32 }
 0x7e4   : > { %7596 = vmatpush.msra.mxu3 %v7500_v58 }
 0x7e6   : > { %7597 = vmatpush.msra.mxu3 %v7496_v30 }
 0x7e8   : > { %7598 = vmatpush.msra.mxu3 %v7492_v42 }
 0x7ea   : > { %7599 = vmatpush.msra.mxu3 %v7488_v62 }
 0x7eb   : > { %9295 = vmatmul.msk.f32.vlgmr.msra.gmra.mxu3 %vm7121_vm0, %v16181_v28 }
 0x802   : > { %v7438_v7 = vpop.f32.mrf.mxu2 }
 0x803   : > { %v7439_v49 = vadd.f32 %v7438_v7, %v7309_v19 }
 0x805   : > { %v7489_v18 = vmax.f32 %v7439_v49, 0.0 }
 0x80a   : > { %v7440_v17 = vpop.f32.mrf.mxu2 }
 0x80b   : > { %v7441_v51 = vadd.f32 %v7440_v17, %v16168_v24 }
 0x80d   : > { %v7493_v37 = vmax.f32 %v7441_v51, 0.0 }
 0x812   : > { %v7443_v43 = vpop.f32.mrf.mxu2 }
 0x813   : > { %v7444_v2 = vadd.f32 %v7443_v43, %v16164_v0 }
 0x814   : > { %v7467_v22 = vpop.f32.mrf.mxu3 }
 0x815   : > { %v16177_v59 = vadd.f32 %v7467_v22, %v7309_v19  ;;  %v7497_v52 = vmax.f32 %v7444_v2, 0.0 }
 0x81a   : > { %v7445_v34 = vpop.f32.mrf.mxu2 }
 0x81b   : > { %v7446_v56 = vadd.f32 %v7445_v34, %v17170_v8 }
 0x81c   : > { %v16179_v33 = vpop.f32.mrf.mxu3 }
 0x81d   : > { %v7501_v41 = vmax.f32 %v7446_v56, 0.0 }
 0x822   : > { %v7448_v5 = vpop.f32.mrf.mxu2 }
 0x823   : > { %v7449_v45 = vadd.f32 %v7448_v5, %v17169_v11 }
 0x824   : > { %v7472_v60 = vpop.f32.mrf.mxu3 }
 0x825   : > { %v7505_v21 = vmax.f32 %v7449_v45, 0.0  ;;  %v7473_v20 = vadd.f32 %v7472_v60, %v16164_v0 }
 0x827   : > { %v7498_v57 = vmax.f32 %v7473_v20, 0.0 }
 0x82a   : > { %v7450_v12 = vpop.f32.mrf.mxu2 }
 0x82b   : > { %v7451_v61 = vadd.f32 %v7450_v12, %v17167_v27 }
 0x82c   : > { %v7474_v47 = vpop.f32.mrf.mxu3 }
 0x82d   : > { %v7509_v54 = vmax.f32 %v7451_v61, 0.0  ;;  %v7475_v58 = vadd.f32 %v7474_v47, %v17170_v8  ;;  %v7541_v8 = vpop.f32.mrf.mxu0 }
 0x832   : > { %v7453_v46 = vpop.f32.mrf.mxu2 }
 0x833   : > { %v7454_v1 = vadd.f32 %v7453_v46, %v17166_v25  ;;  %v7688_v36 = vpop.permute.xlu2 %7687 }
 0x834   : > { %v7477_v10 = vpop.f32.mrf.mxu3 }
 0x835   : > { %v7513_v3 = vmax.f32 %v7454_v1, 0.0  ;;  %v7478_v14 = vadd.f32 %v7477_v10, %v17169_v11  ;;  %v7490_v11 = vmax.f32 %v16177_v59, 0.0  ;;  %v7621_v53 = vpop.f32.mrf.mxu0 }
 0x83a   : > { %v7455_v39 = vpop.f32.mrf.mxu2 }
 0x83b   : > { %v7456_v48 = vadd.f32 %v7455_v39, %v17168_v55 }
 0x83c   : > { %v7479_v15 = vpop.f32.mrf.mxu3 }
 0x83d   : > { %v7517_v50 = vmax.f32 %v7456_v48, 0.0  ;;  %v7480_v40 = vadd.f32 %v7479_v15, %v17167_v27  ;;  %v7470_v27 = vadd.f32 %v16179_v33, %v16168_v24 }
 0x83f   : > { %7632 = vmatpush.msrb.mxu1 %v7517_v50  ;;  %v7510_v19 = vmax.f32 %v7480_v40, 0.0  ;;  %v7494_v9 = vmax.f32 %v7470_v27, 0.0 }
 0x841   : > { %7633 = vmatpush.msrb.mxu1 %v7513_v3 }
 0x842   : > { %v7581_v30 = vpop.f32.mrf.mxu2 }
 0x843   : > { %7634 = vmatpush.msrb.mxu1 %v7509_v54 }
 0x844   : > { %v7482_v35 = vpop.f32.mrf.mxu3 }
 0x845   : > { %7635 = vmatpush.msrb.mxu1 %v7505_v21  ;;  %v7483_v38 = vadd.f32 %v7482_v35, %v17166_v25  ;;  %v7506_v25 = vmax.f32 %v7478_v14, 0.0 }
 0x847   : > { %7636 = vmatpush.msrb.mxu1 %v7501_v41  ;;  %v7514_v44 = vmax.f32 %v7483_v38, 0.0 }
 0x849   : > { %7637 = vmatpush.msrb.mxu1 %v7497_v52 }
 0x84a   : > { %v7661_v5 = vpop.f32.mrf.mxu2 }
 0x84b   : > { %7638 = vmatpush.msrb.mxu1 %v7493_v37 }
 0x84c   : > { %v7484_v4 = vpop.f32.mrf.mxu3 }
 0x84d   : > { %v7485_v16 = vadd.f32 %v7484_v4, %v17168_v55  ;;  %7639 = vmatpush.msrb.mxu1 %v7489_v18  ;;  %v7502_v55 = vmax.f32 %v7475_v58, 0.0 }
 0x84e   : > { %9296 = vmatmul.msk.f32.vlgmr.msrb.gmra.mxu1 %vm7121_vm0, %v16181_v28 }
 0x84f   : > { %v7518_v32 = vmax.f32 %v7485_v16, 0.0 }
 0x851   : > { %7672 = vmatpush.msrb.mxu3 %v7518_v32 }
 0x853   : > { %7673 = vmatpush.msrb.mxu3 %v7514_v44 }
 0x855   : > { %7674 = vmatpush.msrb.mxu3 %v7510_v19 }
 0x857   : > { %7675 = vmatpush.msrb.mxu3 %v7506_v25 }
 0x859   : > { %7676 = vmatpush.msrb.mxu3 %v7502_v55 }
 0x85b   : > { %7677 = vmatpush.msrb.mxu3 %v7498_v57 }
 0x85c   : > { %v7561_v0 = vpop.f32.mrf.mxu1 }
 0x85d   : > { %7678 = vmatpush.msrb.mxu3 %v7494_v9  ;;  %v7562_v24 = vadd.f32 %v7561_v0, %v7541_v8 }
 0x85f   : > { %7679 = vmatpush.msrb.mxu3 %v7490_v11  ;;  %v7690_v7 = vadd.f32 %v7688_v36, %v7562_v24 }
 0x860   : > { %9297 = vmatmul.msk.f32.vlgmr.msrb.gmra.mxu3 %vm7121_vm0, %v16181_v28 }
 0x861   : > { %v9298_v43 = vmul.f32 -1.442695, %v7690_v7 }
 0x86e   : > { %v7601_v23 = vpop.f32.mrf.mxu3 }
 0x86f   : > { %v7602_v42 = vadd.f32 %v7601_v23, %v7581_v30 }
 0x871   : > { %v7691_v26 = vadd.f32 %v7688_v36, %v7602_v42 }
 0x873   : > { %v9299_v49 = vmul.f32 -1.442695, %v7691_v26 }
 0x875   : > { %9457 = vpow2.f32 %v9299_v49 }
 0x87b   : > { %v9458_v22 = vpop.eup %9457 }
 0x87c   : > { %v7707_v33 = vadd.f32 1.0, %v9458_v22 }
 0x87e   : > { %vm7730_vm1 = vweird.f32 %v7707_v33  ;;  %v7736_v21 = vand.u32 2147483648, %v7707_v33  ;;  %v7734_v51 = vand.u32 2147483647, %v7707_v33 }
 0x880   : > { %v7737_v40 = vor.u32 1.1754944e-38, %v7736_v21  ;;  %vm7735_vm9 = vcmp.eq.f32.partialorder %v7734_v51, 8.507059e+37 }
 0x8cb   : > { %v7641_v62 = vpop.f32.mrf.mxu1 }
 0x8cc   : > { %v7642_v31 = vadd.f32 %v7641_v62, %v7621_v53 }
 0x8ce   : > { %v7692_v29 = vadd.f32 %v7688_v36, %v7642_v31 }
 0x8d0   : > { %v9300_v17 = vmul.f32 -1.442695, %v7692_v29  ;;  %v17179_v29 = vlaneseq }
 0x8d2   : > { %9459 = vpow2.f32 %v9300_v17 }
 0x8d3   : > { %9461 = vpow2.f32 %v9298_v43 }
 0x8d4   : > { %9463 = vrcp.f32 %v7707_v33 }
 0x8d8   : > { %v9460_v59 = vpop.eup %9459 }
 0x8d9   : > { %v9462_v34 = vpop.eup %9461  ;;  %v7708_v60 = vadd.f32 1.0, %v9460_v59 }
 0x8da   : > { %v7706_v13 = vadd.f32 1.0, %v9462_v34  ;;  %v9464_v10 = vpop.eup %9463 }
 0x8db   : > { %9465 = vrcp.f32 %v7708_v60  ;;  %v7726_v1 = vmul.f32 %v9464_v10, %v7707_v33  ;;  %vm7731_vm2 = vweird.f32 %v9464_v10  ;;  %vm7745_vm3 = vweird.f32 %v7708_v60 }
 0x8dc   : > { %9467 = vrcp.f32 %v7706_v13  ;;  %vm16210_vm5 = vmor %vm7730_vm1, %vm7731_vm2  ;;  %v7749_v37 = vand.u32 2147483647, %v7708_v60  ;;  %v7751_v4 = vand.u32 2147483648, %v7708_v60  ;;  %vm7715_vm6 = vweird.f32 %v7706_v13 }
 0x8dd   : > { %v7727_v45 = vsub.f32 1.0, %v7726_v1  ;;  %v7721_v16 = vand.u32 2147483648, %v7706_v13  ;;  %v7719_v58 = vand.u32 2147483647, %v7706_v13  ;;  %vm7777_vm1 = vcmask 1040384  }
 0x8de   : > { %v7752_v20 = vor.u32 1.1754944e-38, %v7751_v4  ;;  %vm7750_vm11 = vcmp.eq.f32.partialorder %v7749_v37, 8.507059e+37  ;;  %vm7779_vm2 = vcmask 1042434  }
 0x8df   : > { %v7728_v56 = vmul.f32 %v9464_v10, %v7727_v45  ;;  %v7722_v11 = vor.u32 1.1754944e-38, %v7721_v16  ;;  %vm7720_vm14 = vcmp.eq.f32.partialorder %v7719_v58, 8.507059e+37 }
 0x8e1   : > { %v9466_v39 = vpop.eup %9465  ;;  %v7729_v35 = vadd.f32 %v9464_v10, %v7728_v56 }
 0x8e2   : > { %v9468_v15 = vpop.eup %9467  ;;  %v7741_v48 = vmul.f32 %v9466_v39, %v7708_v60  ;;  %vm7746_vm4 = vweird.f32 %v9466_v39 }
 0x8e3   : > { %v7681_v28 = vpop.f32.mrf.mxu3  ;;  %v7711_v61 = vmul.f32 %v9468_v15, %v7706_v13  ;;  %vm7716_vm7 = vweird.f32 %v9468_v15  ;;  %vm16214_vm8 = vmor %vm7745_vm3, %vm7746_vm4  ;;  %v7733_v19 = vsel %vm16210_vm5, %v9464_v10, %v7729_v35  ;;  %vm7781_vm3 = vcmask 1041408  }
 0x8e4   : > { %v7682_v12 = vadd.f32 %v7681_v28, %v7661_v5  ;;  %v7742_v63 = vsub.f32 1.0, %v7741_v48  ;;  %vm16222_vm10 = vmor %vm7715_vm6, %vm7716_vm7  ;;  %v7738_v8 = vsel %vm7735_vm9, %v7737_v40, %v7733_v19  ;;  %vm7786_vm4 = vcmp.lt.s32.totalorder %v17179_v29, 512 }
 0x8e5   : > { %v7712_v6 = vsub.f32 1.0, %v7711_v61 }
 0x8e6   : > { %v7693_v47 = vadd.f32 %v7688_v36, %v7682_v12  ;;  %v7743_v54 = vmul.f32 %v9466_v39, %v7742_v63  ;;  %v7774_v36 = vrot.slane %v7738_v8, 7 }
 0x8e7   : > { %v7713_v2 = vmul.f32 %v9468_v15, %v7712_v6 }
 0x8e8   : > { %v9301_v46 = vmul.f32 -1.442695, %v7693_v47  ;;  %v7744_v18 = vadd.f32 %v9466_v39, %v7743_v54 }
 0x8e9   : > { %v7714_v14 = vadd.f32 %v9468_v15, %v7713_v2 }
 0x8ea   : > { %9469 = vpow2.f32 %v9301_v46  ;;  %v7748_v9 = vsel %vm16214_vm8, %v9466_v39, %v7744_v18 }
 0x8eb   : > { %v7718_v30 = vsel %vm16222_vm10, %v9468_v15, %v7714_v14  ;;  %v7753_v42 = vsel %vm7750_vm11, %v7752_v20, %v7748_v9 }
 0x8ec   : > { %v7723_v62 = vsel %vm7720_vm14, %v7722_v11, %v7718_v30  ;;  %v7775_v31 = vrot.slane %v7753_v42, 6 }
 0x8ed   : > { %v7778_v7 = vsel %vm7777_vm1, %v7723_v62, %v7774_v36 }
 0x8f0   : > { %v9470_v50 = vpop.eup %9469 }
 0x8f1   : > { %v7709_v3 = vadd.f32 1.0, %v9470_v50 }
 0x8f3   : > { %9471 = vrcp.f32 %v7709_v3  ;;  %v7766_v25 = vand.u32 2147483648, %v7709_v3  ;;  %v7764_v57 = vand.u32 2147483647, %v7709_v3  ;;  %vm7760_vm13 = vweird.f32 %v7709_v3 }
 0x8f5   : > { %v7767_v23 = vor.u32 1.1754944e-38, %v7766_v25  ;;  %vm7765_vm0 = vcmp.eq.f32.partialorder %v7764_v57, 8.507059e+37 }
 0x8f9   : > { %v9472_v41 = vpop.eup %9471 }
 0x8fa   : > { %v7756_v38 = vmul.f32 %v9472_v41, %v7709_v3  ;;  %vm7761_vm12 = vweird.f32 %v9472_v41 }
 0x8fb   : > { %vm7762_vm15 = vmor %vm7760_vm13, %vm7761_vm12 }
 0x8fc   : > { %v7757_v44 = vsub.f32 1.0, %v7756_v38 }
 0x8fe   : > { %v7758_v27 = vmul.f32 %v9472_v41, %v7757_v44 }
 0x900   : > { %v7759_v0 = vadd.f32 %v9472_v41, %v7758_v27 }
 0x902   : > { %v7763_v53 = vsel %vm7762_vm15, %v9472_v41, %v7759_v0 }
 0x903   : > { %v7768_v24 = vsel %vm7765_vm0, %v7767_v23, %v7763_v53 }
 0x904   : > { %v7776_v26 = vrot.slane %v7768_v24, 5 }
 0x906   : > { %v7780_v49 = vsel %vm7779_vm2, %v7775_v31, %v7776_v26 }
 0x907   : > { %v7782_v17 = vsel %vm7781_vm3, %v7778_v7, %v7780_v49 }
 0x908   : > { %7788 = vst.msk [vmem:[%s491_s18] sm:$0xf] %vm7786_vm4, %v7782_v17 }
 0x909   : > { %9715 = shalt.err (!%p9712_p12)
}
 0x90a   : > { %9355 = dma.vmem_to_hbm [thread:$0]  (%p9898_p0), %s7803_s21, 64, %s7805_s5, %s7790_s28  }
 0x90b PF: > { %s17180_s4 = sld [smem:[#allocation19_spill]]  ;;  %p17182_p3 = scmp.ge.s32.totalorder %s9766_s12, 2 }
 0x90d   : > { %p9378_p8 = pnand %p17182_p3, %p9906_p5 }
 0x90f   : > { %p9379_p9 = pneg %p9378_p8 }
 0x911   : > { %s7816_s1 = sand.u32 1, %s17180_s4  }
 0x912   : > { %s7817_s14 = scalar_lea.sflag [#allocation4], %s7816_s1 }
 0x913   : > { %9749 = dma.done.wait (%p9379_p9), %s7817_s14, 64  }
 0x914   : > { %9751 = vsyncadd (%p9379_p9), %s7817_s14, 4294967232  ;;  %s17183_s12 = sld [smem:[#allocation21_spill]]  ;;  %s17186_s30 = smov %s9758_s10 }
 0x915   : > { %s17184_s24 = sld [smem:[#allocation20_spill]] }
 0x916   : > { %s17185_s11 = sld [smem:[#allocation22_spill]] }
 0x91a   : > { %p27_p2 = scmp.ge.s32.totalorder %s17183_s12, 4  }
 0x91b   : > { %s17187_s10 = smov %s17184_s24 }
 0x91c   :  { %29 = sbr.rel (!%p27_p2) target bundleno = 14 (0xe), region = 147 }
 0x921   :  { %7823 = vsyncpa [#allocation3], 1 }
 0x922   :  { %7825 = vsyncpa [#allocation3 + $0x1], 1 }
 0x923   :  { %7826 = vsyncpa [#allocation6], 1 }
 0x924   :  { %7828 = vsyncpa [#allocation6 + $0x1], 1 }
 0x925   :  { %7829 = vsyncpa [#allocation9], 1 }
 0x926   :  { %7830 = vsyncpa [#allocation12], 1 }
 0x927   :  { %7831 = vsyncpa [#allocation4], 1 }
 0x928   :  { %7833 = vsyncpa [#allocation4 + $0x1], 1 }

</bundles_post_ra>
